<compile_context>
chip_gen: v6e
topology: v6e:2x2x1
jax: 0.10.0
libtpu: 0.0.40
codegen_flags: <defaults>
</compile_context>

<pallas_src>
import math

import jax
import jax.numpy as jnp
from jax.experimental import pallas as pl
from jax.experimental.pallas import tpu as pltpu

_BN_EPS = 1e-5
_PAD = 3          # zero ring around the image = max conv radius (7x7 -> 3)
_MARG = 128       # lane-aligned shift margin for the extended canvas (>= 69)
_LANE = 128


def _ceil_to(x, m):
    return ((x + m - 1) // m) * m


# ---------------------------------------------------------------------------
# Fused forward kernel (one grid step = one batch element)
# ---------------------------------------------------------------------------
def _make_kernel(C, H, W):
    P = _PAD
    HP, WP = H + 2 * P, W + 2 * P
    N = HP * WP
    NP = _ceil_to(N, _LANE)                 # lane-padded canvas (484 -> 512)
    MARG = _MARG
    assert MARG >= P * WP + P, "shift margin too small for this image width"
    NE = NP + 2 * MARG
    inv_hw = 1.0 / float(H * W)

    def offs(K):
        p = K // 2
        return tuple((ky - p) * WP + (kx - p)
                     for ky in range(K) for kx in range(K))

    OFF3, OFF5, OFF7 = offs(3), offs(5), offs(7)

    def kernel(x_ref, mask_ref,
               se_w1t, se_b1, se_w2, se_b2,
               cw1, cb1, cw2, cb2, cwa, cba,      # trunk self.conv (3x3 DoubleConv2)
               sw1, sb1, swa, sba,                # stacked branch conv1 + 1x1 adjust
               aw2, ab2, fw2, fb2, gw2, gb2,      # branch second convs (3/5/7)
               wfc_ref,
               o_ref, xz_ref, col_ref):
        x_can = x_ref[0]                    # (C, NP) f32, zero ring + dead lanes
        mask = mask_ref[...]                # (1, NP) f32: 1 at valid image pixels

        # zero only the two shift margins; the interior window is rewritten by
        # every conv.  Unconditional so each megacore shard initializes itself.
        xz_ref[:, 0:MARG] = jnp.zeros((C, MARG), jnp.bfloat16)
        xz_ref[:, MARG + NP:NE] = jnp.zeros((C, MARG), jnp.bfloat16)

        def conv(xc, w_ref, offsets):
            """KxK 'same' conv on the flat canvas: im2col via shifted slices of
            the margin-extended bf16 canvas, then ONE bf16 MXU matmul with f32
            accumulation."""
            xz_ref[:, MARG:MARG + NP] = xc.astype(jnp.bfloat16)
            for t, off in enumerate(offsets):
                col_ref[t * C:(t + 1) * C, :] = (
                    xz_ref[:, MARG + off:MARG + off + NP])
            return jnp.dot(w_ref[...], col_ref[0:len(offsets) * C, :],
                           preferred_element_type=jnp.float32)

        # ---- SEBlock: global avg pool -> fc -> ReLU -> fc -> sigmoid -> scale
        s = jnp.sum(x_can, axis=1, keepdims=True) * inv_hw            # (C, 1)
        h = jnp.sum(se_w1t[...] * s, axis=0, keepdims=True) + se_b1[...]
        h = jnp.maximum(h, 0.0)                                        # (1, hid)
        gate = jax.nn.sigmoid(
            jnp.sum(se_w2[...] * h, axis=1, keepdims=True) + se_b2[...])
        feat0 = x_can * gate                 # zero ring / dead lanes stay zero

        # ---- trunk: self.conv = DoubleConv2(3x3) ----
        t = jnp.maximum(conv(feat0, cw1, OFF3) + cb1[...], 0.0) * mask
        t = jnp.maximum(conv(t, cw2, OFF3) + cb2[...], 0.0)
        ident = jnp.dot(cwa[...], feat0.astype(jnp.bfloat16),
                        preferred_element_type=jnp.float32) + cba[...]
        feat = (t + ident) * mask

        # ---- three branches: conv1 of all three fused through ONE 49-tap
        #      im2col of `feat`, and the three 1x1 residual convs fused into
        #      one (3C, C) matmul.
        stk = jnp.maximum(conv(feat, sw1, OFF7) + sb1[...], 0.0) * mask   # (3C, NP)
        ident3 = jnp.dot(swa[...], feat.astype(jnp.bfloat16),
                         preferred_element_type=jnp.float32) + sba[...]   # (3C, NP)

        u3 = jnp.maximum(conv(stk[0:C], aw2, OFF3) + ab2[...], 0.0)
        f3 = (u3 + ident3[0:C]) * mask
        u5 = jnp.maximum(conv(stk[C:2 * C], fw2, OFF5) + fb2[...], 0.0)
        f5 = (u5 + ident3[C:2 * C]) * mask
        u7 = jnp.maximum(conv(stk[2 * C:3 * C], gw2, OFF7) + gb2[...], 0.0)
        f7 = (u7 + ident3[2 * C:3 * C]) * mask

        # ---- head: cat([f5+x, f7+x, f3+x]) -> 1x1 fc (3C->1) on the VPU ----
        w5 = wfc_ref[0:C]                    # (C, 1) slices of the fc weight
        w7 = wfc_ref[C:2 * C]
        w3 = wfc_ref[2 * C:3 * C]
        y = jnp.sum(w5 * (f5 + x_can) + w7 * (f7 + x_can) + w3 * (f3 + x_can),
                    axis=0, keepdims=True)                             # (1, NP)
        o_ref[...] = jax.nn.sigmoid(y).reshape(1, 1, NP)

    return kernel


def _bcast_spec(shape):
    zero = (0,) * len(shape)
    return pl.BlockSpec(shape, lambda b, _z=zero: _z)


def ddsm_atterjitnet_forward(x_nchw, packed):
    """Forward pass of DDSM_atterJITNet.  x_nchw: (B, C, H, W) -> (B, 1, H, W)."""
    B, C, H, W = x_nchw.shape
    assert C % 8 == 0, "channel count must be a multiple of the sublane tile (8)"
    P = _PAD
    HP, WP = H + 2 * P, W + 2 * P
    N = HP * WP
    NP = _ceil_to(N, _LANE)
    NE = NP + 2 * _MARG

    x = x_nchw.astype(jnp.float32)
    # zero-ring-padded canvas, spatially flattened, lane-padded to a multiple
    # of 128 -> (C, NP) per image with 28 dead (always-zero) lanes at the end.
    x_can = jnp.pad(x, ((0, 0), (0, 0), (P, P), (P, P))).reshape(B, C, N)
    x_can = jnp.pad(x_can, ((0, 0), (0, 0), (0, NP - N)))
    mask = jnp.pad(jnp.ones((H, W), jnp.float32),
                   ((P, P), (P, P))).reshape(1, N)
    mask = jnp.pad(mask, ((0, 0), (0, NP - N)))

    in_specs = [pl.BlockSpec((1, C, NP), lambda b: (b, 0, 0)),
                _bcast_spec(mask.shape)]
    in_specs += [_bcast_spec(tuple(a.shape)) for a in packed]

    out = pl.pallas_call(
        _make_kernel(C, H, W),
        out_shape=jax.ShapeDtypeStruct((B, 1, NP), jnp.float32),
        grid=(B,),
        in_specs=in_specs,
        out_specs=pl.BlockSpec((1, 1, NP), lambda b: (b, 0, 0)),
        scratch_shapes=[
            pltpu.VMEM((C, NE), jnp.bfloat16),        # margin-extended canvas
            pltpu.VMEM((49 * C, NP), jnp.bfloat16),   # shared im2col buffer
        ],
        compiler_params=pltpu.CompilerParams(
            dimension_semantics=("parallel",)),       # batch across TCs on v7x
    )(x_can, mask, *packed)

    # drop dead lanes + zero ring, restore NCHW output
    return (out[:, 0, :N].reshape(B, HP, WP)[:, P:P + H, P:P + W]
            .reshape(B, 1, H, W))


# ---------------------------------------------------------------------------
# Parameters (deterministic xavier weights, non-identity inference BN stats)
# ---------------------------------------------------------------------------
def _xavier(key, shape, fan_in, fan_out):
    bound = math.sqrt(6.0 / (fan_in + fan_out))
    return jax.random.uniform(key, shape, jnp.float32, -bound, bound)


def init_params(key, in_dim, reduction_ratio=8):
    C = in_dim
    hid = max(1, C // reduction_ratio)
    keys = iter(jax.random.split(key, 64))

    def bn_stats():
        return {
            "gamma": jax.random.uniform(next(keys), (C,), jnp.float32, 0.5, 1.5),
            "beta": 0.1 * jax.random.normal(next(keys), (C,)),
            "mean": 0.1 * jax.random.normal(next(keys), (C,)),
            "var": jax.random.uniform(next(keys), (C,), jnp.float32, 0.5, 1.5),
        }

    def conv_block(K):
        fan = C * K * K
        return {
            "w1": _xavier(next(keys), (K, K, C, C), fan, fan),
            "bn1": bn_stats(),
            "w2": _xavier(next(keys), (K, K, C, C), fan, fan),
            "bn2": bn_stats(),
            "wa": _xavier(next(keys), (C, C), C, C),      # 1x1 adjust_channels
            "ba": 0.1 * jax.random.normal(next(keys), (C,)),
        }

    return {
        "se_w1t": _xavier(next(keys), (C, hid), C, hid),   # fc1.weight^T
        "se_b1": 0.1 * jax.random.normal(next(keys), (hid,)),
        "se_w2": _xavier(next(keys), (C, hid), hid, C),    # fc2.weight
        "se_b2": 0.1 * jax.random.normal(next(keys), (C,)),
        "blk_c": conv_block(3),      # self.conv
        "blk_3": conv_block(3),      # self.conv_3x3
        "blk_5": conv_block(5),      # self.conv_5x5
        "blk_7": conv_block(7),      # self.conv_7x7
        "wfc": _xavier(next(keys), (1, 3 * C), 3 * C, 1),  # fc 1x1, bias=False
    }


def _bn_fold(bn):
    """Inference BN -> (scale, bias) with scale folded into the conv weight."""
    scale = bn["gamma"] / jnp.sqrt(bn["var"] + _BN_EPS)
    bias = bn["beta"] - bn["mean"] * scale
    return scale, bias


def _fold_w(w_hwio, scale):
    """(K,K,Cin,Cout) conv weight + BN scale -> matmul-ready (Cout, K*K*Cin)."""
    K, _, Cin, Cout = w_hwio.shape
    return w_hwio.reshape(K * K * Cin, Cout).T * scale[:, None]


def _embed_taps_7x7(w_mat, K, Cin):
    """(Cout, K*K*Cin) in KxK tap order -> (Cout, 49*Cin) in the 7x7 tap order
    (zero at taps outside the KxK footprint)."""
    Cout = w_mat.shape[0]
    out = jnp.zeros((Cout, 49 * Cin), jnp.float32)
    p = K // 2
    for ky in range(K):
        for kx in range(K):
            src = (ky * K + kx) * Cin
            dst = ((ky - p + 3) * 7 + (kx - p + 3)) * Cin
            out = out.at[:, dst:dst + Cin].set(w_mat[:, src:src + Cin])
    return out


def pack_params(p):
    """One-time prep: fold BN (scale into weights, bias = beta - mean*scale),
    cast matmul weights to bf16, zero-embed + row-stack the three branch first
    convs into one (3C, 49C) weight and their 1x1 adjusts into one (3C, C)."""
    C = p["se_w2"].shape[0]
    hid = p["se_w1t"].shape[1]
    bf, f32 = jnp.bfloat16, jnp.float32

    def fold_block(b):
        s1, o1 = _bn_fold(b["bn1"])
        s2, o2 = _bn_fold(b["bn2"])
        return (_fold_w(b["w1"], s1), o1.reshape(C, 1),
                _fold_w(b["w2"], s2), o2.reshape(C, 1),
                b["wa"], b["ba"].reshape(C, 1))

    packed = [p["se_w1t"].astype(f32), p["se_b1"].reshape(1, hid).astype(f32),
              p["se_w2"].astype(f32), p["se_b2"].reshape(C, 1).astype(f32)]

    # trunk (self.conv)
    w1, o1, w2, o2, wa, ba = fold_block(p["blk_c"])
    packed += [w1.astype(bf), o1.astype(f32), w2.astype(bf), o2.astype(f32),
               wa.astype(bf), ba.astype(f32)]

    # branches: conv1 stacked in 49-tap layout, 1x1 adjusts stacked, conv2 per-branch
    w1s, b1s, was, bas, seconds = [], [], [], [], []
    for name, K in (("blk_3", 3), ("blk_5", 5), ("blk_7", 7)):
        w1, o1, w2, o2, wa, ba = fold_block(p[name])
        w1s.append(_embed_taps_7x7(w1, K, C))
        b1s.append(o1)
        was.append(wa)
        bas.append(ba)
        seconds += [w2.astype(bf), o2.astype(f32)]
    packed += [jnp.concatenate(w1s, axis=0).astype(bf),
               jnp.concatenate(b1s, axis=0).astype(f32),
               jnp.concatenate(was, axis=0).astype(bf),
               jnp.concatenate(bas, axis=0).astype(f32)]
    packed += seconds
    packed.append(p["wfc"].reshape(3 * C, 1).astype(f32))
    return tuple(packed)


# ---------------------------------------------------------------------------
# Pure-JAX (XLA) reference of the same forward pass, for numerical checks.
# quantize_matmuls=True rounds conv/1x1 operands to bf16 exactly where the
# kernel rounds them, isolating structural bugs from bf16 noise.
# ---------------------------------------------------------------------------
def reference_forward(x, p, quantize_matmuls=False):
    x = x.astype(jnp.float32)
    if quantize_matmuls:
        q = lambda a: a.astype(jnp.bfloat16).astype(jnp.float32)
    else:
        q = lambda a: a

    def conv(h, w):
        pad = w.shape[0] // 2
        return jax.lax.conv_general_dilated(
            q(h), q(w), (1, 1), [(pad, pad), (pad, pad)],
            dimension_numbers=("NCHW", "HWIO", "NCHW"),
            precision=jax.lax.Precision.HIGHEST)

    def double_conv2(h, b):
        s1, o1 = _bn_fold(b["bn1"])
        s2, o2 = _bn_fold(b["bn2"])
        w1 = b["w1"] * s1.reshape(1, 1, 1, -1)   # fold BN scale as the kernel does
        w2 = b["w2"] * s2.reshape(1, 1, 1, -1)
        t = jax.nn.relu(conv(h, w1) + o1.reshape(1, -1, 1, 1))
        t = jax.nn.relu(conv(t, w2) + o2.reshape(1, -1, 1, 1))
        ident = jnp.einsum("oc,bchw->bohw", q(b["wa"]), q(h),
                           precision=jax.lax.Precision.HIGHEST)
        ident = ident + b["ba"].reshape(1, -1, 1, 1)
        return t + ident

    s = jnp.mean(x, axis=(2, 3))                                       # (B, C)
    h = jax.nn.relu(s @ p["se_w1t"] + p["se_b1"][None, :])
    gate = jax.nn.sigmoid(h @ p["se_w2"].T + p["se_b2"][None, :])
    feat = x * gate[:, :, None, None]
    feat = double_conv2(feat, p["blk_c"])
    f3 = double_conv2(feat, p["blk_3"])
    f5 = double_conv2(feat, p["blk_5"])
    f7 = double_conv2(feat, p["blk_7"])
    cat = jnp.concatenate([f5 + x, f7 + x, f3 + x], axis=1)
    y = jnp.einsum("oc,bchw->bohw", p["wfc"], cat)
    return jax.nn.sigmoid(y)


if __name__ == "__main__":
    key = jax.random.PRNGKey(0)
    k_params, k_x = jax.random.split(key)
    B, C, H, W = 2, 8, 16, 16          # SE reduction_ratio=8 needs C >= 8
    params = init_params(k_params, C)
    packed = pack_params(params)
    x = jax.random.normal(k_x, (B, C, H, W), jnp.float32)   # NCHW input

    fwd = jax.jit(ddsm_atterjitnet_forward)
    out = fwd(x, packed)
    jax.block_until_ready(out)
    assert out.shape == (B, 1, H, W) and out.dtype == jnp.float32
    assert bool(jnp.all(jnp.isfinite(out)))

    with jax.default_matmul_precision("highest"):
        ref_q = reference_forward(x, params, quantize_matmuls=True)
        ref_f = reference_forward(x, params, quantize_matmuls=False)

    # tight check vs a reference that rounds operands to bf16 exactly where the
    # kernel does (catches structural / indexing / folding bugs)
    err_q = float(jnp.max(jnp.abs(out - ref_q)))
    assert err_q < 3e-3, f"mismatch vs bf16-quantized reference: {err_q}"
    # loose check vs the pristine f32 reference (bounds total bf16 noise)
    err_f = float(jnp.max(jnp.abs(out - ref_f)))
    assert err_f < 5e-2, f"mismatch vs f32 reference: {err_f}"

    print("KERNEL_OK")
</pallas_src>

<mosaic_0001>
module attributes {stable_mosaic.version = 11 : i64} {
  func.func @kernel(%arg0: i32, %arg1: memref<1x8x512xf32, #tpu.memory_space<vmem>>, %arg2: memref<1x512xf32, #tpu.memory_space<vmem>>, %arg3: memref<8x1xf32, #tpu.memory_space<vmem>>, %arg4: memref<1x1xf32, #tpu.memory_space<vmem>>, %arg5: memref<8x1xf32, #tpu.memory_space<vmem>>, %arg6: memref<8x1xf32, #tpu.memory_space<vmem>>, %arg7: memref<8x72xbf16, #tpu.memory_space<vmem>>, %arg8: memref<8x1xf32, #tpu.memory_space<vmem>>, %arg9: memref<8x72xbf16, #tpu.memory_space<vmem>>, %arg10: memref<8x1xf32, #tpu.memory_space<vmem>>, %arg11: memref<8x8xbf16, #tpu.memory_space<vmem>>, %arg12: memref<8x1xf32, #tpu.memory_space<vmem>>, %arg13: memref<24x392xbf16, #tpu.memory_space<vmem>>, %arg14: memref<24x1xf32, #tpu.memory_space<vmem>>, %arg15: memref<24x8xbf16, #tpu.memory_space<vmem>>, %arg16: memref<24x1xf32, #tpu.memory_space<vmem>>, %arg17: memref<8x72xbf16, #tpu.memory_space<vmem>>, %arg18: memref<8x1xf32, #tpu.memory_space<vmem>>, %arg19: memref<8x200xbf16, #tpu.memory_space<vmem>>, %arg20: memref<8x1xf32, #tpu.memory_space<vmem>>, %arg21: memref<8x392xbf16, #tpu.memory_space<vmem>>, %arg22: memref<8x1xf32, #tpu.memory_space<vmem>>, %arg23: memref<24x1xf32, #tpu.memory_space<vmem>>, %arg24: memref<1x1x512xf32, #tpu.memory_space<vmem>>, %arg25: memref<8x768xbf16, #tpu.memory_space<vmem>>, %arg26: memref<392x512xbf16, #tpu.memory_space<vmem>>) attributes {dimension_semantics = [#tpu.dimension_semantics<parallel>], iteration_bounds = array<i64: 2>, scalar_prefetch = 0 : i64, scratch_operands = 2 : i64, tpu.core_type = #tpu.core_type<tc>, window_params = [{transform_indices = @transform_0, window_bounds = array<i64: 1, 8, 512>}, {pipeline_mode = #tpu.pipeline_mode<synchronous>, transform_indices = @transform_1, window_bounds = array<i64: 1, 512>}, {pipeline_mode = #tpu.pipeline_mode<synchronous>, transform_indices = @transform_2, window_bounds = array<i64: 8, 1>}, {pipeline_mode = #tpu.pipeline_mode<synchronous>, transform_indices = @transform_3, window_bounds = array<i64: 1, 1>}, {pipeline_mode = #tpu.pipeline_mode<synchronous>, transform_indices = @transform_4, window_bounds = array<i64: 8, 1>}, {pipeline_mode = #tpu.pipeline_mode<synchronous>, transform_indices = @transform_5, window_bounds = array<i64: 8, 1>}, {pipeline_mode = #tpu.pipeline_mode<synchronous>, transform_indices = @transform_6, window_bounds = array<i64: 8, 72>}, {pipeline_mode = #tpu.pipeline_mode<synchronous>, transform_indices = @transform_7, window_bounds = array<i64: 8, 1>}, {pipeline_mode = #tpu.pipeline_mode<synchronous>, transform_indices = @transform_8, window_bounds = array<i64: 8, 72>}, {pipeline_mode = #tpu.pipeline_mode<synchronous>, transform_indices = @transform_9, window_bounds = array<i64: 8, 1>}, {pipeline_mode = #tpu.pipeline_mode<synchronous>, transform_indices = @transform_10, window_bounds = array<i64: 8, 8>}, {pipeline_mode = #tpu.pipeline_mode<synchronous>, transform_indices = @transform_11, window_bounds = array<i64: 8, 1>}, {pipeline_mode = #tpu.pipeline_mode<synchronous>, transform_indices = @transform_12, window_bounds = array<i64: 24, 392>}, {pipeline_mode = #tpu.pipeline_mode<synchronous>, transform_indices = @transform_13, window_bounds = array<i64: 24, 1>}, {pipeline_mode = #tpu.pipeline_mode<synchronous>, transform_indices = @transform_14, window_bounds = array<i64: 24, 8>}, {pipeline_mode = #tpu.pipeline_mode<synchronous>, transform_indices = @transform_15, window_bounds = array<i64: 24, 1>}, {pipeline_mode = #tpu.pipeline_mode<synchronous>, transform_indices = @transform_16, window_bounds = array<i64: 8, 72>}, {pipeline_mode = #tpu.pipeline_mode<synchronous>, transform_indices = @transform_17, window_bounds = array<i64: 8, 1>}, {pipeline_mode = #tpu.pipeline_mode<synchronous>, transform_indices = @transform_18, window_bounds = array<i64: 8, 200>}, {pipeline_mode = #tpu.pipeline_mode<synchronous>, transform_indices = @transform_19, window_bounds = array<i64: 8, 1>}, {pipeline_mode = #tpu.pipeline_mode<synchronous>, transform_indices = @transform_20, window_bounds = array<i64: 8, 392>}, {pipeline_mode = #tpu.pipeline_mode<synchronous>, transform_indices = @transform_21, window_bounds = array<i64: 8, 1>}, {pipeline_mode = #tpu.pipeline_mode<synchronous>, transform_indices = @transform_22, window_bounds = array<i64: 24, 1>}, {transform_indices = @transform_23, window_bounds = array<i64: 1, 1, 512>}]} {
    %c0 = arith.constant 0 : index
    %c0_0 = arith.constant 0 : index
    %c0_1 = arith.constant 0 : index
    %0 = vector.load %arg1[%c0, %c0_0, %c0_1] : memref<1x8x512xf32, #tpu.memory_space<vmem>>, vector<1x8x512xf32>
    %1 = vector.shape_cast %0 : vector<1x8x512xf32> to vector<8x512xf32>
    %c0_2 = arith.constant 0 : index
    %c0_3 = arith.constant 0 : index
    %2 = vector.load %arg2[%c0_2, %c0_3] : memref<1x512xf32, #tpu.memory_space<vmem>>, vector<1x512xf32>
    %cst = arith.constant 0.000000e+00 : bf16
    %3 = vector.broadcast %cst : bf16 to vector<8x128xbf16>
    %c0_4 = arith.constant 0 : index
    %c0_5 = arith.constant 0 : index
    %4 = vector.load %arg25[%c0_4, %c0_5] : memref<8x768xbf16, #tpu.memory_space<vmem>>, vector<8x128xbf16>
    tpu.vector_store %arg25[%c0_4, %c0_5], %3 {strides = array<i32>} : memref<8x768xbf16, #tpu.memory_space<vmem>>, vector<8x128xbf16>,
    %cst_6 = arith.constant 0.000000e+00 : bf16
    %5 = vector.broadcast %cst_6 : bf16 to vector<8x128xbf16>
    %c0_7 = arith.constant 0 : index
    %c640 = arith.constant 640 : index
    %6 = vector.load %arg25[%c0_7, %c640] : memref<8x768xbf16, #tpu.memory_space<vmem>>, vector<8x128xbf16>
    tpu.vector_store %arg25[%c0_7, %c640], %5 {strides = array<i32>} : memref<8x768xbf16, #tpu.memory_space<vmem>>, vector<8x128xbf16>,
    %cst_8 = arith.constant dense<0.000000e+00> : vector<8xf32>
    %7 = vector.multi_reduction <add>, %1, %cst_8 [1] : vector<8x512xf32> to vector<8xf32>
    %8 = vector.shape_cast %7 : vector<8xf32> to vector<8x1xf32>
    %cst_9 = arith.constant 3.906250e-03 : f32
    %9 = vector.broadcast %cst_9 : f32 to vector<8x1xf32>
    %10 = arith.mulf %8, %9 : vector<8x1xf32>
    %c0_10 = arith.constant 0 : index
    %c0_11 = arith.constant 0 : index
    %11 = vector.load %arg3[%c0_10, %c0_11] : memref<8x1xf32, #tpu.memory_space<vmem>>, vector<8x1xf32>
    %12 = arith.mulf %11, %10 : vector<8x1xf32>
    %cst_12 = arith.constant dense<0.000000e+00> : vector<1xf32>
    %13 = vector.multi_reduction <add>, %12, %cst_12 [0] : vector<8x1xf32> to vector<1xf32>
    %14 = vector.shape_cast %13 : vector<1xf32> to vector<1x1xf32>
    %c0_13 = arith.constant 0 : index
    %c0_14 = arith.constant 0 : index
    %15 = vector.load %arg4[%c0_13, %c0_14] : memref<1x1xf32, #tpu.memory_space<vmem>>, vector<1x1xf32>
    %16 = arith.addf %14, %15 : vector<1x1xf32>
    %cst_15 = arith.constant 0.000000e+00 : f32
    %17 = vector.broadcast %cst_15 : f32 to vector<1x1xf32>
    %18 = arith.maximumf %16, %17 : vector<1x1xf32>
    %c0_16 = arith.constant 0 : index
    %c0_17 = arith.constant 0 : index
    %19 = vector.load %arg5[%c0_16, %c0_17] : memref<8x1xf32, #tpu.memory_space<vmem>>, vector<8x1xf32>
    %20 = vector.broadcast %18 : vector<1x1xf32> to vector<8x1xf32>
    %21 = arith.mulf %19, %20 : vector<8x1xf32>
    %cst_18 = arith.constant dense<0.000000e+00> : vector<8xf32>
    %22 = vector.multi_reduction <add>, %21, %cst_18 [1] : vector<8x1xf32> to vector<8xf32>
    %23 = vector.shape_cast %22 : vector<8xf32> to vector<8x1xf32>
    %c0_19 = arith.constant 0 : index
    %c0_20 = arith.constant 0 : index
    %24 = vector.load %arg6[%c0_19, %c0_20] : memref<8x1xf32, #tpu.memory_space<vmem>>, vector<8x1xf32>
    %25 = arith.addf %23, %24 : vector<8x1xf32>
    %26 = arith.negf %25 : vector<8x1xf32>
    %27 = math.exp %26 : vector<8x1xf32>
    %cst_21 = arith.constant 1.000000e+00 : f32
    %28 = vector.broadcast %cst_21 : f32 to vector<8x1xf32>
    %29 = arith.addf %28, %27 : vector<8x1xf32>
    %30 = arith.divf %28, %29 : vector<8x1xf32>
    %31 = vector.broadcast %30 : vector<8x1xf32> to vector<8x512xf32>
    %32 = arith.mulf %1, %31 : vector<8x512xf32>
    %33 = arith.truncf %32 : vector<8x512xf32> to vector<8x512xbf16>
    %c0_22 = arith.constant 0 : index
    %c128 = arith.constant 128 : index
    %34 = vector.load %arg25[%c0_22, %c128] : memref<8x768xbf16, #tpu.memory_space<vmem>>, vector<8x512xbf16>
    tpu.vector_store %arg25[%c0_22, %c128], %33 {strides = array<i32>} : memref<8x768xbf16, #tpu.memory_space<vmem>>, vector<8x512xbf16>,
    %c0_23 = arith.constant 0 : index
    %c105 = arith.constant 105 : index
    %35 = vector.load %arg25[%c0_23, %c105] : memref<8x768xbf16, #tpu.memory_space<vmem>>, vector<8x512xbf16>
    %c0_24 = arith.constant 0 : index
    %c0_25 = arith.constant 0 : index
    %36 = vector.load %arg26[%c0_24, %c0_25] : memref<392x512xbf16, #tpu.memory_space<vmem>>, vector<8x512xbf16>
    tpu.vector_store %arg26[%c0_24, %c0_25], %35 {strides = array<i32>} : memref<392x512xbf16, #tpu.memory_space<vmem>>, vector<8x512xbf16>,
    %c0_26 = arith.constant 0 : index
    %c106 = arith.constant 106 : index
    %37 = vector.load %arg25[%c0_26, %c106] : memref<8x768xbf16, #tpu.memory_space<vmem>>, vector<8x512xbf16>
    %c8 = arith.constant 8 : index
    %c0_27 = arith.constant 0 : index
    %38 = vector.load %arg26[%c8, %c0_27] : memref<392x512xbf16, #tpu.memory_space<vmem>>, vector<8x512xbf16>
    tpu.vector_store %arg26[%c8, %c0_27], %37 {strides = array<i32>} : memref<392x512xbf16, #tpu.memory_space<vmem>>, vector<8x512xbf16>,
    %c0_28 = arith.constant 0 : index
    %c107 = arith.constant 107 : index
    %39 = vector.load %arg25[%c0_28, %c107] : memref<8x768xbf16, #tpu.memory_space<vmem>>, vector<8x512xbf16>
    %c16 = arith.constant 16 : index
    %c0_29 = arith.constant 0 : index
    %40 = vector.load %arg26[%c16, %c0_29] : memref<392x512xbf16, #tpu.memory_space<vmem>>, vector<8x512xbf16>
    tpu.vector_store %arg26[%c16, %c0_29], %39 {strides = array<i32>} : memref<392x512xbf16, #tpu.memory_space<vmem>>, vector<8x512xbf16>,
    %c0_30 = arith.constant 0 : index
    %c127 = arith.constant 127 : index
    %41 = vector.load %arg25[%c0_30, %c127] : memref<8x768xbf16, #tpu.memory_space<vmem>>, vector<8x512xbf16>
    %c24 = arith.constant 24 : index
    %c0_31 = arith.constant 0 : index
    %42 = vector.load %arg26[%c24, %c0_31] : memref<392x512xbf16, #tpu.memory_space<vmem>>, vector<8x512xbf16>
    tpu.vector_store %arg26[%c24, %c0_31], %41 {strides = array<i32>} : memref<392x512xbf16, #tpu.memory_space<vmem>>, vector<8x512xbf16>,
    %c0_32 = arith.constant 0 : index
    %c128_33 = arith.constant 128 : index
    %43 = vector.load %arg25[%c0_32, %c128_33] : memref<8x768xbf16, #tpu.memory_space<vmem>>, vector<8x512xbf16>
    %c32 = arith.constant 32 : index
    %c0_34 = arith.constant 0 : index
    %44 = vector.load %arg26[%c32, %c0_34] : memref<392x512xbf16, #tpu.memory_space<vmem>>, vector<8x512xbf16>
    tpu.vector_store %arg26[%c32, %c0_34], %43 {strides = array<i32>} : memref<392x512xbf16, #tpu.memory_space<vmem>>, vector<8x512xbf16>,
    %c0_35 = arith.constant 0 : index
    %c129 = arith.constant 129 : index
    %45 = vector.load %arg25[%c0_35, %c129] : memref<8x768xbf16, #tpu.memory_space<vmem>>, vector<8x512xbf16>
    %c40 = arith.constant 40 : index
    %c0_36 = arith.constant 0 : index
    %46 = vector.load %arg26[%c40, %c0_36] : memref<392x512xbf16, #tpu.memory_space<vmem>>, vector<8x512xbf16>
    tpu.vector_store %arg26[%c40, %c0_36], %45 {strides = array<i32>} : memref<392x512xbf16, #tpu.memory_space<vmem>>, vector<8x512xbf16>,
    %c0_37 = arith.constant 0 : index
    %c149 = arith.constant 149 : index
    %47 = vector.load %arg25[%c0_37, %c149] : memref<8x768xbf16, #tpu.memory_space<vmem>>, vector<8x512xbf16>
    %c48 = arith.constant 48 : index
    %c0_38 = arith.constant 0 : index
    %48 = vector.load %arg26[%c48, %c0_38] : memref<392x512xbf16, #tpu.memory_space<vmem>>, vector<8x512xbf16>
    tpu.vector_store %arg26[%c48, %c0_38], %47 {strides = array<i32>} : memref<392x512xbf16, #tpu.memory_space<vmem>>, vector<8x512xbf16>,
    %c0_39 = arith.constant 0 : index
    %c150 = arith.constant 150 : index
    %49 = vector.load %arg25[%c0_39, %c150] : memref<8x768xbf16, #tpu.memory_space<vmem>>, vector<8x512xbf16>
    %c56 = arith.constant 56 : index
    %c0_40 = arith.constant 0 : index
    %50 = vector.load %arg26[%c56, %c0_40] : memref<392x512xbf16, #tpu.memory_space<vmem>>, vector<8x512xbf16>
    tpu.vector_store %arg26[%c56, %c0_40], %49 {strides = array<i32>} : memref<392x512xbf16, #tpu.memory_space<vmem>>, vector<8x512xbf16>,
    %c0_41 = arith.constant 0 : index
    %c151 = arith.constant 151 : index
    %51 = vector.load %arg25[%c0_41, %c151] : memref<8x768xbf16, #tpu.memory_space<vmem>>, vector<8x512xbf16>
    %c64 = arith.constant 64 : index
    %c0_42 = arith.constant 0 : index
    %52 = vector.load %arg26[%c64, %c0_42] : memref<392x512xbf16, #tpu.memory_space<vmem>>, vector<8x512xbf16>
    tpu.vector_store %arg26[%c64, %c0_42], %51 {strides = array<i32>} : memref<392x512xbf16, #tpu.memory_space<vmem>>, vector<8x512xbf16>,
    %c0_43 = arith.constant 0 : index
    %c0_44 = arith.constant 0 : index
    %53 = vector.load %arg7[%c0_43, %c0_44] : memref<8x72xbf16, #tpu.memory_space<vmem>>, vector<8x72xbf16>
    %c0_45 = arith.constant 0 : index
    %c0_46 = arith.constant 0 : index
    %54 = vector.load %arg26[%c0_45, %c0_46] : memref<392x512xbf16, #tpu.memory_space<vmem>>, vector<72x512xbf16>
    %cst_47 = arith.constant dense<0.000000e+00> : vector<8x512xf32>
    %55 = tpu.matmul %53, %54, %cst_47 {dimension_numbers = #tpu.dot_dimension_numbers<[1], [0], [0], [1], [0, 0, 1, 1], [], []>} : vector<8x72xbf16>, vector<72x512xbf16>, vector<8x512xf32> -> vector<8x512xf32>
    %c0_48 = arith.constant 0 : index
    %c0_49 = arith.constant 0 : index
    %56 = vector.load %arg8[%c0_48, %c0_49] : memref<8x1xf32, #tpu.memory_space<vmem>>, vector<8x1xf32>
    %57 = vector.broadcast %56 : vector<8x1xf32> to vector<8x512xf32>
    %58 = arith.addf %55, %57 : vector<8x512xf32>
    %cst_50 = arith.constant 0.000000e+00 : f32
    %59 = vector.broadcast %cst_50 : f32 to vector<8x512xf32>
    %60 = arith.maximumf %58, %59 : vector<8x512xf32>
    %61 = vector.broadcast %2 : vector<1x512xf32> to vector<8x512xf32>
    %62 = arith.mulf %60, %61 : vector<8x512xf32>
    %63 = arith.truncf %62 : vector<8x512xf32> to vector<8x512xbf16>
    %c0_51 = arith.constant 0 : index
    %c128_52 = arith.constant 128 : index
    %64 = vector.load %arg25[%c0_51, %c128_52] : memref<8x768xbf16, #tpu.memory_space<vmem>>, vector<8x512xbf16>
    tpu.vector_store %arg25[%c0_51, %c128_52], %63 {strides = array<i32>} : memref<8x768xbf16, #tpu.memory_space<vmem>>, vector<8x512xbf16>,
    %c0_53 = arith.constant 0 : index
    %c105_54 = arith.constant 105 : index
    %65 = vector.load %arg25[%c0_53, %c105_54] : memref<8x768xbf16, #tpu.memory_space<vmem>>, vector<8x512xbf16>
    %c0_55 = arith.constant 0 : index
    %c0_56 = arith.constant 0 : index
    %66 = vector.load %arg26[%c0_55, %c0_56] : memref<392x512xbf16, #tpu.memory_space<vmem>>, vector<8x512xbf16>
    tpu.vector_store %arg26[%c0_55, %c0_56], %65 {strides = array<i32>} : memref<392x512xbf16, #tpu.memory_space<vmem>>, vector<8x512xbf16>,
    %c0_57 = arith.constant 0 : index
    %c106_58 = arith.constant 106 : index
    %67 = vector.load %arg25[%c0_57, %c106_58] : memref<8x768xbf16, #tpu.memory_space<vmem>>, vector<8x512xbf16>
    %c8_59 = arith.constant 8 : index
    %c0_60 = arith.constant 0 : index
    %68 = vector.load %arg26[%c8_59, %c0_60] : memref<392x512xbf16, #tpu.memory_space<vmem>>, vector<8x512xbf16>
    tpu.vector_store %arg26[%c8_59, %c0_60], %67 {strides = array<i32>} : memref<392x512xbf16, #tpu.memory_space<vmem>>, vector<8x512xbf16>,
    %c0_61 = arith.constant 0 : index
    %c107_62 = arith.constant 107 : index
    %69 = vector.load %arg25[%c0_61, %c107_62] : memref<8x768xbf16, #tpu.memory_space<vmem>>, vector<8x512xbf16>
    %c16_63 = arith.constant 16 : index
    %c0_64 = arith.constant 0 : index
    %70 = vector.load %arg26[%c16_63, %c0_64] : memref<392x512xbf16, #tpu.memory_space<vmem>>, vector<8x512xbf16>
    tpu.vector_store %arg26[%c16_63, %c0_64], %69 {strides = array<i32>} : memref<392x512xbf16, #tpu.memory_space<vmem>>, vector<8x512xbf16>,
    %c0_65 = arith.constant 0 : index
    %c127_66 = arith.constant 127 : index
    %71 = vector.load %arg25[%c0_65, %c127_66] : memref<8x768xbf16, #tpu.memory_space<vmem>>, vector<8x512xbf16>
    %c24_67 = arith.constant 24 : index
    %c0_68 = arith.constant 0 : index
    %72 = vector.load %arg26[%c24_67, %c0_68] : memref<392x512xbf16, #tpu.memory_space<vmem>>, vector<8x512xbf16>
    tpu.vector_store %arg26[%c24_67, %c0_68], %71 {strides = array<i32>} : memref<392x512xbf16, #tpu.memory_space<vmem>>, vector<8x512xbf16>,
    %c0_69 = arith.constant 0 : index
    %c128_70 = arith.constant 128 : index
    %73 = vector.load %arg25[%c0_69, %c128_70] : memref<8x768xbf16, #tpu.memory_space<vmem>>, vector<8x512xbf16>
    %c32_71 = arith.constant 32 : index
    %c0_72 = arith.constant 0 : index
    %74 = vector.load %arg26[%c32_71, %c0_72] : memref<392x512xbf16, #tpu.memory_space<vmem>>, vector<8x512xbf16>
    tpu.vector_store %arg26[%c32_71, %c0_72], %73 {strides = array<i32>} : memref<392x512xbf16, #tpu.memory_space<vmem>>, vector<8x512xbf16>,
    %c0_73 = arith.constant 0 : index
    %c129_74 = arith.constant 129 : index
    %75 = vector.load %arg25[%c0_73, %c129_74] : memref<8x768xbf16, #tpu.memory_space<vmem>>, vector<8x512xbf16>
    %c40_75 = arith.constant 40 : index
    %c0_76 = arith.constant 0 : index
    %76 = vector.load %arg26[%c40_75, %c0_76] : memref<392x512xbf16, #tpu.memory_space<vmem>>, vector<8x512xbf16>
    tpu.vector_store %arg26[%c40_75, %c0_76], %75 {strides = array<i32>} : memref<392x512xbf16, #tpu.memory_space<vmem>>, vector<8x512xbf16>,
    %c0_77 = arith.constant 0 : index
    %c149_78 = arith.constant 149 : index
    %77 = vector.load %arg25[%c0_77, %c149_78] : memref<8x768xbf16, #tpu.memory_space<vmem>>, vector<8x512xbf16>
    %c48_79 = arith.constant 48 : index
    %c0_80 = arith.constant 0 : index
    %78 = vector.load %arg26[%c48_79, %c0_80] : memref<392x512xbf16, #tpu.memory_space<vmem>>, vector<8x512xbf16>
    tpu.vector_store %arg26[%c48_79, %c0_80], %77 {strides = array<i32>} : memref<392x512xbf16, #tpu.memory_space<vmem>>, vector<8x512xbf16>,
    %c0_81 = arith.constant 0 : index
    %c150_82 = arith.constant 150 : index
    %79 = vector.load %arg25[%c0_81, %c150_82] : memref<8x768xbf16, #tpu.memory_space<vmem>>, vector<8x512xbf16>
    %c56_83 = arith.constant 56 : index
    %c0_84 = arith.constant 0 : index
    %80 = vector.load %arg26[%c56_83, %c0_84] : memref<392x512xbf16, #tpu.memory_space<vmem>>, vector<8x512xbf16>
    tpu.vector_store %arg26[%c56_83, %c0_84], %79 {strides = array<i32>} : memref<392x512xbf16, #tpu.memory_space<vmem>>, vector<8x512xbf16>,
    %c0_85 = arith.constant 0 : index
    %c151_86 = arith.constant 151 : index
    %81 = vector.load %arg25[%c0_85, %c151_86] : memref<8x768xbf16, #tpu.memory_space<vmem>>, vector<8x512xbf16>
    %c64_87 = arith.constant 64 : index
    %c0_88 = arith.constant 0 : index
    %82 = vector.load %arg26[%c64_87, %c0_88] : memref<392x512xbf16, #tpu.memory_space<vmem>>, vector<8x512xbf16>
    tpu.vector_store %arg26[%c64_87, %c0_88], %81 {strides = array<i32>} : memref<392x512xbf16, #tpu.memory_space<vmem>>, vector<8x512xbf16>,
    %c0_89 = arith.constant 0 : index
    %c0_90 = arith.constant 0 : index
    %83 = vector.load %arg9[%c0_89, %c0_90] : memref<8x72xbf16, #tpu.memory_space<vmem>>, vector<8x72xbf16>
    %c0_91 = arith.constant 0 : index
    %c0_92 = arith.constant 0 : index
    %84 = vector.load %arg26[%c0_91, %c0_92] : memref<392x512xbf16, #tpu.memory_space<vmem>>, vector<72x512xbf16>
    %cst_93 = arith.constant dense<0.000000e+00> : vector<8x512xf32>
    %85 = tpu.matmul %83, %84, %cst_93 {dimension_numbers = #tpu.dot_dimension_numbers<[1], [0], [0], [1], [0, 0, 1, 1], [], []>} : vector<8x72xbf16>, vector<72x512xbf16>, vector<8x512xf32> -> vector<8x512xf32>
    %c0_94 = arith.constant 0 : index
    %c0_95 = arith.constant 0 : index
    %86 = vector.load %arg10[%c0_94, %c0_95] : memref<8x1xf32, #tpu.memory_space<vmem>>, vector<8x1xf32>
    %87 = vector.broadcast %86 : vector<8x1xf32> to vector<8x512xf32>
    %88 = arith.addf %85, %87 : vector<8x512xf32>
    %cst_96 = arith.constant 0.000000e+00 : f32
    %89 = vector.broadcast %cst_96 : f32 to vector<8x512xf32>
    %90 = arith.maximumf %88, %89 : vector<8x512xf32>
    %c0_97 = arith.constant 0 : index
    %c0_98 = arith.constant 0 : index
    %91 = vector.load %arg11[%c0_97, %c0_98] : memref<8x8xbf16, #tpu.memory_space<vmem>>, vector<8x8xbf16>
    %92 = arith.truncf %32 : vector<8x512xf32> to vector<8x512xbf16>
    %cst_99 = arith.constant dense<0.000000e+00> : vector<8x512xf32>
    %93 = tpu.matmul %91, %92, %cst_99 {dimension_numbers = #tpu.dot_dimension_numbers<[1], [0], [0], [1], [0, 0, 1, 1], [], []>} : vector<8x8xbf16>, vector<8x512xbf16>, vector<8x512xf32> -> vector<8x512xf32>
    %c0_100 = arith.constant 0 : index
    %c0_101 = arith.constant 0 : index
    %94 = vector.load %arg12[%c0_100, %c0_101] : memref<8x1xf32, #tpu.memory_space<vmem>>, vector<8x1xf32>
    %95 = vector.broadcast %94 : vector<8x1xf32> to vector<8x512xf32>
    %96 = arith.addf %93, %95 : vector<8x512xf32>
    %97 = arith.addf %90, %96 : vector<8x512xf32>
    %98 = vector.broadcast %2 : vector<1x512xf32> to vector<8x512xf32>
    %99 = arith.mulf %97, %98 : vector<8x512xf32>
    %100 = arith.truncf %99 : vector<8x512xf32> to vector<8x512xbf16>
    %c0_102 = arith.constant 0 : index
    %c128_103 = arith.constant 128 : index
    %101 = vector.load %arg25[%c0_102, %c128_103] : memref<8x768xbf16, #tpu.memory_space<vmem>>, vector<8x512xbf16>
    tpu.vector_store %arg25[%c0_102, %c128_103], %100 {strides = array<i32>} : memref<8x768xbf16, #tpu.memory_space<vmem>>, vector<8x512xbf16>,
    %c0_104 = arith.constant 0 : index
    %c59 = arith.constant 59 : index
    %102 = vector.load %arg25[%c0_104, %c59] : memref<8x768xbf16, #tpu.memory_space<vmem>>, vector<8x512xbf16>
    %c0_105 = arith.constant 0 : index
    %c0_106 = arith.constant 0 : index
    %103 = vector.load %arg26[%c0_105, %c0_106] : memref<392x512xbf16, #tpu.memory_space<vmem>>, vector<8x512xbf16>
    tpu.vector_store %arg26[%c0_105, %c0_106], %102 {strides = array<i32>} : memref<392x512xbf16, #tpu.memory_space<vmem>>, vector<8x512xbf16>,
    %c0_107 = arith.constant 0 : index
    %c60 = arith.constant 60 : index
    %104 = vector.load %arg25[%c0_107, %c60] : memref<8x768xbf16, #tpu.memory_space<vmem>>, vector<8x512xbf16>
    %c8_108 = arith.constant 8 : index
    %c0_109 = arith.constant 0 : index
    %105 = vector.load %arg26[%c8_108, %c0_109] : memref<392x512xbf16, #tpu.memory_space<vmem>>, vector<8x512xbf16>
    tpu.vector_store %arg26[%c8_108, %c0_109], %104 {strides = array<i32>} : memref<392x512xbf16, #tpu.memory_space<vmem>>, vector<8x512xbf16>,
    %c0_110 = arith.constant 0 : index
    %c61 = arith.constant 61 : index
    %106 = vector.load %arg25[%c0_110, %c61] : memref<8x768xbf16, #tpu.memory_space<vmem>>, vector<8x512xbf16>
    %c16_111 = arith.constant 16 : index
    %c0_112 = arith.constant 0 : index
    %107 = vector.load %arg26[%c16_111, %c0_112] : memref<392x512xbf16, #tpu.memory_space<vmem>>, vector<8x512xbf16>
    tpu.vector_store %arg26[%c16_111, %c0_112], %106 {strides = array<i32>} : memref<392x512xbf16, #tpu.memory_space<vmem>>, vector<8x512xbf16>,
    %c0_113 = arith.constant 0 : index
    %c62 = arith.constant 62 : index
    %108 = vector.load %arg25[%c0_113, %c62] : memref<8x768xbf16, #tpu.memory_space<vmem>>, vector<8x512xbf16>
    %c24_114 = arith.constant 24 : index
    %c0_115 = arith.constant 0 : index
    %109 = vector.load %arg26[%c24_114, %c0_115] : memref<392x512xbf16, #tpu.memory_space<vmem>>, vector<8x512xbf16>
    tpu.vector_store %arg26[%c24_114, %c0_115], %108 {strides = array<i32>} : memref<392x512xbf16, #tpu.memory_space<vmem>>, vector<8x512xbf16>,
    %c0_116 = arith.constant 0 : index
    %c63 = arith.constant 63 : index
    %110 = vector.load %arg25[%c0_116, %c63] : memref<8x768xbf16, #tpu.memory_space<vmem>>, vector<8x512xbf16>
    %c32_117 = arith.constant 32 : index
    %c0_118 = arith.constant 0 : index
    %111 = vector.load %arg26[%c32_117, %c0_118] : memref<392x512xbf16, #tpu.memory_space<vmem>>, vector<8x512xbf16>
    tpu.vector_store %arg26[%c32_117, %c0_118], %110 {strides = array<i32>} : memref<392x512xbf16, #tpu.memory_space<vmem>>, vector<8x512xbf16>,
    %c0_119 = arith.constant 0 : index
    %c64_120 = arith.constant 64 : index
    %112 = vector.load %arg25[%c0_119, %c64_120] : memref<8x768xbf16, #tpu.memory_space<vmem>>, vector<8x512xbf16>
    %c40_121 = arith.constant 40 : index
    %c0_122 = arith.constant 0 : index
    %113 = vector.load %arg26[%c40_121, %c0_122] : memref<392x512xbf16, #tpu.memory_space<vmem>>, vector<8x512xbf16>
    tpu.vector_store %arg26[%c40_121, %c0_122], %112 {strides = array<i32>} : memref<392x512xbf16, #tpu.memory_space<vmem>>, vector<8x512xbf16>,
    %c0_123 = arith.constant 0 : index
    %c65 = arith.constant 65 : index
    %114 = vector.load %arg25[%c0_123, %c65] : memref<8x768xbf16, #tpu.memory_space<vmem>>, vector<8x512xbf16>
    %c48_124 = arith.constant 48 : index
    %c0_125 = arith.constant 0 : index
    %115 = vector.load %arg26[%c48_124, %c0_125] : memref<392x512xbf16, #tpu.memory_space<vmem>>, vector<8x512xbf16>
    tpu.vector_store %arg26[%c48_124, %c0_125], %114 {strides = array<i32>} : memref<392x512xbf16, #tpu.memory_space<vmem>>, vector<8x512xbf16>,
    %c0_126 = arith.constant 0 : index
    %c81 = arith.constant 81 : index
    %116 = vector.load %arg25[%c0_126, %c81] : memref<8x768xbf16, #tpu.memory_space<vmem>>, vector<8x512xbf16>
    %c56_127 = arith.constant 56 : index
    %c0_128 = arith.constant 0 : index
    %117 = vector.load %arg26[%c56_127, %c0_128] : memref<392x512xbf16, #tpu.memory_space<vmem>>, vector<8x512xbf16>
    tpu.vector_store %arg26[%c56_127, %c0_128], %116 {strides = array<i32>} : memref<392x512xbf16, #tpu.memory_space<vmem>>, vector<8x512xbf16>,
    %c0_129 = arith.constant 0 : index
    %c82 = arith.constant 82 : index
    %118 = vector.load %arg25[%c0_129, %c82] : memref<8x768xbf16, #tpu.memory_space<vmem>>, vector<8x512xbf16>
    %c64_130 = arith.constant 64 : index
    %c0_131 = arith.constant 0 : index
    %119 = vector.load %arg26[%c64_130, %c0_131] : memref<392x512xbf16, #tpu.memory_space<vmem>>, vector<8x512xbf16>
    tpu.vector_store %arg26[%c64_130, %c0_131], %118 {strides = array<i32>} : memref<392x512xbf16, #tpu.memory_space<vmem>>, vector<8x512xbf16>,
    %c0_132 = arith.constant 0 : index
    %c83 = arith.constant 83 : index
    %120 = vector.load %arg25[%c0_132, %c83] : memref<8x768xbf16, #tpu.memory_space<vmem>>, vector<8x512xbf16>
    %c72 = arith.constant 72 : index
    %c0_133 = arith.constant 0 : index
    %121 = vector.load %arg26[%c72, %c0_133] : memref<392x512xbf16, #tpu.memory_space<vmem>>, vector<8x512xbf16>
    tpu.vector_store %arg26[%c72, %c0_133], %120 {strides = array<i32>} : memref<392x512xbf16, #tpu.memory_space<vmem>>, vector<8x512xbf16>,
    %c0_134 = arith.constant 0 : index
    %c84 = arith.constant 84 : index
    %122 = vector.load %arg25[%c0_134, %c84] : memref<8x768xbf16, #tpu.memory_space<vmem>>, vector<8x512xbf16>
    %c80 = arith.constant 80 : index
    %c0_135 = arith.constant 0 : index
    %123 = vector.load %arg26[%c80, %c0_135] : memref<392x512xbf16, #tpu.memory_space<vmem>>, vector<8x512xbf16>
    tpu.vector_store %arg26[%c80, %c0_135], %122 {strides = array<i32>} : memref<392x512xbf16, #tpu.memory_space<vmem>>, vector<8x512xbf16>,
    %c0_136 = arith.constant 0 : index
    %c85 = arith.constant 85 : index
    %124 = vector.load %arg25[%c0_136, %c85] : memref<8x768xbf16, #tpu.memory_space<vmem>>, vector<8x512xbf16>
    %c88 = arith.constant 88 : index
    %c0_137 = arith.constant 0 : index
    %125 = vector.load %arg26[%c88, %c0_137] : memref<392x512xbf16, #tpu.memory_space<vmem>>, vector<8x512xbf16>
    tpu.vector_store %arg26[%c88, %c0_137], %124 {strides = array<i32>} : memref<392x512xbf16, #tpu.memory_space<vmem>>, vector<8x512xbf16>,
    %c0_138 = arith.constant 0 : index
    %c86 = arith.constant 86 : index
    %126 = vector.load %arg25[%c0_138, %c86] : memref<8x768xbf16, #tpu.memory_space<vmem>>, vector<8x512xbf16>
    %c96 = arith.constant 96 : index
    %c0_139 = arith.constant 0 : index
    %127 = vector.load %arg26[%c96, %c0_139] : memref<392x512xbf16, #tpu.memory_space<vmem>>, vector<8x512xbf16>
    tpu.vector_store %arg26[%c96, %c0_139], %126 {strides = array<i32>} : memref<392x512xbf16, #tpu.memory_space<vmem>>, vector<8x512xbf16>,
    %c0_140 = arith.constant 0 : index
    %c87 = arith.constant 87 : index
    %128 = vector.load %arg25[%c0_140, %c87] : memref<8x768xbf16, #tpu.memory_space<vmem>>, vector<8x512xbf16>
    %c104 = arith.constant 104 : index
    %c0_141 = arith.constant 0 : index
    %129 = vector.load %arg26[%c104, %c0_141] : memref<392x512xbf16, #tpu.memory_space<vmem>>, vector<8x512xbf16>
    tpu.vector_store %arg26[%c104, %c0_141], %128 {strides = array<i32>} : memref<392x512xbf16, #tpu.memory_space<vmem>>, vector<8x512xbf16>,
    %c0_142 = arith.constant 0 : index
    %c103 = arith.constant 103 : index
    %130 = vector.load %arg25[%c0_142, %c103] : memref<8x768xbf16, #tpu.memory_space<vmem>>, vector<8x512xbf16>
    %c112 = arith.constant 112 : index
    %c0_143 = arith.constant 0 : index
    %131 = vector.load %arg26[%c112, %c0_143] : memref<392x512xbf16, #tpu.memory_space<vmem>>, vector<8x512xbf16>
    tpu.vector_store %arg26[%c112, %c0_143], %130 {strides = array<i32>} : memref<392x512xbf16, #tpu.memory_space<vmem>>, vector<8x512xbf16>,
    %c0_144 = arith.constant 0 : index
    %c104_145 = arith.constant 104 : index
    %132 = vector.load %arg25[%c0_144, %c104_145] : memref<8x768xbf16, #tpu.memory_space<vmem>>, vector<8x512xbf16>
    %c120 = arith.constant 120 : index
    %c0_146 = arith.constant 0 : index
    %133 = vector.load %arg26[%c120, %c0_146] : memref<392x512xbf16, #tpu.memory_space<vmem>>, vector<8x512xbf16>
    tpu.vector_store %arg26[%c120, %c0_146], %132 {strides = array<i32>} : memref<392x512xbf16, #tpu.memory_space<vmem>>, vector<8x512xbf16>,
    %c0_147 = arith.constant 0 : index
    %c105_148 = arith.constant 105 : index
    %134 = vector.load %arg25[%c0_147, %c105_148] : memref<8x768xbf16, #tpu.memory_space<vmem>>, vector<8x512xbf16>
    %c128_149 = arith.constant 128 : index
    %c0_150 = arith.constant 0 : index
    %135 = vector.load %arg26[%c128_149, %c0_150] : memref<392x512xbf16, #tpu.memory_space<vmem>>, vector<8x512xbf16>
    tpu.vector_store %arg26[%c128_149, %c0_150], %134 {strides = array<i32>} : memref<392x512xbf16, #tpu.memory_space<vmem>>, vector<8x512xbf16>,
    %c0_151 = arith.constant 0 : index
    %c106_152 = arith.constant 106 : index
    %136 = vector.load %arg25[%c0_151, %c106_152] : memref<8x768xbf16, #tpu.memory_space<vmem>>, vector<8x512xbf16>
    %c136 = arith.constant 136 : index
    %c0_153 = arith.constant 0 : index
    %137 = vector.load %arg26[%c136, %c0_153] : memref<392x512xbf16, #tpu.memory_space<vmem>>, vector<8x512xbf16>
    tpu.vector_store %arg26[%c136, %c0_153], %136 {strides = array<i32>} : memref<392x512xbf16, #tpu.memory_space<vmem>>, vector<8x512xbf16>,
    %c0_154 = arith.constant 0 : index
    %c107_155 = arith.constant 107 : index
    %138 = vector.load %arg25[%c0_154, %c107_155] : memref<8x768xbf16, #tpu.memory_space<vmem>>, vector<8x512xbf16>
    %c144 = arith.constant 144 : index
    %c0_156 = arith.constant 0 : index
    %139 = vector.load %arg26[%c144, %c0_156] : memref<392x512xbf16, #tpu.memory_space<vmem>>, vector<8x512xbf16>
    tpu.vector_store %arg26[%c144, %c0_156], %138 {strides = array<i32>} : memref<392x512xbf16, #tpu.memory_space<vmem>>, vector<8x512xbf16>,
    %c0_157 = arith.constant 0 : index
    %c108 = arith.constant 108 : index
    %140 = vector.load %arg25[%c0_157, %c108] : memref<8x768xbf16, #tpu.memory_space<vmem>>, vector<8x512xbf16>
    %c152 = arith.constant 152 : index
    %c0_158 = arith.constant 0 : index
    %141 = vector.load %arg26[%c152, %c0_158] : memref<392x512xbf16, #tpu.memory_space<vmem>>, vector<8x512xbf16>
    tpu.vector_store %arg26[%c152, %c0_158], %140 {strides = array<i32>} : memref<392x512xbf16, #tpu.memory_space<vmem>>, vector<8x512xbf16>,
    %c0_159 = arith.constant 0 : index
    %c109 = arith.constant 109 : index
    %142 = vector.load %arg25[%c0_159, %c109] : memref<8x768xbf16, #tpu.memory_space<vmem>>, vector<8x512xbf16>
    %c160 = arith.constant 160 : index
    %c0_160 = arith.constant 0 : index
    %143 = vector.load %arg26[%c160, %c0_160] : memref<392x512xbf16, #tpu.memory_space<vmem>>, vector<8x512xbf16>
    tpu.vector_store %arg26[%c160, %c0_160], %142 {strides = array<i32>} : memref<392x512xbf16, #tpu.memory_space<vmem>>, vector<8x512xbf16>,
    %c0_161 = arith.constant 0 : index
    %c125 = arith.constant 125 : index
    %144 = vector.load %arg25[%c0_161, %c125] : memref<8x768xbf16, #tpu.memory_space<vmem>>, vector<8x512xbf16>
    %c168 = arith.constant 168 : index
    %c0_162 = arith.constant 0 : index
    %145 = vector.load %arg26[%c168, %c0_162] : memref<392x512xbf16, #tpu.memory_space<vmem>>, vector<8x512xbf16>
    tpu.vector_store %arg26[%c168, %c0_162], %144 {strides = array<i32>} : memref<392x512xbf16, #tpu.memory_space<vmem>>, vector<8x512xbf16>,
    %c0_163 = arith.constant 0 : index
    %c126 = arith.constant 126 : index
    %146 = vector.load %arg25[%c0_163, %c126] : memref<8x768xbf16, #tpu.memory_space<vmem>>, vector<8x512xbf16>
    %c176 = arith.constant 176 : index
    %c0_164 = arith.constant 0 : index
    %147 = vector.load %arg26[%c176, %c0_164] : memref<392x512xbf16, #tpu.memory_space<vmem>>, vector<8x512xbf16>
    tpu.vector_store %arg26[%c176, %c0_164], %146 {strides = array<i32>} : memref<392x512xbf16, #tpu.memory_space<vmem>>, vector<8x512xbf16>,
    %c0_165 = arith.constant 0 : index
    %c127_166 = arith.constant 127 : index
    %148 = vector.load %arg25[%c0_165, %c127_166] : memref<8x768xbf16, #tpu.memory_space<vmem>>, vector<8x512xbf16>
    %c184 = arith.constant 184 : index
    %c0_167 = arith.constant 0 : index
    %149 = vector.load %arg26[%c184, %c0_167] : memref<392x512xbf16, #tpu.memory_space<vmem>>, vector<8x512xbf16>
    tpu.vector_store %arg26[%c184, %c0_167], %148 {strides = array<i32>} : memref<392x512xbf16, #tpu.memory_space<vmem>>, vector<8x512xbf16>,
    %c0_168 = arith.constant 0 : index
    %c128_169 = arith.constant 128 : index
    %150 = vector.load %arg25[%c0_168, %c128_169] : memref<8x768xbf16, #tpu.memory_space<vmem>>, vector<8x512xbf16>
    %c192 = arith.constant 192 : index
    %c0_170 = arith.constant 0 : index
    %151 = vector.load %arg26[%c192, %c0_170] : memref<392x512xbf16, #tpu.memory_space<vmem>>, vector<8x512xbf16>
    tpu.vector_store %arg26[%c192, %c0_170], %150 {strides = array<i32>} : memref<392x512xbf16, #tpu.memory_space<vmem>>, vector<8x512xbf16>,
    %c0_171 = arith.constant 0 : index
    %c129_172 = arith.constant 129 : index
    %152 = vector.load %arg25[%c0_171, %c129_172] : memref<8x768xbf16, #tpu.memory_space<vmem>>, vector<8x512xbf16>
    %c200 = arith.constant 200 : index
    %c0_173 = arith.constant 0 : index
    %153 = vector.load %arg26[%c200, %c0_173] : memref<392x512xbf16, #tpu.memory_space<vmem>>, vector<8x512xbf16>
    tpu.vector_store %arg26[%c200, %c0_173], %152 {strides = array<i32>} : memref<392x512xbf16, #tpu.memory_space<vmem>>, vector<8x512xbf16>,
    %c0_174 = arith.constant 0 : index
    %c130 = arith.constant 130 : index
    %154 = vector.load %arg25[%c0_174, %c130] : memref<8x768xbf16, #tpu.memory_space<vmem>>, vector<8x512xbf16>
    %c208 = arith.constant 208 : index
    %c0_175 = arith.constant 0 : index
    %155 = vector.load %arg26[%c208, %c0_175] : memref<392x512xbf16, #tpu.memory_space<vmem>>, vector<8x512xbf16>
    tpu.vector_store %arg26[%c208, %c0_175], %154 {strides = array<i32>} : memref<392x512xbf16, #tpu.memory_space<vmem>>, vector<8x512xbf16>,
    %c0_176 = arith.constant 0 : index
    %c131 = arith.constant 131 : index
    %156 = vector.load %arg25[%c0_176, %c131] : memref<8x768xbf16, #tpu.memory_space<vmem>>, vector<8x512xbf16>
    %c216 = arith.constant 216 : index
    %c0_177 = arith.constant 0 : index
    %157 = vector.load %arg26[%c216, %c0_177] : memref<392x512xbf16, #tpu.memory_space<vmem>>, vector<8x512xbf16>
    tpu.vector_store %arg26[%c216, %c0_177], %156 {strides = array<i32>} : memref<392x512xbf16, #tpu.memory_space<vmem>>, vector<8x512xbf16>,
    %c0_178 = arith.constant 0 : index
    %c147 = arith.constant 147 : index
    %158 = vector.load %arg25[%c0_178, %c147] : memref<8x768xbf16, #tpu.memory_space<vmem>>, vector<8x512xbf16>
    %c224 = arith.constant 224 : index
    %c0_179 = arith.constant 0 : index
    %159 = vector.load %arg26[%c224, %c0_179] : memref<392x512xbf16, #tpu.memory_space<vmem>>, vector<8x512xbf16>
    tpu.vector_store %arg26[%c224, %c0_179], %158 {strides = array<i32>} : memref<392x512xbf16, #tpu.memory_space<vmem>>, vector<8x512xbf16>,
    %c0_180 = arith.constant 0 : index
    %c148 = arith.constant 148 : index
    %160 = vector.load %arg25[%c0_180, %c148] : memref<8x768xbf16, #tpu.memory_space<vmem>>, vector<8x512xbf16>
    %c232 = arith.constant 232 : index
    %c0_181 = arith.constant 0 : index
    %161 = vector.load %arg26[%c232, %c0_181] : memref<392x512xbf16, #tpu.memory_space<vmem>>, vector<8x512xbf16>
    tpu.vector_store %arg26[%c232, %c0_181], %160 {strides = array<i32>} : memref<392x512xbf16, #tpu.memory_space<vmem>>, vector<8x512xbf16>,
    %c0_182 = arith.constant 0 : index
    %c149_183 = arith.constant 149 : index
    %162 = vector.load %arg25[%c0_182, %c149_183] : memref<8x768xbf16, #tpu.memory_space<vmem>>, vector<8x512xbf16>
    %c240 = arith.constant 240 : index
    %c0_184 = arith.constant 0 : index
    %163 = vector.load %arg26[%c240, %c0_184] : memref<392x512xbf16, #tpu.memory_space<vmem>>, vector<8x512xbf16>
    tpu.vector_store %arg26[%c240, %c0_184], %162 {strides = array<i32>} : memref<392x512xbf16, #tpu.memory_space<vmem>>, vector<8x512xbf16>,
    %c0_185 = arith.constant 0 : index
    %c150_186 = arith.constant 150 : index
    %164 = vector.load %arg25[%c0_185, %c150_186] : memref<8x768xbf16, #tpu.memory_space<vmem>>, vector<8x512xbf16>
    %c248 = arith.constant 248 : index
    %c0_187 = arith.constant 0 : index
    %165 = vector.load %arg26[%c248, %c0_187] : memref<392x512xbf16, #tpu.memory_space<vmem>>, vector<8x512xbf16>
    tpu.vector_store %arg26[%c248, %c0_187], %164 {strides = array<i32>} : memref<392x512xbf16, #tpu.memory_space<vmem>>, vector<8x512xbf16>,
    %c0_188 = arith.constant 0 : index
    %c151_189 = arith.constant 151 : index
    %166 = vector.load %arg25[%c0_188, %c151_189] : memref<8x768xbf16, #tpu.memory_space<vmem>>, vector<8x512xbf16>
    %c256 = arith.constant 256 : index
    %c0_190 = arith.constant 0 : index
    %167 = vector.load %arg26[%c256, %c0_190] : memref<392x512xbf16, #tpu.memory_space<vmem>>, vector<8x512xbf16>
    tpu.vector_store %arg26[%c256, %c0_190], %166 {strides = array<i32>} : memref<392x512xbf16, #tpu.memory_space<vmem>>, vector<8x512xbf16>,
    %c0_191 = arith.constant 0 : index
    %c152_192 = arith.constant 152 : index
    %168 = vector.load %arg25[%c0_191, %c152_192] : memref<8x768xbf16, #tpu.memory_space<vmem>>, vector<8x512xbf16>
    %c264 = arith.constant 264 : index
    %c0_193 = arith.constant 0 : index
    %169 = vector.load %arg26[%c264, %c0_193] : memref<392x512xbf16, #tpu.memory_space<vmem>>, vector<8x512xbf16>
    tpu.vector_store %arg26[%c264, %c0_193], %168 {strides = array<i32>} : memref<392x512xbf16, #tpu.memory_space<vmem>>, vector<8x512xbf16>,
    %c0_194 = arith.constant 0 : index
    %c153 = arith.constant 153 : index
    %170 = vector.load %arg25[%c0_194, %c153] : memref<8x768xbf16, #tpu.memory_space<vmem>>, vector<8x512xbf16>
    %c272 = arith.constant 272 : index
    %c0_195 = arith.constant 0 : index
    %171 = vector.load %arg26[%c272, %c0_195] : memref<392x512xbf16, #tpu.memory_space<vmem>>, vector<8x512xbf16>
    tpu.vector_store %arg26[%c272, %c0_195], %170 {strides = array<i32>} : memref<392x512xbf16, #tpu.memory_space<vmem>>, vector<8x512xbf16>,
    %c0_196 = arith.constant 0 : index
    %c169 = arith.constant 169 : index
    %172 = vector.load %arg25[%c0_196, %c169] : memref<8x768xbf16, #tpu.memory_space<vmem>>, vector<8x512xbf16>
    %c280 = arith.constant 280 : index
    %c0_197 = arith.constant 0 : index
    %173 = vector.load %arg26[%c280, %c0_197] : memref<392x512xbf16, #tpu.memory_space<vmem>>, vector<8x512xbf16>
    tpu.vector_store %arg26[%c280, %c0_197], %172 {strides = array<i32>} : memref<392x512xbf16, #tpu.memory_space<vmem>>, vector<8x512xbf16>,
    %c0_198 = arith.constant 0 : index
    %c170 = arith.constant 170 : index
    %174 = vector.load %arg25[%c0_198, %c170] : memref<8x768xbf16, #tpu.memory_space<vmem>>, vector<8x512xbf16>
    %c288 = arith.constant 288 : index
    %c0_199 = arith.constant 0 : index
    %175 = vector.load %arg26[%c288, %c0_199] : memref<392x512xbf16, #tpu.memory_space<vmem>>, vector<8x512xbf16>
    tpu.vector_store %arg26[%c288, %c0_199], %174 {strides = array<i32>} : memref<392x512xbf16, #tpu.memory_space<vmem>>, vector<8x512xbf16>,
    %c0_200 = arith.constant 0 : index
    %c171 = arith.constant 171 : index
    %176 = vector.load %arg25[%c0_200, %c171] : memref<8x768xbf16, #tpu.memory_space<vmem>>, vector<8x512xbf16>
    %c296 = arith.constant 296 : index
    %c0_201 = arith.constant 0 : index
    %177 = vector.load %arg26[%c296, %c0_201] : memref<392x512xbf16, #tpu.memory_space<vmem>>, vector<8x512xbf16>
    tpu.vector_store %arg26[%c296, %c0_201], %176 {strides = array<i32>} : memref<392x512xbf16, #tpu.memory_space<vmem>>, vector<8x512xbf16>,
    %c0_202 = arith.constant 0 : index
    %c172 = arith.constant 172 : index
    %178 = vector.load %arg25[%c0_202, %c172] : memref<8x768xbf16, #tpu.memory_space<vmem>>, vector<8x512xbf16>
    %c304 = arith.constant 304 : index
    %c0_203 = arith.constant 0 : index
    %179 = vector.load %arg26[%c304, %c0_203] : memref<392x512xbf16, #tpu.memory_space<vmem>>, vector<8x512xbf16>
    tpu.vector_store %arg26[%c304, %c0_203], %178 {strides = array<i32>} : memref<392x512xbf16, #tpu.memory_space<vmem>>, vector<8x512xbf16>,
    %c0_204 = arith.constant 0 : index
    %c173 = arith.constant 173 : index
    %180 = vector.load %arg25[%c0_204, %c173] : memref<8x768xbf16, #tpu.memory_space<vmem>>, vector<8x512xbf16>
    %c312 = arith.constant 312 : index
    %c0_205 = arith.constant 0 : index
    %181 = vector.load %arg26[%c312, %c0_205] : memref<392x512xbf16, #tpu.memory_space<vmem>>, vector<8x512xbf16>
    tpu.vector_store %arg26[%c312, %c0_205], %180 {strides = array<i32>} : memref<392x512xbf16, #tpu.memory_space<vmem>>, vector<8x512xbf16>,
    %c0_206 = arith.constant 0 : index
    %c174 = arith.constant 174 : index
    %182 = vector.load %arg25[%c0_206, %c174] : memref<8x768xbf16, #tpu.memory_space<vmem>>, vector<8x512xbf16>
    %c320 = arith.constant 320 : index
    %c0_207 = arith.constant 0 : index
    %183 = vector.load %arg26[%c320, %c0_207] : memref<392x512xbf16, #tpu.memory_space<vmem>>, vector<8x512xbf16>
    tpu.vector_store %arg26[%c320, %c0_207], %182 {strides = array<i32>} : memref<392x512xbf16, #tpu.memory_space<vmem>>, vector<8x512xbf16>,
    %c0_208 = arith.constant 0 : index
    %c175 = arith.constant 175 : index
    %184 = vector.load %arg25[%c0_208, %c175] : memref<8x768xbf16, #tpu.memory_space<vmem>>, vector<8x512xbf16>
    %c328 = arith.constant 328 : index
    %c0_209 = arith.constant 0 : index
    %185 = vector.load %arg26[%c328, %c0_209] : memref<392x512xbf16, #tpu.memory_space<vmem>>, vector<8x512xbf16>
    tpu.vector_store %arg26[%c328, %c0_209], %184 {strides = array<i32>} : memref<392x512xbf16, #tpu.memory_space<vmem>>, vector<8x512xbf16>,
    %c0_210 = arith.constant 0 : index
    %c191 = arith.constant 191 : index
    %186 = vector.load %arg25[%c0_210, %c191] : memref<8x768xbf16, #tpu.memory_space<vmem>>, vector<8x512xbf16>
    %c336 = arith.constant 336 : index
    %c0_211 = arith.constant 0 : index
    %187 = vector.load %arg26[%c336, %c0_211] : memref<392x512xbf16, #tpu.memory_space<vmem>>, vector<8x512xbf16>
    tpu.vector_store %arg26[%c336, %c0_211], %186 {strides = array<i32>} : memref<392x512xbf16, #tpu.memory_space<vmem>>, vector<8x512xbf16>,
    %c0_212 = arith.constant 0 : index
    %c192_213 = arith.constant 192 : index
    %188 = vector.load %arg25[%c0_212, %c192_213] : memref<8x768xbf16, #tpu.memory_space<vmem>>, vector<8x512xbf16>
    %c344 = arith.constant 344 : index
    %c0_214 = arith.constant 0 : index
    %189 = vector.load %arg26[%c344, %c0_214] : memref<392x512xbf16, #tpu.memory_space<vmem>>, vector<8x512xbf16>
    tpu.vector_store %arg26[%c344, %c0_214], %188 {strides = array<i32>} : memref<392x512xbf16, #tpu.memory_space<vmem>>, vector<8x512xbf16>,
    %c0_215 = arith.constant 0 : index
    %c193 = arith.constant 193 : index
    %190 = vector.load %arg25[%c0_215, %c193] : memref<8x768xbf16, #tpu.memory_space<vmem>>, vector<8x512xbf16>
    %c352 = arith.constant 352 : index
    %c0_216 = arith.constant 0 : index
    %191 = vector.load %arg26[%c352, %c0_216] : memref<392x512xbf16, #tpu.memory_space<vmem>>, vector<8x512xbf16>
    tpu.vector_store %arg26[%c352, %c0_216], %190 {strides = array<i32>} : memref<392x512xbf16, #tpu.memory_space<vmem>>, vector<8x512xbf16>,
    %c0_217 = arith.constant 0 : index
    %c194 = arith.constant 194 : index
    %192 = vector.load %arg25[%c0_217, %c194] : memref<8x768xbf16, #tpu.memory_space<vmem>>, vector<8x512xbf16>
    %c360 = arith.constant 360 : index
    %c0_218 = arith.constant 0 : index
    %193 = vector.load %arg26[%c360, %c0_218] : memref<392x512xbf16, #tpu.memory_space<vmem>>, vector<8x512xbf16>
    tpu.vector_store %arg26[%c360, %c0_218], %192 {strides = array<i32>} : memref<392x512xbf16, #tpu.memory_space<vmem>>, vector<8x512xbf16>,
    %c0_219 = arith.constant 0 : index
    %c195 = arith.constant 195 : index
    %194 = vector.load %arg25[%c0_219, %c195] : memref<8x768xbf16, #tpu.memory_space<vmem>>, vector<8x512xbf16>
    %c368 = arith.constant 368 : index
    %c0_220 = arith.constant 0 : index
    %195 = vector.load %arg26[%c368, %c0_220] : memref<392x512xbf16, #tpu.memory_space<vmem>>, vector<8x512xbf16>
    tpu.vector_store %arg26[%c368, %c0_220], %194 {strides = array<i32>} : memref<392x512xbf16, #tpu.memory_space<vmem>>, vector<8x512xbf16>,
    %c0_221 = arith.constant 0 : index
    %c196 = arith.constant 196 : index
    %196 = vector.load %arg25[%c0_221, %c196] : memref<8x768xbf16, #tpu.memory_space<vmem>>, vector<8x512xbf16>
    %c376 = arith.constant 376 : index
    %c0_222 = arith.constant 0 : index
    %197 = vector.load %arg26[%c376, %c0_222] : memref<392x512xbf16, #tpu.memory_space<vmem>>, vector<8x512xbf16>
    tpu.vector_store %arg26[%c376, %c0_222], %196 {strides = array<i32>} : memref<392x512xbf16, #tpu.memory_space<vmem>>, vector<8x512xbf16>,
    %c0_223 = arith.constant 0 : index
    %c197 = arith.constant 197 : index
    %198 = vector.load %arg25[%c0_223, %c197] : memref<8x768xbf16, #tpu.memory_space<vmem>>, vector<8x512xbf16>
    %c384 = arith.constant 384 : index
    %c0_224 = arith.constant 0 : index
    %199 = vector.load %arg26[%c384, %c0_224] : memref<392x512xbf16, #tpu.memory_space<vmem>>, vector<8x512xbf16>
    tpu.vector_store %arg26[%c384, %c0_224], %198 {strides = array<i32>} : memref<392x512xbf16, #tpu.memory_space<vmem>>, vector<8x512xbf16>,
    %c0_225 = arith.constant 0 : index
    %c0_226 = arith.constant 0 : index
    %200 = vector.load %arg13[%c0_225, %c0_226] : memref<24x392xbf16, #tpu.memory_space<vmem>>, vector<24x392xbf16>
    %c0_227 = arith.constant 0 : index
    %c0_228 = arith.constant 0 : index
    %201 = vector.load %arg26[%c0_227, %c0_228] : memref<392x512xbf16, #tpu.memory_space<vmem>>, vector<392x512xbf16>
    %cst_229 = arith.constant dense<0.000000e+00> : vector<24x512xf32>
    %202 = tpu.matmul %200, %201, %cst_229 {dimension_numbers = #tpu.dot_dimension_numbers<[1], [0], [0], [1], [0, 0, 1, 1], [], []>} : vector<24x392xbf16>, vector<392x512xbf16>, vector<24x512xf32> -> vector<24x512xf32>
    %c0_230 = arith.constant 0 : index
    %c0_231 = arith.constant 0 : index
    %203 = vector.load %arg14[%c0_230, %c0_231] : memref<24x1xf32, #tpu.memory_space<vmem>>, vector<24x1xf32>
    %204 = vector.broadcast %203 : vector<24x1xf32> to vector<24x512xf32>
    %205 = arith.addf %202, %204 : vector<24x512xf32>
    %cst_232 = arith.constant 0.000000e+00 : f32
    %206 = vector.broadcast %cst_232 : f32 to vector<24x512xf32>
    %207 = arith.maximumf %205, %206 : vector<24x512xf32>
    %208 = vector.broadcast %2 : vector<1x512xf32> to vector<24x512xf32>
    %209 = arith.mulf %207, %208 : vector<24x512xf32>
    %c0_233 = arith.constant 0 : index
    %c0_234 = arith.constant 0 : index
    %210 = vector.load %arg15[%c0_233, %c0_234] : memref<24x8xbf16, #tpu.memory_space<vmem>>, vector<24x8xbf16>
    %211 = arith.truncf %99 : vector<8x512xf32> to vector<8x512xbf16>
    %cst_235 = arith.constant dense<0.000000e+00> : vector<24x512xf32>
    %212 = tpu.matmul %210, %211, %cst_235 {dimension_numbers = #tpu.dot_dimension_numbers<[1], [0], [0], [1], [0, 0, 1, 1], [], []>} : vector<24x8xbf16>, vector<8x512xbf16>, vector<24x512xf32> -> vector<24x512xf32>
    %c0_236 = arith.constant 0 : index
    %c0_237 = arith.constant 0 : index
    %213 = vector.load %arg16[%c0_236, %c0_237] : memref<24x1xf32, #tpu.memory_space<vmem>>, vector<24x1xf32>
    %214 = vector.broadcast %213 : vector<24x1xf32> to vector<24x512xf32>
    %215 = arith.addf %212, %214 : vector<24x512xf32>
    %216 = vector.extract_strided_slice %209 {offsets = [0, 0], sizes = [8, 512], strides = [1, 1]} : vector<24x512xf32> to vector<8x512xf32>
    %217 = arith.truncf %216 : vector<8x512xf32> to vector<8x512xbf16>
    %c0_238 = arith.constant 0 : index
    %c128_239 = arith.constant 128 : index
    %218 = vector.load %arg25[%c0_238, %c128_239] : memref<8x768xbf16, #tpu.memory_space<vmem>>, vector<8x512xbf16>
    tpu.vector_store %arg25[%c0_238, %c128_239], %217 {strides = array<i32>} : memref<8x768xbf16, #tpu.memory_space<vmem>>, vector<8x512xbf16>,
    %c0_240 = arith.constant 0 : index
    %c105_241 = arith.constant 105 : index
    %219 = vector.load %arg25[%c0_240, %c105_241] : memref<8x768xbf16, #tpu.memory_space<vmem>>, vector<8x512xbf16>
    %c0_242 = arith.constant 0 : index
    %c0_243 = arith.constant 0 : index
    %220 = vector.load %arg26[%c0_242, %c0_243] : memref<392x512xbf16, #tpu.memory_space<vmem>>, vector<8x512xbf16>
    tpu.vector_store %arg26[%c0_242, %c0_243], %219 {strides = array<i32>} : memref<392x512xbf16, #tpu.memory_space<vmem>>, vector<8x512xbf16>,
    %c0_244 = arith.constant 0 : index
    %c106_245 = arith.constant 106 : index
    %221 = vector.load %arg25[%c0_244, %c106_245] : memref<8x768xbf16, #tpu.memory_space<vmem>>, vector<8x512xbf16>
    %c8_246 = arith.constant 8 : index
    %c0_247 = arith.constant 0 : index
    %222 = vector.load %arg26[%c8_246, %c0_247] : memref<392x512xbf16, #tpu.memory_space<vmem>>, vector<8x512xbf16>
    tpu.vector_store %arg26[%c8_246, %c0_247], %221 {strides = array<i32>} : memref<392x512xbf16, #tpu.memory_space<vmem>>, vector<8x512xbf16>,
    %c0_248 = arith.constant 0 : index
    %c107_249 = arith.constant 107 : index
    %223 = vector.load %arg25[%c0_248, %c107_249] : memref<8x768xbf16, #tpu.memory_space<vmem>>, vector<8x512xbf16>
    %c16_250 = arith.constant 16 : index
    %c0_251 = arith.constant 0 : index
    %224 = vector.load %arg26[%c16_250, %c0_251] : memref<392x512xbf16, #tpu.memory_space<vmem>>, vector<8x512xbf16>
    tpu.vector_store %arg26[%c16_250, %c0_251], %223 {strides = array<i32>} : memref<392x512xbf16, #tpu.memory_space<vmem>>, vector<8x512xbf16>,
    %c0_252 = arith.constant 0 : index
    %c127_253 = arith.constant 127 : index
    %225 = vector.load %arg25[%c0_252, %c127_253] : memref<8x768xbf16, #tpu.memory_space<vmem>>, vector<8x512xbf16>
    %c24_254 = arith.constant 24 : index
    %c0_255 = arith.constant 0 : index
    %226 = vector.load %arg26[%c24_254, %c0_255] : memref<392x512xbf16, #tpu.memory_space<vmem>>, vector<8x512xbf16>
    tpu.vector_store %arg26[%c24_254, %c0_255], %225 {strides = array<i32>} : memref<392x512xbf16, #tpu.memory_space<vmem>>, vector<8x512xbf16>,
    %c0_256 = arith.constant 0 : index
    %c128_257 = arith.constant 128 : index
    %227 = vector.load %arg25[%c0_256, %c128_257] : memref<8x768xbf16, #tpu.memory_space<vmem>>, vector<8x512xbf16>
    %c32_258 = arith.constant 32 : index
    %c0_259 = arith.constant 0 : index
    %228 = vector.load %arg26[%c32_258, %c0_259] : memref<392x512xbf16, #tpu.memory_space<vmem>>, vector<8x512xbf16>
    tpu.vector_store %arg26[%c32_258, %c0_259], %227 {strides = array<i32>} : memref<392x512xbf16, #tpu.memory_space<vmem>>, vector<8x512xbf16>,
    %c0_260 = arith.constant 0 : index
    %c129_261 = arith.constant 129 : index
    %229 = vector.load %arg25[%c0_260, %c129_261] : memref<8x768xbf16, #tpu.memory_space<vmem>>, vector<8x512xbf16>
    %c40_262 = arith.constant 40 : index
    %c0_263 = arith.constant 0 : index
    %230 = vector.load %arg26[%c40_262, %c0_263] : memref<392x512xbf16, #tpu.memory_space<vmem>>, vector<8x512xbf16>
    tpu.vector_store %arg26[%c40_262, %c0_263], %229 {strides = array<i32>} : memref<392x512xbf16, #tpu.memory_space<vmem>>, vector<8x512xbf16>,
    %c0_264 = arith.constant 0 : index
    %c149_265 = arith.constant 149 : index
    %231 = vector.load %arg25[%c0_264, %c149_265] : memref<8x768xbf16, #tpu.memory_space<vmem>>, vector<8x512xbf16>
    %c48_266 = arith.constant 48 : index
    %c0_267 = arith.constant 0 : index
    %232 = vector.load %arg26[%c48_266, %c0_267] : memref<392x512xbf16, #tpu.memory_space<vmem>>, vector<8x512xbf16>
    tpu.vector_store %arg26[%c48_266, %c0_267], %231 {strides = array<i32>} : memref<392x512xbf16, #tpu.memory_space<vmem>>, vector<8x512xbf16>,
    %c0_268 = arith.constant 0 : index
    %c150_269 = arith.constant 150 : index
    %233 = vector.load %arg25[%c0_268, %c150_269] : memref<8x768xbf16, #tpu.memory_space<vmem>>, vector<8x512xbf16>
    %c56_270 = arith.constant 56 : index
    %c0_271 = arith.constant 0 : index
    %234 = vector.load %arg26[%c56_270, %c0_271] : memref<392x512xbf16, #tpu.memory_space<vmem>>, vector<8x512xbf16>
    tpu.vector_store %arg26[%c56_270, %c0_271], %233 {strides = array<i32>} : memref<392x512xbf16, #tpu.memory_space<vmem>>, vector<8x512xbf16>,
    %c0_272 = arith.constant 0 : index
    %c151_273 = arith.constant 151 : index
    %235 = vector.load %arg25[%c0_272, %c151_273] : memref<8x768xbf16, #tpu.memory_space<vmem>>, vector<8x512xbf16>
    %c64_274 = arith.constant 64 : index
    %c0_275 = arith.constant 0 : index
    %236 = vector.load %arg26[%c64_274, %c0_275] : memref<392x512xbf16, #tpu.memory_space<vmem>>, vector<8x512xbf16>
    tpu.vector_store %arg26[%c64_274, %c0_275], %235 {strides = array<i32>} : memref<392x512xbf16, #tpu.memory_space<vmem>>, vector<8x512xbf16>,
    %c0_276 = arith.constant 0 : index
    %c0_277 = arith.constant 0 : index
    %237 = vector.load %arg17[%c0_276, %c0_277] : memref<8x72xbf16, #tpu.memory_space<vmem>>, vector<8x72xbf16>
    %c0_278 = arith.constant 0 : index
    %c0_279 = arith.constant 0 : index
    %238 = vector.load %arg26[%c0_278, %c0_279] : memref<392x512xbf16, #tpu.memory_space<vmem>>, vector<72x512xbf16>
    %cst_280 = arith.constant dense<0.000000e+00> : vector<8x512xf32>
    %239 = tpu.matmul %237, %238, %cst_280 {dimension_numbers = #tpu.dot_dimension_numbers<[1], [0], [0], [1], [0, 0, 1, 1], [], []>} : vector<8x72xbf16>, vector<72x512xbf16>, vector<8x512xf32> -> vector<8x512xf32>
    %c0_281 = arith.constant 0 : index
    %c0_282 = arith.constant 0 : index
    %240 = vector.load %arg18[%c0_281, %c0_282] : memref<8x1xf32, #tpu.memory_space<vmem>>, vector<8x1xf32>
    %241 = vector.broadcast %240 : vector<8x1xf32> to vector<8x512xf32>
    %242 = arith.addf %239, %241 : vector<8x512xf32>
    %cst_283 = arith.constant 0.000000e+00 : f32
    %243 = vector.broadcast %cst_283 : f32 to vector<8x512xf32>
    %244 = arith.maximumf %242, %243 : vector<8x512xf32>
    %245 = vector.extract_strided_slice %215 {offsets = [0, 0], sizes = [8, 512], strides = [1, 1]} : vector<24x512xf32> to vector<8x512xf32>
    %246 = arith.addf %244, %245 : vector<8x512xf32>
    %247 = vector.broadcast %2 : vector<1x512xf32> to vector<8x512xf32>
    %248 = arith.mulf %246, %247 : vector<8x512xf32>
    %249 = vector.extract_strided_slice %209 {offsets = [8, 0], sizes = [8, 512], strides = [1, 1]} : vector<24x512xf32> to vector<8x512xf32>
    %250 = arith.truncf %249 : vector<8x512xf32> to vector<8x512xbf16>
    %c0_284 = arith.constant 0 : index
    %c128_285 = arith.constant 128 : index
    %251 = vector.load %arg25[%c0_284, %c128_285] : memref<8x768xbf16, #tpu.memory_space<vmem>>, vector<8x512xbf16>
    tpu.vector_store %arg25[%c0_284, %c128_285], %250 {strides = array<i32>} : memref<8x768xbf16, #tpu.memory_space<vmem>>, vector<8x512xbf16>,
    %c0_286 = arith.constant 0 : index
    %c82_287 = arith.constant 82 : index
    %252 = vector.load %arg25[%c0_286, %c82_287] : memref<8x768xbf16, #tpu.memory_space<vmem>>, vector<8x512xbf16>
    %c0_288 = arith.constant 0 : index
    %c0_289 = arith.constant 0 : index
    %253 = vector.load %arg26[%c0_288, %c0_289] : memref<392x512xbf16, #tpu.memory_space<vmem>>, vector<8x512xbf16>
    tpu.vector_store %arg26[%c0_288, %c0_289], %252 {strides = array<i32>} : memref<392x512xbf16, #tpu.memory_space<vmem>>, vector<8x512xbf16>,
    %c0_290 = arith.constant 0 : index
    %c83_291 = arith.constant 83 : index
    %254 = vector.load %arg25[%c0_290, %c83_291] : memref<8x768xbf16, #tpu.memory_space<vmem>>, vector<8x512xbf16>
    %c8_292 = arith.constant 8 : index
    %c0_293 = arith.constant 0 : index
    %255 = vector.load %arg26[%c8_292, %c0_293] : memref<392x512xbf16, #tpu.memory_space<vmem>>, vector<8x512xbf16>
    tpu.vector_store %arg26[%c8_292, %c0_293], %254 {strides = array<i32>} : memref<392x512xbf16, #tpu.memory_space<vmem>>, vector<8x512xbf16>,
    %c0_294 = arith.constant 0 : index
    %c84_295 = arith.constant 84 : index
    %256 = vector.load %arg25[%c0_294, %c84_295] : memref<8x768xbf16, #tpu.memory_space<vmem>>, vector<8x512xbf16>
    %c16_296 = arith.constant 16 : index
    %c0_297 = arith.constant 0 : index
    %257 = vector.load %arg26[%c16_296, %c0_297] : memref<392x512xbf16, #tpu.memory_space<vmem>>, vector<8x512xbf16>
    tpu.vector_store %arg26[%c16_296, %c0_297], %256 {strides = array<i32>} : memref<392x512xbf16, #tpu.memory_space<vmem>>, vector<8x512xbf16>,
    %c0_298 = arith.constant 0 : index
    %c85_299 = arith.constant 85 : index
    %258 = vector.load %arg25[%c0_298, %c85_299] : memref<8x768xbf16, #tpu.memory_space<vmem>>, vector<8x512xbf16>
    %c24_300 = arith.constant 24 : index
    %c0_301 = arith.constant 0 : index
    %259 = vector.load %arg26[%c24_300, %c0_301] : memref<392x512xbf16, #tpu.memory_space<vmem>>, vector<8x512xbf16>
    tpu.vector_store %arg26[%c24_300, %c0_301], %258 {strides = array<i32>} : memref<392x512xbf16, #tpu.memory_space<vmem>>, vector<8x512xbf16>,
    %c0_302 = arith.constant 0 : index
    %c86_303 = arith.constant 86 : index
    %260 = vector.load %arg25[%c0_302, %c86_303] : memref<8x768xbf16, #tpu.memory_space<vmem>>, vector<8x512xbf16>
    %c32_304 = arith.constant 32 : index
    %c0_305 = arith.constant 0 : index
    %261 = vector.load %arg26[%c32_304, %c0_305] : memref<392x512xbf16, #tpu.memory_space<vmem>>, vector<8x512xbf16>
    tpu.vector_store %arg26[%c32_304, %c0_305], %260 {strides = array<i32>} : memref<392x512xbf16, #tpu.memory_space<vmem>>, vector<8x512xbf16>,
    %c0_306 = arith.constant 0 : index
    %c104_307 = arith.constant 104 : index
    %262 = vector.load %arg25[%c0_306, %c104_307] : memref<8x768xbf16, #tpu.memory_space<vmem>>, vector<8x512xbf16>
    %c40_308 = arith.constant 40 : index
    %c0_309 = arith.constant 0 : index
    %263 = vector.load %arg26[%c40_308, %c0_309] : memref<392x512xbf16, #tpu.memory_space<vmem>>, vector<8x512xbf16>
    tpu.vector_store %arg26[%c40_308, %c0_309], %262 {strides = array<i32>} : memref<392x512xbf16, #tpu.memory_space<vmem>>, vector<8x512xbf16>,
    %c0_310 = arith.constant 0 : index
    %c105_311 = arith.constant 105 : index
    %264 = vector.load %arg25[%c0_310, %c105_311] : memref<8x768xbf16, #tpu.memory_space<vmem>>, vector<8x512xbf16>
    %c48_312 = arith.constant 48 : index
    %c0_313 = arith.constant 0 : index
    %265 = vector.load %arg26[%c48_312, %c0_313] : memref<392x512xbf16, #tpu.memory_space<vmem>>, vector<8x512xbf16>
    tpu.vector_store %arg26[%c48_312, %c0_313], %264 {strides = array<i32>} : memref<392x512xbf16, #tpu.memory_space<vmem>>, vector<8x512xbf16>,
    %c0_314 = arith.constant 0 : index
    %c106_315 = arith.constant 106 : index
    %266 = vector.load %arg25[%c0_314, %c106_315] : memref<8x768xbf16, #tpu.memory_space<vmem>>, vector<8x512xbf16>
    %c56_316 = arith.constant 56 : index
    %c0_317 = arith.constant 0 : index
    %267 = vector.load %arg26[%c56_316, %c0_317] : memref<392x512xbf16, #tpu.memory_space<vmem>>, vector<8x512xbf16>
    tpu.vector_store %arg26[%c56_316, %c0_317], %266 {strides = array<i32>} : memref<392x512xbf16, #tpu.memory_space<vmem>>, vector<8x512xbf16>,
    %c0_318 = arith.constant 0 : index
    %c107_319 = arith.constant 107 : index
    %268 = vector.load %arg25[%c0_318, %c107_319] : memref<8x768xbf16, #tpu.memory_space<vmem>>, vector<8x512xbf16>
    %c64_320 = arith.constant 64 : index
    %c0_321 = arith.constant 0 : index
    %269 = vector.load %arg26[%c64_320, %c0_321] : memref<392x512xbf16, #tpu.memory_space<vmem>>, vector<8x512xbf16>
    tpu.vector_store %arg26[%c64_320, %c0_321], %268 {strides = array<i32>} : memref<392x512xbf16, #tpu.memory_space<vmem>>, vector<8x512xbf16>,
    %c0_322 = arith.constant 0 : index
    %c108_323 = arith.constant 108 : index
    %270 = vector.load %arg25[%c0_322, %c108_323] : memref<8x768xbf16, #tpu.memory_space<vmem>>, vector<8x512xbf16>
    %c72_324 = arith.constant 72 : index
    %c0_325 = arith.constant 0 : index
    %271 = vector.load %arg26[%c72_324, %c0_325] : memref<392x512xbf16, #tpu.memory_space<vmem>>, vector<8x512xbf16>
    tpu.vector_store %arg26[%c72_324, %c0_325], %270 {strides = array<i32>} : memref<392x512xbf16, #tpu.memory_space<vmem>>, vector<8x512xbf16>,
    %c0_326 = arith.constant 0 : index
    %c126_327 = arith.constant 126 : index
    %272 = vector.load %arg25[%c0_326, %c126_327] : memref<8x768xbf16, #tpu.memory_space<vmem>>, vector<8x512xbf16>
    %c80_328 = arith.constant 80 : index
    %c0_329 = arith.constant 0 : index
    %273 = vector.load %arg26[%c80_328, %c0_329] : memref<392x512xbf16, #tpu.memory_space<vmem>>, vector<8x512xbf16>
    tpu.vector_store %arg26[%c80_328, %c0_329], %272 {strides = array<i32>} : memref<392x512xbf16, #tpu.memory_space<vmem>>, vector<8x512xbf16>,
    %c0_330 = arith.constant 0 : index
    %c127_331 = arith.constant 127 : index
    %274 = vector.load %arg25[%c0_330, %c127_331] : memref<8x768xbf16, #tpu.memory_space<vmem>>, vector<8x512xbf16>
    %c88_332 = arith.constant 88 : index
    %c0_333 = arith.constant 0 : index
    %275 = vector.load %arg26[%c88_332, %c0_333] : memref<392x512xbf16, #tpu.memory_space<vmem>>, vector<8x512xbf16>
    tpu.vector_store %arg26[%c88_332, %c0_333], %274 {strides = array<i32>} : memref<392x512xbf16, #tpu.memory_space<vmem>>, vector<8x512xbf16>,
    %c0_334 = arith.constant 0 : index
    %c128_335 = arith.constant 128 : index
    %276 = vector.load %arg25[%c0_334, %c128_335] : memref<8x768xbf16, #tpu.memory_space<vmem>>, vector<8x512xbf16>
    %c96_336 = arith.constant 96 : index
    %c0_337 = arith.constant 0 : index
    %277 = vector.load %arg26[%c96_336, %c0_337] : memref<392x512xbf16, #tpu.memory_space<vmem>>, vector<8x512xbf16>
    tpu.vector_store %arg26[%c96_336, %c0_337], %276 {strides = array<i32>} : memref<392x512xbf16, #tpu.memory_space<vmem>>, vector<8x512xbf16>,
    %c0_338 = arith.constant 0 : index
    %c129_339 = arith.constant 129 : index
    %278 = vector.load %arg25[%c0_338, %c129_339] : memref<8x768xbf16, #tpu.memory_space<vmem>>, vector<8x512xbf16>
    %c104_340 = arith.constant 104 : index
    %c0_341 = arith.constant 0 : index
    %279 = vector.load %arg26[%c104_340, %c0_341] : memref<392x512xbf16, #tpu.memory_space<vmem>>, vector<8x512xbf16>
    tpu.vector_store %arg26[%c104_340, %c0_341], %278 {strides = array<i32>} : memref<392x512xbf16, #tpu.memory_space<vmem>>, vector<8x512xbf16>,
    %c0_342 = arith.constant 0 : index
    %c130_343 = arith.constant 130 : index
    %280 = vector.load %arg25[%c0_342, %c130_343] : memref<8x768xbf16, #tpu.memory_space<vmem>>, vector<8x512xbf16>
    %c112_344 = arith.constant 112 : index
    %c0_345 = arith.constant 0 : index
    %281 = vector.load %arg26[%c112_344, %c0_345] : memref<392x512xbf16, #tpu.memory_space<vmem>>, vector<8x512xbf16>
    tpu.vector_store %arg26[%c112_344, %c0_345], %280 {strides = array<i32>} : memref<392x512xbf16, #tpu.memory_space<vmem>>, vector<8x512xbf16>,
    %c0_346 = arith.constant 0 : index
    %c148_347 = arith.constant 148 : index
    %282 = vector.load %arg25[%c0_346, %c148_347] : memref<8x768xbf16, #tpu.memory_space<vmem>>, vector<8x512xbf16>
    %c120_348 = arith.constant 120 : index
    %c0_349 = arith.constant 0 : index
    %283 = vector.load %arg26[%c120_348, %c0_349] : memref<392x512xbf16, #tpu.memory_space<vmem>>, vector<8x512xbf16>
    tpu.vector_store %arg26[%c120_348, %c0_349], %282 {strides = array<i32>} : memref<392x512xbf16, #tpu.memory_space<vmem>>, vector<8x512xbf16>,
    %c0_350 = arith.constant 0 : index
    %c149_351 = arith.constant 149 : index
    %284 = vector.load %arg25[%c0_350, %c149_351] : memref<8x768xbf16, #tpu.memory_space<vmem>>, vector<8x512xbf16>
    %c128_352 = arith.constant 128 : index
    %c0_353 = arith.constant 0 : index
    %285 = vector.load %arg26[%c128_352, %c0_353] : memref<392x512xbf16, #tpu.memory_space<vmem>>, vector<8x512xbf16>
    tpu.vector_store %arg26[%c128_352, %c0_353], %284 {strides = array<i32>} : memref<392x512xbf16, #tpu.memory_space<vmem>>, vector<8x512xbf16>,
    %c0_354 = arith.constant 0 : index
    %c150_355 = arith.constant 150 : index
    %286 = vector.load %arg25[%c0_354, %c150_355] : memref<8x768xbf16, #tpu.memory_space<vmem>>, vector<8x512xbf16>
    %c136_356 = arith.constant 136 : index
    %c0_357 = arith.constant 0 : index
    %287 = vector.load %arg26[%c136_356, %c0_357] : memref<392x512xbf16, #tpu.memory_space<vmem>>, vector<8x512xbf16>
    tpu.vector_store %arg26[%c136_356, %c0_357], %286 {strides = array<i32>} : memref<392x512xbf16, #tpu.memory_space<vmem>>, vector<8x512xbf16>,
    %c0_358 = arith.constant 0 : index
    %c151_359 = arith.constant 151 : index
    %288 = vector.load %arg25[%c0_358, %c151_359] : memref<8x768xbf16, #tpu.memory_space<vmem>>, vector<8x512xbf16>
    %c144_360 = arith.constant 144 : index
    %c0_361 = arith.constant 0 : index
    %289 = vector.load %arg26[%c144_360, %c0_361] : memref<392x512xbf16, #tpu.memory_space<vmem>>, vector<8x512xbf16>
    tpu.vector_store %arg26[%c144_360, %c0_361], %288 {strides = array<i32>} : memref<392x512xbf16, #tpu.memory_space<vmem>>, vector<8x512xbf16>,
    %c0_362 = arith.constant 0 : index
    %c152_363 = arith.constant 152 : index
    %290 = vector.load %arg25[%c0_362, %c152_363] : memref<8x768xbf16, #tpu.memory_space<vmem>>, vector<8x512xbf16>
    %c152_364 = arith.constant 152 : index
    %c0_365 = arith.constant 0 : index
    %291 = vector.load %arg26[%c152_364, %c0_365] : memref<392x512xbf16, #tpu.memory_space<vmem>>, vector<8x512xbf16>
    tpu.vector_store %arg26[%c152_364, %c0_365], %290 {strides = array<i32>} : memref<392x512xbf16, #tpu.memory_space<vmem>>, vector<8x512xbf16>,
    %c0_366 = arith.constant 0 : index
    %c170_367 = arith.constant 170 : index
    %292 = vector.load %arg25[%c0_366, %c170_367] : memref<8x768xbf16, #tpu.memory_space<vmem>>, vector<8x512xbf16>
    %c160_368 = arith.constant 160 : index
    %c0_369 = arith.constant 0 : index
    %293 = vector.load %arg26[%c160_368, %c0_369] : memref<392x512xbf16, #tpu.memory_space<vmem>>, vector<8x512xbf16>
    tpu.vector_store %arg26[%c160_368, %c0_369], %292 {strides = array<i32>} : memref<392x512xbf16, #tpu.memory_space<vmem>>, vector<8x512xbf16>,
    %c0_370 = arith.constant 0 : index
    %c171_371 = arith.constant 171 : index
    %294 = vector.load %arg25[%c0_370, %c171_371] : memref<8x768xbf16, #tpu.memory_space<vmem>>, vector<8x512xbf16>
    %c168_372 = arith.constant 168 : index
    %c0_373 = arith.constant 0 : index
    %295 = vector.load %arg26[%c168_372, %c0_373] : memref<392x512xbf16, #tpu.memory_space<vmem>>, vector<8x512xbf16>
    tpu.vector_store %arg26[%c168_372, %c0_373], %294 {strides = array<i32>} : memref<392x512xbf16, #tpu.memory_space<vmem>>, vector<8x512xbf16>,
    %c0_374 = arith.constant 0 : index
    %c172_375 = arith.constant 172 : index
    %296 = vector.load %arg25[%c0_374, %c172_375] : memref<8x768xbf16, #tpu.memory_space<vmem>>, vector<8x512xbf16>
    %c176_376 = arith.constant 176 : index
    %c0_377 = arith.constant 0 : index
    %297 = vector.load %arg26[%c176_376, %c0_377] : memref<392x512xbf16, #tpu.memory_space<vmem>>, vector<8x512xbf16>
    tpu.vector_store %arg26[%c176_376, %c0_377], %296 {strides = array<i32>} : memref<392x512xbf16, #tpu.memory_space<vmem>>, vector<8x512xbf16>,
    %c0_378 = arith.constant 0 : index
    %c173_379 = arith.constant 173 : index
    %298 = vector.load %arg25[%c0_378, %c173_379] : memref<8x768xbf16, #tpu.memory_space<vmem>>, vector<8x512xbf16>
    %c184_380 = arith.constant 184 : index
    %c0_381 = arith.constant 0 : index
    %299 = vector.load %arg26[%c184_380, %c0_381] : memref<392x512xbf16, #tpu.memory_space<vmem>>, vector<8x512xbf16>
    tpu.vector_store %arg26[%c184_380, %c0_381], %298 {strides = array<i32>} : memref<392x512xbf16, #tpu.memory_space<vmem>>, vector<8x512xbf16>,
    %c0_382 = arith.constant 0 : index
    %c174_383 = arith.constant 174 : index
    %300 = vector.load %arg25[%c0_382, %c174_383] : memref<8x768xbf16, #tpu.memory_space<vmem>>, vector<8x512xbf16>
    %c192_384 = arith.constant 192 : index
    %c0_385 = arith.constant 0 : index
    %301 = vector.load %arg26[%c192_384, %c0_385] : memref<392x512xbf16, #tpu.memory_space<vmem>>, vector<8x512xbf16>
    tpu.vector_store %arg26[%c192_384, %c0_385], %300 {strides = array<i32>} : memref<392x512xbf16, #tpu.memory_space<vmem>>, vector<8x512xbf16>,
    %c0_386 = arith.constant 0 : index
    %c0_387 = arith.constant 0 : index
    %302 = vector.load %arg19[%c0_386, %c0_387] : memref<8x200xbf16, #tpu.memory_space<vmem>>, vector<8x200xbf16>
    %c0_388 = arith.constant 0 : index
    %c0_389 = arith.constant 0 : index
    %303 = vector.load %arg26[%c0_388, %c0_389] : memref<392x512xbf16, #tpu.memory_space<vmem>>, vector<200x512xbf16>
    %cst_390 = arith.constant dense<0.000000e+00> : vector<8x512xf32>
    %304 = tpu.matmul %302, %303, %cst_390 {dimension_numbers = #tpu.dot_dimension_numbers<[1], [0], [0], [1], [0, 0, 1, 1], [], []>} : vector<8x200xbf16>, vector<200x512xbf16>, vector<8x512xf32> -> vector<8x512xf32>
    %c0_391 = arith.constant 0 : index
    %c0_392 = arith.constant 0 : index
    %305 = vector.load %arg20[%c0_391, %c0_392] : memref<8x1xf32, #tpu.memory_space<vmem>>, vector<8x1xf32>
    %306 = vector.broadcast %305 : vector<8x1xf32> to vector<8x512xf32>
    %307 = arith.addf %304, %306 : vector<8x512xf32>
    %cst_393 = arith.constant 0.000000e+00 : f32
    %308 = vector.broadcast %cst_393 : f32 to vector<8x512xf32>
    %309 = arith.maximumf %307, %308 : vector<8x512xf32>
    %310 = vector.extract_strided_slice %215 {offsets = [8, 0], sizes = [8, 512], strides = [1, 1]} : vector<24x512xf32> to vector<8x512xf32>
    %311 = arith.addf %309, %310 : vector<8x512xf32>
    %312 = vector.broadcast %2 : vector<1x512xf32> to vector<8x512xf32>
    %313 = arith.mulf %311, %312 : vector<8x512xf32>
    %314 = vector.extract_strided_slice %209 {offsets = [16, 0], sizes = [8, 512], strides = [1, 1]} : vector<24x512xf32> to vector<8x512xf32>
    %315 = arith.truncf %314 : vector<8x512xf32> to vector<8x512xbf16>
    %c0_394 = arith.constant 0 : index
    %c128_395 = arith.constant 128 : index
    %316 = vector.load %arg25[%c0_394, %c128_395] : memref<8x768xbf16, #tpu.memory_space<vmem>>, vector<8x512xbf16>
    tpu.vector_store %arg25[%c0_394, %c128_395], %315 {strides = array<i32>} : memref<8x768xbf16, #tpu.memory_space<vmem>>, vector<8x512xbf16>,
    %c0_396 = arith.constant 0 : index
    %c59_397 = arith.constant 59 : index
    %317 = vector.load %arg25[%c0_396, %c59_397] : memref<8x768xbf16, #tpu.memory_space<vmem>>, vector<8x512xbf16>
    %c0_398 = arith.constant 0 : index
    %c0_399 = arith.constant 0 : index
    %318 = vector.load %arg26[%c0_398, %c0_399] : memref<392x512xbf16, #tpu.memory_space<vmem>>, vector<8x512xbf16>
    tpu.vector_store %arg26[%c0_398, %c0_399], %317 {strides = array<i32>} : memref<392x512xbf16, #tpu.memory_space<vmem>>, vector<8x512xbf16>,
    %c0_400 = arith.constant 0 : index
    %c60_401 = arith.constant 60 : index
    %319 = vector.load %arg25[%c0_400, %c60_401] : memref<8x768xbf16, #tpu.memory_space<vmem>>, vector<8x512xbf16>
    %c8_402 = arith.constant 8 : index
    %c0_403 = arith.constant 0 : index
    %320 = vector.load %arg26[%c8_402, %c0_403] : memref<392x512xbf16, #tpu.memory_space<vmem>>, vector<8x512xbf16>
    tpu.vector_store %arg26[%c8_402, %c0_403], %319 {strides = array<i32>} : memref<392x512xbf16, #tpu.memory_space<vmem>>, vector<8x512xbf16>,
    %c0_404 = arith.constant 0 : index
    %c61_405 = arith.constant 61 : index
    %321 = vector.load %arg25[%c0_404, %c61_405] : memref<8x768xbf16, #tpu.memory_space<vmem>>, vector<8x512xbf16>
    %c16_406 = arith.constant 16 : index
    %c0_407 = arith.constant 0 : index
    %322 = vector.load %arg26[%c16_406, %c0_407] : memref<392x512xbf16, #tpu.memory_space<vmem>>, vector<8x512xbf16>
    tpu.vector_store %arg26[%c16_406, %c0_407], %321 {strides = array<i32>} : memref<392x512xbf16, #tpu.memory_space<vmem>>, vector<8x512xbf16>,
    %c0_408 = arith.constant 0 : index
    %c62_409 = arith.constant 62 : index
    %323 = vector.load %arg25[%c0_408, %c62_409] : memref<8x768xbf16, #tpu.memory_space<vmem>>, vector<8x512xbf16>
    %c24_410 = arith.constant 24 : index
    %c0_411 = arith.constant 0 : index
    %324 = vector.load %arg26[%c24_410, %c0_411] : memref<392x512xbf16, #tpu.memory_space<vmem>>, vector<8x512xbf16>
    tpu.vector_store %arg26[%c24_410, %c0_411], %323 {strides = array<i32>} : memref<392x512xbf16, #tpu.memory_space<vmem>>, vector<8x512xbf16>,
    %c0_412 = arith.constant 0 : index
    %c63_413 = arith.constant 63 : index
    %325 = vector.load %arg25[%c0_412, %c63_413] : memref<8x768xbf16, #tpu.memory_space<vmem>>, vector<8x512xbf16>
    %c32_414 = arith.constant 32 : index
    %c0_415 = arith.constant 0 : index
    %326 = vector.load %arg26[%c32_414, %c0_415] : memref<392x512xbf16, #tpu.memory_space<vmem>>, vector<8x512xbf16>
    tpu.vector_store %arg26[%c32_414, %c0_415], %325 {strides = array<i32>} : memref<392x512xbf16, #tpu.memory_space<vmem>>, vector<8x512xbf16>,
    %c0_416 = arith.constant 0 : index
    %c64_417 = arith.constant 64 : index
    %327 = vector.load %arg25[%c0_416, %c64_417] : memref<8x768xbf16, #tpu.memory_space<vmem>>, vector<8x512xbf16>
    %c40_418 = arith.constant 40 : index
    %c0_419 = arith.constant 0 : index
    %328 = vector.load %arg26[%c40_418, %c0_419] : memref<392x512xbf16, #tpu.memory_space<vmem>>, vector<8x512xbf16>
    tpu.vector_store %arg26[%c40_418, %c0_419], %327 {strides = array<i32>} : memref<392x512xbf16, #tpu.memory_space<vmem>>, vector<8x512xbf16>,
    %c0_420 = arith.constant 0 : index
    %c65_421 = arith.constant 65 : index
    %329 = vector.load %arg25[%c0_420, %c65_421] : memref<8x768xbf16, #tpu.memory_space<vmem>>, vector<8x512xbf16>
    %c48_422 = arith.constant 48 : index
    %c0_423 = arith.constant 0 : index
    %330 = vector.load %arg26[%c48_422, %c0_423] : memref<392x512xbf16, #tpu.memory_space<vmem>>, vector<8x512xbf16>
    tpu.vector_store %arg26[%c48_422, %c0_423], %329 {strides = array<i32>} : memref<392x512xbf16, #tpu.memory_space<vmem>>, vector<8x512xbf16>,
    %c0_424 = arith.constant 0 : index
    %c81_425 = arith.constant 81 : index
    %331 = vector.load %arg25[%c0_424, %c81_425] : memref<8x768xbf16, #tpu.memory_space<vmem>>, vector<8x512xbf16>
    %c56_426 = arith.constant 56 : index
    %c0_427 = arith.constant 0 : index
    %332 = vector.load %arg26[%c56_426, %c0_427] : memref<392x512xbf16, #tpu.memory_space<vmem>>, vector<8x512xbf16>
    tpu.vector_store %arg26[%c56_426, %c0_427], %331 {strides = array<i32>} : memref<392x512xbf16, #tpu.memory_space<vmem>>, vector<8x512xbf16>,
    %c0_428 = arith.constant 0 : index
    %c82_429 = arith.constant 82 : index
    %333 = vector.load %arg25[%c0_428, %c82_429] : memref<8x768xbf16, #tpu.memory_space<vmem>>, vector<8x512xbf16>
    %c64_430 = arith.constant 64 : index
    %c0_431 = arith.constant 0 : index
    %334 = vector.load %arg26[%c64_430, %c0_431] : memref<392x512xbf16, #tpu.memory_space<vmem>>, vector<8x512xbf16>
    tpu.vector_store %arg26[%c64_430, %c0_431], %333 {strides = array<i32>} : memref<392x512xbf16, #tpu.memory_space<vmem>>, vector<8x512xbf16>,
    %c0_432 = arith.constant 0 : index
    %c83_433 = arith.constant 83 : index
    %335 = vector.load %arg25[%c0_432, %c83_433] : memref<8x768xbf16, #tpu.memory_space<vmem>>, vector<8x512xbf16>
    %c72_434 = arith.constant 72 : index
    %c0_435 = arith.constant 0 : index
    %336 = vector.load %arg26[%c72_434, %c0_435] : memref<392x512xbf16, #tpu.memory_space<vmem>>, vector<8x512xbf16>
    tpu.vector_store %arg26[%c72_434, %c0_435], %335 {strides = array<i32>} : memref<392x512xbf16, #tpu.memory_space<vmem>>, vector<8x512xbf16>,
    %c0_436 = arith.constant 0 : index
    %c84_437 = arith.constant 84 : index
    %337 = vector.load %arg25[%c0_436, %c84_437] : memref<8x768xbf16, #tpu.memory_space<vmem>>, vector<8x512xbf16>
    %c80_438 = arith.constant 80 : index
    %c0_439 = arith.constant 0 : index
    %338 = vector.load %arg26[%c80_438, %c0_439] : memref<392x512xbf16, #tpu.memory_space<vmem>>, vector<8x512xbf16>
    tpu.vector_store %arg26[%c80_438, %c0_439], %337 {strides = array<i32>} : memref<392x512xbf16, #tpu.memory_space<vmem>>, vector<8x512xbf16>,
    %c0_440 = arith.constant 0 : index
    %c85_441 = arith.constant 85 : index
    %339 = vector.load %arg25[%c0_440, %c85_441] : memref<8x768xbf16, #tpu.memory_space<vmem>>, vector<8x512xbf16>
    %c88_442 = arith.constant 88 : index
    %c0_443 = arith.constant 0 : index
    %340 = vector.load %arg26[%c88_442, %c0_443] : memref<392x512xbf16, #tpu.memory_space<vmem>>, vector<8x512xbf16>
    tpu.vector_store %arg26[%c88_442, %c0_443], %339 {strides = array<i32>} : memref<392x512xbf16, #tpu.memory_space<vmem>>, vector<8x512xbf16>,
    %c0_444 = arith.constant 0 : index
    %c86_445 = arith.constant 86 : index
    %341 = vector.load %arg25[%c0_444, %c86_445] : memref<8x768xbf16, #tpu.memory_space<vmem>>, vector<8x512xbf16>
    %c96_446 = arith.constant 96 : index
    %c0_447 = arith.constant 0 : index
    %342 = vector.load %arg26[%c96_446, %c0_447] : memref<392x512xbf16, #tpu.memory_space<vmem>>, vector<8x512xbf16>
    tpu.vector_store %arg26[%c96_446, %c0_447], %341 {strides = array<i32>} : memref<392x512xbf16, #tpu.memory_space<vmem>>, vector<8x512xbf16>,
    %c0_448 = arith.constant 0 : index
    %c87_449 = arith.constant 87 : index
    %343 = vector.load %arg25[%c0_448, %c87_449] : memref<8x768xbf16, #tpu.memory_space<vmem>>, vector<8x512xbf16>
    %c104_450 = arith.constant 104 : index
    %c0_451 = arith.constant 0 : index
    %344 = vector.load %arg26[%c104_450, %c0_451] : memref<392x512xbf16, #tpu.memory_space<vmem>>, vector<8x512xbf16>
    tpu.vector_store %arg26[%c104_450, %c0_451], %343 {strides = array<i32>} : memref<392x512xbf16, #tpu.memory_space<vmem>>, vector<8x512xbf16>,
    %c0_452 = arith.constant 0 : index
    %c103_453 = arith.constant 103 : index
    %345 = vector.load %arg25[%c0_452, %c103_453] : memref<8x768xbf16, #tpu.memory_space<vmem>>, vector<8x512xbf16>
    %c112_454 = arith.constant 112 : index
    %c0_455 = arith.constant 0 : index
    %346 = vector.load %arg26[%c112_454, %c0_455] : memref<392x512xbf16, #tpu.memory_space<vmem>>, vector<8x512xbf16>
    tpu.vector_store %arg26[%c112_454, %c0_455], %345 {strides = array<i32>} : memref<392x512xbf16, #tpu.memory_space<vmem>>, vector<8x512xbf16>,
    %c0_456 = arith.constant 0 : index
    %c104_457 = arith.constant 104 : index
    %347 = vector.load %arg25[%c0_456, %c104_457] : memref<8x768xbf16, #tpu.memory_space<vmem>>, vector<8x512xbf16>
    %c120_458 = arith.constant 120 : index
    %c0_459 = arith.constant 0 : index
    %348 = vector.load %arg26[%c120_458, %c0_459] : memref<392x512xbf16, #tpu.memory_space<vmem>>, vector<8x512xbf16>
    tpu.vector_store %arg26[%c120_458, %c0_459], %347 {strides = array<i32>} : memref<392x512xbf16, #tpu.memory_space<vmem>>, vector<8x512xbf16>,
    %c0_460 = arith.constant 0 : index
    %c105_461 = arith.constant 105 : index
    %349 = vector.load %arg25[%c0_460, %c105_461] : memref<8x768xbf16, #tpu.memory_space<vmem>>, vector<8x512xbf16>
    %c128_462 = arith.constant 128 : index
    %c0_463 = arith.constant 0 : index
    %350 = vector.load %arg26[%c128_462, %c0_463] : memref<392x512xbf16, #tpu.memory_space<vmem>>, vector<8x512xbf16>
    tpu.vector_store %arg26[%c128_462, %c0_463], %349 {strides = array<i32>} : memref<392x512xbf16, #tpu.memory_space<vmem>>, vector<8x512xbf16>,
    %c0_464 = arith.constant 0 : index
    %c106_465 = arith.constant 106 : index
    %351 = vector.load %arg25[%c0_464, %c106_465] : memref<8x768xbf16, #tpu.memory_space<vmem>>, vector<8x512xbf16>
    %c136_466 = arith.constant 136 : index
    %c0_467 = arith.constant 0 : index
    %352 = vector.load %arg26[%c136_466, %c0_467] : memref<392x512xbf16, #tpu.memory_space<vmem>>, vector<8x512xbf16>
    tpu.vector_store %arg26[%c136_466, %c0_467], %351 {strides = array<i32>} : memref<392x512xbf16, #tpu.memory_space<vmem>>, vector<8x512xbf16>,
    %c0_468 = arith.constant 0 : index
    %c107_469 = arith.constant 107 : index
    %353 = vector.load %arg25[%c0_468, %c107_469] : memref<8x768xbf16, #tpu.memory_space<vmem>>, vector<8x512xbf16>
    %c144_470 = arith.constant 144 : index
    %c0_471 = arith.constant 0 : index
    %354 = vector.load %arg26[%c144_470, %c0_471] : memref<392x512xbf16, #tpu.memory_space<vmem>>, vector<8x512xbf16>
    tpu.vector_store %arg26[%c144_470, %c0_471], %353 {strides = array<i32>} : memref<392x512xbf16, #tpu.memory_space<vmem>>, vector<8x512xbf16>,
    %c0_472 = arith.constant 0 : index
    %c108_473 = arith.constant 108 : index
    %355 = vector.load %arg25[%c0_472, %c108_473] : memref<8x768xbf16, #tpu.memory_space<vmem>>, vector<8x512xbf16>
    %c152_474 = arith.constant 152 : index
    %c0_475 = arith.constant 0 : index
    %356 = vector.load %arg26[%c152_474, %c0_475] : memref<392x512xbf16, #tpu.memory_space<vmem>>, vector<8x512xbf16>
    tpu.vector_store %arg26[%c152_474, %c0_475], %355 {strides = array<i32>} : memref<392x512xbf16, #tpu.memory_space<vmem>>, vector<8x512xbf16>,
    %c0_476 = arith.constant 0 : index
    %c109_477 = arith.constant 109 : index
    %357 = vector.load %arg25[%c0_476, %c109_477] : memref<8x768xbf16, #tpu.memory_space<vmem>>, vector<8x512xbf16>
    %c160_478 = arith.constant 160 : index
    %c0_479 = arith.constant 0 : index
    %358 = vector.load %arg26[%c160_478, %c0_479] : memref<392x512xbf16, #tpu.memory_space<vmem>>, vector<8x512xbf16>
    tpu.vector_store %arg26[%c160_478, %c0_479], %357 {strides = array<i32>} : memref<392x512xbf16, #tpu.memory_space<vmem>>, vector<8x512xbf16>,
    %c0_480 = arith.constant 0 : index
    %c125_481 = arith.constant 125 : index
    %359 = vector.load %arg25[%c0_480, %c125_481] : memref<8x768xbf16, #tpu.memory_space<vmem>>, vector<8x512xbf16>
    %c168_482 = arith.constant 168 : index
    %c0_483 = arith.constant 0 : index
    %360 = vector.load %arg26[%c168_482, %c0_483] : memref<392x512xbf16, #tpu.memory_space<vmem>>, vector<8x512xbf16>
    tpu.vector_store %arg26[%c168_482, %c0_483], %359 {strides = array<i32>} : memref<392x512xbf16, #tpu.memory_space<vmem>>, vector<8x512xbf16>,
    %c0_484 = arith.constant 0 : index
    %c126_485 = arith.constant 126 : index
    %361 = vector.load %arg25[%c0_484, %c126_485] : memref<8x768xbf16, #tpu.memory_space<vmem>>, vector<8x512xbf16>
    %c176_486 = arith.constant 176 : index
    %c0_487 = arith.constant 0 : index
    %362 = vector.load %arg26[%c176_486, %c0_487] : memref<392x512xbf16, #tpu.memory_space<vmem>>, vector<8x512xbf16>
    tpu.vector_store %arg26[%c176_486, %c0_487], %361 {strides = array<i32>} : memref<392x512xbf16, #tpu.memory_space<vmem>>, vector<8x512xbf16>,
    %c0_488 = arith.constant 0 : index
    %c127_489 = arith.constant 127 : index
    %363 = vector.load %arg25[%c0_488, %c127_489] : memref<8x768xbf16, #tpu.memory_space<vmem>>, vector<8x512xbf16>
    %c184_490 = arith.constant 184 : index
    %c0_491 = arith.constant 0 : index
    %364 = vector.load %arg26[%c184_490, %c0_491] : memref<392x512xbf16, #tpu.memory_space<vmem>>, vector<8x512xbf16>
    tpu.vector_store %arg26[%c184_490, %c0_491], %363 {strides = array<i32>} : memref<392x512xbf16, #tpu.memory_space<vmem>>, vector<8x512xbf16>,
    %c0_492 = arith.constant 0 : index
    %c128_493 = arith.constant 128 : index
    %365 = vector.load %arg25[%c0_492, %c128_493] : memref<8x768xbf16, #tpu.memory_space<vmem>>, vector<8x512xbf16>
    %c192_494 = arith.constant 192 : index
    %c0_495 = arith.constant 0 : index
    %366 = vector.load %arg26[%c192_494, %c0_495] : memref<392x512xbf16, #tpu.memory_space<vmem>>, vector<8x512xbf16>
    tpu.vector_store %arg26[%c192_494, %c0_495], %365 {strides = array<i32>} : memref<392x512xbf16, #tpu.memory_space<vmem>>, vector<8x512xbf16>,
    %c0_496 = arith.constant 0 : index
    %c129_497 = arith.constant 129 : index
    %367 = vector.load %arg25[%c0_496, %c129_497] : memref<8x768xbf16, #tpu.memory_space<vmem>>, vector<8x512xbf16>
    %c200_498 = arith.constant 200 : index
    %c0_499 = arith.constant 0 : index
    %368 = vector.load %arg26[%c200_498, %c0_499] : memref<392x512xbf16, #tpu.memory_space<vmem>>, vector<8x512xbf16>
    tpu.vector_store %arg26[%c200_498, %c0_499], %367 {strides = array<i32>} : memref<392x512xbf16, #tpu.memory_space<vmem>>, vector<8x512xbf16>,
    %c0_500 = arith.constant 0 : index
    %c130_501 = arith.constant 130 : index
    %369 = vector.load %arg25[%c0_500, %c130_501] : memref<8x768xbf16, #tpu.memory_space<vmem>>, vector<8x512xbf16>
    %c208_502 = arith.constant 208 : index
    %c0_503 = arith.constant 0 : index
    %370 = vector.load %arg26[%c208_502, %c0_503] : memref<392x512xbf16, #tpu.memory_space<vmem>>, vector<8x512xbf16>
    tpu.vector_store %arg26[%c208_502, %c0_503], %369 {strides = array<i32>} : memref<392x512xbf16, #tpu.memory_space<vmem>>, vector<8x512xbf16>,
    %c0_504 = arith.constant 0 : index
    %c131_505 = arith.constant 131 : index
    %371 = vector.load %arg25[%c0_504, %c131_505] : memref<8x768xbf16, #tpu.memory_space<vmem>>, vector<8x512xbf16>
    %c216_506 = arith.constant 216 : index
    %c0_507 = arith.constant 0 : index
    %372 = vector.load %arg26[%c216_506, %c0_507] : memref<392x512xbf16, #tpu.memory_space<vmem>>, vector<8x512xbf16>
    tpu.vector_store %arg26[%c216_506, %c0_507], %371 {strides = array<i32>} : memref<392x512xbf16, #tpu.memory_space<vmem>>, vector<8x512xbf16>,
    %c0_508 = arith.constant 0 : index
    %c147_509 = arith.constant 147 : index
    %373 = vector.load %arg25[%c0_508, %c147_509] : memref<8x768xbf16, #tpu.memory_space<vmem>>, vector<8x512xbf16>
    %c224_510 = arith.constant 224 : index
    %c0_511 = arith.constant 0 : index
    %374 = vector.load %arg26[%c224_510, %c0_511] : memref<392x512xbf16, #tpu.memory_space<vmem>>, vector<8x512xbf16>
    tpu.vector_store %arg26[%c224_510, %c0_511], %373 {strides = array<i32>} : memref<392x512xbf16, #tpu.memory_space<vmem>>, vector<8x512xbf16>,
    %c0_512 = arith.constant 0 : index
    %c148_513 = arith.constant 148 : index
    %375 = vector.load %arg25[%c0_512, %c148_513] : memref<8x768xbf16, #tpu.memory_space<vmem>>, vector<8x512xbf16>
    %c232_514 = arith.constant 232 : index
    %c0_515 = arith.constant 0 : index
    %376 = vector.load %arg26[%c232_514, %c0_515] : memref<392x512xbf16, #tpu.memory_space<vmem>>, vector<8x512xbf16>
    tpu.vector_store %arg26[%c232_514, %c0_515], %375 {strides = array<i32>} : memref<392x512xbf16, #tpu.memory_space<vmem>>, vector<8x512xbf16>,
    %c0_516 = arith.constant 0 : index
    %c149_517 = arith.constant 149 : index
    %377 = vector.load %arg25[%c0_516, %c149_517] : memref<8x768xbf16, #tpu.memory_space<vmem>>, vector<8x512xbf16>
    %c240_518 = arith.constant 240 : index
    %c0_519 = arith.constant 0 : index
    %378 = vector.load %arg26[%c240_518, %c0_519] : memref<392x512xbf16, #tpu.memory_space<vmem>>, vector<8x512xbf16>
    tpu.vector_store %arg26[%c240_518, %c0_519], %377 {strides = array<i32>} : memref<392x512xbf16, #tpu.memory_space<vmem>>, vector<8x512xbf16>,
    %c0_520 = arith.constant 0 : index
    %c150_521 = arith.constant 150 : index
    %379 = vector.load %arg25[%c0_520, %c150_521] : memref<8x768xbf16, #tpu.memory_space<vmem>>, vector<8x512xbf16>
    %c248_522 = arith.constant 248 : index
    %c0_523 = arith.constant 0 : index
    %380 = vector.load %arg26[%c248_522, %c0_523] : memref<392x512xbf16, #tpu.memory_space<vmem>>, vector<8x512xbf16>
    tpu.vector_store %arg26[%c248_522, %c0_523], %379 {strides = array<i32>} : memref<392x512xbf16, #tpu.memory_space<vmem>>, vector<8x512xbf16>,
    %c0_524 = arith.constant 0 : index
    %c151_525 = arith.constant 151 : index
    %381 = vector.load %arg25[%c0_524, %c151_525] : memref<8x768xbf16, #tpu.memory_space<vmem>>, vector<8x512xbf16>
    %c256_526 = arith.constant 256 : index
    %c0_527 = arith.constant 0 : index
    %382 = vector.load %arg26[%c256_526, %c0_527] : memref<392x512xbf16, #tpu.memory_space<vmem>>, vector<8x512xbf16>
    tpu.vector_store %arg26[%c256_526, %c0_527], %381 {strides = array<i32>} : memref<392x512xbf16, #tpu.memory_space<vmem>>, vector<8x512xbf16>,
    %c0_528 = arith.constant 0 : index
    %c152_529 = arith.constant 152 : index
    %383 = vector.load %arg25[%c0_528, %c152_529] : memref<8x768xbf16, #tpu.memory_space<vmem>>, vector<8x512xbf16>
    %c264_530 = arith.constant 264 : index
    %c0_531 = arith.constant 0 : index
    %384 = vector.load %arg26[%c264_530, %c0_531] : memref<392x512xbf16, #tpu.memory_space<vmem>>, vector<8x512xbf16>
    tpu.vector_store %arg26[%c264_530, %c0_531], %383 {strides = array<i32>} : memref<392x512xbf16, #tpu.memory_space<vmem>>, vector<8x512xbf16>,
    %c0_532 = arith.constant 0 : index
    %c153_533 = arith.constant 153 : index
    %385 = vector.load %arg25[%c0_532, %c153_533] : memref<8x768xbf16, #tpu.memory_space<vmem>>, vector<8x512xbf16>
    %c272_534 = arith.constant 272 : index
    %c0_535 = arith.constant 0 : index
    %386 = vector.load %arg26[%c272_534, %c0_535] : memref<392x512xbf16, #tpu.memory_space<vmem>>, vector<8x512xbf16>
    tpu.vector_store %arg26[%c272_534, %c0_535], %385 {strides = array<i32>} : memref<392x512xbf16, #tpu.memory_space<vmem>>, vector<8x512xbf16>,
    %c0_536 = arith.constant 0 : index
    %c169_537 = arith.constant 169 : index
    %387 = vector.load %arg25[%c0_536, %c169_537] : memref<8x768xbf16, #tpu.memory_space<vmem>>, vector<8x512xbf16>
    %c280_538 = arith.constant 280 : index
    %c0_539 = arith.constant 0 : index
    %388 = vector.load %arg26[%c280_538, %c0_539] : memref<392x512xbf16, #tpu.memory_space<vmem>>, vector<8x512xbf16>
    tpu.vector_store %arg26[%c280_538, %c0_539], %387 {strides = array<i32>} : memref<392x512xbf16, #tpu.memory_space<vmem>>, vector<8x512xbf16>,
    %c0_540 = arith.constant 0 : index
    %c170_541 = arith.constant 170 : index
    %389 = vector.load %arg25[%c0_540, %c170_541] : memref<8x768xbf16, #tpu.memory_space<vmem>>, vector<8x512xbf16>
    %c288_542 = arith.constant 288 : index
    %c0_543 = arith.constant 0 : index
    %390 = vector.load %arg26[%c288_542, %c0_543] : memref<392x512xbf16, #tpu.memory_space<vmem>>, vector<8x512xbf16>
    tpu.vector_store %arg26[%c288_542, %c0_543], %389 {strides = array<i32>} : memref<392x512xbf16, #tpu.memory_space<vmem>>, vector<8x512xbf16>,
    %c0_544 = arith.constant 0 : index
    %c171_545 = arith.constant 171 : index
    %391 = vector.load %arg25[%c0_544, %c171_545] : memref<8x768xbf16, #tpu.memory_space<vmem>>, vector<8x512xbf16>
    %c296_546 = arith.constant 296 : index
    %c0_547 = arith.constant 0 : index
    %392 = vector.load %arg26[%c296_546, %c0_547] : memref<392x512xbf16, #tpu.memory_space<vmem>>, vector<8x512xbf16>
    tpu.vector_store %arg26[%c296_546, %c0_547], %391 {strides = array<i32>} : memref<392x512xbf16, #tpu.memory_space<vmem>>, vector<8x512xbf16>,
    %c0_548 = arith.constant 0 : index
    %c172_549 = arith.constant 172 : index
    %393 = vector.load %arg25[%c0_548, %c172_549] : memref<8x768xbf16, #tpu.memory_space<vmem>>, vector<8x512xbf16>
    %c304_550 = arith.constant 304 : index
    %c0_551 = arith.constant 0 : index
    %394 = vector.load %arg26[%c304_550, %c0_551] : memref<392x512xbf16, #tpu.memory_space<vmem>>, vector<8x512xbf16>
    tpu.vector_store %arg26[%c304_550, %c0_551], %393 {strides = array<i32>} : memref<392x512xbf16, #tpu.memory_space<vmem>>, vector<8x512xbf16>,
    %c0_552 = arith.constant 0 : index
    %c173_553 = arith.constant 173 : index
    %395 = vector.load %arg25[%c0_552, %c173_553] : memref<8x768xbf16, #tpu.memory_space<vmem>>, vector<8x512xbf16>
    %c312_554 = arith.constant 312 : index
    %c0_555 = arith.constant 0 : index
    %396 = vector.load %arg26[%c312_554, %c0_555] : memref<392x512xbf16, #tpu.memory_space<vmem>>, vector<8x512xbf16>
    tpu.vector_store %arg26[%c312_554, %c0_555], %395 {strides = array<i32>} : memref<392x512xbf16, #tpu.memory_space<vmem>>, vector<8x512xbf16>,
    %c0_556 = arith.constant 0 : index
    %c174_557 = arith.constant 174 : index
    %397 = vector.load %arg25[%c0_556, %c174_557] : memref<8x768xbf16, #tpu.memory_space<vmem>>, vector<8x512xbf16>
    %c320_558 = arith.constant 320 : index
    %c0_559 = arith.constant 0 : index
    %398 = vector.load %arg26[%c320_558, %c0_559] : memref<392x512xbf16, #tpu.memory_space<vmem>>, vector<8x512xbf16>
    tpu.vector_store %arg26[%c320_558, %c0_559], %397 {strides = array<i32>} : memref<392x512xbf16, #tpu.memory_space<vmem>>, vector<8x512xbf16>,
    %c0_560 = arith.constant 0 : index
    %c175_561 = arith.constant 175 : index
    %399 = vector.load %arg25[%c0_560, %c175_561] : memref<8x768xbf16, #tpu.memory_space<vmem>>, vector<8x512xbf16>
    %c328_562 = arith.constant 328 : index
    %c0_563 = arith.constant 0 : index
    %400 = vector.load %arg26[%c328_562, %c0_563] : memref<392x512xbf16, #tpu.memory_space<vmem>>, vector<8x512xbf16>
    tpu.vector_store %arg26[%c328_562, %c0_563], %399 {strides = array<i32>} : memref<392x512xbf16, #tpu.memory_space<vmem>>, vector<8x512xbf16>,
    %c0_564 = arith.constant 0 : index
    %c191_565 = arith.constant 191 : index
    %401 = vector.load %arg25[%c0_564, %c191_565] : memref<8x768xbf16, #tpu.memory_space<vmem>>, vector<8x512xbf16>
    %c336_566 = arith.constant 336 : index
    %c0_567 = arith.constant 0 : index
    %402 = vector.load %arg26[%c336_566, %c0_567] : memref<392x512xbf16, #tpu.memory_space<vmem>>, vector<8x512xbf16>
    tpu.vector_store %arg26[%c336_566, %c0_567], %401 {strides = array<i32>} : memref<392x512xbf16, #tpu.memory_space<vmem>>, vector<8x512xbf16>,
    %c0_568 = arith.constant 0 : index
    %c192_569 = arith.constant 192 : index
    %403 = vector.load %arg25[%c0_568, %c192_569] : memref<8x768xbf16, #tpu.memory_space<vmem>>, vector<8x512xbf16>
    %c344_570 = arith.constant 344 : index
    %c0_571 = arith.constant 0 : index
    %404 = vector.load %arg26[%c344_570, %c0_571] : memref<392x512xbf16, #tpu.memory_space<vmem>>, vector<8x512xbf16>
    tpu.vector_store %arg26[%c344_570, %c0_571], %403 {strides = array<i32>} : memref<392x512xbf16, #tpu.memory_space<vmem>>, vector<8x512xbf16>,
    %c0_572 = arith.constant 0 : index
    %c193_573 = arith.constant 193 : index
    %405 = vector.load %arg25[%c0_572, %c193_573] : memref<8x768xbf16, #tpu.memory_space<vmem>>, vector<8x512xbf16>
    %c352_574 = arith.constant 352 : index
    %c0_575 = arith.constant 0 : index
    %406 = vector.load %arg26[%c352_574, %c0_575] : memref<392x512xbf16, #tpu.memory_space<vmem>>, vector<8x512xbf16>
    tpu.vector_store %arg26[%c352_574, %c0_575], %405 {strides = array<i32>} : memref<392x512xbf16, #tpu.memory_space<vmem>>, vector<8x512xbf16>,
    %c0_576 = arith.constant 0 : index
    %c194_577 = arith.constant 194 : index
    %407 = vector.load %arg25[%c0_576, %c194_577] : memref<8x768xbf16, #tpu.memory_space<vmem>>, vector<8x512xbf16>
    %c360_578 = arith.constant 360 : index
    %c0_579 = arith.constant 0 : index
    %408 = vector.load %arg26[%c360_578, %c0_579] : memref<392x512xbf16, #tpu.memory_space<vmem>>, vector<8x512xbf16>
    tpu.vector_store %arg26[%c360_578, %c0_579], %407 {strides = array<i32>} : memref<392x512xbf16, #tpu.memory_space<vmem>>, vector<8x512xbf16>,
    %c0_580 = arith.constant 0 : index
    %c195_581 = arith.constant 195 : index
    %409 = vector.load %arg25[%c0_580, %c195_581] : memref<8x768xbf16, #tpu.memory_space<vmem>>, vector<8x512xbf16>
    %c368_582 = arith.constant 368 : index
    %c0_583 = arith.constant 0 : index
    %410 = vector.load %arg26[%c368_582, %c0_583] : memref<392x512xbf16, #tpu.memory_space<vmem>>, vector<8x512xbf16>
    tpu.vector_store %arg26[%c368_582, %c0_583], %409 {strides = array<i32>} : memref<392x512xbf16, #tpu.memory_space<vmem>>, vector<8x512xbf16>,
    %c0_584 = arith.constant 0 : index
    %c196_585 = arith.constant 196 : index
    %411 = vector.load %arg25[%c0_584, %c196_585] : memref<8x768xbf16, #tpu.memory_space<vmem>>, vector<8x512xbf16>
    %c376_586 = arith.constant 376 : index
    %c0_587 = arith.constant 0 : index
    %412 = vector.load %arg26[%c376_586, %c0_587] : memref<392x512xbf16, #tpu.memory_space<vmem>>, vector<8x512xbf16>
    tpu.vector_store %arg26[%c376_586, %c0_587], %411 {strides = array<i32>} : memref<392x512xbf16, #tpu.memory_space<vmem>>, vector<8x512xbf16>,
    %c0_588 = arith.constant 0 : index
    %c197_589 = arith.constant 197 : index
    %413 = vector.load %arg25[%c0_588, %c197_589] : memref<8x768xbf16, #tpu.memory_space<vmem>>, vector<8x512xbf16>
    %c384_590 = arith.constant 384 : index
    %c0_591 = arith.constant 0 : index
    %414 = vector.load %arg26[%c384_590, %c0_591] : memref<392x512xbf16, #tpu.memory_space<vmem>>, vector<8x512xbf16>
    tpu.vector_store %arg26[%c384_590, %c0_591], %413 {strides = array<i32>} : memref<392x512xbf16, #tpu.memory_space<vmem>>, vector<8x512xbf16>,
    %c0_592 = arith.constant 0 : index
    %c0_593 = arith.constant 0 : index
    %415 = vector.load %arg21[%c0_592, %c0_593] : memref<8x392xbf16, #tpu.memory_space<vmem>>, vector<8x392xbf16>
    %c0_594 = arith.constant 0 : index
    %c0_595 = arith.constant 0 : index
    %416 = vector.load %arg26[%c0_594, %c0_595] : memref<392x512xbf16, #tpu.memory_space<vmem>>, vector<392x512xbf16>
    %cst_596 = arith.constant dense<0.000000e+00> : vector<8x512xf32>
    %417 = tpu.matmul %415, %416, %cst_596 {dimension_numbers = #tpu.dot_dimension_numbers<[1], [0], [0], [1], [0, 0, 1, 1], [], []>} : vector<8x392xbf16>, vector<392x512xbf16>, vector<8x512xf32> -> vector<8x512xf32>
    %c0_597 = arith.constant 0 : index
    %c0_598 = arith.constant 0 : index
    %418 = vector.load %arg22[%c0_597, %c0_598] : memref<8x1xf32, #tpu.memory_space<vmem>>, vector<8x1xf32>
    %419 = vector.broadcast %418 : vector<8x1xf32> to vector<8x512xf32>
    %420 = arith.addf %417, %419 : vector<8x512xf32>
    %cst_599 = arith.constant 0.000000e+00 : f32
    %421 = vector.broadcast %cst_599 : f32 to vector<8x512xf32>
    %422 = arith.maximumf %420, %421 : vector<8x512xf32>
    %423 = vector.extract_strided_slice %215 {offsets = [16, 0], sizes = [8, 512], strides = [1, 1]} : vector<24x512xf32> to vector<8x512xf32>
    %424 = arith.addf %422, %423 : vector<8x512xf32>
    %425 = vector.broadcast %2 : vector<1x512xf32> to vector<8x512xf32>
    %426 = arith.mulf %424, %425 : vector<8x512xf32>
    %c0_600 = arith.constant 0 : index
    %c0_601 = arith.constant 0 : index
    %427 = vector.load %arg23[%c0_600, %c0_601] : memref<24x1xf32, #tpu.memory_space<vmem>>, vector<8x1xf32>
    %c8_602 = arith.constant 8 : index
    %c0_603 = arith.constant 0 : index
    %428 = vector.load %arg23[%c8_602, %c0_603] : memref<24x1xf32, #tpu.memory_space<vmem>>, vector<8x1xf32>
    %c16_604 = arith.constant 16 : index
    %c0_605 = arith.constant 0 : index
    %429 = vector.load %arg23[%c16_604, %c0_605] : memref<24x1xf32, #tpu.memory_space<vmem>>, vector<8x1xf32>
    %430 = arith.addf %313, %1 : vector<8x512xf32>
    %431 = vector.broadcast %427 : vector<8x1xf32> to vector<8x512xf32>
    %432 = arith.mulf %431, %430 : vector<8x512xf32>
    %433 = arith.addf %426, %1 : vector<8x512xf32>
    %434 = vector.broadcast %428 : vector<8x1xf32> to vector<8x512xf32>
    %435 = arith.mulf %434, %433 : vector<8x512xf32>
    %436 = arith.addf %432, %435 : vector<8x512xf32>
    %437 = arith.addf %248, %1 : vector<8x512xf32>
    %438 = vector.broadcast %429 : vector<8x1xf32> to vector<8x512xf32>
    %439 = arith.mulf %438, %437 : vector<8x512xf32>
    %440 = arith.addf %436, %439 : vector<8x512xf32>
    %cst_606 = arith.constant dense<0.000000e+00> : vector<512xf32>
    %441 = vector.multi_reduction <add>, %440, %cst_606 [0] : vector<8x512xf32> to vector<512xf32>
    %442 = vector.shape_cast %441 : vector<512xf32> to vector<1x512xf32>
    %443 = arith.negf %442 : vector<1x512xf32>
    %444 = math.exp %443 : vector<1x512xf32>
    %cst_607 = arith.constant 1.000000e+00 : f32
    %445 = vector.broadcast %cst_607 : f32 to vector<1x512xf32>
    %446 = arith.addf %445, %444 : vector<1x512xf32>
    %447 = arith.divf %445, %446 : vector<1x512xf32>
    %448 = vector.shape_cast %447 : vector<1x512xf32> to vector<1x1x512xf32>
    %c0_608 = arith.constant 0 : index
    %c0_609 = arith.constant 0 : index
    %c0_610 = arith.constant 0 : index
    %449 = vector.load %arg24[%c0_608, %c0_609, %c0_610] : memref<1x1x512xf32, #tpu.memory_space<vmem>>, vector<1x1x512xf32>
    tpu.vector_store %arg24[%c0_608, %c0_609, %c0_610], %448 {strides = array<i32>} : memref<1x1x512xf32, #tpu.memory_space<vmem>>, vector<1x1x512xf32>,
    return
  }
  func.func @transform_0(%arg0: i32) -> (i32, i32, i32) {
    %c0_i32 = arith.constant 0 : i32
    %c0_i32_0 = arith.constant 0 : i32
    %c0_i32_1 = arith.constant 0 : i32
    return %arg0, %c0_i32, %c0_i32_0 : i32, i32, i32
  }
  func.func @transform_1(%arg0: i32) -> (i32, i32) {
    %c0_i32 = arith.constant 0 : i32
    %c0_i32_0 = arith.constant 0 : i32
    %c0_i32_1 = arith.constant 0 : i32
    return %c0_i32, %c0_i32_0 : i32, i32
  }
  func.func @transform_2(%arg0: i32) -> (i32, i32) {
    %c0_i32 = arith.constant 0 : i32
    %c0_i32_0 = arith.constant 0 : i32
    %c0_i32_1 = arith.constant 0 : i32
    return %c0_i32, %c0_i32_0 : i32, i32
  }
  func.func @transform_3(%arg0: i32) -> (i32, i32) {
    %c0_i32 = arith.constant 0 : i32
    %c0_i32_0 = arith.constant 0 : i32
    %c0_i32_1 = arith.constant 0 : i32
    return %c0_i32, %c0_i32_0 : i32, i32
  }
  func.func @transform_4(%arg0: i32) -> (i32, i32) {
    %c0_i32 = arith.constant 0 : i32
    %c0_i32_0 = arith.constant 0 : i32
    %c0_i32_1 = arith.constant 0 : i32
    return %c0_i32, %c0_i32_0 : i32, i32
  }
  func.func @transform_5(%arg0: i32) -> (i32, i32) {
    %c0_i32 = arith.constant 0 : i32
    %c0_i32_0 = arith.constant 0 : i32
    %c0_i32_1 = arith.constant 0 : i32
    return %c0_i32, %c0_i32_0 : i32, i32
  }
  func.func @transform_6(%arg0: i32) -> (i32, i32) {
    %c0_i32 = arith.constant 0 : i32
    %c0_i32_0 = arith.constant 0 : i32
    %c0_i32_1 = arith.constant 0 : i32
    return %c0_i32, %c0_i32_0 : i32, i32
  }
  func.func @transform_7(%arg0: i32) -> (i32, i32) {
    %c0_i32 = arith.constant 0 : i32
    %c0_i32_0 = arith.constant 0 : i32
    %c0_i32_1 = arith.constant 0 : i32
    return %c0_i32, %c0_i32_0 : i32, i32
  }
  func.func @transform_8(%arg0: i32) -> (i32, i32) {
    %c0_i32 = arith.constant 0 : i32
    %c0_i32_0 = arith.constant 0 : i32
    %c0_i32_1 = arith.constant 0 : i32
    return %c0_i32, %c0_i32_0 : i32, i32
  }
  func.func @transform_9(%arg0: i32) -> (i32, i32) {
    %c0_i32 = arith.constant 0 : i32
    %c0_i32_0 = arith.constant 0 : i32
    %c0_i32_1 = arith.constant 0 : i32
    return %c0_i32, %c0_i32_0 : i32, i32
  }
  func.func @transform_10(%arg0: i32) -> (i32, i32) {
    %c0_i32 = arith.constant 0 : i32
    %c0_i32_0 = arith.constant 0 : i32
    %c0_i32_1 = arith.constant 0 : i32
    return %c0_i32, %c0_i32_0 : i32, i32
  }
  func.func @transform_11(%arg0: i32) -> (i32, i32) {
    %c0_i32 = arith.constant 0 : i32
    %c0_i32_0 = arith.constant 0 : i32
    %c0_i32_1 = arith.constant 0 : i32
    return %c0_i32, %c0_i32_0 : i32, i32
  }
  func.func @transform_12(%arg0: i32) -> (i32, i32) {
    %c0_i32 = arith.constant 0 : i32
    %c0_i32_0 = arith.constant 0 : i32
    %c0_i32_1 = arith.constant 0 : i32
    return %c0_i32, %c0_i32_0 : i32, i32
  }
  func.func @transform_13(%arg0: i32) -> (i32, i32) {
    %c0_i32 = arith.constant 0 : i32
    %c0_i32_0 = arith.constant 0 : i32
    %c0_i32_1 = arith.constant 0 : i32
    return %c0_i32, %c0_i32_0 : i32, i32
  }
  func.func @transform_14(%arg0: i32) -> (i32, i32) {
    %c0_i32 = arith.constant 0 : i32
    %c0_i32_0 = arith.constant 0 : i32
    %c0_i32_1 = arith.constant 0 : i32
    return %c0_i32, %c0_i32_0 : i32, i32
  }
  func.func @transform_15(%arg0: i32) -> (i32, i32) {
    %c0_i32 = arith.constant 0 : i32
    %c0_i32_0 = arith.constant 0 : i32
    %c0_i32_1 = arith.constant 0 : i32
    return %c0_i32, %c0_i32_0 : i32, i32
  }
  func.func @transform_16(%arg0: i32) -> (i32, i32) {
    %c0_i32 = arith.constant 0 : i32
    %c0_i32_0 = arith.constant 0 : i32
    %c0_i32_1 = arith.constant 0 : i32
    return %c0_i32, %c0_i32_0 : i32, i32
  }
  func.func @transform_17(%arg0: i32) -> (i32, i32) {
    %c0_i32 = arith.constant 0 : i32
    %c0_i32_0 = arith.constant 0 : i32
    %c0_i32_1 = arith.constant 0 : i32
    return %c0_i32, %c0_i32_0 : i32, i32
  }
  func.func @transform_18(%arg0: i32) -> (i32, i32) {
    %c0_i32 = arith.constant 0 : i32
    %c0_i32_0 = arith.constant 0 : i32
    %c0_i32_1 = arith.constant 0 : i32
    return %c0_i32, %c0_i32_0 : i32, i32
  }
  func.func @transform_19(%arg0: i32) -> (i32, i32) {
    %c0_i32 = arith.constant 0 : i32
    %c0_i32_0 = arith.constant 0 : i32
    %c0_i32_1 = arith.constant 0 : i32
    return %c0_i32, %c0_i32_0 : i32, i32
  }
  func.func @transform_20(%arg0: i32) -> (i32, i32) {
    %c0_i32 = arith.constant 0 : i32
    %c0_i32_0 = arith.constant 0 : i32
    %c0_i32_1 = arith.constant 0 : i32
    return %c0_i32, %c0_i32_0 : i32, i32
  }
  func.func @transform_21(%arg0: i32) -> (i32, i32) {
    %c0_i32 = arith.constant 0 : i32
    %c0_i32_0 = arith.constant 0 : i32
    %c0_i32_1 = arith.constant 0 : i32
    return %c0_i32, %c0_i32_0 : i32, i32
  }
  func.func @transform_22(%arg0: i32) -> (i32, i32) {
    %c0_i32 = arith.constant 0 : i32
    %c0_i32_0 = arith.constant 0 : i32
    %c0_i32_1 = arith.constant 0 : i32
    return %c0_i32, %c0_i32_0 : i32, i32
  }
  func.func @transform_23(%arg0: i32) -> (i32, i32, i32) {
    %c0_i32 = arith.constant 0 : i32
    %c0_i32_0 = arith.constant 0 : i32
    %c0_i32_1 = arith.constant 0 : i32
    return %arg0, %c0_i32, %c0_i32_0 : i32, i32, i32
  }
}

</mosaic_0001>

<bundles_post_ra>
// kernel: squeeze.1
= control target key start
LH: loop header
LB: loop body
LE: loop exit
PB: predicated region body
PF: predicated region fallthrough
CT: control target
= control target key end

     0   :  { %s40_s14 = smov 3  ;;  %s172_s15 = smov 3  ;;  %vm161_vm0 = vcmask 900096   ;;  %vm177_vm1 = vcmask 932864   ;;  %vm193_vm2 = vcmask 965632   ;;  %vm22_vm3 = vcmask 179200   ;;  %s390_s0 = inlined_call_operand.vmem [shape: f32[2,484], index: 0, kind: input, shape index: {}]   ;;  %s391_s1 = inlined_call_operand.vmem [shape: f32[2,22,22], index: 1, kind: output, shape index: {}]  }
   0x1   :  { %v206_v0 = vld [vmem:[%s390_s0 + $0x4] sm:$0x3]  ;;  %v207_v1 = vld [vmem:[%s390_s0 + $0x2] sm:$0x3]  ;;  %v19_v2 = vld [vmem:[%s390_s0] sm:$0x3] }
   0x2   :  { %14 = vst [vmem:[#allocation0 + $0x10] sm:$0x3] %v206_v0  ;;  %18 = vst [vmem:[#allocation0 + $0x8] sm:$0x3] %v207_v1  ;;  %v205_v3 = vld [vmem:[%s390_s0 + $0x6] sm:$0x3] }
   0x3   :  { %20 = vst [vmem:[#allocation0] sm:$0x3] %v19_v2  ;;  %s32_s0 = smov 3  ;;  %9 = vst [vmem:[#allocation0 + $0x18] sm:$0x3] %v205_v3  ;;  %s175_s16 = smov 3 }
   0x4   :  { %s188_s17 = smov 3  ;;  %s191_s18 = smov 3  ;;  %vm165_vm4 = vcmask 146432   ;;  %vm168_vm5 = vcmask 179344   ;;  %vm181_vm6 = vcmask 113664   ;;  %vm197_vm7 = vcmask 80896  }
   0x5   :  { %s253_s19 = smov 120   ;;  %s254_s20 = smov 124   ;;  %vm184_vm8 = vcmask 179312   ;;  %vm200_vm9 = vcmask 179280  }
   0x6   :  { %s255_s23 = smov 18   ;;  %s256_s24 = smov 116  }
   0x7   :  { %s257_s25 = smov 14   ;;  %s258_s26 = smov 10  }
   0x8   :  { %s61_s27 = smov 3  ;;  %s69_s28 = smov 3 }
   0x9   :  { %v33_v4 = vld [vmem:[#allocation0 + $0x11] ss:$-1 sm:%s32_s0]   ;;  %v25_v5 = vld [vmem:[#allocation0 + $0x8] sm:$0x3]   ;;  %s259_s29 = smov 106   ;;  %s260_s30 = smov 102  }
   0xa   :  { %v160_v6 = vld [vmem:[#allocation0 + $0x8] sm:$0x3]   ;;  %34 = vrot.lane.b32.xlu0 %v33_v4, %s253_s19  ;;  %26 = vrot.lane.b32.xlu1 %v25_v5, %s254_s20  ;;  %v158_v7 = vld [vmem:[#allocation0] sm:$0x3]   ;;  %v41_v9 = vld [vmem:[#allocation0 + $0x19] ss:$-1 sm:%s40_s14]  }
   0xb   :  { %v162_v8 = vsel %vm161_vm0, %v160_v6, %v158_v7  ;;  %v173_v10 = vld [vmem:[#allocation0 + $0x9] ss:$-1 sm:%s172_s15]   ;;  %v176_v11 = vld [vmem:[#allocation0 + $0x11] ss:$-1 sm:%s175_s16]   ;;  %v192_v13 = vld [vmem:[#allocation0 + $0x19] ss:$-1 sm:%s191_s18]  }
   0xc   :  { %v189_v12 = vld [vmem:[#allocation0 + $0x11] ss:$-1 sm:%s188_s17]   ;;  %v21_v14 = vld [vmem:[#allocation0] sm:$0x3]   ;;  %v178_v15 = vsel %vm177_vm1, %v176_v11, %v173_v10  ;;  %v54_v18 = vld [vmem:[#allocation0 + $0x8] sm:$0x3]  }
   0xd   :  { %23 = vst.msk [vmem:[%s391_s1] ss:$24 sm:$0x3] %vm22_vm3, %v21_v14   ;;  %v194_v16 = vsel %vm193_vm2, %v192_v13, %v189_v12  ;;  %v47_v17 = vld [vmem:[#allocation0] sm:$0x3]   ;;  %s83_s2 = smov 3 }
   0xe   :  { %163 = vrot.lane.b32.xlu0 %v162_v8, %s255_s23  ;;  %42 = vrot.lane.b32.xlu1 %v41_v9, %s256_s24  ;;  %v62_v19 = vld [vmem:[#allocation0 + $0x11] ss:$-1 sm:%s61_s27]   ;;  %v70_v20 = vld [vmem:[#allocation0 + $0x19] ss:$-1 sm:%s69_s28]   ;;  %s261_s3 = smov 98   ;;  %s262_s4 = smov 94  }
   0xf   :  { %v76_v21 = vld [vmem:[#allocation0] sm:$0x3]   ;;  %v84_v22 = vld [vmem:[#allocation0 + $0x9] ss:$-1 sm:%s83_s2]   ;;  %s91_s5 = smov 3  ;;  %s99_s6 = smov 3 }
  0x10   :  { %s263_s7 = smov 84   ;;  %s264_s8 = smov 80   ;;  %v92_v23 = vld [vmem:[#allocation0 + $0x11] ss:$-1 sm:%s91_s5]   ;;  %v100_v24 = vld [vmem:[#allocation0 + $0x19] ss:$-1 sm:%s99_s6]  }
  0x11   :  { %s113_s9 = smov 3  ;;  %s265_s10 = smov 76   ;;  %v106_v25 = vld [vmem:[#allocation0] sm:$0x3]  }
  0x12   :  { %179 = vrot.lane.b32.xlu0 %v178_v15, %s257_s25  ;;  %195 = vrot.lane.b32.xlu1 %v194_v16, %s258_s26  ;;  %s266_s11 = smov 72   ;;  %v114_v26 = vld [vmem:[#allocation0 + $0x9] ss:$-1 sm:%s113_s9]   ;;  %s121_s12 = smov 3  ;;  %v136_v29 = vld [vmem:[#allocation0] sm:$0x3]  }
  0x13   :  { %s129_s13 = smov 3  ;;  %s267_s0 = smov 62   ;;  %v122_v27 = vld [vmem:[#allocation0 + $0x11] ss:$-1 sm:%s121_s12]  }
  0x14   :  { %s268_s14 = smov 58   ;;  %v130_v28 = vld [vmem:[#allocation0 + $0x19] ss:$-1 sm:%s129_s13]   ;;  %s143_s15 = smov 3 }
  0x15   :  { %s269_s16 = smov 54   ;;  %s270_s17 = smov 50   ;;  %v144_v30 = vld [vmem:[#allocation0 + $0x9] ss:$-1 sm:%s143_s15]  }
  0x16   :  { %48 = vrot.lane.b32.xlu0 %v47_v17, %s259_s29  ;;  %55 = vrot.lane.b32.xlu1 %v54_v18, %s260_s30  ;;  %s151_s18 = smov 3  ;;  %s271_s19 = smov 40  }
  0x17   :  { %s272_s20 = smov 36   ;;  %v152_v31 = vld [vmem:[#allocation0 + $0x11] ss:$-1 sm:%s151_s18]   ;;  %s273_s21 = smov 32  }
  0x1a   :  { %63 = vrot.lane.b32.xlu0 %v62_v19, %s261_s3  ;;  %71 = vrot.lane.b32.xlu1 %v70_v20, %s262_s4 }
  0x1e   :  { %77 = vrot.lane.b32.xlu0 %v76_v21, %s263_s7  ;;  %85 = vrot.lane.b32.xlu1 %v84_v22, %s264_s8 }
  0x22   :  { %93 = vrot.lane.b32.xlu0 %v92_v23, %s265_s10  ;;  %101 = vrot.lane.b32.xlu1 %v100_v24, %s266_s11 }
  0x26   :  { %107 = vrot.lane.b32.xlu0 %v106_v25, %s267_s0  ;;  %115 = vrot.lane.b32.xlu1 %v114_v26, %s268_s14 }
  0x2a   :  { %123 = vrot.lane.b32.xlu0 %v122_v27, %s269_s16  ;;  %131 = vrot.lane.b32.xlu1 %v130_v28, %s270_s17 }
  0x2e   :  { %137 = vrot.lane.b32.xlu0 %v136_v29, %s271_s19  ;;  %145 = vrot.lane.b32.xlu1 %v144_v30, %s272_s20 }
  0x32   :  { %153 = vrot.lane.b32.xlu0 %v152_v31, %s273_s21 }
  0x7c   :  { %v35_v32 = vpop.permute.xlu0 %34   ;;  %v27_v33 = vpop.permute.xlu1 %26  }
  0x7d   :  { %209 = vst.msk [vmem:[%s391_s1 + $0x24] ss:$-24 sm:$0x3] %vm22_vm3, %v35_v32   ;;  %208 = vst.msk [vmem:[%s391_s1 + $0x6] ss:$24 sm:$0x3] %vm22_vm3, %v27_v33  }
  0x80   :  { %v164_v34 = vpop.permute.xlu0 %163   ;;  %v43_v35 = vpop.permute.xlu1 %42  }
  0x81   :  { %226 = vst.msk [vmem:[%s391_s1 + $0x5] ss:$24 sm:$0x3] %vm165_vm4, %v164_v34  }
  0x82   :  { %210 = vst.msk [vmem:[%s391_s1 + $0x2a] ss:$-24 sm:$0x3] %vm22_vm3, %v43_v35  }
  0x83   :  { %227 = vst.msk [vmem:[%s391_s1 + $0x5] ss:$24 sm:$0x3] %vm168_vm5, %v164_v34  }
  0x84   :  { %v180_v36 = vpop.permute.xlu0 %179   ;;  %v196_v37 = vpop.permute.xlu1 %195  }
  0x85   :  { %228 = vst.msk [vmem:[%s391_s1 + $0x23] ss:$-24 sm:$0x3] %vm181_vm6, %v180_v36  }
  0x86   :  { %230 = vst.msk [vmem:[%s391_s1 + $0x29] ss:$-24 sm:$0x3] %vm197_vm7, %v196_v37  }
  0x87   :  { %229 = vst.msk [vmem:[%s391_s1 + $0x23] ss:$-24 sm:$0x3] %vm184_vm8, %v180_v36  }
  0x88   :  { %231 = vst.msk [vmem:[%s391_s1 + $0x29] ss:$-24 sm:$0x3] %vm200_vm9, %v196_v37   ;;  %v49_v38 = vpop.permute.xlu0 %48   ;;  %v56_v39 = vpop.permute.xlu1 %55  }
  0x89   :  { %211 = vst.msk [vmem:[%s391_s1 + $0x1] ss:$24 sm:$0x3] %vm22_vm3, %v49_v38   ;;  %212 = vst.msk [vmem:[%s391_s1 + $0x7] ss:$24 sm:$0x3] %vm22_vm3, %v56_v39  }
  0x8c   :  { %v64_v40 = vpop.permute.xlu0 %63   ;;  %v72_v41 = vpop.permute.xlu1 %71  }
  0x8d   :  { %213 = vst.msk [vmem:[%s391_s1 + $0x25] ss:$-24 sm:$0x3] %vm22_vm3, %v64_v40   ;;  %214 = vst.msk [vmem:[%s391_s1 + $0x2b] ss:$-24 sm:$0x3] %vm22_vm3, %v72_v41  }
  0x90   :  { %v78_v42 = vpop.permute.xlu0 %77   ;;  %v86_v43 = vpop.permute.xlu1 %85  }
  0x91   :  { %215 = vst.msk [vmem:[%s391_s1 + $0x2] ss:$24 sm:$0x3] %vm22_vm3, %v78_v42   ;;  %216 = vst.msk [vmem:[%s391_s1 + $0x20] ss:$-24 sm:$0x3] %vm22_vm3, %v86_v43  }
  0x94   :  { %v94_v44 = vpop.permute.xlu0 %93   ;;  %v102_v45 = vpop.permute.xlu1 %101  }
  0x95   :  { %217 = vst.msk [vmem:[%s391_s1 + $0x26] ss:$-24 sm:$0x3] %vm22_vm3, %v94_v44   ;;  %218 = vst.msk [vmem:[%s391_s1 + $0x2c] ss:$-24 sm:$0x3] %vm22_vm3, %v102_v45  }
  0x98   :  { %v108_v46 = vpop.permute.xlu0 %107   ;;  %v116_v47 = vpop.permute.xlu1 %115  }
  0x99   :  { %219 = vst.msk [vmem:[%s391_s1 + $0x3] ss:$24 sm:$0x3] %vm22_vm3, %v108_v46   ;;  %220 = vst.msk [vmem:[%s391_s1 + $0x21] ss:$-24 sm:$0x3] %vm22_vm3, %v116_v47  }
  0x9c   :  { %v124_v48 = vpop.permute.xlu0 %123   ;;  %v132_v49 = vpop.permute.xlu1 %131  }
  0x9d   :  { %221 = vst.msk [vmem:[%s391_s1 + $0x27] ss:$-24 sm:$0x3] %vm22_vm3, %v124_v48   ;;  %222 = vst.msk [vmem:[%s391_s1 + $0x2d] ss:$-24 sm:$0x3] %vm22_vm3, %v132_v49  }
  0xa0   :  { %v138_v50 = vpop.permute.xlu0 %137   ;;  %v146_v51 = vpop.permute.xlu1 %145  }
  0xa1   :  { %223 = vst.msk [vmem:[%s391_s1 + $0x4] ss:$24 sm:$0x3] %vm22_vm3, %v138_v50   ;;  %224 = vst.msk [vmem:[%s391_s1 + $0x22] ss:$-24 sm:$0x3] %vm22_vm3, %v146_v51  }
  0xa4   :  { %v154_v52 = vpop.permute.xlu0 %153  }
  0xa5   :  { %225 = vst.msk [vmem:[%s391_s1 + $0x28] ss:$-24 sm:$0x3] %vm22_vm3, %v154_v52  }

// kernel: ddsm_atterjitnet_forward.1
= control target key start
LH: loop header
LB: loop body
LE: loop exit
PB: predicated region body
PF: predicated region fallthrough
CT: control target
= control target key end

     0   :  { %s8199_s25 = smov 0   ;;  %s10966_s0 = inlined_call_operand.vmem [shape: f32[2,8,512], index: 0, kind: input, shape index: {}]   ;;  %s10967_s1 = inlined_call_operand.vmem [shape: f32[1,512], index: 1, kind: input, shape index: {}]   ;;  %s10968_s2 = inlined_call_operand.vmem [shape: f32[8,1], index: 2, kind: input, shape index: {}]   ;;  %s10969_s3 = inlined_call_operand.<no memory space> [shape: f32[1,1], index: 3, kind: input, shape index: {}]   ;;  %s10970_s4 = inlined_call_operand.vmem [shape: f32[8,1], index: 4, kind: input, shape index: {}]   ;;  %s10971_s5 = inlined_call_operand.vmem [shape: f32[8,1], index: 5, kind: input, shape index: {}]   ;;  %s10972_s6 = inlined_call_operand.vmem [shape: bf16[8,72], index: 6, kind: input, shape index: {}]   ;;  %s10973_s7 = inlined_call_operand.vmem [shape: f32[8,1], index: 7, kind: input, shape index: {}]   ;;  %s10974_s8 = inlined_call_operand.vmem [shape: bf16[8,72], index: 8, kind: input, shape index: {}]   ;;  %s10975_s9 = inlined_call_operand.vmem [shape: f32[8,1], index: 9, kind: input, shape index: {}]   ;;  %s10976_s10 = inlined_call_operand.vmem [shape: bf16[8,8], index: 10, kind: input, shape index: {}]   ;;  %s10977_s11 = inlined_call_operand.vmem [shape: f32[8,1], index: 11, kind: input, shape index: {}]   ;;  %s10978_s12 = inlined_call_operand.vmem [shape: bf16[24,392], index: 12, kind: input, shape index: {}]   ;;  %s10979_s13 = inlined_call_operand.vmem [shape: f32[24,1], index: 13, kind: input, shape index: {}]   ;;  %s10980_s14 = inlined_call_operand.vmem [shape: bf16[24,8], index: 14, kind: input, shape index: {}]   ;;  %s10981_s15 = inlined_call_operand.vmem [shape: f32[24,1], index: 15, kind: input, shape index: {}]   ;;  %s10982_s16 = inlined_call_operand.vmem [shape: bf16[8,72], index: 16, kind: input, shape index: {}]   ;;  %s10983_s17 = inlined_call_operand.vmem [shape: f32[8,1], index: 17, kind: input, shape index: {}]   ;;  %s10984_s18 = inlined_call_operand.vmem [shape: bf16[8,200], index: 18, kind: input, shape index: {}]   ;;  %s10985_s19 = inlined_call_operand.vmem [shape: f32[8,1], index: 19, kind: input, shape index: {}]   ;;  %s10986_s20 = inlined_call_operand.vmem [shape: bf16[8,392], index: 20, kind: input, shape index: {}]   ;;  %s10987_s21 = inlined_call_operand.vmem [shape: f32[8,1], index: 21, kind: input, shape index: {}]   ;;  %s10988_s22 = inlined_call_operand.vmem [shape: f32[24,1], index: 22, kind: input, shape index: {}]   ;;  %s10989_s23 = inlined_call_operand.vmem [shape: f32[2,1,512], index: 23, kind: output, shape index: {}]  }
   0x1   :  { %11218 = sst [smem:[#allocation33_spill]] %s10966_s0 }
   0x2   :  { %11219 = sst [smem:[#allocation34_spill]] %s10967_s1 }
   0x3   :  { %11220 = sst [smem:[#allocation35_spill]] %s10968_s2 }
   0x4   :  { %11221 = sst [smem:[#allocation36_spill]] %s10969_s3 }
   0x5   :  { %11222 = sst [smem:[#allocation37_spill]] %s10970_s4 }
   0x6   :  { %11223 = sst [smem:[#allocation38_spill]] %s10971_s5 }
   0x7   :  { %11224 = sst [smem:[#allocation39_spill]] %s10972_s6 }
   0x8   :  { %11225 = sst [smem:[#allocation40_spill]] %s10973_s7 }
   0x9   :  { %11226 = sst [smem:[#allocation41_spill]] %s10974_s8 }
   0xa   :  { %11227 = sst [smem:[#allocation42_spill]] %s10975_s9 }
   0xb   :  { %11228 = sst [smem:[#allocation43_spill]] %s10976_s10 }
   0xc   :  { %11229 = sst [smem:[#allocation44_spill]] %s10977_s11 }
   0xd   :  { %11230 = sst [smem:[#allocation45_spill]] %s10978_s12 }
   0xe   :  { %11231 = sst [smem:[#allocation46_spill]] %s10979_s13 }
   0xf   :  { %11232 = sst [smem:[#allocation47_spill]] %s10980_s14 }
  0x10   :  { %11233 = sst [smem:[#allocation48_spill]] %s10981_s15 }
  0x11   :  { %11234 = sst [smem:[#allocation49_spill]] %s10982_s16 }
  0x12   :  { %11235 = sst [smem:[#allocation50_spill]] %s10983_s17 }
  0x13   :  { %11236 = sst [smem:[#allocation51_spill]] %s10984_s18 }
  0x14   :  { %11237 = sst [smem:[#allocation52_spill]] %s10985_s19 }
  0x15   :  { %11238 = sst [smem:[#allocation53_spill]] %s10986_s20 }
  0x16   :  { %11239 = sst [smem:[#allocation54_spill]] %s10987_s21 }
  0x17   :  { %11240 = sst [smem:[#allocation55_spill]] %s10988_s22 }
  0x18   :  { %11241 = sst [smem:[#allocation56_spill]] %s10989_s23 }
  0x19   :  { %s11242_s24 = sld [smem:[#allocation36_spill]] }
  0x1f   :  { %v28_v0 = vstv %s11242_s24 }
  0x20   :  { %29 = vst [vmem:[#allocation4] sm:$0x1] %v28_v0 }
  0x21 LB: > { %11243 = sst [smem:[#allocation5_spill]] %s8027_s25  ;;  %s7494_s5 = sadd.s32 4294967295, %s8027_s25   ;;  %s8027_s25 = sphi %s8199_s25, %s35_s25  }
  0x22   : > { %p7498_p0 = scmp.ge.s32.totalorder %s8027_s25, 1  ;;  %p639_p1 = scmp.lt.s32.totalorder %s8027_s25, 3 }
  0x24   : > { %p640_p2 = pnand %p7498_p0, %p639_p1 }
  0x26   : > { %643 = sbr.rel (%p640_p2) target bundleno = 2512 (0x9d0), region = 112 }
  0x2b   : > { %p702_p3 = scmp.lt.s32.totalorder %s7494_s5, 1  ;;  %s11245_s6 = sld [smem:[#allocation33_spill]]  ;;  %v11073_v8 = vmov 0   ;;  %vm11097_vm0 = vcmask 7168   ;;  %v11072_v17 = vlaneseq  ;;  %v735_v22 = vld [vmem:[#allocation4] sm:$0x1] }
  0x2c   : > { %7953 = vset.pattern.permute.xlu0 %v11073_v8  ;;  %717 = vst [vmem:[#allocation2] sm:$0xf] %v11073_v8  ;;  %718 = vst [vmem:[#allocation2 + $0x14] sm:$0xf] %v11073_v8  ;;  %1141 = vmatprep.mubr.bf16.mxu0 %v11073_v8  ;;  %s11026_s7 = smov 105   ;;  %s11247_s3 = sld [smem:[#allocation35_spill]] }
  0x2d   : > { %s11639_s5 = smov (!%p702_p3, %s7494_s5), 1  ;;  %1182 = vmatprep.mubr.bf16.mxu1 %v11073_v8  ;;  %7954 = vset.pattern.permute.xlu1 %v11073_v8  ;;  %v8231_v20 = vshrl.u32 %v11072_v17, 7  ;;  %s11249_s30 = sld [smem:[#allocation37_spill]]  ;;  %vm11143_vm1 = vcmask 859136   ;;  %vm795_vm2 = vcmask 1043456   ;;  %vm11156_vm3 = vcmask 875520  }
  0x2e   : > { %11244 = sst [smem:[#allocation6_spill]] %s11639_s5  ;;  %s7885_s1 = sshll.u32 %s11639_s5, 5  ;;  %vm11155_vm4 = vcmask 867328   ;;  %vm11098_vm5 = vcmask 1039360   ;;  %vm11092_vm6 = vcmask 171008   ;;  %vm11091_vm7 = vcmask 187392  }
  0x2f   : > { %11248 = vst [vmem:[#allocation8_spill] sm:$0xff] %v8231_v20  ;;  %v741_v24 = vsub.s32 0, %v8231_v20  ;;  %s11250_s26 = sld [smem:[#allocation38_spill]]  ;;  %s11058_s2 = smov 107   ;;  %vm11087_vm8 = vcmask 179200   ;;  %vm11086_vm9 = vcmask 588800  }
  0x30   : > { %s11018_s28 = smov 127   ;;  %s10990_s29 = smov 21   ;;  %vm1649_vm10 = vcmask 64512   ;;  %vm11080_vm11 = vcmask 498688   ;;  %vm11075_vm12 = vcmask 490496   ;;  %vm11158_vm13 = vcmask 203776  }
  0x31   : > { %s8213_s27 = scalar_lea.vmem %s11245_s6, %s7885_s1  ;;  %s10998_s6 = smov 106   ;;  %vm11161_vm14 = vcmask 195584   ;;  %vm11166_vm15 = vcmask 515072  }
  0x32   : > { %11246 = sst [smem:[#allocation7_spill]] %s8213_s27  ;;  %v712_v1 = vld [vmem:[%s8213_s27] sm:$0xff]  ;;  %v713_v2 = vld [vmem:[%s8213_s27 + $0x8] sm:$0xff]  ;;  %v714_v3 = vld [vmem:[%s8213_s27 + $0x10] sm:$0xff]  ;;  %s10994_s0 = smov 23  }
  0x33   : > { %v719_v4 = vadd.f32 %v713_v2, %v712_v1  ;;  %v715_v5 = vld [vmem:[%s8213_s27 + $0x18] sm:$0xff]  ;;  %v955_v9 = vld [vmem:[#allocation2 + $0x14] sm:$0xf]  ;;  %v725_v10 = vld [vmem:[%s11247_s3] sm:$0xff]  ;;  %s10996_s3 = smov 1   ;;  %s10992_s4 = smov 22  }
  0x34   : > { %963 = vrot.lane.b32.xlu1 %v955_v9, %s11026_s7  ;;  %v738_v27 = vld [vmem:[%s11249_s30] sm:$0xff]  ;;  %v907_v35 = vld [vmem:[#allocation2 + $0x14] sm:$0xf]  ;;  %s11251_s1 = sld [smem:[#allocation40_spill]]  ;;  %s11294_s23 = smov 25  }
  0x35   : > { %v720_v6 = vadd.f32 %v719_v4, %v714_v3  ;;  %v745_v29 = vld [vmem:[%s11250_s26] sm:$0xff]  ;;  %v931_v36 = vld [vmem:[#allocation2 + $0x14] sm:$0xf]  ;;  %s11252_s24 = sld [smem:[#allocation39_spill]]  ;;  %s11038_s26 = smov 60  }
  0x36   : > { %v883_v37 = vld [vmem:[#allocation2 + $0x14] sm:$0xf]  ;;  %s11253_s30 = sld [smem:[#allocation34_spill]]  ;;  %s11296_s25 = smov 109  }
  0x37   : > { %v721_v7 = vadd.f32 %v720_v6, %v715_v5  ;;  %s11258_s11 = sld [smem:[#allocation44_spill]]  ;;  %s11297_s5 = smov 108  }
  0x38   : > { %915 = vrot.lane.b32.xlu1 %v907_v35, %s11058_s2  ;;  %s11259_s9 = sld [smem:[#allocation42_spill]]  ;;  %s11298_s27 = smov 42  }
  0x39   : > { %722 = vadd.xlane.f32.xlu0 %v721_v7  ;;  %s11260_s13 = sld [smem:[#allocation46_spill]]  ;;  %s11299_s17 = smov 41  }
  0x3a   : > { %v996_v50 = vld [vmem:[%s11251_s1] sm:$0xff]  ;;  %s11000_s1 = smov 108   ;;  %s11261_s15 = sld [smem:[#allocation48_spill]] }
  0x3b   : > { %s11262_s8 = sld [smem:[#allocation41_spill]]  ;;  %s11300_s21 = smov 126  }
  0x3c   : > { %939 = vrot.lane.b32.xlu1 %v931_v36, %s10998_s6  ;;  %s11263_s10 = sld [smem:[#allocation43_spill]]  ;;  %s11301_s22 = smov 125  }
  0x3d   : > { %s11293_s12 = sld [smem:[#allocation45_spill]]  ;;  %s11302_s19 = smov 44  }
  0x3e   : > { %s11303_s20 = smov 43   ;;  %s11307_s18 = smov 1  }
  0x3f   : > { %s11310_s16 = smov 67   ;;  %s11384_s14 = sld [smem:[#allocation47_spill]] }
  0x40   : > { %891 = vrot.lane.b32.xlu1 %v883_v37, %s11018_s28 }
  0xa6   : > { %v964_v53 = vpop.permute.xlu1 %963 }
  0xa7   : > { %v967_v59 = vrot.slane %v964_v53, 4 }
  0xaa   : > { %v916_v54 = vpop.permute.xlu1 %915 }
  0xae   : > { %v940_v55 = vpop.permute.xlu1 %939 }
  0xb2   : > { %v892_v56 = vpop.permute.xlu1 %891 }
  0xc2   : > { %v723_v11 = vpop.xlane.xlu0 %722 }
  0xc3   : > { %v724_v12 = vmul.f32 0.00390625, %v723_v11 }
  0xc5   : > { %v726_v13 = vmul.f32 %v725_v10, %v724_v12 }
  0xc7   : > { %v728_v14 = vsel %vm11097_vm0, %v726_v13, 0.0 }
  0xc8   : > { %v729_v15 = vrot.slane %v728_v14, 4 }
  0xca   : > { %v730_v16 = vadd.f32 %v729_v15, %v728_v14  ;;  %v919_v14 = vrot.slane %v916_v54, 4 }
  0xcc   : > { %v731_v18 = vrot.slane %v730_v16, 2 }
  0xce   : > { %v732_v19 = vadd.f32 %v731_v18, %v730_v16  ;;  %v943_v16 = vrot.slane %v940_v55, 4 }
  0xd0   : > { %v733_v21 = vrot.slane %v732_v19, 1 }
  0xd2   : > { %v734_v23 = vadd.f32 %v733_v21, %v732_v19 }
  0xd4   : > { %v736_v25 = vadd.f32 %v735_v22, %v734_v23 }
  0xd6   : > { %v737_v26 = vmax.f32 %v736_v25, 0.0 }
  0xd8   : > { %v742_v28 = vrot.slane %v737_v26, %v741_v24 }
  0xda   : > { %v743_v30 = vmul.f32 %v742_v28, %v738_v27 }
  0xdc   : > { %v746_v31 = vadd.f32 %v745_v29, %v743_v30 }
  0xde   : > { %v7502_v32 = vmul.f32 -1.442695, %v746_v31 }
  0xe0   : > { %7993 = vpow2.f32 %v7502_v32 }
  0xed   : > { %v7994_v33 = vpop.eup %7993 }
  0xee   : > { %v750_v34 = vadd.f32 1.0, %v7994_v33 }
  0xf0   : > { %7995 = vrcp.f32 %v750_v34 }
  0xfd   : > { %v7996_v38 = vpop.eup %7995 }
  0xfe   : > { %755 = vperm.xlu0 %7953, %v7996_v38  }
 0x179   : > { %v756_v39 = vpop.permute.xlu0 %755 }
 0x17a   : > { %v8245_v40 = vmul.f32 %v756_v39, %v712_v1  ;;  %v8247_v41 = vmul.f32 %v756_v39, %v713_v2  ;;  %v8249_v42 = vmul.f32 %v756_v39, %v714_v3  ;;  %v8251_v43 = vmul.f32 %v756_v39, %v715_v5 }
 0x17b   : > { %v895_v39 = vrot.slane %v892_v56, 4 }
 0x17c   : > { %v8255_v44 = vpack.c.bf16 %v8247_v41, %v8245_v40  ;;  %v8259_v45 = vpack.c.bf16 %v8251_v43, %v8249_v42 }
 0x17e   : > { %778 = vst [vmem:[#allocation2 + $0x4] sm:$0xff] %v8255_v44  ;;  %779 = vst [vmem:[#allocation2 + $0xc] sm:$0xff] %v8259_v45  ;;  %959 = vrot.lane.b32.xlu1 %v8255_v44, %s11026_s7 }
 0x182   : > { %961 = vrot.lane.b32.xlu1 %v8259_v45, %s11026_s7 }
 0x185   : > { %v829_v46 = vld [vmem:[#allocation2] sm:$0xff]  ;;  %v831_v47 = vld [vmem:[#allocation2 + $0x10] sm:$0xf]  ;;  %v854_v48 = vld [vmem:[#allocation2 + $0x8] sm:$0xff] }
 0x186   : > { %835 = vrot.lane.b32.xlu0 %v829_v46, %s10990_s29  ;;  %911 = vrot.lane.b32.xlu1 %v8255_v44, %s11058_s2  ;;  %v782_v49 = vld [vmem:[#allocation2 + $0x10] sm:$0xf] }
 0x187   : > { %v855_v51 = vld [vmem:[#allocation2 + $0x10] sm:$0xf] }
 0x188   : > { %v807_v52 = vld [vmem:[#allocation2 + $0x10] sm:$0xf] }
 0x18a   : > { %839 = vrot.lane.b32.xlu0 %v831_v47, %s10990_s29  ;;  %913 = vrot.lane.b32.xlu1 %v8259_v45, %s11058_s2 }
 0x18e   : > { %861 = vrot.lane.b32.xlu0 %v854_v48, %s10996_s3  ;;  %935 = vrot.lane.b32.xlu1 %v8255_v44, %s10998_s6 }
 0x192   : > { %786 = vrot.lane.b32.xlu0 %v829_v46, %s10994_s0  ;;  %937 = vrot.lane.b32.xlu1 %v8259_v45, %s10998_s6 }
 0x196   : > { %790 = vrot.lane.b32.xlu0 %v782_v49, %s10994_s0  ;;  %887 = vrot.lane.b32.xlu1 %v8255_v44, %s11018_s28 }
 0x19a   : > { %813 = vrot.lane.b32.xlu0 %v854_v48, %s10992_s4  ;;  %889 = vrot.lane.b32.xlu1 %v8259_v45, %s11018_s28 }
 0x19e   : > { %999 = vperm.xlu0 %7953, %v996_v50   ;;  %837 = vrot.lane.b32.xlu1 %v854_v48, %s10990_s29 }
 0x1a2   : > { %859 = vrot.lane.b32.xlu1 %v829_v46, %s10996_s3 }
 0x1a6   : > { %863 = vrot.lane.b32.xlu1 %v855_v51, %s10996_s3 }
 0x1aa   : > { %788 = vrot.lane.b32.xlu1 %v854_v48, %s10994_s0 }
 0x1ae   : > { %811 = vrot.lane.b32.xlu1 %v829_v46, %s10992_s4 }
 0x1b2   : > { %815 = vrot.lane.b32.xlu1 %v807_v52, %s10992_s4 }
 0x1f0   : > { %v960_v57 = vpop.permute.xlu1 %959 }
 0x1f1   : > { %v965_v60 = vrot.slane %v960_v57, 4 }
 0x1f4   : > { %v962_v58 = vpop.permute.xlu1 %961 }
 0x1f5   : > { %v966_v61 = vrot.slane %v962_v58, 4 }
 0x1f7   : > { %v968_v62 = vsel %vm795_vm2, %v965_v60, %v966_v61  ;;  %v971_v63 = vsel %vm795_vm2, %v966_v61, %v967_v59 }
 0x1f8   : > { %v912_v0 = vpop.permute.xlu1 %911  ;;  %v970_v1 = vsel %vm11143_vm1, %v960_v57, %v968_v62  ;;  %v972_v2 = vsel %vm11143_vm1, %v962_v58, %v971_v63  ;;  %v836_v11 = vpop.permute.xlu0 %835 }
 0x1f9   : > { %v7522_v3 = vcombine.high %v970_v1, %v970_v1  ;;  %v7524_v4 = vcombine.high %v972_v2, %v972_v2  ;;  %v7521_v5 = vcombine.low %v970_v1, %v970_v1  ;;  %v7523_v6 = vcombine.low %v972_v2, %v972_v2 }
 0x1fa   : > { %v917_v15 = vrot.slane %v912_v0, 4  ;;  %v841_v59 = vrot.slane %v836_v11, 4 }
 0x1fb   : > { %7525 = vmatprep.subr.msk.bf16.mxu0 %vm795_vm2, %v7522_v3  ;;  %7527 = vmatprep.subr.msk.bf16.mxu1 %vm795_vm2, %v7524_v4  ;;  %v1098_v7 = vsel %vm795_vm2, %v7521_v5, 0  ;;  %v1104_v9 = vsel %vm795_vm2, %v7523_v6, 0 }
 0x1fc   : > { %v914_v10 = vpop.permute.xlu1 %913  ;;  %1116 = vmatpush1.bf16.msra.mxu0 %v1098_v7  ;;  %1157 = vmatpush1.bf16.msra.mxu1 %v1104_v9  ;;  %v840_v25 = vpop.permute.xlu0 %839 }
 0x1fd   : > { %v918_v13 = vrot.slane %v914_v10, 4 }
 0x1ff   : > { %v923_v19 = vsel %vm795_vm2, %v918_v13, %v919_v14  ;;  %v920_v23 = vsel %vm795_vm2, %v917_v15, %v918_v13 }
 0x200   : > { %v936_v12 = vpop.permute.xlu1 %935  ;;  %v924_v28 = vsel %vm11156_vm3, %v914_v10, %v923_v19  ;;  %v922_v31 = vsel %vm11156_vm3, %v912_v0, %v920_v23  ;;  %v862_v37 = vpop.permute.xlu0 %861  ;;  %v843_v0 = vrot.slane %v840_v25, 4 }
 0x201   : > { %v941_v21 = vrot.slane %v936_v12, 4  ;;  %v866_v61 = vrot.slane %v862_v37, 4 }
 0x204   : > { %v938_v18 = vpop.permute.xlu1 %937  ;;  %v787_v56 = vpop.permute.xlu0 %786 }
 0x205   : > { %v942_v22 = vrot.slane %v938_v18, 4  ;;  %v792_v19 = vrot.slane %v787_v56, 4 }
 0x207   : > { %v947_v26 = vsel %vm795_vm2, %v942_v22, %v943_v16  ;;  %v944_v27 = vsel %vm795_vm2, %v941_v21, %v942_v22 }
 0x208   : > { %v948_v29 = vsel %vm11155_vm4, %v938_v18, %v947_v26  ;;  %v888_v30 = vpop.permute.xlu1 %887  ;;  %v946_v32 = vsel %vm11155_vm4, %v936_v12, %v944_v27  ;;  %v791_v2 = vpop.permute.xlu0 %790 }
 0x209   : > { %v7518_v33 = vcombine.high %v922_v31, %v946_v32  ;;  %v7520_v34 = vcombine.high %v924_v28, %v948_v29  ;;  %v7517_v35 = vcombine.low %v922_v31, %v946_v32  ;;  %v7519_v36 = vcombine.low %v924_v28, %v948_v29 }
 0x20a   : > { %v893_v46 = vrot.slane %v888_v30, 4  ;;  %v794_v25 = vrot.slane %v791_v2, 4 }
 0x20b   : > { %1117 = vmatprep.subr.bf16.mxu0 %v7518_v33  ;;  %1158 = vmatprep.subr.bf16.mxu1 %v7520_v34 }
 0x20c   : > { %1118 = vmatpush1.bf16.msra.mxu0 %v7517_v35  ;;  %1159 = vmatpush1.bf16.msra.mxu1 %v7519_v36  ;;  %v890_v38 = vpop.permute.xlu1 %889  ;;  %v814_v18 = vpop.permute.xlu0 %813  ;;  %v977_v36 = vld [vmem:[%s11252_s24] sm:$0xf]  ;;  %s11002_s24 = smov 62  }
 0x20d   : > { %v894_v47 = vrot.slane %v890_v38, 4  ;;  %v818_v21 = vrot.slane %v814_v18, 4 }
 0x20f   : > { %v899_v48 = vsel %vm795_vm2, %v894_v47, %v895_v39  ;;  %v896_v49 = vsel %vm795_vm2, %v893_v46, %v894_v47  ;;  %v1405_v46 = vld [vmem:[#allocation2 + $0x14] sm:$0xf] }
 0x210   : > { %v900_v50 = vsel %vm11098_vm5, %v890_v38, %v899_v48  ;;  %v838_v51 = vpop.permute.xlu1 %837  ;;  %v898_v52 = vsel %vm11098_vm5, %v888_v30, %v896_v49  ;;  %1413 = vrot.lane.b32.xlu1 %v1405_v46, %s11026_s7  ;;  %v1382_v47 = vld [vmem:[#allocation2 + $0x14] sm:$0xf] }
 0x211   : > { %v842_v53 = vrot.slane %v838_v51, 4  ;;  %v7514_v54 = vcombine.high %v8255_v44, %v898_v52  ;;  %v7516_v55 = vcombine.high %v8259_v45, %v900_v50  ;;  %v7513_v57 = vcombine.low %v8255_v44, %v898_v52  ;;  %v1359_v48 = vld [vmem:[#allocation2 + $0x14] sm:$0xf] }
 0x212   : > { %v7515_v58 = vcombine.low %v8259_v45, %v900_v50  ;;  %1367 = vrot.lane.b32.xlu0 %v1359_v48, %s11058_s2  ;;  %v1336_v49 = vld [vmem:[#allocation2 + $0x14] sm:$0xf]  ;;  %v1202_v50 = vsub.s32 1, %v8231_v20 }
 0x213   : > { %1119 = vmatprep.subr.bf16.mxu0 %v7514_v54  ;;  %1160 = vmatprep.subr.bf16.mxu1 %v7516_v55  ;;  %v844_v63 = vsel %vm795_vm2, %v841_v59, %v842_v53  ;;  %v847_v4 = vsel %vm795_vm2, %v842_v53, %v843_v0  ;;  %v1206_v55 = vsub.s32 2, %v8231_v20  ;;  %v2707_v46 = vld [vmem:[#allocation2 + $0x14] sm:$0xf] }
 0x214   : > { %1120 = vmatpush1.bf16.msra.mxu0 %v7513_v57  ;;  %1161 = vmatpush1.bf16.msra.mxu1 %v7515_v58  ;;  %v860_v60 = vpop.permute.xlu1 %859  ;;  %v846_v45 = vsel %vm11092_vm6, %v836_v11, %v844_v63  ;;  %v848_v10 = vsel %vm11092_vm6, %v838_v51, %v847_v4  ;;  %v716_v51 = vld [vmem:[%s11253_s30] sm:$0xf]  ;;  %v1210_v57 = vsub.s32 3, %v8231_v20  ;;  %s11004_s30 = smov 64   ;;  %v2563_v48 = vld [vmem:[#allocation2 + $0x14] sm:$0xf] }
 0x215   : > { %v865_v62 = vrot.slane %v860_v60, 4  ;;  %1390 = vrot.lane.b32.xlu1 %v1382_v47, %s10998_s6  ;;  %v8353_v58 = vrot.slane %v716_v51, %v741_v24  ;;  %v8355_v59 = vrot.slane %v716_v51, %v1202_v50  ;;  %v8357_v2 = vrot.slane %v716_v51, %v1206_v55  ;;  %v2611_v47 = vld [vmem:[#allocation2 + $0x14] sm:$0xf] }
 0x216   : > { %1344 = vrot.lane.b32.xlu0 %v1336_v49, %s11018_s28  ;;  %v2351_v49 = vld [vmem:[#allocation2 + $0x14] sm:$0xf] }
 0x217   : > { %v868_v1 = vsel %vm795_vm2, %v865_v62, %v866_v61  ;;  %11254 = vst [vmem:[#allocation9_spill] sm:$0xff] %v8353_v58  ;;  %11255 = vst [vmem:[#allocation10_spill] sm:$0xff] %v8355_v59  ;;  %v2516_v50 = vld [vmem:[#allocation2 + $0x14] sm:$0xf] }
 0x218   : > { %v870_v44 = vsel %vm11097_vm0, %v860_v60, %v868_v1  ;;  %v864_v3 = vpop.permute.xlu1 %863  ;;  %11256 = vst [vmem:[#allocation11_spill] sm:$0xff] %v8357_v2  ;;  %v2896_v55 = vld [vmem:[#allocation2 + $0x14] sm:$0xf] }
 0x219   : > { %v867_v5 = vrot.slane %v864_v3, 4  ;;  %v7510_v6 = vcombine.high %v846_v45, %v870_v44  ;;  %v7509_v7 = vcombine.low %v846_v45, %v870_v44  ;;  %v1000_v52 = vpop.permute.xlu0 %999  ;;  %v8359_v44 = vrot.slane %v716_v51, %v1210_v57  ;;  %v4142_v51 = vld [vmem:[#allocation2 + $0x14] sm:$0xf] }
 0x21a   : > { %v2587_v57 = vld [vmem:[#allocation2 + $0x14] sm:$0xf] }
 0x21b   : > { %v871_v9 = vsel %vm795_vm2, %v866_v61, %v867_v5  ;;  %1121 = vmatprep.subr.bf16.mxu0 %v7510_v6  ;;  %11257 = vst [vmem:[#allocation12_spill] sm:$0xff] %v8359_v44 }
 0x21c   : > { %1122 = vmatpush1.bf16.msra.mxu0 %v7509_v7  ;;  %v789_v12 = vpop.permute.xlu1 %788  ;;  %v872_v13 = vsel %vm11097_vm0, %v862_v37, %v871_v9 }
 0x21d   : > { %v793_v14 = vrot.slane %v789_v12, 4  ;;  %v7512_v15 = vcombine.high %v848_v10, %v872_v13  ;;  %v7511_v16 = vcombine.low %v848_v10, %v872_v13 }
 0x21f   : > { %1162 = vmatprep.subr.bf16.mxu1 %v7512_v15  ;;  %v796_v23 = vsel %vm795_vm2, %v792_v19, %v793_v14  ;;  %v799_v30 = vsel %vm795_vm2, %v793_v14, %v794_v25  ;;  %v2872_v25 = vld [vmem:[#allocation2 + $0x14] sm:$0xf] }
 0x220   : > { %1163 = vmatpush1.bf16.msra.mxu1 %v7511_v16  ;;  %v812_v11 = vpop.permute.xlu1 %811  ;;  %v798_v29 = vsel %vm11091_vm7, %v787_v56, %v796_v23  ;;  %v800_v35 = vsel %vm11091_vm7, %v789_v12, %v799_v30  ;;  %v1643_v23 = vld [vmem:[%s11258_s11] sm:$0xff]  ;;  %v2470_v30 = vld [vmem:[#allocation2 + $0x14] sm:$0xf]  ;;  %s11289_s11 = smov 104  }
 0x221   : > { %v817_v22 = vrot.slane %v812_v11, 4 }
 0x223   : > { %v820_v26 = vsel %vm795_vm2, %v817_v22, %v818_v21 }
 0x224   : > { %v822_v27 = vsel %vm11087_vm8, %v812_v11, %v820_v26  ;;  %v816_v28 = vpop.permute.xlu1 %815  ;;  %v1445_v26 = vld [vmem:[%s11259_s9] sm:$0xff]  ;;  %s11066_s9 = smov 66  }
 0x225   : > { %v819_v31 = vrot.slane %v816_v28, 4  ;;  %v7506_v32 = vcombine.high %v798_v29, %v822_v27  ;;  %v7505_v33 = vcombine.low %v798_v29, %v822_v27  ;;  %v2493_v27 = vld [vmem:[#allocation2 + $0x14] sm:$0xf] }
 0x226   : > { %v2848_v28 = vld [vmem:[#allocation2 + $0x14] sm:$0xf] }
 0x227   : > { %v823_v34 = vsel %vm795_vm2, %v818_v21, %v819_v31  ;;  %1123 = vmatprep.subr.bf16.mxu0 %v7506_v32  ;;  %v2824_v29 = vld [vmem:[#allocation2 + $0x14] sm:$0xf] }
 0x228   : > { %1124 = vmatpush1.bf16.msra.mxu0 %v7505_v33  ;;  %v824_v37 = vsel %vm11087_vm8, %v814_v18, %v823_v34  ;;  %v2446_v31 = vld [vmem:[#allocation2 + $0x14] sm:$0xf] }
 0x229   : > { %v7508_v38 = vcombine.high %v800_v35, %v824_v37  ;;  %v7507_v39 = vcombine.low %v800_v35, %v824_v37  ;;  %v2801_v32 = vld [vmem:[#allocation2 + $0x14] sm:$0xf] }
 0x22a   : > { %v2778_v33 = vld [vmem:[#allocation2 + $0x14] sm:$0xf] }
 0x22b   : > { %7526 = vmatmul.mubr.msk.bf16.vlgmr.msra.gmra.mxu0 %vm11086_vm9, %v977_v36  ;;  %1164 = vmatprep.subr.bf16.mxu1 %v7508_v38  ;;  %v2422_v34 = vld [vmem:[#allocation2 + $0x14] sm:$0xf] }
 0x22c   : > { %1165 = vmatpush1.bf16.msra.mxu1 %v7507_v39  ;;  %1588 = vmatprep.mubr.bf16.mxu0 %v11073_v8  ;;  %v2398_v35 = vld [vmem:[#allocation2 + $0x14] sm:$0xf] }
 0x22d   : > { %v2731_v37 = vld [vmem:[#allocation2 + $0x14] sm:$0xf] }
 0x22e   : > { %v2374_v38 = vld [vmem:[#allocation2 + $0x14] sm:$0xf] }
 0x22f   : > { %7528 = vmatmul.mubr.msk.bf16.vlgmr.msra.gmra.mxu1 %vm11086_vm9, %v977_v36  ;;  %v2755_v36 = vld [vmem:[#allocation2 + $0x14] sm:$0xf] }
 0x230   : > { %1629 = vmatprep.mubr.bf16.mxu1 %v11073_v8  ;;  %v2659_v39 = vld [vmem:[#allocation2 + $0x14] sm:$0xf] }
 0x2eb   : > { %v1143_v53 = vpop.f32.mrf.mxu0 }
 0x2ec   : > { %v1144_v54 = vadd.f32 %v1143_v53, %v1000_v52  ;;  %v2683_v53 = vld [vmem:[#allocation2 + $0x14] sm:$0xf] }
 0x2ed   : > { %v1145_v56 = vpop.f32.mrf.mxu0 }
 0x2ee   : > { %v1191_v60 = vmax.f32 %v1144_v54, 0.0  ;;  %v1146_v61 = vadd.f32 %v1145_v56, %v1000_v52  ;;  %v2635_v54 = vld [vmem:[#allocation2 + $0x14] sm:$0xf]  ;;  %v3023_v56 = vld [vmem:[%s11260_s13 + $0x8] sm:$0xff] }
 0x2ef   : > { %v1147_v62 = vpop.f32.mrf.mxu0  ;;  %v1184_v63 = vpop.f32.mrf.mxu1 }
 0x2f0   : > { %v1192_v0 = vmax.f32 %v1146_v61, 0.0  ;;  %v1185_v1 = vadd.f32 %v1184_v63, %v1000_v52  ;;  %v1216_v4 = vmul.f32 %v8353_v58, %v1191_v60  ;;  %v2539_v60 = vld [vmem:[#allocation2 + $0x14] sm:$0xf]  ;;  %v3811_v61 = vld [vmem:[%s11261_s15] sm:$0xff] }
 0x2f1   : > { %v1148_v3 = vpop.f32.mrf.mxu0  ;;  %v1186_v45 = vpop.f32.mrf.mxu1  ;;  %v3022_v62 = vld [vmem:[%s11260_s13] sm:$0xff]  ;;  %v3813_v63 = vld [vmem:[%s11261_s15 + $0x10] sm:$0xff] }
 0x2f2   : > { %v1217_v5 = vmul.f32 %v8355_v59, %v1192_v0  ;;  %v1193_v24 = vmax.f32 %v1185_v1, 0.0  ;;  %v1187_v6 = vadd.f32 %v1186_v45, %v1000_v52  ;;  %v7955_v52 = vpack.i.bf16 %v4142_v51, %v2516_v50  ;;  %v1414_v0 = vpop.permute.xlu1 %1413  ;;  %v3024_v1 = vld [vmem:[%s11260_s13 + $0x10] sm:$0xff]  ;;  %v1368_v3 = vpop.permute.xlu0 %1367  ;;  %s11292_s13 = smov 106  }
 0x2f3   : > { %v1188_v7 = vpop.f32.mrf.mxu1 }
 0x2f4   : > { %v8363_v9 = vpack.c.bf16 %v1217_v5, %v1216_v4  ;;  %v1194_v10 = vmax.f32 %v1187_v6, 0.0  ;;  %v1218_v13 = vmul.f32 %v8357_v2, %v1193_v24  ;;  %v3812_v4 = vld [vmem:[%s11261_s15 + $0x8] sm:$0xff]  ;;  %s11295_s15 = smov 24  }
 0x2f5   : > { %v1189_v12 = vpop.f32.mrf.mxu1 }
 0x2f6   : > { %1236 = vst [vmem:[#allocation2 + $0x4] sm:$0xff] %v8363_v9  ;;  %v1219_v14 = vmul.f32 %v8359_v44, %v1194_v10  ;;  %1409 = vrot.lane.b32.xlu1 %v8363_v9, %s11026_s7  ;;  %v1391_v45 = vpop.permute.xlu1 %1390  ;;  %v1345_v5 = vpop.permute.xlu0 %1344  ;;  %v1417_v10 = vrot.slane %v1414_v0, 4 }
 0x2f8   : > { %v8370_v15 = vpack.c.bf16 %v1219_v14, %v1218_v13 }
 0x2fa   : > { %1237 = vst [vmem:[#allocation2 + $0xc] sm:$0xff] %v8370_v15  ;;  %1411 = vrot.lane.b32.xlu0 %v8370_v15, %s11026_s7  ;;  %1365 = vrot.lane.b32.xlu1 %v8370_v15, %s11058_s2 }
 0x2fd   : > { %v1284_v16 = vld [vmem:[#allocation2] sm:$0xff] }
 0x2fe   : > { %1386 = vrot.lane.b32.xlu1 %v8363_v9, %s10998_s6  ;;  %1363 = vrot.lane.b32.xlu0 %v8363_v9, %s11058_s2 }
 0x301   : > { %v1285_v18 = vld [vmem:[#allocation2 + $0x8] sm:$0xff]  ;;  %v1286_v19 = vld [vmem:[#allocation2 + $0x10] sm:$0xf] }
 0x302   : > { %1342 = vrot.lane.b32.xlu1 %v8370_v15, %s11018_s28  ;;  %1388 = vrot.lane.b32.xlu0 %v8370_v15, %s10998_s6  ;;  %v1309_v11 = vld [vmem:[#allocation2 + $0x10] sm:$0xf] }
 0x303   : > { %v1240_v21 = vld [vmem:[#allocation2 + $0x10] sm:$0xf] }
 0x304   : > { %v1263_v22 = vld [vmem:[#allocation2 + $0x10] sm:$0xf] }
 0x306   : > { %1340 = vrot.lane.b32.xlu0 %v8363_v9, %s11018_s28  ;;  %1290 = vrot.lane.b32.xlu1 %v1284_v16, %s10990_s29 }
 0x30a   : > { %1292 = vrot.lane.b32.xlu0 %v1285_v18, %s10990_s29  ;;  %1294 = vrot.lane.b32.xlu1 %v1286_v19, %s10990_s29  ;;  %s11034_s29 = smov 63  }
 0x30e   : > { %1313 = vrot.lane.b32.xlu0 %v1284_v16, %s10996_s3  ;;  %1315 = vrot.lane.b32.xlu1 %v1285_v18, %s10996_s3 }
 0x312   : > { %1317 = vrot.lane.b32.xlu0 %v1309_v11, %s10996_s3  ;;  %1244 = vrot.lane.b32.xlu1 %v1284_v16, %s10994_s0  ;;  %s11008_s3 = smov 125  }
 0x316   : > { %1246 = vrot.lane.b32.xlu0 %v1285_v18, %s10994_s0  ;;  %1248 = vrot.lane.b32.xlu1 %v1240_v21, %s10994_s0  ;;  %s11006_s0 = smov 109  }
 0x31a   : > { %1267 = vrot.lane.b32.xlu0 %v1284_v16, %s10992_s4  ;;  %1269 = vrot.lane.b32.xlu1 %v1285_v18, %s10992_s4 }
 0x31e   : > { %1271 = vrot.lane.b32.xlu0 %v1263_v22, %s10992_s4  ;;  %1448 = vperm.xlu1 %7954, %v1445_v26   ;;  %s11040_s4 = smov 61  }
 0x322   : > { %1646 = vperm.xlu0 %7953, %v1643_v23   ;;  %2856 = vrot.lane.b32.xlu1 %v2848_v28, %s11040_s4 }
 0x326   : > { %2880 = vrot.lane.b32.xlu0 %v2872_v25, %s11038_s26  ;;  %2478 = vrot.lane.b32.xlu1 %v2470_v30, %s11058_s2 }
 0x32a   : > { %2501 = vrot.lane.b32.xlu0 %v2493_v27, %s10998_s6  ;;  %2809 = vrot.lane.b32.xlu1 %v2801_v32, %s11034_s29  ;;  %s11028_s6 = smov 65   ;;  %v1348_v32 = vrot.slane %v1345_v5, 4  ;;  %s11270_s29 = smov 65  }
 0x32e   : > { %2832 = vrot.lane.b32.xlu0 %v2824_v29, %s11002_s24  ;;  %2430 = vrot.lane.b32.xlu1 %v2422_v34, %s11006_s0  ;;  %s11012_s24 = smov 126   ;;  %s11020_s0 = smov 82   ;;  %v1371_v29 = vrot.slane %v1368_v3, 4 }
 0x332   : > { %2454 = vrot.lane.b32.xlu0 %v2446_v31, %s11000_s1  ;;  %2763 = vrot.lane.b32.xlu1 %v2755_v36, %s11028_s6  ;;  %s11010_s1 = smov 81   ;;  %s11062_s6 = smov 104   ;;  %v1394_v31 = vrot.slane %v1391_v45, 4 }
 0x336   : > { %2786 = vrot.lane.b32.xlu0 %v2778_v33, %s11004_s30  ;;  %2382 = vrot.lane.b32.xlu1 %v2374_v38, %s11012_s24  ;;  %s11014_s30 = smov 84   ;;  %s11024_s24 = smov 83  }
 0x33a   : > { %2406 = vrot.lane.b32.xlu0 %v2398_v35, %s11008_s3  ;;  %2715 = vrot.lane.b32.xlu1 %v2707_v46, %s11020_s0  ;;  %s11016_s3 = smov 86   ;;  %s11050_s0 = smov 24  }
 0x33e   : > { %2739 = vrot.lane.b32.xlu0 %v2731_v37, %s11010_s1  ;;  %2359 = vrot.lane.b32.xlu1 %v2351_v49, %s11018_s28  ;;  %s11022_s1 = smov 103   ;;  %s11056_s28 = smov 25  }
 0x342   : > { %2667 = vrot.lane.b32.xlu0 %v2659_v39, %s11014_s30  ;;  %2691 = vrot.lane.b32.xlu1 %v2683_v53, %s11024_s24  ;;  %s11030_s30 = smov 85   ;;  %s11269_s24 = smov 62  }
 0x346   : > { %2619 = vrot.lane.b32.xlu0 %v2611_v47, %s11016_s3  ;;  %2643 = vrot.lane.b32.xlu1 %v2635_v54, %s11030_s30  ;;  %s11032_s3 = smov 59   ;;  %s11271_s30 = smov 64  }
 0x34a   : > { %2571 = vrot.lane.b32.xlu0 %v2563_v48, %s11022_s1  ;;  %s11036_s1 = smov 87  }
 0x34b   : > { %2595 = vrot.lane.b32.xlu1 %v2587_v57, %s11036_s1  ;;  %s11042_s1 = smov 41  }
 0x34e   : > { %7956 = vrot.lane.b32.xlu0 %v7955_v52, %s11026_s7  ;;  %s11268_s7 = smov 63  }
 0x34f   : > { %2547 = vrot.lane.b32.xlu1 %v2539_v60, %s11062_s6  ;;  %s11282_s6 = smov 87  }
 0x352   : > { %2904 = vrot.lane.b32.xlu0 %v2896_v55, %s11032_s3  ;;  %s11044_s3 = smov 42  }
 0x353   : > { %3027 = vperm.xlu1 %7954, %v3022_v62  }
 0x356   : > { %3032 = vperm.xlu0 %7953, %v3023_v56  }
 0x357   : > { %3037 = vperm.xlu1 %7954, %v3024_v1  }
 0x35a   : > { %3816 = vperm.xlu0 %7953, %v3811_v61  }
 0x35b   : > { %3821 = vperm.xlu1 %7954, %v3812_v4  }
 0x35e   : > { %3826 = vperm.xlu0 %7953, %v3813_v63  }
 0x368   : > { %v1410_v24 = vpop.permute.xlu1 %1409 }
 0x369   : > { %v1415_v12 = vrot.slane %v1410_v24, 4 }
 0x36c   : > { %v1366_v6 = vpop.permute.xlu1 %1365  ;;  %v1412_v7 = vpop.permute.xlu0 %1411 }
 0x36d   : > { %v1416_v13 = vrot.slane %v1412_v7, 4  ;;  %v1370_v22 = vrot.slane %v1366_v6, 4 }
 0x36f   : > { %v1418_v14 = vsel %vm795_vm2, %v1415_v12, %v1416_v13  ;;  %v1420_v16 = vsel %vm795_vm2, %v1416_v13, %v1417_v10  ;;  %v1374_v36 = vsel %vm795_vm2, %v1370_v22, %v1371_v29 }
 0x370   : > { %v1421_v18 = vsel %vm11143_vm1, %v1412_v7, %v1420_v16  ;;  %v1387_v19 = vpop.permute.xlu1 %1386  ;;  %v1364_v11 = vpop.permute.xlu0 %1363  ;;  %v1419_v21 = vsel %vm11143_vm1, %v1410_v24, %v1418_v14  ;;  %v1375_v50 = vsel %vm11156_vm3, %v1366_v6, %v1374_v36 }
 0x371   : > { %v7549_v23 = vcombine.low %v1421_v18, %v1421_v18  ;;  %v7550_v25 = vcombine.high %v1421_v18, %v1421_v18  ;;  %v1369_v26 = vrot.slane %v1364_v11, 4  ;;  %v7548_v27 = vcombine.high %v1419_v21, %v1419_v21 }
 0x372   : > { %v7547_v28 = vcombine.low %v1419_v21, %v1419_v21  ;;  %v1392_v37 = vrot.slane %v1387_v19, 4 }
 0x373   : > { %7553 = vmatprep.subr.msk.bf16.mxu1 %vm795_vm2, %v7550_v25  ;;  %v1551_v30 = vsel %vm795_vm2, %v7549_v23, 0  ;;  %7551 = vmatprep.subr.msk.bf16.mxu0 %vm795_vm2, %v7548_v27  ;;  %v1372_v46 = vsel %vm795_vm2, %v1369_v26, %v1370_v22 }
 0x374   : > { %v1343_v33 = vpop.permute.xlu1 %1342  ;;  %v1545_v34 = vsel %vm795_vm2, %v7547_v28, 0  ;;  %1604 = vmatpush1.bf16.msra.mxu1 %v1551_v30  ;;  %v1389_v35 = vpop.permute.xlu0 %1388  ;;  %v1373_v55 = vsel %vm11156_vm3, %v1364_v11, %v1372_v46 }
 0x375   : > { %v1347_v38 = vrot.slane %v1343_v33, 4  ;;  %1563 = vmatpush1.bf16.msra.mxu0 %v1545_v34  ;;  %v1393_v39 = vrot.slane %v1389_v35, 4 }
 0x377   : > { %v1351_v47 = vsel %vm795_vm2, %v1347_v38, %v1348_v32  ;;  %v1397_v48 = vsel %vm795_vm2, %v1393_v39, %v1394_v31  ;;  %v1395_v49 = vsel %vm795_vm2, %v1392_v37, %v1393_v39 }
 0x378   : > { %v1398_v51 = vsel %vm11155_vm4, %v1389_v35, %v1397_v48  ;;  %v1291_v52 = vpop.permute.xlu1 %1290  ;;  %v1341_v53 = vpop.permute.xlu0 %1340  ;;  %v1396_v54 = vsel %vm11155_vm4, %v1387_v19, %v1395_v49  ;;  %v1352_v57 = vsel %vm11098_vm5, %v1343_v33, %v1351_v47 }
 0x379   : > { %v7545_v56 = vcombine.low %v1375_v50, %v1398_v51  ;;  %v1346_v60 = vrot.slane %v1341_v53, 4  ;;  %v7543_v61 = vcombine.low %v1373_v55, %v1396_v54  ;;  %v7544_v62 = vcombine.high %v1373_v55, %v1396_v54 }
 0x37a   : > { %v7546_v63 = vcombine.high %v1375_v50, %v1398_v51  ;;  %v7542_v4 = vcombine.high %v8370_v15, %v1352_v57  ;;  %v7541_v7 = vcombine.low %v8370_v15, %v1352_v57  ;;  %v1296_v10 = vrot.slane %v1291_v52, 4 }
 0x37b   : > { %v1349_v0 = vsel %vm795_vm2, %v1346_v60, %v1347_v38  ;;  %1564 = vmatprep.subr.bf16.mxu0 %v7544_v62  ;;  %v763_v60 = vpack.c.bf16 %v8247_v41, %v8247_v41 }
 0x37c   : > { %v1350_v1 = vsel %vm11098_vm5, %v1341_v53, %v1349_v0  ;;  %1605 = vmatprep.subr.bf16.mxu1 %v7546_v63  ;;  %v1295_v3 = vpop.permute.xlu1 %1294  ;;  %v1293_v45 = vpop.permute.xlu0 %1292  ;;  %1565 = vmatpush1.bf16.msra.mxu0 %v7543_v61  ;;  %v762_v61 = vpack.c.bf16 %v8245_v40, %v8245_v40  ;;  %v1426_v63 = vld [vmem:[%s11262_s8] sm:$0xf]  ;;  %v765_v40 = vpack.c.bf16 %v8251_v43, %v8251_v43  ;;  %v4756_v43 = vld [vmem:[#allocation2 + $0x14] sm:$0xf]  ;;  %s11064_s8 = smov 67   ;;  %vm11101_vm5 = vcmask 662528  }
 0x37d   : > { %v7539_v5 = vcombine.low %v8363_v9, %v1350_v1  ;;  %1606 = vmatpush1.bf16.msra.mxu1 %v7545_v56  ;;  %v1297_v24 = vrot.slane %v1293_v45, 4  ;;  %v7540_v6 = vcombine.high %v8363_v9, %v1350_v1  ;;  %v1298_v14 = vrot.slane %v1295_v3, 4 }
 0x37e   : > { %1607 = vmatprep.subr.bf16.mxu1 %v7542_v4  ;;  %v1654_v41 = vsel %vm795_vm2, %v762_v61, 0 }
 0x37f   : > { %1566 = vmatprep.subr.bf16.mxu0 %v7540_v6  ;;  %v1299_v18 = vsel %vm795_vm2, %v1296_v10, %v1297_v24  ;;  %v1301_v15 = vsel %vm795_vm2, %v1297_v24, %v1298_v14 }
 0x380   : > { %v1316_v12 = vpop.permute.xlu1 %1315  ;;  %v1314_v13 = vpop.permute.xlu0 %1313  ;;  %1567 = vmatpush1.bf16.msra.mxu0 %v7539_v5  ;;  %v1300_v21 = vsel %vm11092_vm6, %v1291_v52, %v1299_v18  ;;  %v1302_v29 = vsel %vm11092_vm6, %v1293_v45, %v1301_v15  ;;  %v764_v45 = vpack.c.bf16 %v8249_v42, %v8249_v42  ;;  %v1642_v5 = vld [vmem:[%s11263_s10] sm:$0xf]  ;;  %v4096_v42 = vld [vmem:[#allocation2 + $0x14] sm:$0xf]  ;;  %s11287_s10 = smov 105   ;;  %vm11105_vm6 = vcmask 351232  }
 0x381   : > { %v1320_v16 = vrot.slane %v1316_v12, 4  ;;  %1608 = vmatpush1.bf16.msra.mxu1 %v7541_v7  ;;  %v1319_v19 = vrot.slane %v1314_v13, 4  ;;  %v7960_v24 = vpack.i.bf16 %v4756_v43, %v4096_v42 }
 0x382   : > { %v1660_v4 = vsel %vm795_vm2, %v764_v45, 0 }
 0x383   : > { %v1322_v11 = vsel %vm795_vm2, %v1319_v19, %v1320_v16  ;;  %7961 = vrot.lane.b32.xlu0 %v7960_v24, %s11058_s2  ;;  %s11278_s2 = smov 85  }
 0x384   : > { %v1323_v9 = vsel %vm11097_vm0, %v1314_v13, %v1322_v11  ;;  %v1245_v22 = vpop.permute.xlu1 %1244  ;;  %v1318_v23 = vpop.permute.xlu0 %1317 }
 0x385   : > { %v7535_v25 = vcombine.low %v1300_v21, %v1323_v9  ;;  %v1321_v26 = vrot.slane %v1318_v23, 4  ;;  %v7536_v27 = vcombine.high %v1300_v21, %v1323_v9  ;;  %v1250_v36 = vrot.slane %v1245_v22, 4 }
 0x387   : > { %v1324_v28 = vsel %vm795_vm2, %v1320_v16, %v1321_v26  ;;  %1568 = vmatprep.subr.bf16.mxu0 %v7536_v27 }
 0x388   : > { %v1249_v30 = vpop.permute.xlu1 %1248  ;;  %1569 = vmatpush1.bf16.msra.mxu0 %v7535_v25  ;;  %v1247_v31 = vpop.permute.xlu0 %1246  ;;  %v1325_v32 = vsel %vm11097_vm0, %v1316_v12, %v1324_v28  ;;  %vm11102_vm0 = vcmask 670720  }
 0x389   : > { %v1251_v33 = vrot.slane %v1247_v31, 4  ;;  %v7537_v34 = vcombine.low %v1302_v29, %v1325_v32  ;;  %v7538_v35 = vcombine.high %v1302_v29, %v1325_v32  ;;  %v1252_v39 = vrot.slane %v1249_v30, 4 }
 0x38b   : > { %1609 = vmatprep.subr.bf16.mxu1 %v7538_v35  ;;  %v1253_v47 = vsel %vm795_vm2, %v1250_v36, %v1251_v33  ;;  %v1255_v53 = vsel %vm795_vm2, %v1251_v33, %v1252_v39 }
 0x38c   : > { %v1270_v37 = vpop.permute.xlu1 %1269  ;;  %1610 = vmatpush1.bf16.msra.mxu1 %v7537_v34  ;;  %v1268_v38 = vpop.permute.xlu0 %1267  ;;  %v1254_v50 = vsel %vm11091_vm7, %v1245_v22, %v1253_v47  ;;  %v1256_v62 = vsel %vm11091_vm7, %v1247_v31, %v1255_v53  ;;  %vm11106_vm7 = vcmask 359424  }
 0x38d   : > { %v1274_v46 = vrot.slane %v1270_v37, 4  ;;  %v1273_v48 = vrot.slane %v1268_v38, 4 }
 0x38f   : > { %v1276_v49 = vsel %vm795_vm2, %v1273_v48, %v1274_v46 }
 0x390   : > { %v1277_v51 = vsel %vm11087_vm8, %v1268_v38, %v1276_v49  ;;  %v1272_v52 = vpop.permute.xlu0 %1271 }
 0x391   : > { %v7531_v54 = vcombine.low %v1254_v50, %v1277_v51  ;;  %v1275_v55 = vrot.slane %v1272_v52, 4  ;;  %v7532_v57 = vcombine.high %v1254_v50, %v1277_v51 }
 0x393   : > { %v1278_v56 = vsel %vm795_vm2, %v1274_v46, %v1275_v55  ;;  %1570 = vmatprep.subr.bf16.mxu0 %v7532_v57 }
 0x394   : > { %1571 = vmatpush1.bf16.msra.mxu0 %v7531_v54  ;;  %v1279_v0 = vsel %vm11087_vm8, %v1270_v37, %v1278_v56  ;;  %vm11140_vm8 = vcmask 523264  }
 0x395   : > { %7555 = vmatprep.subr.msk.bf16.mxu0 %vm795_vm2, %v763_v60  ;;  %v7533_v1 = vcombine.low %v1256_v62, %v1279_v0  ;;  %v7534_v3 = vcombine.high %v1256_v62, %v1279_v0 }
 0x397   : > { %7552 = vmatmul.mubr.msk.bf16.vlgmr.msra.gmra.mxu0 %vm11086_vm9, %v1426_v63  ;;  %1611 = vmatprep.subr.bf16.mxu1 %v7534_v3 }
 0x398   : > { %1612 = vmatpush1.bf16.msra.mxu1 %v7533_v1  ;;  %1680 = vmatpush1.bf16.msra.mxu0 %v1654_v41 }
 0x399   : > { %7557 = vmatprep.subr.msk.bf16.mxu1 %vm795_vm2, %v765_v40  ;;  %1697 = vmatprep.mubr.bf16.mxu0 %v11073_v8  ;;  %v1449_v10 = vpop.permute.xlu1 %1448 }
 0x39b   : > { %7554 = vmatmul.mubr.msk.bf16.vlgmr.msra.gmra.mxu1 %vm11086_vm9, %v1426_v63  ;;  %vm1885_vm9 = vcmask 531456  }
 0x39c   : > { %1721 = vmatpush1.bf16.msra.mxu1 %v1660_v4  ;;  %1738 = vmatprep.mubr.bf16.mxu1 %v11073_v8 }
 0x39d   : > { %v1647_v19 = vpop.permute.xlu0 %1646  ;;  %v8566_v61 = vpop.permute.xlu1 %2856 }
 0x39f   : > { %7556 = vmatmul.mubr.msk.bf16.vlgmr.msra.gmra.mxu0 %vm1649_vm10, %v1642_v5 }
 0x3a1   : > { %v8560_v60 = vpop.permute.xlu0 %2880  ;;  %v8574_v63 = vpop.permute.xlu1 %2478 }
 0x3a3   : > { %7558 = vmatmul.mubr.msk.bf16.vlgmr.msra.gmra.mxu1 %vm1649_vm10, %v1642_v5 }
 0x3a5   : > { %v8572_v62 = vpop.permute.xlu0 %2501  ;;  %v8586_v1 = vpop.permute.xlu1 %2809 }
 0x3a6   : > { %v2813_v8 = vrot.slane %v8586_v1, 4 }
 0x3a9   : > { %v8580_v0 = vpop.permute.xlu0 %2832  ;;  %v8594_v41 = vpop.permute.xlu1 %2430 }
 0x3ad   : > { %v8592_v3 = vpop.permute.xlu0 %2454  ;;  %v8606_v45 = vpop.permute.xlu1 %2763 }
 0x3b1   : > { %v8600_v40 = vpop.permute.xlu0 %2786  ;;  %v8614_v5 = vpop.permute.xlu1 %2382 }
 0x3b5   : > { %v8612_v4 = vpop.permute.xlu0 %2406  ;;  %v8626_v43 = vpop.permute.xlu1 %2715 }
 0x3b9   : > { %v8620_v42 = vpop.permute.xlu0 %2739 }
 0x3bd   : > { %v8632_v24 = vpop.permute.xlu0 %2667 }
 0x457   : > { %v1590_v6 = vpop.f32.mrf.mxu0 }
 0x458   : > { %v1591_v14 = vadd.f32 %v1590_v6, %v1449_v10  ;;  %v8634_v6 = vpop.permute.xlu1 %2359 }
 0x459   : > { %v1592_v7 = vpop.f32.mrf.mxu0 }
 0x45a   : > { %v1593_v11 = vadd.f32 %v1592_v7, %v1449_v10  ;;  %v1638_v22 = vmax.f32 %v1591_v14, 0.0  ;;  %v8640_v7 = vpop.permute.xlu0 %2619 }
 0x45b   : > { %v1594_v12 = vpop.f32.mrf.mxu0  ;;  %v1631_v13 = vpop.f32.mrf.mxu1 }
 0x45c   : > { %v1632_v23 = vadd.f32 %v1631_v13, %v1449_v10  ;;  %v1639_v28 = vmax.f32 %v1593_v11, 0.0 }
 0x45d   : > { %v1595_v16 = vpop.f32.mrf.mxu0  ;;  %v1633_v18 = vpop.f32.mrf.mxu1 }
 0x45e   : > { %v1634_v25 = vadd.f32 %v1633_v18, %v1449_v10  ;;  %v1640_v33 = vmax.f32 %v1632_v23, 0.0  ;;  %v8646_v10 = vpop.permute.xlu1 %2691  ;;  %v8652_v12 = vpop.permute.xlu0 %2571 }
 0x45f   : > { %v1635_v21 = vpop.f32.mrf.mxu1  ;;  %v1699_v9 = vpop.f32.mrf.mxu0 }
 0x460   : > { %v1700_v15 = vadd.f32 %v1699_v9, %v1647_v19  ;;  %v1641_v36 = vmax.f32 %v1634_v25, 0.0 }
 0x461   : > { %v1636_v26 = vpop.f32.mrf.mxu1  ;;  %v1701_v27 = vpop.f32.mrf.mxu0 }
 0x462   : > { %v1747_v29 = vadd.f32 %v1700_v15, %v1638_v22  ;;  %v1702_v30 = vadd.f32 %v1701_v27, %v1647_v19  ;;  %v8654_v13 = vpop.permute.xlu1 %2643  ;;  %v8660_v14 = vpop.permute.xlu0 %7956 }
 0x463   : > { %v1703_v31 = vpop.f32.mrf.mxu0  ;;  %v1740_v32 = vpop.f32.mrf.mxu1  ;;  %11277 = vst [vmem:[#allocation17_spill] sm:$0xff] %v8660_v14 }
 0x464   : > { %v1748_v34 = vadd.f32 %v1702_v30, %v1639_v28  ;;  %v1741_v35 = vadd.f32 %v1740_v32, %v1647_v19  ;;  %v8513_v39 = vmul.f32 %v1747_v29, %v8353_v58  ;;  %v2860_v30 = vrot.slane %v8566_v61, 4 }
 0x465   : > { %v1704_v37 = vpop.f32.mrf.mxu0  ;;  %v1742_v38 = vpop.f32.mrf.mxu1  ;;  %v2884_v32 = vrot.slane %v8560_v60, 4 }
 0x466   : > { %11264 = vst [vmem:[#allocation13_spill] sm:$0xff] %v8513_v39  ;;  %v8516_v46 = vmul.f32 %v1748_v34, %v8355_v59  ;;  %v1749_v47 = vadd.f32 %v1741_v35, %v1640_v33  ;;  %v1743_v48 = vadd.f32 %v1742_v38, %v1647_v19  ;;  %v8666_v16 = vpop.permute.xlu1 %2595  ;;  %v8672_v18 = vpop.permute.xlu0 %2904 }
 0x467   : > { %v1744_v49 = vpop.f32.mrf.mxu1 }
 0x468   : > { %11265 = vst [vmem:[#allocation14_spill] sm:$0xff] %v8516_v46  ;;  %v8520_v50 = vpack.c.bf16 %v8516_v46, %v8513_v39  ;;  %v1750_v51 = vadd.f32 %v1743_v48, %v1641_v36  ;;  %v8524_v53 = vmul.f32 %v1749_v47, %v8357_v2 }
 0x469   : > { %v1745_v52 = vpop.f32.mrf.mxu1 }
 0x46a   : > { %1771 = vst [vmem:[#allocation2 + $0x4] sm:$0xff] %v8520_v50  ;;  %11266 = vst [vmem:[#allocation15_spill] sm:$0xff] %v8524_v53  ;;  %v8527_v54 = vmul.f32 %v1750_v51, %v8359_v44  ;;  %2852 = vrot.lane.b32.xlu1 %v8520_v50, %s11040_s4  ;;  %v8674_v19 = vpop.permute.xlu1 %2547  ;;  %v8680_v11 = vpop.permute.xlu0 %3032 }
 0x46b   : > { %11279 = vst [vmem:[#allocation18_spill] sm:$0xff] %v8680_v11 }
 0x46c   : > { %11267 = vst [vmem:[#allocation16_spill] sm:$0xff] %v8527_v54  ;;  %v8533_v55 = vpack.c.bf16 %v8527_v54, %v8524_v53 }
 0x46e   : > { %1772 = vst [vmem:[#allocation2 + $0xc] sm:$0xff] %v8533_v55  ;;  %2854 = vrot.lane.b32.xlu0 %v8533_v55, %s11040_s4  ;;  %2876 = vrot.lane.b32.xlu1 %v8520_v50, %s11038_s26  ;;  %s11048_s4 = smov 43   ;;  %v8686_v21 = vpop.permute.xlu1 %3027  ;;  %v8692_v9 = vpop.permute.xlu0 %3816 }
 0x46f   : > { %11281 = vst [vmem:[#allocation19_spill] sm:$0xff] %v8686_v21  ;;  %11283 = vst [vmem:[#allocation20_spill] sm:$0xff] %v8692_v9 }
 0x471   : > { %v8540_v57 = vld [vmem:[#allocation2] sm:$0xff] }
 0x472   : > { %2878 = vrot.lane.b32.xlu0 %v8533_v55, %s11038_s26  ;;  %2115 = vrot.lane.b32.xlu1 %v8540_v57, %s11056_s28  ;;  %s11046_s26 = smov 44   ;;  %v8694_v22 = vpop.permute.xlu1 %3037  ;;  %v8700_v23 = vpop.permute.xlu0 %3826 }
 0x473   : > { %11284 = vst [vmem:[#allocation21_spill] sm:$0xff] %v8694_v22  ;;  %11285 = vst [vmem:[#allocation22_spill] sm:$0xff] %v8700_v23 }
 0x475   : > { %v8546_v56 = vld [vmem:[#allocation2 + $0x8] sm:$0xff]  ;;  %v1823_v22 = vld [vmem:[#allocation2 + $0x10] sm:$0xf] }
 0x476   : > { %2117 = vrot.lane.b32.xlu0 %v8546_v56, %s11056_s28  ;;  %2139 = vrot.lane.b32.xlu1 %v8540_v57, %s11050_s0  ;;  %s11276_s28 = smov 86   ;;  %v8706_v15 = vpop.permute.xlu1 %3821  ;;  %v8712_v25 = vpop.permute.xlu0 %7961  ;;  %v2182_v53 = vld [vmem:[#allocation2 + $0x10] sm:$0xf] }
 0x477   : > { %11286 = vst [vmem:[#allocation23_spill] sm:$0xff] %v8706_v15  ;;  %11288 = vst [vmem:[#allocation24_spill] sm:$0xff] %v8712_v25 }
 0x47a   : > { %2141 = vrot.lane.b32.xlu0 %v8546_v56, %s11050_s0  ;;  %2805 = vrot.lane.b32.xlu1 %v8520_v50, %s11268_s7  ;;  %s11274_s0 = smov 84  }
 0x47e   : > { %2807 = vrot.lane.b32.xlu0 %v8533_v55, %s11268_s7  ;;  %2828 = vrot.lane.b32.xlu1 %v8520_v50, %s11269_s24 }
 0x482   : > { %2830 = vrot.lane.b32.xlu0 %v8533_v55, %s11269_s24  ;;  %2067 = vrot.lane.b32.xlu1 %v8540_v57, %s11044_s3 }
 0x486   : > { %2069 = vrot.lane.b32.xlu0 %v8546_v56, %s11044_s3  ;;  %2091 = vrot.lane.b32.xlu1 %v8540_v57, %s11042_s1  ;;  %s11273_s3 = smov 81  }
 0x48a   : > { %2093 = vrot.lane.b32.xlu0 %v8546_v56, %s11042_s1  ;;  %2759 = vrot.lane.b32.xlu1 %v8520_v50, %s11270_s29  ;;  %s11272_s1 = smov 82  }
 0x48e   : > { %2761 = vrot.lane.b32.xlu0 %v8533_v55, %s11270_s29  ;;  %2782 = vrot.lane.b32.xlu1 %v8520_v50, %s11271_s30 }
 0x492   : > { %2784 = vrot.lane.b32.xlu0 %v8533_v55, %s11271_s30  ;;  %2019 = vrot.lane.b32.xlu1 %v8540_v57, %s11046_s26 }
 0x496   : > { %2021 = vrot.lane.b32.xlu0 %v8546_v56, %s11046_s26  ;;  %2043 = vrot.lane.b32.xlu1 %v8540_v57, %s11048_s4  ;;  %s11052_s26 = smov 46  }
 0x49a   : > { %2045 = vrot.lane.b32.xlu0 %v8546_v56, %s11048_s4  ;;  %2711 = vrot.lane.b32.xlu1 %v8520_v50, %s11272_s1  ;;  %s11054_s4 = smov 45  }
 0x49e   : > { %2713 = vrot.lane.b32.xlu0 %v8533_v55, %s11272_s1  ;;  %2735 = vrot.lane.b32.xlu1 %v8520_v50, %s11273_s3 }
 0x4a2   : > { %2737 = vrot.lane.b32.xlu0 %v8533_v55, %s11273_s3  ;;  %1971 = vrot.lane.b32.xlu1 %v8540_v57, %s11052_s26 }
 0x4a6   : > { %1973 = vrot.lane.b32.xlu0 %v8546_v56, %s11052_s26  ;;  %1995 = vrot.lane.b32.xlu1 %v8540_v57, %s11054_s4  ;;  %s11275_s26 = smov 83  }
 0x4aa   : > { %1997 = vrot.lane.b32.xlu0 %v8546_v56, %s11054_s4  ;;  %2663 = vrot.lane.b32.xlu1 %v8520_v50, %s11274_s0  ;;  %s11060_s4 = smov 47  }
 0x4ae   : > { %2665 = vrot.lane.b32.xlu0 %v8533_v55, %s11274_s0  ;;  %2687 = vrot.lane.b32.xlu1 %v8520_v50, %s11275_s26 }
 0x4b2   : > { %2689 = vrot.lane.b32.xlu0 %v8533_v55, %s11275_s26  ;;  %1923 = vrot.lane.b32.xlu1 %v8540_v57, %s11268_s7 }
 0x4b6   : > { %1925 = vrot.lane.b32.xlu0 %v8546_v56, %s11268_s7  ;;  %1947 = vrot.lane.b32.xlu1 %v8540_v57, %s11060_s4 }
 0x4ba   : > { %1949 = vrot.lane.b32.xlu0 %v8546_v56, %s11060_s4  ;;  %2615 = vrot.lane.b32.xlu1 %v8520_v50, %s11276_s28  ;;  %s11280_s4 = smov 103  }
 0x4be   : > { %2617 = vrot.lane.b32.xlu0 %v8533_v55, %s11276_s28  ;;  %2639 = vrot.lane.b32.xlu1 %v8520_v50, %s11278_s2 }
 0x4c2   : > { %2641 = vrot.lane.b32.xlu0 %v8533_v55, %s11278_s2  ;;  %1875 = vrot.lane.b32.xlu1 %v8540_v57, %s11270_s29 }
 0x4c6   : > { %1877 = vrot.lane.b32.xlu0 %v8546_v56, %s11270_s29  ;;  %1899 = vrot.lane.b32.xlu1 %v8540_v57, %s11271_s30 }
 0x4ca   : > { %1901 = vrot.lane.b32.xlu0 %v8546_v56, %s11271_s30  ;;  %2567 = vrot.lane.b32.xlu1 %v8520_v50, %s11280_s4 }
 0x4ce   : > { %2569 = vrot.lane.b32.xlu0 %v8533_v55, %s11280_s4  ;;  %2591 = vrot.lane.b32.xlu1 %v8520_v50, %s11282_s6  ;;  %s11306_s4 = smov 45  }
 0x4d2   : > { %2593 = vrot.lane.b32.xlu0 %v8533_v55, %s11282_s6  ;;  %1827 = vrot.lane.b32.xlu1 %v8540_v57, %s11064_s8  ;;  %s11305_s6 = smov 46  }
 0x4d6   : > { %1829 = vrot.lane.b32.xlu0 %v8546_v56, %s11064_s8  ;;  %1851 = vrot.lane.b32.xlu1 %v8540_v57, %s11066_s9  ;;  %s11068_s8 = smov 69  }
 0x4da   : > { %1853 = vrot.lane.b32.xlu0 %v8546_v56, %s11066_s9  ;;  %2520 = vrot.lane.b32.xlu1 %v8520_v50, %s11287_s10  ;;  %s11070_s9 = smov 68  }
 0x4dc   : > { %v2853_v26 = vpop.permute.xlu1 %2852 }
 0x4dd   : > { %v2858_v31 = vrot.slane %v2853_v26, 4 }
 0x4de   : > { %2522 = vrot.lane.b32.xlu0 %v8533_v55, %s11287_s10  ;;  %2543 = vrot.lane.b32.xlu1 %v8520_v50, %s11289_s11 }
 0x4e0   : > { %v2855_v27 = vpop.permute.xlu0 %2854  ;;  %v2877_v28 = vpop.permute.xlu1 %2876 }
 0x4e1   : > { %v2859_v29 = vrot.slane %v2855_v27, 4  ;;  %v2882_v36 = vrot.slane %v2877_v28, 4 }
 0x4e2   : > { %2545 = vrot.lane.b32.xlu0 %v8533_v55, %s11289_s11  ;;  %1779 = vrot.lane.b32.xlu1 %v8540_v57, %s11068_s8 }
 0x4e3   : > { %v2864_v35 = vsel %vm795_vm2, %v2859_v29, %v2860_v30  ;;  %v2861_v38 = vsel %vm795_vm2, %v2858_v31, %v2859_v29 }
 0x4e4   : > { %v2879_v33 = vpop.permute.xlu0 %2878  ;;  %v2116_v34 = vpop.permute.xlu1 %2115  ;;  %v8733_v49 = vsel %vm11080_vm11, %v2855_v27, %v2864_v35  ;;  %v2863_v61 = vsel %vm11080_vm11, %v2853_v26, %v2861_v38  ;;  %vm11160_vm11 = vcmask 334848  }
 0x4e5   : > { %v2883_v37 = vrot.slane %v2879_v33, 4  ;;  %v2121_v35 = vrot.slane %v2116_v34, 4 }
 0x4e6   : > { %1781 = vrot.lane.b32.xlu0 %v8546_v56, %s11068_s8  ;;  %1803 = vrot.lane.b32.xlu1 %v8540_v57, %s11070_s9  ;;  %s11290_s8 = smov 59  }
 0x4e7   : > { %v2888_v47 = vsel %vm795_vm2, %v2883_v37, %v2884_v32  ;;  %v2885_v48 = vsel %vm795_vm2, %v2882_v36, %v2883_v37 }
 0x4e8   : > { %v8736_v51 = vsel %vm11075_vm12, %v2879_v33, %v2888_v47  ;;  %v8738_v52 = vpop.permute.xlu0 %2117  ;;  %v2140_v60 = vpop.permute.xlu1 %2139  ;;  %v2887_v29 = vsel %vm11075_vm12, %v2877_v28, %v2885_v48  ;;  %vm11079_vm12 = vcmask 506880   ;;  %v2111_v33 = vld [vmem:[#allocation2 + $0x10] sm:$0xf] }
 0x4e9   : > { %v11078_v31 = vrot.slane %v8738_v52, 4  ;;  %v7661_v32 = vcombine.low %v2863_v61, %v2887_v29  ;;  %v7662_v27 = vcombine.high %v2863_v61, %v2887_v29  ;;  %v2145_v36 = vrot.slane %v2140_v60, 4 }
 0x4ea   : > { %1805 = vrot.lane.b32.xlu0 %v8546_v56, %s11070_s9  ;;  %2900 = vrot.lane.b32.xlu1 %v8520_v50, %s11290_s8  ;;  %s11291_s9 = smov 107  }
 0x4eb   : > { %3631 = vmatprep.subr.bf16.mxu1 %v7662_v27  ;;  %v2124_v38 = vsel %vm795_vm2, %v2121_v35, %v11078_v31 }
 0x4ec   : > { %v8751_v26 = vpop.permute.xlu0 %2141  ;;  %v2806_v28 = vpop.permute.xlu1 %2805  ;;  %3632 = vmatpush1.bf16.msra.mxu1 %v7661_v32  ;;  %v2126_v29 = vsel %vm11158_vm13, %v2116_v34, %v2124_v38  ;;  %v7975_v38 = vld [vmem:[%s11293_s12 + $0xc] ss:$16 sps:$4 sm:$0xff]  }
 0x4ed   : > { %v11077_v37 = vrot.slane %v8751_v26, 4  ;;  %v2811_v30 = vrot.slane %v2806_v28, 4  ;;  %7670 = vmatprep.mubr.msk.bf16.mxu1 %vm1649_vm10, %v7975_v38 }
 0x4ee   : > { %2902 = vrot.lane.b32.xlu0 %v8533_v55, %s11290_s8  ;;  %2474 = vrot.lane.b32.xlu1 %v8520_v50, %s11291_s9  ;;  %s11304_s8 = smov 127  }
 0x4ef   : > { %v2148_v47 = vsel %vm795_vm2, %v2145_v36, %v11077_v37  ;;  %v2836_v36 = vrot.slane %v8580_v0, 4 }
 0x4f0   : > { %v2808_v48 = vpop.permute.xlu0 %2807  ;;  %v2829_v61 = vpop.permute.xlu1 %2828  ;;  %v2150_v32 = vsel %vm11161_vm14, %v2140_v60, %v2148_v47 }
 0x4f1   : > { %v2812_v27 = vrot.slane %v2808_v48, 4  ;;  %v7597_v17 = vcombine.low %v2126_v29, %v2150_v32  ;;  %v7598_v35 = vcombine.high %v2126_v29, %v2150_v32  ;;  %v2834_v29 = vrot.slane %v2829_v61, 4 }
 0x4f2   : > { %2476 = vrot.lane.b32.xlu0 %v8533_v55, %s11291_s9  ;;  %2497 = vrot.lane.b32.xlu1 %v8520_v50, %s11292_s13 }
 0x4f3   : > { %3580 = vmatprep.subr.bf16.mxu0 %v7598_v35  ;;  %v2816_v47 = vsel %vm795_vm2, %v2812_v27, %v2813_v8  ;;  %v2814_v1 = vsel %vm795_vm2, %v2811_v30, %v2812_v27 }
 0x4f4   : > { %v2831_v34 = vpop.permute.xlu0 %2830  ;;  %3581 = vmatpush1.bf16.msra.mxu0 %v7597_v17  ;;  %v2068_v60 = vpop.permute.xlu1 %2067  ;;  %v8784_v35 = vsel %vm11166_vm15, %v2808_v48, %v2816_v47  ;;  %v2815_v27 = vsel %vm11166_vm15, %v2806_v28, %v2814_v1 }
 0x4f5   : > { %v2835_v32 = vrot.slane %v2831_v34, 4  ;;  %v2073_v47 = vrot.slane %v2068_v60, 4 }
 0x4f6   : > { %2499 = vrot.lane.b32.xlu0 %v8533_v55, %s11292_s13  ;;  %2119 = vrot.lane.b32.xlu1 %v2111_v33, %s11294_s23  ;;  %v2063_v33 = vld [vmem:[#allocation2 + $0x10] sm:$0xf]  ;;  %s11113_s23 = smov 19  }
 0x4f7   : > { %v2840_v0 = vsel %vm795_vm2, %v2835_v32, %v2836_v36  ;;  %v2837_v17 = vsel %vm795_vm2, %v2834_v29, %v2835_v32  ;;  %v2135_v29 = vld [vmem:[#allocation2 + $0x10] sm:$0xf] }
 0x4f8   : > { %v8787_v8 = vsel %vm11079_vm12, %v2831_v34, %v2840_v0  ;;  %v8789_v37 = vpop.permute.xlu0 %2069  ;;  %v2092_v30 = vpop.permute.xlu1 %2091  ;;  %v2839_v31 = vsel %vm11079_vm12, %v2829_v61, %v2837_v17  ;;  %vm2077_vm12 = vcmask 343040  }
 0x4f9   : > { %v11084_v36 = vrot.slane %v8789_v37, 4  ;;  %v7657_v38 = vcombine.low %v2815_v27, %v2839_v31  ;;  %v7658_v48 = vcombine.high %v2815_v27, %v2839_v31  ;;  %v2097_v32 = vrot.slane %v2092_v30, 4 }
 0x4fa   : > { %2143 = vrot.lane.b32.xlu0 %v2135_v29, %s11295_s15  ;;  %2426 = vrot.lane.b32.xlu1 %v8520_v50, %s11296_s25 }
 0x4fb   : > { %3633 = vmatprep.subr.bf16.mxu1 %v7658_v48  ;;  %v2076_v0 = vsel %vm795_vm2, %v2073_v47, %v11084_v36  ;;  %v2767_v36 = vrot.slane %v8606_v45, 4 }
 0x4fc   : > { %v8801_v28 = vpop.permute.xlu0 %2093  ;;  %v2760_v61 = vpop.permute.xlu1 %2759  ;;  %3634 = vmatpush1.bf16.msra.mxu1 %v7657_v38  ;;  %v2078_v29 = vsel %vm2077_vm12, %v2068_v60, %v2076_v0 }
 0x4fd   : > { %v11088_v1 = vrot.slane %v8801_v28, 4  ;;  %v2765_v20 = vrot.slane %v2760_v61, 4 }
 0x4fe   : > { %2428 = vrot.lane.b32.xlu0 %v8533_v55, %s11296_s25  ;;  %2450 = vrot.lane.b32.xlu1 %v8520_v50, %s11297_s5 }
 0x4ff   : > { %v2100_v31 = vsel %vm795_vm2, %v2097_v32, %v11088_v1  ;;  %v2790_v32 = vrot.slane %v8600_v40, 4 }
 0x500   : > { %v2762_v17 = vpop.permute.xlu0 %2761  ;;  %v2783_v27 = vpop.permute.xlu1 %2782  ;;  %v2102_v38 = vsel %vm11160_vm11, %v2092_v30, %v2100_v31 }
 0x501   : > { %v2766_v48 = vrot.slane %v2762_v17, 4  ;;  %v7593_v47 = vcombine.low %v2078_v29, %v2102_v38  ;;  %v7594_v34 = vcombine.high %v2078_v29, %v2102_v38  ;;  %v2788_v31 = vrot.slane %v2783_v27, 4  ;;  %v2087_v38 = vld [vmem:[#allocation2 + $0x10] sm:$0xf] }
 0x502   : > { %2452 = vrot.lane.b32.xlu0 %v8533_v55, %s11297_s5  ;;  %2071 = vrot.lane.b32.xlu1 %v2063_v33, %s11298_s27 }
 0x503   : > { %3582 = vmatprep.subr.bf16.mxu0 %v7594_v34  ;;  %v2770_v0 = vsel %vm795_vm2, %v2766_v48, %v2767_v36  ;;  %v2768_v1 = vsel %vm795_vm2, %v2765_v20, %v2766_v48 }
 0x504   : > { %v2785_v60 = vpop.permute.xlu0 %2784  ;;  %3583 = vmatpush1.bf16.msra.mxu0 %v7593_v47  ;;  %v2020_v30 = vpop.permute.xlu1 %2019  ;;  %v8829_v33 = vsel %vm1885_vm9, %v2762_v17, %v2770_v0  ;;  %v2769_v20 = vsel %vm1885_vm9, %v2760_v61, %v2768_v1 }
 0x505   : > { %v2789_v29 = vrot.slane %v2785_v60, 4  ;;  %v2025_v0 = vrot.slane %v2020_v30, 4 }
 0x506   : > { %2095 = vrot.lane.b32.xlu0 %v2087_v38, %s11299_s17  ;;  %2378 = vrot.lane.b32.xlu1 %v8520_v50, %s11300_s21  ;;  %s11108_s17 = smov 2  }
 0x507   : > { %v2793_v45 = vsel %vm795_vm2, %v2789_v29, %v2790_v32  ;;  %v2791_v40 = vsel %vm795_vm2, %v2788_v31, %v2789_v29  ;;  %v2015_v29 = vld [vmem:[#allocation2 + $0x10] sm:$0xf] }
 0x508   : > { %v8832_v34 = vsel %vm11140_vm8, %v2785_v60, %v2793_v45  ;;  %v8834_v36 = vpop.permute.xlu0 %2021  ;;  %v2044_v47 = vpop.permute.xlu1 %2043  ;;  %v2792_v48 = vsel %vm11140_vm8, %v2783_v27, %v2791_v40  ;;  %v2039_v60 = vld [vmem:[#allocation2 + $0x10] sm:$0xf] }
 0x509   : > { %v11096_v32 = vrot.slane %v8834_v36, 4  ;;  %v7653_v23 = vcombine.low %v2769_v20, %v2792_v48  ;;  %v7654_v17 = vcombine.high %v2769_v20, %v2792_v48  ;;  %v2049_v27 = vrot.slane %v2044_v47, 4 }
 0x50a   : > { %2380 = vrot.lane.b32.xlu0 %v8533_v55, %s11300_s21  ;;  %2402 = vrot.lane.b32.xlu1 %v8520_v50, %s11301_s22 }
 0x50b   : > { %3635 = vmatprep.subr.bf16.mxu1 %v7654_v17  ;;  %v2028_v45 = vsel %vm795_vm2, %v2025_v0, %v11096_v32 }
 0x50c   : > { %v8847_v61 = vpop.permute.xlu0 %2045  ;;  %v2712_v1 = vpop.permute.xlu1 %2711  ;;  %3636 = vmatpush1.bf16.msra.mxu1 %v7653_v23  ;;  %v2030_v23 = vsel %vm11106_vm7, %v2020_v30, %v2028_v45  ;;  %vm11116_vm7 = vcmask 678912  }
 0x50d   : > { %v11104_v31 = vrot.slane %v8847_v61, 4  ;;  %v2717_v32 = vrot.slane %v2712_v1, 4 }
 0x50e   : > { %2404 = vrot.lane.b32.xlu0 %v8533_v55, %s11301_s22  ;;  %2023 = vrot.lane.b32.xlu1 %v2015_v29, %s11302_s19  ;;  %v2719_v29 = vrot.slane %v8626_v43, 4  ;;  %s11407_s19 = smov 45  }
 0x50f   : > { %v2052_v40 = vsel %vm795_vm2, %v2049_v27, %v11104_v31  ;;  %v2743_v27 = vrot.slane %v8620_v42, 4 }
 0x510   : > { %v2714_v20 = vpop.permute.xlu0 %2713  ;;  %v2736_v48 = vpop.permute.xlu1 %2735  ;;  %v2054_v17 = vsel %vm11105_vm6, %v2044_v47, %v2052_v40  ;;  %vm11111_vm6 = vcmask 687104  }
 0x511   : > { %v2718_v38 = vrot.slane %v2714_v20, 4  ;;  %v7589_v9 = vcombine.low %v2030_v23, %v2054_v17  ;;  %v7590_v0 = vcombine.high %v2030_v23, %v2054_v17  ;;  %v2741_v40 = vrot.slane %v2736_v48, 4  ;;  %v1967_v17 = vld [vmem:[#allocation2 + $0x10] sm:$0xf] }
 0x512   : > { %2047 = vrot.lane.b32.xlu0 %v2039_v60, %s11303_s20  ;;  %2355 = vrot.lane.b32.xlu1 %v8520_v50, %s11304_s8  ;;  %s11405_s20 = smov 43  }
 0x513   : > { %3584 = vmatprep.subr.bf16.mxu0 %v7590_v0  ;;  %v2723_v45 = vsel %vm795_vm2, %v2718_v38, %v2719_v29  ;;  %v2720_v60 = vsel %vm795_vm2, %v2717_v32, %v2718_v38 }
 0x514   : > { %v2738_v30 = vpop.permute.xlu0 %2737  ;;  %3585 = vmatpush1.bf16.msra.mxu0 %v7589_v9  ;;  %v1972_v47 = vpop.permute.xlu1 %1971  ;;  %v8874_v43 = vsel %vm11102_vm0, %v2714_v20, %v2723_v45  ;;  %v2722_v38 = vsel %vm11102_vm0, %v2712_v1, %v2720_v60  ;;  %vm11117_vm0 = vcmask 367616  }
 0x515   : > { %v2742_v23 = vrot.slane %v2738_v30, 4  ;;  %v1977_v1 = vrot.slane %v1972_v47, 4 }
 0x516   : > { %2357 = vrot.lane.b32.xlu0 %v8533_v55, %s11304_s8  ;;  %1975 = vrot.lane.b32.xlu1 %v1967_v17, %s11305_s6  ;;  %v1991_v17 = vld [vmem:[#allocation2 + $0x10] sm:$0xf]  ;;  %s11314_s6 = smov 69  }
 0x517   : > { %v2747_v50 = vsel %vm795_vm2, %v2742_v23, %v2743_v27  ;;  %v2744_v42 = vsel %vm795_vm2, %v2741_v40, %v2742_v23  ;;  %v1919_v55 = vld [vmem:[#allocation2 + $0x10] sm:$0xf] }
 0x518   : > { %v8877_v9 = vsel %vm11101_vm5, %v2738_v30, %v2747_v50  ;;  %v8879_v0 = vpop.permute.xlu0 %1973  ;;  %v1996_v29 = vpop.permute.xlu1 %1995  ;;  %v2746_v32 = vsel %vm11101_vm5, %v2736_v48, %v2744_v42  ;;  %vm1981_vm5 = vcmask 375808  }
 0x519   : > { %v11103_v27 = vrot.slane %v8879_v0, 4  ;;  %v7649_v40 = vcombine.low %v2722_v38, %v2746_v32  ;;  %v7650_v20 = vcombine.high %v2722_v38, %v2746_v32  ;;  %v2001_v23 = vrot.slane %v1996_v29, 4 }
 0x51a   : > { %1999 = vrot.lane.b32.xlu0 %v1991_v17, %s11306_s4  ;;  %2304 = vrot.lane.b32.xlu1 %v8540_v57, %s11108_s17  ;;  %s11315_s4 = smov 68  }
 0x51b   : > { %3637 = vmatprep.subr.bf16.mxu1 %v7650_v20  ;;  %v1980_v50 = vsel %vm795_vm2, %v1977_v1, %v11103_v27  ;;  %v2671_v27 = vrot.slane %v8632_v24, 4 }
 0x51c   : > { %v8891_v48 = vpop.permute.xlu0 %1997  ;;  %v2664_v45 = vpop.permute.xlu1 %2663  ;;  %3638 = vmatpush1.bf16.msra.mxu1 %v7649_v40  ;;  %v1982_v17 = vsel %vm1981_vm5, %v1972_v47, %v1980_v50 }
 0x51d   : > { %v11107_v60 = vrot.slane %v8891_v48, 4  ;;  %v2669_v31 = vrot.slane %v2664_v45, 4 }
 0x51e   : > { %2306 = vrot.lane.b32.xlu0 %v8546_v56, %s11108_s17  ;;  %2328 = vrot.lane.b32.xlu1 %v8540_v57, %s11307_s18  ;;  %s11308_s17 = smov 47  }
 0x51f   : > { %v2004_v42 = vsel %vm795_vm2, %v2001_v23, %v11107_v60  ;;  %v2695_v23 = vrot.slane %v8646_v10, 4 }
 0x520   : > { %v2666_v38 = vpop.permute.xlu0 %2665  ;;  %v2688_v32 = vpop.permute.xlu1 %2687  ;;  %v2006_v40 = vsel %vm11117_vm0, %v1996_v29, %v2004_v42  ;;  %vm11126_vm0 = vcmask 695296  }
 0x521   : > { %v2670_v20 = vrot.slane %v2666_v38, 4  ;;  %v7585_v1 = vcombine.low %v1982_v17, %v2006_v40  ;;  %v7586_v30 = vcombine.high %v1982_v17, %v2006_v40  ;;  %v2693_v42 = vrot.slane %v2688_v32, 4  ;;  %v1943_v40 = vld [vmem:[#allocation2 + $0x10] sm:$0xf] }
 0x522   : > { %2330 = vrot.lane.b32.xlu0 %v8546_v56, %s11307_s18  ;;  %1927 = vrot.lane.b32.xlu1 %v1919_v55, %s11268_s7 }
 0x523   : > { %3586 = vmatprep.subr.bf16.mxu0 %v7586_v30  ;;  %v2675_v50 = vsel %vm795_vm2, %v2670_v20, %v2671_v27  ;;  %v2672_v60 = vsel %vm795_vm2, %v2669_v31, %v2670_v20 }
 0x524   : > { %v2690_v47 = vpop.permute.xlu0 %2689  ;;  %3587 = vmatpush1.bf16.msra.mxu0 %v7585_v1  ;;  %v1924_v29 = vpop.permute.xlu1 %1923  ;;  %v8919_v55 = vsel %vm11111_vm6, %v2666_v38, %v2675_v50  ;;  %v2674_v31 = vsel %vm11111_vm6, %v2664_v45, %v2672_v60  ;;  %vm11165_vm6 = vcmask 384000  }
 0x525   : > { %v2694_v17 = vrot.slane %v2690_v47, 4  ;;  %v1929_v45 = vrot.slane %v1924_v29, 4 }
 0x526   : > { %1951 = vrot.lane.b32.xlu0 %v1943_v40, %s11308_s17  ;;  %2256 = vrot.lane.b32.xlu1 %v8540_v57, %s11113_s23  ;;  %s11118_s17 = smov 3  }
 0x527   : > { %v2699_v24 = vsel %vm795_vm2, %v2694_v17, %v2695_v23  ;;  %v2696_v10 = vsel %vm795_vm2, %v2693_v42, %v2694_v17  ;;  %v1871_v17 = vld [vmem:[#allocation2 + $0x10] sm:$0xf] }
 0x528   : > { %v8922_v27 = vsel %vm11116_vm7, %v2690_v47, %v2699_v24  ;;  %v8924_v30 = vpop.permute.xlu0 %1925  ;;  %v1948_v1 = vpop.permute.xlu1 %1947  ;;  %v2698_v20 = vsel %vm11116_vm7, %v2688_v32, %v2696_v10  ;;  %v1895_v47 = vld [vmem:[#allocation2 + $0x10] sm:$0xf]  ;;  %vm11127_vm7 = vcmask 703488  }
 0x529   : > { %v11115_v23 = vrot.slane %v8924_v30, 4  ;;  %v7645_v15 = vcombine.low %v2674_v31, %v2698_v20  ;;  %v7646_v38 = vcombine.high %v2674_v31, %v2698_v20  ;;  %v1953_v50 = vrot.slane %v1948_v1, 4 }
 0x52a   : > { %2258 = vrot.lane.b32.xlu0 %v8546_v56, %s11113_s23  ;;  %2280 = vrot.lane.b32.xlu1 %v8540_v57, %s11118_s17  ;;  %s11309_s23 = smov 21  }
 0x52b   : > { %3639 = vmatprep.subr.bf16.mxu1 %v7646_v38  ;;  %v1932_v24 = vsel %vm795_vm2, %v1929_v45, %v11115_v23 }
 0x52c   : > { %v8937_v60 = vpop.permute.xlu0 %1949  ;;  %v2616_v32 = vpop.permute.xlu1 %2615  ;;  %3640 = vmatpush1.bf16.msra.mxu1 %v7645_v15  ;;  %v1934_v15 = vsel %vm11166_vm15, %v1924_v29, %v1932_v24 }
 0x52d   : > { %v11120_v42 = vrot.slane %v8937_v60, 4  ;;  %v2621_v23 = vrot.slane %v2616_v32, 4 }
 0x52e   : > { %2282 = vrot.lane.b32.xlu0 %v8546_v56, %s11118_s17  ;;  %1879 = vrot.lane.b32.xlu1 %v1871_v17, %s11270_s29  ;;  %v2623_v17 = vrot.slane %v8640_v7, 4  ;;  %s11122_s17 = smov 20  }
 0x52f   : > { %v1956_v10 = vsel %vm795_vm2, %v1953_v50, %v11120_v42  ;;  %v2647_v50 = vrot.slane %v8654_v13, 4 }
 0x530   : > { %v2618_v31 = vpop.permute.xlu0 %2617  ;;  %v2640_v20 = vpop.permute.xlu1 %2639  ;;  %v1958_v38 = vsel %vm11165_vm6, %v1948_v1, %v1956_v10 }
 0x531   : > { %v2622_v40 = vrot.slane %v2618_v31, 4  ;;  %v7581_v25 = vcombine.low %v1934_v15, %v1958_v38  ;;  %v7582_v45 = vcombine.high %v1934_v15, %v1958_v38  ;;  %v2645_v10 = vrot.slane %v2640_v20, 4 }
 0x532   : > { %1903 = vrot.lane.b32.xlu0 %v1895_v47, %s11271_s30  ;;  %2209 = vrot.lane.b32.xlu1 %v8540_v57, %s11309_s23 }
 0x533   : > { %3588 = vmatprep.subr.bf16.mxu0 %v7582_v45  ;;  %v2627_v24 = vsel %vm795_vm2, %v2622_v40, %v2623_v17  ;;  %v2624_v47 = vsel %vm795_vm2, %v2621_v23, %v2622_v40 }
 0x534   : > { %v2642_v29 = vpop.permute.xlu0 %2641  ;;  %3589 = vmatpush1.bf16.msra.mxu0 %v7581_v25  ;;  %v1876_v1 = vpop.permute.xlu1 %1875  ;;  %v8965_v25 = vsel %vm11127_vm7, %v2618_v31, %v2627_v24  ;;  %v2626_v23 = vsel %vm11127_vm7, %v2616_v32, %v2624_v47  ;;  %vm11133_vm7 = vcmask 711680  }
 0x535   : > { %v2646_v15 = vrot.slane %v2642_v29, 4  ;;  %v1881_v24 = vrot.slane %v1876_v1, 4 }
 0x536   : > { %2211 = vrot.lane.b32.xlu0 %v8546_v56, %s11309_s23  ;;  %2232 = vrot.lane.b32.xlu1 %v8540_v57, %s11122_s17 }
 0x537   : > { %v2651_v7 = vsel %vm795_vm2, %v2646_v15, %v2647_v50  ;;  %v2648_v13 = vsel %vm795_vm2, %v2645_v10, %v2646_v15 }
 0x538   : > { %v8968_v38 = vsel %vm11126_vm0, %v2642_v29, %v2651_v7  ;;  %v8970_v45 = vpop.permute.xlu0 %1877  ;;  %v1900_v40 = vpop.permute.xlu1 %1899  ;;  %v2650_v17 = vsel %vm11126_vm0, %v2640_v20, %v2648_v13  ;;  %v1847_v7 = vld [vmem:[#allocation2 + $0x10] sm:$0xf]  ;;  %vm11134_vm0 = vcmask 842752  }
 0x539   : > { %v11129_v50 = vrot.slane %v8970_v45, 4  ;;  %v7641_v10 = vcombine.low %v2626_v23, %v2650_v17  ;;  %v7642_v31 = vcombine.high %v2626_v23, %v2650_v17  ;;  %v1905_v15 = vrot.slane %v1900_v40, 4 }
 0x53a   : > { %2234 = vrot.lane.b32.xlu0 %v8546_v56, %s11122_s17  ;;  %1831 = vrot.lane.b32.xlu1 %v1823_v22, %s11310_s16  ;;  %s11311_s17 = smov 66   ;;  %s11312_s16 = smov 23  }
 0x53b   : > { %3641 = vmatprep.subr.bf16.mxu1 %v7642_v31  ;;  %v1884_v13 = vsel %vm795_vm2, %v1881_v24, %v11129_v50  ;;  %v2575_v24 = vrot.slane %v8652_v12, 4  ;;  %v4779_v50 = vld [vmem:[#allocation2 + $0x14] sm:$0xf] }
 0x53c   : > { %v8982_v32 = vpop.permute.xlu0 %1901  ;;  %v2568_v20 = vpop.permute.xlu1 %2567  ;;  %3642 = vmatpush1.bf16.msra.mxu1 %v7641_v10  ;;  %v1886_v10 = vsel %vm1885_vm9, %v1876_v1, %v1884_v13  ;;  %v2599_v1 = vrot.slane %v8666_v16, 4  ;;  %v4710_v16 = vld [vmem:[#allocation2 + $0x14] sm:$0xf] }
 0x53d   : > { %v11128_v47 = vrot.slane %v8982_v32, 4 }
 0x53e   : > { %1855 = vrot.lane.b32.xlu0 %v1847_v7, %s11311_s17  ;;  %2163 = vrot.lane.b32.xlu1 %v8540_v57, %s11312_s16  ;;  %s11313_s17 = smov 22   ;;  %v2573_v7 = vrot.slane %v2568_v20, 4 }
 0x53f   : > { %v1908_v22 = vsel %vm795_vm2, %v1905_v15, %v11128_v47  ;;  %v9004_v15 = vld [vmem:[%s11293_s12 + $0x4] ss:$16 sps:$4 sm:$0xff]  }
 0x540   : > { %v2570_v23 = vpop.permute.xlu0 %2569  ;;  %v2592_v17 = vpop.permute.xlu1 %2591  ;;  %v1910_v31 = vsel %vm11140_vm8, %v1900_v40, %v1908_v22  ;;  %3612 = vmatprep.mubr.bf16.mxu0 %v9004_v15  ;;  %v4119_v47 = vld [vmem:[#allocation2 + $0x14] sm:$0xf]  ;;  %vm11142_vm8 = vcmask 850944  }
 0x541   : > { %v2574_v42 = vrot.slane %v2570_v23, 4  ;;  %v7577_v29 = vcombine.low %v1886_v10, %v1910_v31  ;;  %v7578_v44 = vcombine.high %v1886_v10, %v1910_v31  ;;  %v2597_v10 = vrot.slane %v2592_v17, 4  ;;  %v1775_v31 = vld [vmem:[#allocation2 + $0x10] sm:$0xf] }
 0x542   : > { %2165 = vrot.lane.b32.xlu0 %v8546_v56, %s11312_s16  ;;  %2186 = vrot.lane.b32.xlu1 %v8540_v57, %s11313_s17 }
 0x543   : > { %3590 = vmatprep.subr.bf16.mxu0 %v7578_v44  ;;  %v2579_v22 = vsel %vm795_vm2, %v2574_v42, %v2575_v24  ;;  %v2576_v12 = vsel %vm795_vm2, %v2573_v7, %v2574_v42 }
 0x544   : > { %v2594_v40 = vpop.permute.xlu0 %2593  ;;  %3591 = vmatpush1.bf16.msra.mxu0 %v7577_v29  ;;  %v1828_v13 = vpop.permute.xlu1 %1827  ;;  %v9016_v24 = vsel %vm11134_vm0, %v2570_v23, %v2579_v22  ;;  %v4733_v22 = vld [vmem:[#allocation2 + $0x14] sm:$0xf] }
 0x545   : > { %v2598_v57 = vrot.slane %v2594_v40, 4 }
 0x546   : > { %2188 = vrot.lane.b32.xlu0 %v8546_v56, %s11313_s17  ;;  %1783 = vrot.lane.b32.xlu1 %v1775_v31, %s11314_s6  ;;  %v2578_v56 = vsel %vm11134_vm0, %v2568_v20, %v2576_v12  ;;  %v1833_v20 = vrot.slane %v1828_v13, 4  ;;  %v4073_v12 = vld [vmem:[#allocation2 + $0x14] sm:$0xf]  ;;  %vm11144_vm0 = vcmask 539648   ;;  %s11319_s6 = smov 20  }
 0x547   : > { %v2603_v44 = vsel %vm795_vm2, %v2598_v57, %v2599_v1  ;;  %v2600_v29 = vsel %vm795_vm2, %v2597_v10, %v2598_v57  ;;  %v1799_v57 = vld [vmem:[#allocation2 + $0x10] sm:$0xf] }
 0x548   : > { %v9019_v2 = vsel %vm11133_vm7, %v2594_v40, %v2603_v44  ;;  %v9021_v42 = vpop.permute.xlu0 %1829  ;;  %v1852_v7 = vpop.permute.xlu1 %1851  ;;  %v2602_v31 = vsel %vm11133_vm7, %v2592_v17, %v2600_v29  ;;  %v7965_v40 = vpack.i.bf16 %v4779_v50, %v4119_v47  ;;  %v4687_v17 = vld [vmem:[#allocation2 + $0x14] sm:$0xf]  ;;  %vm11169_vm7 = vcmask 547840  }
 0x549   : > { %v7637_v11 = vcombine.low %v2578_v56, %v2602_v31  ;;  %v7638_v23 = vcombine.high %v2578_v56, %v2602_v31  ;;  %v1857_v10 = vrot.slane %v1852_v7, 4  ;;  %v7970_v47 = vpack.i.bf16 %v4687_v17, %v4073_v12  ;;  %v4940_v31 = vld [vmem:[#allocation2 + $0x14] sm:$0xf] }
 0x54a   : > { %1807 = vrot.lane.b32.xlu0 %v1799_v57, %s11315_s4  ;;  %4718 = vrot.lane.b32.xlu1 %v4710_v16, %s11300_s21  ;;  %v11316_v16 = vrot.slane %v9021_v42, 4  ;;  %v7958_v56 = vunpack.i.l.bf16 %v8660_v14  ;;  %v4894_v12 = vld [vmem:[#allocation2 + $0x14] sm:$0xf]  ;;  %v2551_v17 = vrot.slane %v8674_v19, 4  ;;  %s11317_s4 = smov 3  }
 0x54b   : > { %3643 = vmatprep.subr.bf16.mxu1 %v7638_v23 }
 0x54c   : > { %v9032_v29 = vpop.permute.xlu0 %1853  ;;  %v2521_v1 = vpop.permute.xlu1 %2520  ;;  %3644 = vmatpush1.bf16.msra.mxu1 %v7637_v11  ;;  %v1836_v50 = vsel %vm795_vm2, %v1833_v20, %v11316_v16 }
 0x54d   : > { %v11141_v57 = vrot.slane %v9032_v29, 4  ;;  %v1838_v59 = vsel %vm11169_vm7, %v1828_v13, %v1836_v50 }
 0x54e   : > { %7966 = vrot.lane.b32.xlu0 %v7965_v40, %s11292_s13  ;;  %4741 = vrot.lane.b32.xlu1 %v4733_v22, %s11297_s5  ;;  %v2528_v40 = vrot.slane %v7958_v56, 4  ;;  %v2526_v22 = vrot.slane %v2521_v1, 4 }
 0x54f   : > { %v1860_v23 = vsel %vm795_vm2, %v1857_v10, %v11141_v57 }
 0x550   : > { %v2523_v11 = vpop.permute.xlu0 %2522  ;;  %v2544_v44 = vpop.permute.xlu1 %2543  ;;  %v1862_v58 = vsel %vm11144_vm0, %v1852_v7, %v1860_v23  ;;  %v2324_v23 = vld [vmem:[#allocation2 + $0x10] sm:$0xf]  ;;  %vm2910_vm0 = vcmask 482304  }
 0x551   : > { %v2527_v20 = vrot.slane %v2523_v11, 4  ;;  %v7573_v16 = vcombine.low %v1838_v59, %v1862_v58  ;;  %v7574_v21 = vcombine.high %v1838_v59, %v1862_v58  ;;  %v2549_v7 = vrot.slane %v2544_v44, 4 }
 0x552   : > { %7971 = vrot.lane.b32.xlu0 %v7970_v47, %s11304_s8  ;;  %4948 = vrot.lane.b32.xlu1 %v4940_v31, %s11272_s1 }
 0x553   : > { %3592 = vmatprep.subr.bf16.mxu0 %v7574_v21  ;;  %v2531_v13 = vsel %vm795_vm2, %v2527_v20, %v2528_v40  ;;  %v2529_v58 = vsel %vm795_vm2, %v2526_v22, %v2527_v20  ;;  %v4917_v21 = vld [vmem:[#allocation2 + $0x14] sm:$0xf] }
 0x554   : > { %v2546_v10 = vpop.permute.xlu0 %2545  ;;  %3593 = vmatpush1.bf16.msra.mxu0 %v7573_v16  ;;  %v1780_v57 = vpop.permute.xlu1 %1779  ;;  %v9056_v47 = vsel %vm11143_vm1, %v2523_v11, %v2531_v13  ;;  %v2530_v20 = vsel %vm11143_vm1, %v2521_v1, %v2529_v58  ;;  %vm1813_vm1 = vcmask 556032  }
 0x555   : > { %v2550_v50 = vrot.slane %v2546_v10, 4  ;;  %v1785_v13 = vrot.slane %v1780_v57, 4 }
 0x556   : > { %4902 = vrot.lane.b32.xlu0 %v4894_v12, %s11274_s0  ;;  %2332 = vrot.lane.b32.xlu1 %v2324_v23, %s11307_s18  ;;  %s11321_s0 = smov 61  }
 0x557   : > { %v2555_v59 = vsel %vm795_vm2, %v2550_v50, %v2551_v17  ;;  %v2552_v19 = vsel %vm795_vm2, %v2549_v7, %v2550_v50  ;;  %v2276_v17 = vld [vmem:[#allocation2 + $0x10] sm:$0xf] }
 0x558   : > { %v9059_v56 = vsel %vm11142_vm8, %v2546_v10, %v2555_v59  ;;  %v9061_v31 = vpop.permute.xlu0 %1781  ;;  %v1804_v16 = vpop.permute.xlu1 %1803  ;;  %v2554_v40 = vsel %vm11142_vm8, %v2544_v44, %v2552_v19  ;;  %v2300_v50 = vld [vmem:[#allocation2 + $0x10] sm:$0xf]  ;;  %vm1789_vm8 = vcmask 564224   ;;  %v6442_v19 = vld [vmem:[#allocation2 + $0x14] sm:$0xf] }
 0x559   : > { %v11145_v12 = vrot.slane %v9061_v31, 4  ;;  %v7633_v7 = vcombine.low %v2530_v20, %v2554_v40  ;;  %v7634_v11 = vcombine.high %v2530_v20, %v2554_v40  ;;  %v1809_v23 = vrot.slane %v1804_v16, 4  ;;  %v2228_v59 = vld [vmem:[#allocation2 + $0x10] sm:$0xf] }
 0x55a   : > { %4925 = vrot.lane.b32.xlu0 %v4917_v21, %s11275_s26  ;;  %2284 = vrot.lane.b32.xlu1 %v2276_v17, %s11317_s4  ;;  %s11318_s4 = smov 2   ;;  %v2252_v10 = vld [vmem:[#allocation2 + $0x10] sm:$0xf]  ;;  %s11320_s26 = smov 19  }
 0x55b   : > { %3645 = vmatprep.subr.bf16.mxu1 %v7634_v11  ;;  %v1788_v21 = vsel %vm795_vm2, %v1785_v13, %v11145_v12 }
 0x55c   : > { %v9072_v1 = vpop.permute.xlu0 %1805  ;;  %v2901_v44 = vpop.permute.xlu1 %2900  ;;  %3646 = vmatpush1.bf16.msra.mxu1 %v7633_v7  ;;  %v1790_v7 = vsel %vm1789_vm8, %v1780_v57, %v1788_v21 }
 0x55d   : > { %v11148_v58 = vrot.slane %v9072_v1, 4  ;;  %v2906_v22 = vrot.slane %v2901_v44, 4 }
 0x55e   : > { %2308 = vrot.lane.b32.xlu0 %v2300_v50, %s11318_s4  ;;  %2236 = vrot.lane.b32.xlu1 %v2228_v59, %s11319_s6  ;;  %v6074_v59 = vld [vmem:[#allocation2 + $0x14] sm:$0xf] }
 0x55f   : > { %v1812_v20 = vsel %vm795_vm2, %v1809_v23, %v11148_v58 }
 0x560   : > { %v9083_v40 = vpop.permute.xlu0 %2902  ;;  %v2475_v17 = vpop.permute.xlu1 %2474  ;;  %v1814_v11 = vsel %vm1813_vm1, %v1804_v16, %v1812_v20  ;;  %v2205_v20 = vld [vmem:[#allocation2 + $0x10] sm:$0xf] }
 0x561   : > { %v11149_v13 = vrot.slane %v9083_v40, 4  ;;  %v7569_v50 = vcombine.low %v1790_v7, %v1814_v11  ;;  %v7570_v12 = vcombine.high %v1790_v7, %v1814_v11  ;;  %v2923_v7 = vld [vmem:[%s11293_s12 + $0x28] sm:$0xff]  ;;  %v2505_v11 = vrot.slane %v8572_v62, 4  ;;  %v2159_v62 = vld [vmem:[#allocation2 + $0x10] sm:$0xf] }
 0x562   : > { %2260 = vrot.lane.b32.xlu0 %v2252_v10, %s11320_s26  ;;  %6450 = vrot.lane.b32.xlu1 %v6442_v19, %s11321_s0  ;;  %s11349_s26 = smov 60  }
 0x563   : > { %v2909_v23 = vsel %vm795_vm2, %v2906_v22, %v11149_v13  ;;  %3594 = vmatprep.subr.bf16.mxu0 %v7570_v12  ;;  %v2482_v22 = vrot.slane %v8574_v63, 4  ;;  %v2480_v12 = vrot.slane %v2475_v17, 4 }
 0x564   : > { %v2477_v58 = vpop.permute.xlu0 %2476  ;;  %3595 = vmatpush1.bf16.msra.mxu0 %v7569_v50  ;;  %v2498_v57 = vpop.permute.xlu1 %2497  ;;  %v2911_v16 = vsel %vm2910_vm0, %v2901_v44, %v2909_v23 }
 0x565   : > { %v2481_v21 = vrot.slane %v2477_v58, 4  ;;  %v7666_v10 = vcombine.high %v2911_v16, %v2911_v16  ;;  %v7665_v19 = vcombine.low %v2911_v16, %v2911_v16  ;;  %v2503_v50 = vrot.slane %v2498_v57, 4 }
 0x566   : > { %2213 = vrot.lane.b32.xlu0 %v2205_v20, %s11309_s23  ;;  %6082 = vrot.lane.b32.xlu1 %v6074_v59, %s11291_s9  ;;  %v9106_v20 = vld [vmem:[%s11293_s12 + $0x8] ss:$16 sps:$4 sm:$0xff]   ;;  %v9108_v59 = vcombine.high %v2923_v7, %v2923_v7 }
 0x567   : > { %7669 = vmatprep.subr.msk.bf16.mxu1 %vm795_vm2, %v7666_v10  ;;  %v3569_v23 = vsel %vm795_vm2, %v7665_v19, 0  ;;  %v2485_v16 = vsel %vm795_vm2, %v2481_v21, %v2482_v22  ;;  %v2483_v10 = vsel %vm795_vm2, %v2480_v12, %v2481_v21  ;;  %v11322_v12 = vrot.slane %v8738_v52, 4 }
 0x568   : > { %v2500_v44 = vpop.permute.xlu0 %2499  ;;  %v2120_v13 = vpop.permute.xlu1 %2119  ;;  %3662 = vmatpush2.bf16.msra.mxu1 %v3569_v23  ;;  %v9117_v39 = vsel %vm11156_vm3, %v2477_v58, %v2485_v16  ;;  %v2484_v46 = vsel %vm11156_vm3, %v2475_v17, %v2483_v10  ;;  %vm2460_vm3 = vcmask 883712  }
 0x569   : > { %v2504_v63 = vrot.slane %v2500_v44, 4  ;;  %v2123_v14 = vrot.slane %v2120_v13, 4 }
 0x56a   : > { %2167 = vrot.lane.b32.xlu0 %v2159_v62, %s11312_s16  ;;  %2190 = vrot.lane.b32.xlu1 %v2182_v53, %s11313_s17 }
 0x56b   : > { %v2508_v19 = vsel %vm795_vm2, %v2504_v63, %v2505_v11  ;;  %v2506_v54 = vsel %vm795_vm2, %v2503_v50, %v2504_v63  ;;  %3664 = vmatmul.mubr.bf16.vlgmr.msra.gmra.mxu1 %v9106_v20  ;;  %v2127_v11 = vsel %vm795_vm2, %v11322_v12, %v2123_v14 }
 0x56c   : > { %v9120_v22 = vsel %vm11155_vm4, %v2500_v44, %v2508_v19  ;;  %v2144_v23 = vpop.permute.xlu0 %2143  ;;  %v2427_v13 = vpop.permute.xlu1 %2426  ;;  %v2507_v21 = vsel %vm11155_vm4, %v2498_v57, %v2506_v54  ;;  %7671 = vmatprep.mubr.msk.bf16.mxu1 %vm1649_vm10, %v9108_v59  ;;  %v11323_v54 = vrot.slane %v8751_v26, 4  ;;  %v2128_v62 = vsel %vm11158_vm13, %v8738_v52, %v2127_v11 }
 0x56d   : > { %v7631_v53 = vcombine.low %v9117_v39, %v9120_v22  ;;  %v2147_v58 = vrot.slane %v2144_v23, 4  ;;  %v7629_v50 = vcombine.low %v2484_v46, %v2507_v21  ;;  %v7630_v44 = vcombine.high %v2484_v46, %v2507_v21 }
 0x56e   : > { %v7632_v17 = vcombine.high %v9117_v39, %v9120_v22  ;;  %v9141_v23 = vcombine.low %v2923_v7, %v2923_v7  ;;  %v2434_v21 = vrot.slane %v8594_v41, 4  ;;  %v2432_v12 = vrot.slane %v2427_v13, 4 }
 0x56f   : > { %v2151_v57 = vsel %vm795_vm2, %v11323_v54, %v2147_v58  ;;  %3596 = vmatprep.subr.bf16.mxu0 %v7630_v44  ;;  %v2458_v58 = vrot.slane %v8592_v3, 4  ;;  %vm11157_vm4 = vcmask 891904   ;;  %vm11159_vm13 = vcmask 1022976  }
 0x570   : > { %v2429_v16 = vpop.permute.xlu0 %2428  ;;  %v2451_v63 = vpop.permute.xlu1 %2450  ;;  %v2152_v14 = vsel %vm11161_vm14, %v8751_v26, %v2151_v57  ;;  %3597 = vmatpush2.bf16.msra.mxu0 %v7629_v50  ;;  %vm11330_vm14 = vcmask 1039360   ;;  %v11354_v39 = vcombine.low %v8829_v33, %v8832_v34 }
 0x571   : > { %v2433_v10 = vrot.slane %v2429_v16, 4  ;;  %v7599_v19 = vcombine.low %v2128_v62, %v2152_v14  ;;  %v7600_v46 = vcombine.high %v2128_v62, %v2152_v14  ;;  %v2456_v44 = vrot.slane %v2451_v63, 4 }
 0x573   : > { %3682 = vmatprep.subr.bf16.mxu1 %v7600_v46  ;;  %v2438_v26 = vsel %vm795_vm2, %v2433_v10, %v2434_v21  ;;  %v2435_v57 = vsel %vm795_vm2, %v2432_v12, %v2433_v10  ;;  %3674 = vmatmul.mubr.bf16.gmra.mxu1 %v9141_v23 }
 0x574   : > { %v2453_v54 = vpop.permute.xlu0 %2452  ;;  %3683 = vmatpush1.bf16.msra.mxu1 %v7599_v19  ;;  %v2072_v52 = vpop.permute.xlu1 %2071  ;;  %3714 = vmatprep.mubr.bf16.mxu1 %v9004_v15  ;;  %v9152_v7 = vsel %vm11157_vm4, %v2429_v16, %v2438_v26  ;;  %v2437_v46 = vsel %vm11157_vm4, %v2427_v13, %v2435_v57  ;;  %v11324_v15 = vrot.slane %v8789_v37, 4  ;;  %vm2388_vm4 = vcmask 1031168  }
 0x575   : > { %v2457_v11 = vrot.slane %v2453_v54, 4  ;;  %v2075_v50 = vrot.slane %v2072_v52, 4  ;;  %v11325_v52 = vrot.slane %v8801_v28, 4 }
 0x577   : > { %v2462_v41 = vsel %vm795_vm2, %v2457_v11, %v2458_v58  ;;  %v2459_v3 = vsel %vm795_vm2, %v2456_v44, %v2457_v11  ;;  %v2079_v12 = vsel %vm795_vm2, %v11324_v15, %v2075_v50 }
 0x578   : > { %v9155_v62 = vsel %vm2460_vm3, %v2453_v54, %v2462_v41  ;;  %v2096_v14 = vpop.permute.xlu0 %2095  ;;  %v2379_v19 = vpop.permute.xlu1 %2378  ;;  %v2461_v10 = vsel %vm2460_vm3, %v2451_v63, %v2459_v3  ;;  %v2080_v11 = vsel %vm2077_vm12, %v8789_v37, %v2079_v12 }
 0x579   : > { %v7627_v21 = vcombine.low %v9152_v7, %v9155_v62  ;;  %v2099_v58 = vrot.slane %v2096_v14, 4  ;;  %v7625_v44 = vcombine.low %v2437_v46, %v2461_v10  ;;  %v7626_v16 = vcombine.high %v2437_v46, %v2461_v10 }
 0x57a   : > { %v7628_v54 = vcombine.high %v9152_v7, %v9155_v62  ;;  %v2386_v14 = vrot.slane %v8614_v5, 4  ;;  %v2384_v46 = vrot.slane %v2379_v19, 4  ;;  %v2410_v10 = vrot.slane %v8612_v4, 4 }
 0x57b   : > { %v2103_v26 = vsel %vm795_vm2, %v11325_v52, %v2099_v58  ;;  %3598 = vmatprep.subr.bf16.mxu0 %v7626_v16 }
 0x57c   : > { %v2381_v13 = vpop.permute.xlu0 %2380  ;;  %v2403_v63 = vpop.permute.xlu1 %2402  ;;  %v2104_v57 = vsel %vm11160_vm11, %v8801_v28, %v2103_v26  ;;  %3599 = vmatpush2.bf16.msra.mxu0 %v7625_v44  ;;  %vm11329_vm11 = vcmask 351232  }
 0x57d   : > { %v2385_v50 = vrot.slane %v2381_v13, 4  ;;  %v7595_v41 = vcombine.low %v2080_v11, %v2104_v57  ;;  %v7596_v3 = vcombine.high %v2080_v11, %v2104_v57  ;;  %v2408_v15 = vrot.slane %v2403_v63, 4 }
 0x57f   : > { %3684 = vmatprep.subr.bf16.mxu1 %v7596_v3  ;;  %v2390_v37 = vsel %vm795_vm2, %v2385_v50, %v2386_v14  ;;  %v2387_v44 = vsel %vm795_vm2, %v2384_v46, %v2385_v50  ;;  %v11326_v50 = vrot.slane %v8834_v36, 4  ;;  %v11336_v14 = vrot.slane %v8937_v60, 4 }
 0x580   : > { %v2405_v58 = vpop.permute.xlu0 %2404  ;;  %3685 = vmatpush1.bf16.msra.mxu1 %v7595_v41  ;;  %v2024_v16 = vpop.permute.xlu1 %2023  ;;  %v9180_v26 = vsel %vm2388_vm4, %v2381_v13, %v2390_v37  ;;  %v2389_v41 = vsel %vm2388_vm4, %v2379_v19, %v2387_v44 }
 0x581   : > { %v2409_v12 = vrot.slane %v2405_v58, 4  ;;  %v2027_v28 = vrot.slane %v2024_v16, 4  ;;  %v11327_v16 = vrot.slane %v8847_v61, 4 }
 0x583   : > { %v2414_v52 = vsel %vm795_vm2, %v2409_v12, %v2410_v10  ;;  %v2411_v5 = vsel %vm795_vm2, %v2408_v15, %v2409_v12  ;;  %v2031_v46 = vsel %vm795_vm2, %v11326_v50, %v2027_v28 }
 0x584   : > { %v9183_v4 = vsel %vm11159_vm13, %v2405_v58, %v2414_v52  ;;  %v2048_v11 = vpop.permute.xlu0 %2047  ;;  %v2356_v57 = vpop.permute.xlu1 %2355  ;;  %v2413_v3 = vsel %vm11159_vm13, %v2403_v63, %v2411_v5  ;;  %vm11328_vm13 = vcmask 359424  }
 0x585   : > { %v2051_v10 = vrot.slane %v2048_v11, 4  ;;  %v7621_v15 = vcombine.low %v2389_v41, %v2413_v3  ;;  %v7622_v13 = vcombine.high %v2389_v41, %v2413_v3  ;;  %v7624_v58 = vcombine.high %v9180_v26, %v9183_v4 }
 0x586   : > { %v2361_v19 = vrot.slane %v2356_v57, 4  ;;  %v2032_v44 = vsel %vm11328_vm13, %v8834_v36, %v2031_v46  ;;  %v11331_v46 = vrot.slane %v8879_v0, 4  ;;  %vm2314_vm13 = vcmask 15360  }
 0x587   : > { %v2055_v37 = vsel %vm795_vm2, %v11327_v16, %v2051_v10  ;;  %3600 = vmatprep.subr.bf16.mxu0 %v7622_v13  ;;  %v2345_v13 = vld [vmem:[#allocation2 + $0x4] sm:$0xff] }
 0x588   : > { %v9197_v63 = vpop.permute.xlu0 %2357  ;;  %v1976_v12 = vpop.permute.xlu1 %1975  ;;  %v2056_v28 = vsel %vm11329_vm11, %v8847_v61, %v2055_v37  ;;  %3601 = vmatpush2.bf16.msra.mxu0 %v7621_v15  ;;  %vm11333_vm11 = vcmask 367616  }
 0x589   : > { %v2362_v52 = vrot.slane %v9197_v63, 4  ;;  %v1979_v5 = vrot.slane %v1976_v12, 4  ;;  %v7591_v11 = vcombine.low %v2032_v44, %v2056_v28  ;;  %v7592_v41 = vcombine.high %v2032_v44, %v2056_v28 }
 0x58a   : > { %v11332_v12 = vrot.slane %v8891_v48, 4 }
 0x58b   : > { %3686 = vmatprep.subr.bf16.mxu1 %v7592_v41  ;;  %v2364_v3 = vsel %vm795_vm2, %v2361_v19, %v2362_v52  ;;  %v1983_v61 = vsel %vm795_vm2, %v11331_v46, %v1979_v5 }
 0x58c   : > { %v2000_v50 = vpop.permute.xlu0 %1999  ;;  %3687 = vmatpush1.bf16.msra.mxu1 %v7591_v11  ;;  %v2305_v10 = vpop.permute.xlu1 %2304  ;;  %v2365_v36 = vsel %vm11330_vm14, %v2356_v57, %v2364_v3  ;;  %v1984_v11 = vsel %vm1981_vm5, %v8879_v0, %v1983_v61  ;;  %vm11334_vm14 = vcmask 7168  }
 0x58d   : > { %v2003_v16 = vrot.slane %v2000_v50, 4  ;;  %v7617_v15 = vcombine.low %v2345_v13, %v2365_v36  ;;  %v7618_v37 = vcombine.high %v2345_v13, %v2365_v36  ;;  %v2310_v50 = vrot.slane %v2305_v10, 4 }
 0x58f   : > { %v2007_v44 = vsel %vm795_vm2, %v11332_v12, %v2003_v16  ;;  %3602 = vmatprep.subr.bf16.mxu0 %v7618_v37 }
 0x590   : > { %v9214_v28 = vpop.permute.xlu0 %2306  ;;  %v2329_v19 = vpop.permute.xlu1 %2328  ;;  %v2008_v57 = vsel %vm11333_vm11, %v8891_v48, %v2007_v44  ;;  %3603 = vmatpush2.bf16.msra.mxu0 %v7617_v15  ;;  %vm11179_vm11 = vcmask 154624  }
 0x591   : > { %v11162_v41 = vrot.slane %v9214_v28, 4  ;;  %v7587_v5 = vcombine.low %v1984_v11, %v2008_v57  ;;  %v7588_v3 = vcombine.high %v1984_v11, %v2008_v57  ;;  %v2334_v46 = vrot.slane %v2329_v19, 4 }
 0x592   : > { %v11335_v11 = vrot.slane %v8924_v30, 4 }
 0x593   : > { %3688 = vmatprep.subr.bf16.mxu1 %v7588_v3  ;;  %v2313_v0 = vsel %vm795_vm2, %v2310_v50, %v11162_v41 }
 0x594   : > { %v9221_v13 = vpop.permute.xlu0 %2330  ;;  %3689 = vmatpush1.bf16.msra.mxu1 %v7587_v5  ;;  %v1928_v36 = vpop.permute.xlu1 %1927  ;;  %v2315_v12 = vsel %vm2314_vm13, %v2305_v10, %v2313_v0 }
 0x595   : > { %v11163_v16 = vrot.slane %v9221_v13, 4  ;;  %v1931_v37 = vrot.slane %v1928_v36, 4  ;;  %v11358_v7 = vrot.slane %v9221_v13, 4 }
 0x597   : > { %v2337_v48 = vsel %vm795_vm2, %v2334_v46, %v11163_v16  ;;  %v1935_v57 = vsel %vm795_vm2, %v11335_v11, %v1931_v37  ;;  %v11338_v16 = vrot.slane %v8982_v32, 4 }
 0x598   : > { %v1952_v61 = vpop.permute.xlu0 %1951  ;;  %v2257_v15 = vpop.permute.xlu1 %2256  ;;  %v2338_v44 = vsel %vm11334_vm14, %v2329_v19, %v2337_v48  ;;  %v1936_v10 = vsel %vm11166_vm15, %v8924_v30, %v1935_v57  ;;  %vm11178_vm14 = vcmask 23552   ;;  %vm2242_vm15 = vcmask 162816  }
 0x599   : > { %v1955_v5 = vrot.slane %v1952_v61, 4  ;;  %v7613_v3 = vcombine.low %v2315_v12, %v2338_v44  ;;  %v7614_v36 = vcombine.high %v2315_v12, %v2338_v44  ;;  %v2262_v61 = vrot.slane %v2257_v15, 4 }
 0x59b   : > { %v1959_v50 = vsel %vm795_vm2, %v11336_v14, %v1955_v5  ;;  %3604 = vmatprep.subr.bf16.mxu0 %v7614_v36 }
 0x59c   : > { %v9238_v41 = vpop.permute.xlu0 %2258  ;;  %3605 = vmatpush2.bf16.msra.mxu0 %v7613_v3  ;;  %v2281_v46 = vpop.permute.xlu1 %2280  ;;  %v1960_v19 = vsel %vm11165_vm6, %v8937_v60, %v1959_v50  ;;  %vm11339_vm6 = vcmask 523264  }
 0x59d   : > { %v11164_v37 = vrot.slane %v9238_v41, 4  ;;  %v7583_v0 = vcombine.low %v1936_v10, %v1960_v19  ;;  %v7584_v48 = vcombine.high %v1936_v10, %v1960_v19  ;;  %v2286_v44 = vrot.slane %v2281_v46, 4 }
 0x59e   : > { %v11337_v10 = vrot.slane %v8970_v45, 4 }
 0x59f   : > { %3690 = vmatprep.subr.bf16.mxu1 %v7584_v48  ;;  %v2265_v30 = vsel %vm795_vm2, %v2262_v61, %v11164_v37 }
 0x5a0   : > { %v9245_v12 = vpop.permute.xlu0 %2282  ;;  %3691 = vmatpush1.bf16.msra.mxu1 %v7583_v0  ;;  %v1880_v14 = vpop.permute.xlu1 %1879  ;;  %v2267_v36 = vsel %vm11179_vm11, %v2257_v15, %v2265_v30 }
 0x5a1   : > { %v11167_v11 = vrot.slane %v9245_v12, 4  ;;  %v1883_v5 = vrot.slane %v1880_v14, 4 }
 0x5a3   : > { %v2289_v60 = vsel %vm795_vm2, %v2286_v44, %v11167_v11  ;;  %v1887_v19 = vsel %vm795_vm2, %v11337_v10, %v1883_v5  ;;  %v4848_v11 = vld [vmem:[#allocation2 + $0x14] sm:$0xf] }
 0x5a4   : > { %v1904_v57 = vpop.permute.xlu0 %1903  ;;  %v2210_v3 = vpop.permute.xlu1 %2209  ;;  %v2291_v50 = vsel %vm11178_vm14, %v2281_v46, %v2289_v60  ;;  %v1888_v15 = vsel %vm1885_vm9, %v8970_v45, %v1887_v19  ;;  %4856 = vrot.lane.b32.xlu0 %v4848_v11, %s11276_s28 }
 0x5a5   : > { %v1907_v0 = vrot.slane %v1904_v57, 4  ;;  %v7609_v48 = vcombine.low %v2267_v36, %v2291_v50  ;;  %v7610_v14 = vcombine.high %v2267_v36, %v2291_v50  ;;  %v2215_v57 = vrot.slane %v2210_v3, 4 }
 0x5a7   : > { %v1911_v61 = vsel %vm795_vm2, %v11338_v16, %v1907_v0  ;;  %3606 = vmatprep.subr.bf16.mxu0 %v7610_v14 }
 0x5a8   : > { %v9262_v37 = vpop.permute.xlu0 %2211  ;;  %3607 = vmatpush2.bf16.msra.mxu0 %v7609_v48  ;;  %v2233_v44 = vpop.permute.xlu1 %2232  ;;  %v1912_v46 = vsel %vm11339_vm6, %v8982_v32, %v1911_v61  ;;  %vm11340_vm6 = vcmask 171008  }
 0x5a9   : > { %v11168_v5 = vrot.slane %v9262_v37, 4  ;;  %v7579_v30 = vcombine.low %v1888_v15, %v1912_v46  ;;  %v7580_v60 = vcombine.high %v1888_v15, %v1912_v46  ;;  %v2238_v50 = vrot.slane %v2233_v44, 4 }
 0x5aa   : > { %v11341_v15 = vrot.slane %v9021_v42, 4 }
 0x5ab   : > { %3692 = vmatprep.subr.bf16.mxu1 %v7580_v60  ;;  %v2218_v45 = vsel %vm795_vm2, %v2215_v57, %v11168_v5  ;;  %v11342_v57 = vrot.slane %v9032_v29, 4 }
 0x5ac   : > { %v9269_v36 = vpop.permute.xlu0 %2234  ;;  %3693 = vmatpush1.bf16.msra.mxu1 %v7579_v30  ;;  %v1832_v16 = vpop.permute.xlu1 %1831  ;;  %v2219_v14 = vsel %vm11340_vm6, %v2210_v3, %v2218_v45  ;;  %vm11343_vm6 = vcmask 539648   ;;  %v4871_v45 = vld [vmem:[#allocation2 + $0x14] sm:$0xf] }
 0x5ad   : > { %v11171_v10 = vrot.slane %v9269_v36, 4  ;;  %v1835_v0 = vrot.slane %v1832_v16, 4  ;;  %4879 = vrot.lane.b32.xlu0 %v4871_v45, %s11278_s2 }
 0x5af   : > { %v2241_v32 = vsel %vm795_vm2, %v2238_v50, %v11171_v10  ;;  %v1839_v46 = vsel %vm795_vm2, %v11341_v15, %v1835_v0  ;;  %v11347_v10 = vrot.slane %v9072_v1, 4 }
 0x5b0   : > { %v1856_v19 = vpop.permute.xlu0 %1855  ;;  %v2164_v48 = vpop.permute.xlu1 %2163  ;;  %v2243_v61 = vsel %vm2242_vm15, %v2233_v44, %v2241_v32  ;;  %v1840_v44 = vsel %vm11169_vm7, %v9021_v42, %v1839_v46  ;;  %v6396_v32 = vld [vmem:[#allocation2 + $0x14] sm:$0xf]  ;;  %vm11345_vm7 = vcmask 179200  }
 0x5b1   : > { %v1859_v30 = vrot.slane %v1856_v19, 4  ;;  %v7605_v60 = vcombine.low %v2219_v14, %v2243_v61  ;;  %v7606_v16 = vcombine.high %v2219_v14, %v2243_v61  ;;  %6404 = vrot.lane.b32.xlu1 %v6396_v32, %s11268_s7  ;;  %v2169_v15 = vrot.slane %v2164_v48, 4  ;;  %v4802_v42 = vld [vmem:[#allocation2 + $0x14] sm:$0xf]  ;;  %s11406_s7 = smov 46  }
 0x5b2   : > { %4810 = vrot.lane.b32.xlu0 %v4802_v42, %s11287_s10  ;;  %v4825_v32 = vld [vmem:[#allocation2 + $0x14] sm:$0xf]  ;;  %v9319_v42 = vld [vmem:[%s11293_s12] ss:$16 sps:$4 sm:$0xff]  }
 0x5b3   : > { %v1863_v5 = vsel %vm795_vm2, %v11342_v57, %v1859_v30  ;;  %3608 = vmatprep.subr.bf16.mxu0 %v7606_v16 }
 0x5b4   : > { %v9287_v50 = vpop.permute.xlu0 %2165  ;;  %3609 = vmatpush2.bf16.msra.mxu0 %v7605_v60  ;;  %v2187_v3 = vpop.permute.xlu1 %2186  ;;  %v1864_v0 = vsel %vm11343_vm6, %v9032_v29, %v1863_v5  ;;  %vm11344_vm6 = vcmask 187392  }
 0x5b5   : > { %v11170_v19 = vrot.slane %v9287_v50, 4  ;;  %v7575_v14 = vcombine.low %v1840_v44, %v1864_v0  ;;  %v7576_v61 = vcombine.high %v1840_v44, %v1864_v0  ;;  %v2192_v46 = vrot.slane %v2187_v3, 4 }
 0x5b6   : > { %4833 = vrot.lane.b32.xlu0 %v4825_v32, %s11289_s11 }
 0x5b7   : > { %3694 = vmatprep.subr.bf16.mxu1 %v7576_v61  ;;  %v2172_v60 = vsel %vm795_vm2, %v2169_v15, %v11170_v19 }
 0x5b8   : > { %v9296_v11 = vpop.permute.xlu0 %2188  ;;  %3695 = vmatpush1.bf16.msra.mxu1 %v7575_v14  ;;  %v1784_v30 = vpop.permute.xlu1 %1783  ;;  %v2173_v0 = vsel %vm11344_vm6, %v2164_v48, %v2172_v60  ;;  %v11346_v14 = vrot.slane %v9061_v31, 4  ;;  %v2922_v48 = vld [vmem:[%s11293_s12 + $0x20] sm:$0xff]  ;;  %v6465_v60 = vld [vmem:[#allocation2 + $0x14] sm:$0xf]  ;;  %vm11364_vm6 = vcmask 7168  }
 0x5b9   : > { %v2193_v29 = vrot.slane %v9296_v11, 4  ;;  %v1787_v5 = vrot.slane %v1784_v30, 4 }
 0x5ba   : > { %6473 = vrot.lane.b32.xlu0 %v6465_v60, %s11349_s26  ;;  %v11359_v60 = vcombine.low %v9180_v26, %v9183_v4 }
 0x5bb   : > { %v2195_v16 = vsel %vm795_vm2, %v2192_v46, %v2193_v29  ;;  %v1791_v61 = vsel %vm795_vm2, %v11346_v14, %v1787_v5  ;;  %v6097_v14 = vld [vmem:[#allocation2 + $0x14] sm:$0xf] }
 0x5bc   : > { %v1808_v57 = vpop.permute.xlu0 %1807  ;;  %v9306_v44 = vpop.permute.xlu1 %4718  ;;  %v2196_v45 = vsel %vm11345_vm7, %v2187_v3, %v2195_v16  ;;  %v11348_v16 = vcombine.high %v8733_v49, %v8736_v51  ;;  %vm11355_vm7 = vcmask 1039360  }
 0x5bd   : > { %v1811_v30 = vrot.slane %v1808_v57, 4  ;;  %v7601_v15 = vcombine.low %v2173_v0, %v2196_v45  ;;  %v7602_v19 = vcombine.high %v2173_v0, %v2196_v45  ;;  %v9336_v45 = vcombine.high %v2922_v48, %v2922_v48 }
 0x5be   : > { %6105 = vrot.lane.b32.xlu0 %v6097_v14, %s11292_s13  ;;  %v11363_v14 = vcombine.low %v8919_v55, %v8922_v27 }
 0x5bf   : > { %v1815_v46 = vsel %vm795_vm2, %v11347_v10, %v1811_v30  ;;  %3610 = vmatprep.subr.bf16.mxu0 %v7602_v19  ;;  %v1792_v10 = vsel %vm1789_vm8, %v9061_v31, %v1791_v61  ;;  %v11350_v31 = vcombine.low %v8733_v49, %v8736_v51  ;;  %v11351_v61 = vcombine.high %v8784_v35, %v8787_v8 }
 0x5c0   : > { %v9325_v3 = vpop.permute.xlu0 %7966  ;;  %3611 = vmatpush2.bf16.msra.mxu0 %v7601_v15  ;;  %v9327_v5 = vpop.permute.xlu1 %4741  ;;  %v1816_v19 = vsel %vm1813_vm1, %v9072_v1, %v1815_v46  ;;  %v9354_v30 = vcombine.low %v2922_v48, %v2922_v48  ;;  %v2363_v49 = vrot.slane %v8634_v6, 4  ;;  %v11352_v15 = vcombine.low %v8784_v35, %v8787_v8  ;;  %v8013_v8 = vld [vmem:[%s11293_s12 + $0xc] ss:$16 sps:$4 sm:$0xff]   ;;  %s11404_s12 = smov 44  }
 0x5c1   : > { %3733 = vmatprep.subr.bf16.mxu0 %v11348_v16  ;;  %v7571_v57 = vcombine.low %v1792_v10, %v1816_v19  ;;  %v7572_v0 = vcombine.high %v1792_v10, %v1816_v19  ;;  %v11357_v10 = vcombine.low %v8874_v43, %v8877_v9 }
 0x5c2   : > { %v2366_v48 = vsel %vm795_vm2, %v2362_v52, %v2363_v49 }
 0x5c3   : > { %3613 = vmatmul.mubr.bf16.vlgmr.msra.gmra.mxu0 %v9319_v42  ;;  %3696 = vmatprep.subr.bf16.mxu1 %v7572_v0  ;;  %v2367_v22 = vsel %vm11355_vm7, %v9197_v63, %v2366_v48  ;;  %vm11373_vm7 = vcmask 171008  }
 0x5c4   : > { %v9340_v32 = vpop.permute.xlu0 %7971  ;;  %3734 = vmatpush1.bf16.msra.mxu0 %v11350_v31  ;;  %v9345_v1 = vpop.permute.xlu1 %4948  ;;  %3697 = vmatpush1.bf16.msra.mxu1 %v7571_v57  ;;  %v11362_v57 = vrot.slane %v9245_v12, 4 }
 0x5c5   : > { %3735 = vmatprep.subr.bf16.mxu0 %v11351_v61  ;;  %3698 = vmatprep.subr.bf16.mxu1 %v7632_v17  ;;  %v11353_v17 = vcombine.high %v8829_v33, %v8832_v34  ;;  %v2346_v33 = vld [vmem:[#allocation2 + $0xc] sm:$0xff] }
 0x5c6   : > { %3622 = vmatprep.mubr.bf16.mxu0 %v9336_v45  ;;  %v7620_v19 = vcombine.high %v2346_v33, %v2367_v22  ;;  %v7619_v16 = vcombine.low %v2346_v33, %v2367_v22 }
 0x5c8   : > { %v9358_v51 = vpop.permute.xlu0 %4902  ;;  %3736 = vmatpush1.bf16.msra.mxu0 %v11352_v15  ;;  %v2333_v46 = vpop.permute.xlu1 %2332  ;;  %3699 = vmatpush2.bf16.msra.mxu1 %v7631_v53 }
 0x5c9   : > { %3737 = vmatprep.subr.bf16.mxu0 %v11353_v17  ;;  %3700 = vmatprep.subr.bf16.mxu1 %v7628_v54  ;;  %v2336_v53 = vrot.slane %v2333_v46, 4  ;;  %v11356_v54 = vcombine.high %v8874_v43, %v8877_v9  ;;  %v11361_v43 = vrot.slane %v9214_v28, 4  ;;  %v11365_v46 = vcombine.high %v8965_v25, %v8968_v38 }
 0x5cb   : > { %3623 = vmatmul.mubr.bf16.gmra.mxu0 %v9354_v30  ;;  %v2339_v62 = vsel %vm795_vm2, %v11358_v7, %v2336_v53 }
 0x5cc   : > { %v9376_v6 = vpop.permute.xlu0 %4925  ;;  %3738 = vmatpush1.bf16.msra.mxu0 %v11354_v39  ;;  %v2285_v35 = vpop.permute.xlu1 %2284  ;;  %7673 = vmatprep.mubr.msk.bf16.mxu0 %vm1649_vm10, %v8013_v8  ;;  %v2340_v61 = vsel %vm11364_vm6, %v9221_v13, %v2339_v62  ;;  %v11368_v8 = vcombine.low %v8965_v25, %v8968_v38  ;;  %vm11377_vm6 = vcmask 187392  }
 0x5cd   : > { %3701 = vmatpush2.bf16.msra.mxu1 %v7627_v21  ;;  %3739 = vmatprep.subr.bf16.mxu0 %v11356_v54  ;;  %v2288_v34 = vrot.slane %v2285_v35, 4  ;;  %v11369_v54 = vrot.slane %v9269_v36, 4 }
 0x5ce   : > { %3702 = vmatprep.subr.bf16.mxu1 %v7624_v58  ;;  %v11360_v58 = vcombine.high %v8919_v55, %v8922_v27  ;;  %v2908_v55 = vrot.slane %v8672_v18, 4  ;;  %v11366_v27 = vrot.slane %v9238_v41, 4 }
 0x5cf   : > { %v2292_v0 = vsel %vm795_vm2, %v11362_v57, %v2288_v34 }
 0x5d0   : > { %v2309_v52 = vpop.permute.xlu0 %2308  ;;  %3740 = vmatpush1.bf16.msra.mxu0 %v11357_v10  ;;  %v2237_v63 = vpop.permute.xlu1 %2236  ;;  %v2293_v18 = vsel %vm11178_vm14, %v9245_v12, %v2292_v0  ;;  %v11371_v10 = vrot.slane %v9262_v37, 4 }
 0x5d1   : > { %v2312_v21 = vrot.slane %v2309_v52, 4  ;;  %3703 = vmatpush2.bf16.msra.mxu1 %v11359_v60  ;;  %3741 = vmatprep.subr.bf16.mxu0 %v11360_v58  ;;  %v2240_v49 = vrot.slane %v2237_v63, 4  ;;  %v11370_v52 = vcombine.high %v9016_v24, %v9019_v2 }
 0x5d2   : > { %3704 = vmatprep.subr.bf16.mxu1 %v7620_v19  ;;  %v11372_v19 = vcombine.low %v9016_v24, %v9019_v2  ;;  %v11375_v2 = vrot.slane %v9287_v50, 4 }
 0x5d3   : > { %v2316_v9 = vsel %vm795_vm2, %v11361_v43, %v2312_v21  ;;  %v2244_v33 = vsel %vm795_vm2, %v11369_v54, %v2240_v49 }
 0x5d4   : > { %v2261_v31 = vpop.permute.xlu0 %2260  ;;  %3742 = vmatpush1.bf16.msra.mxu0 %v11363_v14  ;;  %v9417_v26 = vpop.permute.xlu1 %6450  ;;  %v2317_v4 = vsel %vm2314_vm13, %v9214_v28, %v2316_v9  ;;  %v11367_v28 = vrot.slane %v9083_v40, 4  ;;  %v2245_v21 = vsel %vm2242_vm15, %v9269_v36, %v2244_v33  ;;  %v11376_v36 = vcombine.low %v9056_v47, %v9059_v56 }
 0x5d5   : > { %v2264_v15 = vrot.slane %v2261_v31, 4  ;;  %3705 = vmatpush2.bf16.msra.mxu1 %v7619_v16  ;;  %3743 = vmatprep.subr.bf16.mxu0 %v11365_v46  ;;  %v7615_v17 = vcombine.low %v2317_v4, %v2340_v61  ;;  %v7616_v48 = vcombine.high %v2317_v4, %v2340_v61  ;;  %v11374_v16 = vcombine.high %v9056_v47, %v9059_v56  ;;  %v11379_v61 = vld [vmem:[#allocation14_spill] sm:$0xff]  ;;  %v11381_v56 = vld [vmem:[#allocation16_spill] sm:$0xff]  ;;  %v11382_v46 = vld [vmem:[#allocation15_spill] sm:$0xff] }
 0x5d6   : > { %v2912_v13 = vsel %vm795_vm2, %v11367_v28, %v2908_v55  ;;  %v1756_v49 = vpack.c.bf16 %v11379_v61, %v11379_v61  ;;  %v11383_v55 = vmov 0   ;;  %v5982_v28 = vld [vmem:[#allocation2 + $0x14] sm:$0xf] }
 0x5d7   : > { %v2268_v39 = vsel %vm795_vm2, %v11366_v27, %v2264_v15  ;;  %3706 = vmatprep.subr.bf16.mxu1 %v7616_v48  ;;  %v11380_v15 = vld [vmem:[#allocation13_spill] sm:$0xff]  ;;  %v6350_v27 = vld [vmem:[#allocation2 + $0x14] sm:$0xf] }
 0x5d8   : > { %v2214_v35 = vpop.permute.xlu0 %2213  ;;  %3744 = vmatpush1.bf16.msra.mxu0 %v11368_v8  ;;  %v9436_v22 = vpop.permute.xlu1 %6082  ;;  %v2269_v53 = vsel %vm11179_vm11, %v9238_v41, %v2268_v39  ;;  %v2913_v41 = vsel %vm2910_vm0, %v9083_v40, %v2912_v13  ;;  %v1755_v47 = vpack.c.bf16 %v11380_v15, %v11380_v15  ;;  %v6005_v39 = vld [vmem:[#allocation2 + $0x14] sm:$0xf]  ;;  %v11388_v15 = vld [vmem:[#allocation18_spill] sm:$0xff] }
 0x5d9   : > { %v2217_v34 = vrot.slane %v2214_v35, 4  ;;  %3707 = vmatpush2.bf16.msra.mxu1 %v7615_v17  ;;  %3745 = vmatprep.subr.bf16.mxu0 %v11370_v52  ;;  %v7611_v25 = vcombine.low %v2269_v53, %v2293_v18  ;;  %v7612_v38 = vcombine.high %v2269_v53, %v2293_v18  ;;  %v7667_v9 = vcombine.low %v2913_v41, %v2913_v41  ;;  %v6327_v13 = vld [vmem:[#allocation2 + $0x14] sm:$0xf] }
 0x5da   : > { %v7668_v57 = vcombine.high %v2913_v41, %v2913_v41  ;;  %v3844_v17 = vsel %vm795_vm2, %v1755_v47, 0  ;;  %v6304_v35 = vld [vmem:[#allocation2 + $0x14] sm:$0xf] }
 0x5db   : > { %v2220_v63 = vsel %vm795_vm2, %v11371_v10, %v2217_v34  ;;  %3708 = vmatprep.subr.bf16.mxu1 %v7612_v38  ;;  %v5959_v8 = vld [vmem:[#allocation2 + $0x14] sm:$0xf] }
 0x5dc   : > { %v2168_v12 = vpop.permute.xlu0 %2167  ;;  %3746 = vmatpush1.bf16.msra.mxu0 %v11372_v19  ;;  %v2191_v7 = vpop.permute.xlu1 %2190  ;;  %v2221_v62 = vsel %vm11373_vm7, %v9262_v37, %v2220_v63  ;;  %vm11378_vm7 = vcmask 179200   ;;  %v11385_v63 = vld [vmem:[#allocation19_spill] sm:$0xff] }
 0x5dd   : > { %v2171_v60 = vrot.slane %v2168_v12, 4  ;;  %3709 = vmatpush2.bf16.msra.mxu1 %v7611_v25  ;;  %v2194_v58 = vrot.slane %v2191_v7, 4  ;;  %3747 = vmatprep.subr.bf16.mxu0 %v11374_v16  ;;  %v7607_v40 = vcombine.low %v2221_v62, %v2245_v21  ;;  %v7608_v43 = vcombine.high %v2221_v62, %v2245_v21 }
 0x5df   : > { %v2174_v24 = vsel %vm795_vm2, %v11375_v2, %v2171_v60  ;;  %v2197_v37 = vsel %vm795_vm2, %v2193_v29, %v2194_v58  ;;  %3710 = vmatprep.subr.bf16.mxu1 %v7608_v43  ;;  %v3575_v29 = vsel %vm795_vm2, %v7667_v9, 0  ;;  %v11386_v43 = vld [vmem:[#allocation9_spill] sm:$0xff] }
 0x5e0   : > { %3748 = vmatpush1.bf16.msra.mxu0 %v11376_v36  ;;  %v2175_v0 = vsel %vm11377_vm6, %v9287_v50, %v2174_v24  ;;  %v2198_v31 = vsel %vm11378_vm7, %v9296_v11, %v2197_v37  ;;  %v1758_v50 = vpack.c.bf16 %v11381_v56, %v11381_v56  ;;  %v1757_v11 = vpack.c.bf16 %v11382_v46, %v11382_v46 }
 0x5e1   : > { %3711 = vmatpush2.bf16.msra.mxu1 %v7607_v40  ;;  %7672 = vmatprep.subr.msk.bf16.mxu0 %vm795_vm2, %v7668_v57  ;;  %v7603_v14 = vcombine.low %v2175_v0, %v2198_v31  ;;  %v7604_v4 = vcombine.high %v2175_v0, %v2198_v31  ;;  %v11387_v57 = vld [vmem:[#allocation10_spill] sm:$0xff]  ;;  %vm11412_vm6 = vcmask 859136  }
 0x5e2   : > { %v3850_v48 = vsel %vm795_vm2, %v1757_v11, 0  ;;  %vm11413_vm7 = vmmov %vm11412_vm6 }
 0x5e3   : > { %3712 = vmatprep.subr.bf16.mxu1 %v7604_v4 }
 0x5e4   : > { %3764 = vmatpush2.bf16.msra.mxu0 %v3575_v29 }
 0x5e5   : > { %3713 = vmatpush2.bf16.msra.mxu1 %v7603_v14  ;;  %7677 = vmatprep.subr.msk.bf16.mxu0 %vm795_vm2, %v1756_v49 }
 0x5e6   : > { %7680 = vmatprep.subr.msk.bf16.mxu1 %vm795_vm2, %v1758_v50 }
 0x5e7   : > { %3766 = vmatmul.mubr.bf16.vlgmr.msra.gmra.mxu0 %v9106_v20  ;;  %v7985_v20 = vld [vmem:[%s11384_s14] sm:$0xff]  }
 0x5e8   : > { %3715 = vmatmul.mubr.bf16.vlgmr.msra.gmra.mxu1 %v9319_v42  ;;  %3870 = vmatpush1.bf16.msra.mxu0 %v3844_v17  ;;  %v6051_v42 = vld [vmem:[#allocation2 + $0x14] sm:$0xf] }
 0x5e9   : > { %3921 = vmatpush1.bf16.msra.mxu1 %v3850_v48  ;;  %3724 = vmatprep.mubr.bf16.mxu1 %v9336_v45  ;;  %v6028_v45 = vld [vmem:[#allocation2 + $0x14] sm:$0xf] }
 0x5ea   : > { %7674 = vmatprep.mubr.msk.bf16.mxu0 %vm1649_vm10, %v9108_v59  ;;  %v7986_v59 = vld [vmem:[%s11384_s14 + $0x8] ss:$0 sps:$4 sm:$0xff]   ;;  %6036 = vrot.lane.b32.xlu1 %v6028_v45, %s11296_s25  ;;  %s11408_s14 = smov 84  }
 0x5ee   : > { %6358 = vrot.lane.b32.xlu1 %v6350_v27, %s11270_s29 }
 0x5ef   : > { %3776 = vmatmul.mubr.bf16.gmra.mxu0 %v9141_v23  ;;  %v6419_v23 = vld [vmem:[#allocation2 + $0x14] sm:$0xf] }
 0x5f0   : > { %3725 = vmatmul.mubr.bf16.gmra.mxu1 %v9354_v30  ;;  %3887 = vmatprep.mubr.bf16.mxu0 %v11383_v55  ;;  %v6373_v30 = vld [vmem:[#allocation2 + $0x14] sm:$0xf] }
 0x5f1   : > { %3938 = vmatprep.mubr.bf16.mxu1 %v11383_v55  ;;  %6427 = vrot.lane.b32.xlu0 %v6419_v23, %s11269_s24 }
 0x5f2   : > { %5990 = vrot.lane.b32.xlu1 %v5982_v28, %s11300_s21 }
 0x5f5   : > { %6059 = vrot.lane.b32.xlu0 %v6051_v42, %s11297_s5 }
 0x5f6   : > { %6312 = vrot.lane.b32.xlu1 %v6304_v35, %s11272_s1 }
 0x5f7   : > { %7678 = vmatmul.mubr.msk.bf16.vlgmr.msra.gmra.mxu0 %vm1649_vm10, %v7985_v20 }
 0x5f8   : > { %7681 = vmatmul.mubr.msk.bf16.vlgmr.msra.gmra.mxu1 %vm1649_vm10, %v7985_v20  ;;  %3897 = vmatprep.mubr.bf16.mxu0 %v11383_v55 }
 0x5f9   : > { %3948 = vmatprep.mubr.bf16.mxu1 %v11383_v55  ;;  %6381 = vrot.lane.b32.xlu0 %v6373_v30, %s11271_s30 }
 0x5fa   : > { %5967 = vrot.lane.b32.xlu1 %v5959_v8, %s11304_s8  ;;  %v11390_v8 = vld [vmem:[#allocation12_spill] sm:$0xff] }
 0x5fd   : > { %6013 = vrot.lane.b32.xlu0 %v6005_v39, %s11301_s22 }
 0x5ff   : > { %7679 = vmatmul.mubr.msk.bf16.gmra.mxu0 %vm1649_vm10, %v7986_v59 }
 0x600   : > { %7682 = vmatmul.mubr.msk.bf16.gmra.mxu1 %vm1649_vm10, %v7986_v59  ;;  %4325 = vmatprep.mubr.bf16.mxu0 %v11383_v55 }
 0x601   : > { %4366 = vmatprep.mubr.bf16.mxu1 %v11383_v55  ;;  %6335 = vrot.lane.b32.xlu0 %v6327_v13, %s11273_s3  ;;  %v11389_v13 = vld [vmem:[#allocation11_spill] sm:$0xff] }
 0x62b   : > { %v3665_v53 = vpop.f32.mrf.mxu1 }
 0x62d   : > { %v3667_v18 = vpop.f32.mrf.mxu1 }
 0x62f   : > { %v3669_v54 = vpop.f32.mrf.mxu1 }
 0x631   : > { %v3671_v33 = vpop.f32.mrf.mxu1 }
 0x633   : > { %v9523_v34 = vpop.f32.mrf.mxu1 }
 0x635   : > { %v9525_v52 = vpop.f32.mrf.mxu1 }
 0x637   : > { %v3679_v25 = vpop.f32.mrf.mxu1 }
 0x639   : > { %v3680_v38 = vpop.f32.mrf.mxu1 }
 0x683   : > { %v3614_v10 = vpop.f32.mrf.mxu0 }
 0x684   : > { %v3615_v41 = vadd.f32 %v3614_v10, %v11385_v63 }
 0x685   : > { %v3616_v12 = vpop.f32.mrf.mxu0 }
 0x686   : > { %v3666_v19 = vadd.f32 %v3665_v53, %v3615_v41  ;;  %v3617_v7 = vadd.f32 %v3616_v12, %v11385_v63 }
 0x687   : > { %v3618_v62 = vpop.f32.mrf.mxu0 }
 0x688   : > { %v3784_v21 = vmax.f32 %v3666_v19, 0.0  ;;  %v3668_v60 = vadd.f32 %v3667_v18, %v3617_v7  ;;  %v3619_v17 = vadd.f32 %v3618_v62, %v11388_v15  ;;  %v11391_v19 = vld [vmem:[#allocation21_spill] sm:$0xff] }
 0x689   : > { %v3620_v58 = vpop.f32.mrf.mxu0 }
 0x68a   : > { %v3785_v16 = vmax.f32 %v3668_v60, 0.0  ;;  %v3796_v9 = vmul.f32 %v3784_v21, %v11386_v43  ;;  %v3621_v47 = vadd.f32 %v3620_v58, %v11388_v15  ;;  %v3670_v28 = vadd.f32 %v3669_v54, %v3619_v17 }
 0x68b   : > { %v3624_v40 = vpop.f32.mrf.mxu0 }
 0x68c   : > { %v3797_v2 = vmul.f32 %v3785_v16, %v11387_v57  ;;  %v3672_v42 = vadd.f32 %v3671_v33, %v3621_v47  ;;  %v3788_v21 = vmax.f32 %v3670_v28, 0.0  ;;  %v3625_v60 = vadd.f32 %v3624_v40, %v11391_v19 }
 0x68d   : > { %v3626_v24 = vpop.f32.mrf.mxu0 }
 0x68e   : > { %v9531_v37 = vpack.c.bf16 %v3797_v2, %v3796_v9  ;;  %v3627_v33 = vadd.f32 %v3626_v24, %v11391_v19  ;;  %v3676_v40 = vadd.f32 %v9523_v34, %v3625_v60 }
 0x68f   : > { %v3628_v36 = vpop.f32.mrf.mxu0 }
 0x690   : > { %3973 = vst [vmem:[#allocation2 + $0x4] sm:$0xff] %v9531_v37  ;;  %4146 = vrot.lane.b32.xlu0 %v9531_v37, %s11287_s10  ;;  %v3678_v36 = vadd.f32 %v9525_v52, %v3627_v33 }
 0x691   : > { %v3629_v0 = vpop.f32.mrf.mxu0 }
 0x692   : > { %v3793_v47 = vmax.f32 %v3678_v36, 0.0 }
 0x694   : > { %4123 = vrot.lane.b32.xlu0 %v9531_v37, %s11292_s13 }
 0x697   : > { %v3975_v31 = vld [vmem:[#allocation2] sm:$0xff] }
 0x698   : > { %3981 = vrot.lane.b32.xlu1 %v3975_v31, %s11312_s16  ;;  %4027 = vrot.lane.b32.xlu0 %v3975_v31, %s11309_s23 }
 0x69c   : > { %4100 = vrot.lane.b32.xlu1 %v9531_v37, %s11291_s9 }
 0x6a0   : > { %4077 = vrot.lane.b32.xlu1 %v9531_v37, %s11304_s8 }
 0x6a4   : > { %4050 = vrot.lane.b32.xlu1 %v3975_v31, %s11307_s18 }
 0x6a7   : > { %v3767_v14 = vpop.f32.mrf.mxu0 }
 0x6a8   : > { %v3716_v4 = vpop.f32.mrf.mxu1  ;;  %4004 = vrot.lane.b32.xlu1 %v3975_v31, %s11313_s17 }
 0x6a9   : > { %v3717_v61 = vadd.f32 %v3716_v4, %v11385_v63  ;;  %v3769_v49 = vpop.f32.mrf.mxu0 }
 0x6aa   : > { %v3718_v29 = vpop.f32.mrf.mxu1 }
 0x6ab   : > { %v3768_v56 = vadd.f32 %v3767_v14, %v3717_v61  ;;  %v3719_v50 = vadd.f32 %v3718_v29, %v11385_v63  ;;  %v3771_v46 = vpop.f32.mrf.mxu0  ;;  %v3789_v63 = vmax.f32 %v3672_v42, 0.0  ;;  %v3800_v14 = vmul.f32 %v3788_v21, %v11386_v43 }
 0x6ac   : > { %v3720_v11 = vpop.f32.mrf.mxu1 }
 0x6ad   : > { %v3786_v48 = vmax.f32 %v3768_v56, 0.0  ;;  %v3770_v55 = vadd.f32 %v3769_v49, %v3719_v50  ;;  %v3773_v20 = vpop.f32.mrf.mxu0  ;;  %v3721_v59 = vadd.f32 %v3720_v11, %v11388_v15  ;;  %v3801_v9 = vmul.f32 %v3789_v63, %v11387_v57 }
 0x6ae   : > { %v3722_v23 = vpop.f32.mrf.mxu1 }
 0x6af   : > { %v3787_v45 = vmax.f32 %v3770_v55, 0.0  ;;  %v3723_v30 = vadd.f32 %v3722_v23, %v11388_v15  ;;  %v3777_v27 = vpop.f32.mrf.mxu0  ;;  %v3798_v35 = vmul.f32 %v3786_v48, %v11389_v13  ;;  %v3772_v38 = vadd.f32 %v3771_v46, %v3721_v59 }
 0x6b0   : > { %v3726_v39 = vpop.f32.mrf.mxu1  ;;  %v9579_v29 = vpack.c.bf16 %v3801_v9, %v3800_v14  ;;  %v3792_v59 = vmax.f32 %v3676_v40, 0.0 }
 0x6b1   : > { %v3799_v53 = vmul.f32 %v3787_v45, %v11390_v8  ;;  %v3774_v18 = vadd.f32 %v3773_v20, %v3723_v30  ;;  %v3779_v25 = vpop.f32.mrf.mxu0  ;;  %v3790_v58 = vmax.f32 %v3772_v38, 0.0  ;;  %v3727_v49 = vadd.f32 %v3726_v39, %v11391_v19 }
 0x6b2   : > { %v3728_v10 = vpop.f32.mrf.mxu1  ;;  %v3805_v30 = vmul.f32 %v3793_v47, %v11387_v57  ;;  %v9640_v47 = vpop.permute.xlu0 %4856 }
 0x6b3   : > { %v9554_v41 = vpack.c.bf16 %v3799_v53, %v3798_v35  ;;  %v3781_v12 = vpop.f32.mrf.mxu0  ;;  %v3791_v7 = vmax.f32 %v3774_v18, 0.0  ;;  %v3729_v0 = vadd.f32 %v3728_v10, %v11391_v19  ;;  %v3802_v61 = vmul.f32 %v3790_v58, %v11389_v13 }
 0x6b4   : > { %v3730_v62 = vpop.f32.mrf.mxu1  ;;  %v3778_v23 = vadd.f32 %v3777_v27, %v3727_v49  ;;  %v3804_v27 = vmul.f32 %v3792_v59, %v11386_v43 }
 0x6b5   : > { %3974 = vst [vmem:[#allocation2 + $0xc] sm:$0xff] %v9554_v41  ;;  %v3782_v54 = vpop.f32.mrf.mxu0  ;;  %4148 = vrot.lane.b32.xlu1 %v9554_v41, %s11287_s10  ;;  %v3803_v24 = vmul.f32 %v3791_v7, %v11390_v8  ;;  %v3780_v50 = vadd.f32 %v3779_v25, %v3729_v0 }
 0x6b6   : > { %v3731_v16 = vpop.f32.mrf.mxu1  ;;  %v3794_v53 = vmax.f32 %v3778_v23, 0.0  ;;  %v9609_v38 = vpack.c.bf16 %v3805_v30, %v3804_v27 }
 0x6b7   : > { %v9562_v2 = vpop.f32.mrf.mxu0  ;;  %v9583_v56 = vpack.c.bf16 %v3803_v24, %v3802_v61  ;;  %v3795_v39 = vmax.f32 %v3780_v50, 0.0  ;;  %v9647_v50 = vpop.permute.xlu0 %4879 }
 0x6b8   : > { %11392 = vst [vmem:[#allocation14_spill] sm:$0xff] %v9562_v2  ;;  %v9567_v31 = vpop.f32.mrf.mxu1  ;;  %v3806_v21 = vmul.f32 %v3794_v53, %v11389_v13 }
 0x6b9   : > { %11393 = vst [vmem:[#allocation13_spill] sm:$0xff] %v9567_v31  ;;  %v9570_v4 = vpop.f32.mrf.mxu0  ;;  %4102 = vrot.lane.b32.xlu1 %v9554_v41, %s11291_s9  ;;  %v3807_v10 = vmul.f32 %v3795_v39, %v11390_v8 }
 0x6ba   : > { %11394 = vst [vmem:[#allocation16_spill] sm:$0xff] %v9570_v4  ;;  %v9577_v52 = vpop.f32.mrf.mxu1 }
 0x6bb   : > { %11395 = vst [vmem:[#allocation15_spill] sm:$0xff] %v9577_v52  ;;  %v9581_v15 = vpop.f32.mrf.mxu0  ;;  %v9620_v0 = vpack.c.bf16 %v3807_v10, %v3806_v21 }
 0x6bc   : > { %11396 = vst [vmem:[#allocation19_spill] sm:$0xff] %v9581_v15  ;;  %v9585_v46 = vpop.f32.mrf.mxu1  ;;  %v3976_v11 = vld [vmem:[#allocation2 + $0x8] sm:$0xff]  ;;  %v3977_v17 = vld [vmem:[#allocation2 + $0x10] sm:$0xf] }
 0x6bd   : > { %11397 = vst [vmem:[#allocation18_spill] sm:$0xff] %v9585_v46  ;;  %v4023_v48 = vld [vmem:[#allocation2 + $0x10] sm:$0xf]  ;;  %3983 = vrot.lane.b32.xlu0 %v3976_v11, %s11312_s16  ;;  %v9588_v34 = vpop.f32.mrf.mxu0  ;;  %4125 = vrot.lane.b32.xlu1 %v9554_v41, %s11292_s13  ;;  %4403 = vst [vmem:[#allocation2 + $0x4] sm:$0xff] %v9579_v29 }
 0x6be   : > { %11398 = vst [vmem:[#allocation21_spill] sm:$0xff] %v9588_v34  ;;  %v4000_v55 = vld [vmem:[#allocation2 + $0x10] sm:$0xf]  ;;  %v9593_v42 = vpop.f32.mrf.mxu1 }
 0x6bf   : > { %v4046_v20 = vld [vmem:[#allocation2 + $0x10] sm:$0xf]  ;;  %11399 = vst [vmem:[#allocation25_spill] sm:$0xff] %v9593_v42  ;;  %v9596_v45 = vpop.f32.mrf.mxu0 }
 0x6c0   : > { %4404 = vst [vmem:[#allocation2 + $0xc] sm:$0xff] %v9583_v56  ;;  %11400 = vst [vmem:[#allocation26_spill] sm:$0xff] %v9596_v45  ;;  %v9599_v28 = vpop.f32.mrf.mxu1 }
 0x6c1   : > { %11401 = vst [vmem:[#allocation27_spill] sm:$0xff] %v9599_v28  ;;  %4029 = vrot.lane.b32.xlu0 %v3976_v11, %s11309_s23  ;;  %v9602_v35 = vpop.f32.mrf.mxu0  ;;  %4079 = vrot.lane.b32.xlu1 %v9554_v41, %s11304_s8 }
 0x6c2   : > { %11402 = vst [vmem:[#allocation28_spill] sm:$0xff] %v9602_v35  ;;  %v9607_v18 = vpop.f32.mrf.mxu1 }
 0x6c3   : > { %11403 = vst [vmem:[#allocation29_spill] sm:$0xff] %v9607_v18  ;;  %v3903_v25 = vpop.f32.mrf.mxu0 }
 0x6c4   : > { %v9612_v63 = vld [vmem:[#allocation2] sm:$0xff]  ;;  %v3954_v12 = vpop.f32.mrf.mxu1 }
 0x6c5   : > { %4052 = vrot.lane.b32.xlu0 %v3976_v11, %s11307_s18  ;;  %4031 = vrot.lane.b32.xlu1 %v4023_v48, %s11309_s23  ;;  %v3904_v62 = vpop.f32.mrf.mxu0 }
 0x6c6   : > { %v3955_v16 = vpop.f32.mrf.mxu1 }
 0x6c7   : > { %v4637_v19 = vld [vmem:[#allocation2 + $0x10] sm:$0xf]  ;;  %v9616_v33 = vld [vmem:[#allocation2 + $0x8] sm:$0xff] }
 0x6c8   : > { %v4660_v7 = vld [vmem:[#allocation2 + $0x10] sm:$0xf]  ;;  %5399 = vst [vmem:[#allocation2 + $0x4] sm:$0xff] %v9609_v38  ;;  %v11409_v16 = vld [vmem:[#allocation17_spill] sm:$0xff] }
 0x6c9   : > { %v4591_v54 = vld [vmem:[#allocation2 + $0x10] sm:$0xf]  ;;  %3985 = vrot.lane.b32.xlu0 %v3977_v17, %s11312_s16  ;;  %4054 = vrot.lane.b32.xlu1 %v4046_v20, %s11307_s18  ;;  %v9654_v17 = vpop.permute.xlu0 %4810 }
 0x6ca   : > { %v4614_v60 = vld [vmem:[#allocation2 + $0x10] sm:$0xf] }
 0x6cb   : > { %v4545_v58 = vld [vmem:[#allocation2 + $0x10] sm:$0xf] }
 0x6cc   : > { %v4568_v9 = vld [vmem:[#allocation2 + $0x10] sm:$0xf] }
 0x6cd   : > { %v4499_v36 = vld [vmem:[#allocation2 + $0x10] sm:$0xf]  ;;  %4008 = vrot.lane.b32.xlu0 %v4000_v55, %s11313_s17  ;;  %4006 = vrot.lane.b32.xlu1 %v3976_v11, %s11313_s17  ;;  %v9652_v11 = vpop.permute.xlu1 %6404  ;;  %v9665_v55 = vpop.permute.xlu0 %4833 }
 0x6ce   : > { %v4522_v24 = vld [vmem:[#allocation2 + $0x10] sm:$0xf] }
 0x6cf   : > { %v4453_v14 = vld [vmem:[#allocation2 + $0x10] sm:$0xf] }
 0x6d0   : > { %v4476_v40 = vld [vmem:[#allocation2 + $0x10] sm:$0xf] }
 0x6d1   : > { %v4407_v61 = vld [vmem:[#allocation2 + $0x10] sm:$0xf]  ;;  %4716 = vrot.lane.b32.xlu0 %v9583_v56, %s11300_s21  ;;  %4737 = vrot.lane.b32.xlu1 %v9579_v29, %s11297_s5  ;;  %v9663_v48 = vpop.permute.xlu1 %6036  ;;  %v9672_v59 = vpop.permute.xlu0 %6473 }
 0x6d2   : > { %v4430_v49 = vld [vmem:[#allocation2 + $0x10] sm:$0xf] }
 0x6d3   : > { %5400 = vst [vmem:[#allocation2 + $0xc] sm:$0xff] %v9620_v0 }
 0x6d5   : > { %4739 = vrot.lane.b32.xlu0 %v9583_v56, %s11297_s5  ;;  %4691 = vrot.lane.b32.xlu1 %v9579_v29, %s11304_s8  ;;  %v9670_v20 = vpop.permute.xlu1 %6358  ;;  %v9683_v30 = vpop.permute.xlu0 %6105 }
 0x6d9   : > { %4714 = vrot.lane.b32.xlu0 %v9579_v29, %s11300_s21  ;;  %4645 = vrot.lane.b32.xlu1 %v4637_v19, %s11318_s4  ;;  %v9679_v23 = vpop.permute.xlu1 %5990  ;;  %v9690_v27 = vpop.permute.xlu0 %6427 }
 0x6dd   : > { %4693 = vrot.lane.b32.xlu0 %v9583_v56, %s11304_s8  ;;  %4668 = vrot.lane.b32.xlu1 %v4660_v7, %s11307_s18  ;;  %v9688_v39 = vpop.permute.xlu1 %6312  ;;  %v9701_v25 = vpop.permute.xlu0 %6059 }
 0x6e1   : > { %4643 = vrot.lane.b32.xlu0 %v9616_v33, %s11318_s4  ;;  %4664 = vrot.lane.b32.xlu1 %v9612_v63, %s11307_s18  ;;  %v9697_v53 = vpop.permute.xlu1 %5967  ;;  %v9708_v12 = vpop.permute.xlu0 %6381 }
 0x6e5   : > { %4666 = vrot.lane.b32.xlu0 %v9616_v33, %s11307_s18  ;;  %4599 = vrot.lane.b32.xlu1 %v4591_v54, %s11309_s23  ;;  %v9719_v7 = vpop.permute.xlu0 %6013  ;;  %s11432_s18 = sld [smem:[#allocation51_spill]] }
 0x6e9   : > { %4641 = vrot.lane.b32.xlu0 %v9612_v63, %s11318_s4  ;;  %4622 = vrot.lane.b32.xlu1 %v4614_v60, %s11319_s6  ;;  %v9726_v21 = vpop.permute.xlu0 %6335 }
 0x6ed   : > { %4597 = vrot.lane.b32.xlu0 %v9616_v33, %s11309_s23  ;;  %4618 = vrot.lane.b32.xlu1 %v9612_v63, %s11319_s6 }
 0x6f1   : > { %4620 = vrot.lane.b32.xlu0 %v9616_v33, %s11319_s6  ;;  %4553 = vrot.lane.b32.xlu1 %v4545_v58, %s11312_s16  ;;  %s11474_s6 = smov 69  }
 0x6f5   : > { %4595 = vrot.lane.b32.xlu0 %v9612_v63, %s11309_s23  ;;  %4576 = vrot.lane.b32.xlu1 %v4568_v9, %s11313_s17  ;;  %v7959_v9 = vunpack.i.h.bf16 %v11409_v16  ;;  %s11428_s23 = sld [smem:[#allocation49_spill]] }
 0x6f9   : > { %4551 = vrot.lane.b32.xlu0 %v9616_v33, %s11312_s16  ;;  %4572 = vrot.lane.b32.xlu1 %v9612_v63, %s11313_s17 }
 0x6fd   : > { %4574 = vrot.lane.b32.xlu0 %v9616_v33, %s11313_s17  ;;  %4507 = vrot.lane.b32.xlu1 %v4499_v36, %s11298_s27  ;;  %s11410_s17 = smov 83  }
 0x701   : > { %4549 = vrot.lane.b32.xlu0 %v9612_v63, %s11312_s16  ;;  %4530 = vrot.lane.b32.xlu1 %v4522_v24, %s11295_s15  ;;  %s11431_s16 = smov 25  }
 0x702   : > { %v4147_v60 = vpop.permute.xlu0 %4146 }
 0x705   : > { %4505 = vrot.lane.b32.xlu0 %v9616_v33, %s11298_s27  ;;  %4526 = vrot.lane.b32.xlu1 %v9612_v63, %s11295_s15 }
 0x706   : > { %v4124_v36 = vpop.permute.xlu0 %4123 }
 0x707   : > { %v4129_v43 = vrot.slane %v4124_v36, 4 }
 0x709   : > { %4528 = vrot.lane.b32.xlu0 %v9616_v33, %s11295_s15  ;;  %4461 = vrot.lane.b32.xlu1 %v4453_v14, %s11404_s12  ;;  %v4154_v14 = vrot.slane %v7959_v9, 4 }
 0x70a   : > { %v9706_v10 = vpop.permute.xlu1 %3981  ;;  %v9756_v8 = vpop.permute.xlu0 %4027 }
 0x70b   : > { %v4033_v34 = vrot.slane %v9756_v8, 4 }
 0x70d   : > { %4503 = vrot.lane.b32.xlu0 %v9612_v63, %s11298_s27  ;;  %4484 = vrot.lane.b32.xlu1 %v4476_v40, %s11405_s20  ;;  %v4152_v40 = vrot.slane %v4147_v60, 4 }
 0x70e   : > { %v9713_v19 = vpop.permute.xlu1 %4100 }
 0x70f   : > { %v4106_v35 = vrot.slane %v9713_v19, 4 }
 0x711   : > { %4459 = vrot.lane.b32.xlu0 %v9616_v33, %s11404_s12  ;;  %4480 = vrot.lane.b32.xlu1 %v9612_v63, %s11405_s20 }
 0x712   : > { %v9724_v62 = vpop.permute.xlu1 %4077 }
 0x715   : > { %4482 = vrot.lane.b32.xlu0 %v9616_v33, %s11405_s20  ;;  %4415 = vrot.lane.b32.xlu1 %v4407_v61, %s11406_s7 }
 0x716   : > { %v9731_v54 = vpop.permute.xlu1 %4050 }
 0x719   : > { %4457 = vrot.lane.b32.xlu0 %v9612_v63, %s11404_s12  ;;  %4438 = vrot.lane.b32.xlu1 %v4430_v49, %s11407_s19 }
 0x71a   : > { %v9741_v58 = vpop.permute.xlu1 %4004 }
 0x71d   : > { %4413 = vrot.lane.b32.xlu0 %v9616_v33, %s11406_s7  ;;  %4434 = vrot.lane.b32.xlu1 %v9612_v63, %s11407_s19 }
 0x721   : > { %4436 = vrot.lane.b32.xlu0 %v9616_v33, %s11407_s19  ;;  %4900 = vrot.lane.b32.xlu1 %v9583_v56, %s11408_s14  ;;  %v11411_v33 = vld [vmem:[#allocation24_spill] sm:$0xff] }
 0x722   : > { %v7963_v49 = vunpack.i.l.bf16 %v11411_v33 }
 0x725   : > { %4411 = vrot.lane.b32.xlu0 %v9612_v63, %s11406_s7  ;;  %4923 = vrot.lane.b32.xlu1 %v9583_v56, %s11410_s17  ;;  %v7968_v63 = vunpack.i.l.bf16 %v9325_v3 }
 0x727   : > { %v4149_v24 = vpop.permute.xlu1 %4148 }
 0x728   : > { %v4153_v61 = vrot.slane %v4149_v24, 4 }
 0x729   : > { %4946 = vrot.lane.b32.xlu0 %v9583_v56, %s11272_s1  ;;  %4898 = vrot.lane.b32.xlu1 %v9579_v29, %s11408_s14 }
 0x72a   : > { %v4155_v16 = vsel %vm795_vm2, %v4152_v40, %v4153_v61  ;;  %v4157_v18 = vsel %vm795_vm2, %v4153_v61, %v4154_v14  ;;  %v4108_v40 = vrot.slane %v7963_v49, 4  ;;  %v7973_v61 = vunpack.i.l.bf16 %v9340_v32 }
 0x72b   : > { %v4158_v9 = vsel %vm11412_vm6, %v4149_v24, %v4157_v18  ;;  %v4103_v28 = vpop.permute.xlu1 %4102  ;;  %v4156_v13 = vsel %vm11413_vm7, %v4147_v60, %v4155_v16  ;;  %v4131_v60 = vrot.slane %v7968_v63, 4  ;;  %vm11414_vm6 = vcmask 875520  }
 0x72c   : > { %v7703_v52 = vcombine.low %v4158_v9, %v4158_v9  ;;  %v7704_v31 = vcombine.high %v4158_v9, %v4158_v9  ;;  %v4107_v46 = vrot.slane %v4103_v28, 4  ;;  %v7702_v57 = vcombine.high %v4156_v13, %v4156_v13  ;;  %vm11416_vm14 = vmmov %vm11414_vm6 }
 0x72d   : > { %4944 = vrot.lane.b32.xlu0 %v9579_v29, %s11272_s1  ;;  %4854 = vrot.lane.b32.xlu1 %v9583_v56, %s11276_s28  ;;  %v7701_v14 = vcombine.low %v4156_v13, %v4156_v13  ;;  %vm11415_vm7 = vcmask 867328  }
 0x72e   : > { %7705 = vmatprep.subr.msk.bf16.mxu0 %vm795_vm2, %v7702_v57  ;;  %7707 = vmatprep.subr.msk.bf16.mxu1 %vm795_vm2, %v7704_v31  ;;  %v4288_v18 = vsel %vm795_vm2, %v7703_v52, 0  ;;  %v4111_v13 = vsel %vm795_vm2, %v4107_v46, %v4108_v40  ;;  %v4109_v45 = vsel %vm795_vm2, %v4106_v35, %v4107_v46  ;;  %v4085_v57 = vrot.slane %v7973_v61, 4  ;;  %vm11417_vm11 = vmmov %vm11415_vm7 }
 0x72f   : > { %v9769_v24 = vpop.permute.xlu0 %3983  ;;  %4341 = vmatpush1.bf16.msra.mxu1 %v4288_v18  ;;  %v4126_v16 = vpop.permute.xlu1 %4125  ;;  %v4282_v9 = vsel %vm795_vm2, %v7701_v14, 0  ;;  %v4083_v31 = vrot.slane %v9724_v62, 4  ;;  %v4112_v40 = vsel %vm11414_vm6, %v4103_v28, %v4111_v13  ;;  %v4110_v46 = vsel %vm11416_vm14, %v9713_v19, %v4109_v45 }
 0x730   : > { %v4130_v49 = vrot.slane %v4126_v16, 4  ;;  %4300 = vmatpush1.bf16.msra.mxu0 %v4282_v9  ;;  %v4056_v19 = vrot.slane %v9731_v54, 4  ;;  %vm11420_vm6 = vcmask 171008  }
 0x731   : > { %4921 = vrot.lane.b32.xlu0 %v9579_v29, %s11410_s17  ;;  %4877 = vrot.lane.b32.xlu1 %v9583_v56, %s11278_s2 }
 0x732   : > { %v4134_v52 = vsel %vm795_vm2, %v4130_v49, %v4131_v60  ;;  %v4132_v63 = vsel %vm795_vm2, %v4129_v43, %v4130_v49 }
 0x733   : > { %v4030_v14 = vpop.permute.xlu0 %4029  ;;  %v4135_v18 = vsel %vm11415_vm7, %v4126_v16, %v4134_v52  ;;  %v4080_v9 = vpop.permute.xlu1 %4079  ;;  %v4133_v35 = vsel %vm11417_vm11, %v4124_v36, %v4132_v63  ;;  %vm11418_vm11 = vcmask 1039360   ;;  %vm11421_vm7 = vcmask 7168  }
 0x734   : > { %v4034_v4 = vrot.slane %v4030_v14, 4  ;;  %v7699_v2 = vcombine.low %v4112_v40, %v4135_v18  ;;  %v4084_v61 = vrot.slane %v4080_v9, 4  ;;  %v7697_v42 = vcombine.low %v4110_v46, %v4133_v35  ;;  %vm11419_vm14 = vmmov %vm11418_vm11 }
 0x735   : > { %4875 = vrot.lane.b32.xlu0 %v9579_v29, %s11278_s2  ;;  %4852 = vrot.lane.b32.xlu1 %v9579_v29, %s11276_s28  ;;  %v7698_v43 = vcombine.high %v4110_v46, %v4133_v35  ;;  %v7700_v28 = vcombine.high %v4112_v40, %v4135_v18 }
 0x736   : > { %v4088_v60 = vsel %vm795_vm2, %v4084_v61, %v4085_v57  ;;  %v4086_v45 = vsel %vm795_vm2, %v4083_v31, %v4084_v61  ;;  %v4036_v52 = vsel %vm795_vm2, %v4033_v34, %v4034_v4 }
 0x737   : > { %v4053_v36 = vpop.permute.xlu0 %4052  ;;  %v4089_v16 = vsel %vm11418_vm11, %v4080_v9, %v4088_v60  ;;  %4301 = vmatprep.subr.bf16.mxu0 %v7698_v43  ;;  %4342 = vmatprep.subr.bf16.mxu1 %v7700_v28  ;;  %v4032_v13 = vpop.permute.xlu1 %4031  ;;  %v4087_v49 = vsel %vm11419_vm14, %v9724_v62, %v4086_v45  ;;  %v3988_v9 = vrot.slane %v9769_v24, 4  ;;  %v4037_v35 = vsel %vm11420_vm6, %v9756_v8, %v4036_v52  ;;  %vm11422_vm11 = vmmov %vm11420_vm6 }
 0x738   : > { %v4057_v63 = vrot.slane %v4053_v36, 4  ;;  %v7695_v40 = vcombine.low %v9554_v41, %v4089_v16  ;;  %4343 = vmatpush1.bf16.msra.mxu1 %v7699_v2  ;;  %v4035_v57 = vrot.slane %v4032_v13, 4  ;;  %4302 = vmatpush1.bf16.msra.mxu0 %v7697_v42  ;;  %v7693_v31 = vcombine.low %v9531_v37, %v4087_v49  ;;  %vm11423_vm14 = vmmov %vm11421_vm7 }
 0x739   : > { %4829 = vrot.lane.b32.xlu0 %v9579_v29, %s11289_s11  ;;  %4808 = vrot.lane.b32.xlu1 %v9583_v56, %s11287_s10  ;;  %v7694_v18 = vcombine.high %v9531_v37, %v4087_v49  ;;  %v7696_v62 = vcombine.high %v9554_v41, %v4089_v16  ;;  %v3987_v60 = vrot.slane %v9706_v10, 4  ;;  %vm11424_vm6 = vcmask 187392  }
 0x73a   : > { %v4059_v34 = vsel %vm795_vm2, %v4056_v19, %v4057_v63  ;;  %v4038_v2 = vsel %vm795_vm2, %v4034_v4, %v4035_v57  ;;  %v4010_v4 = vrot.slane %v9741_v58, 4 }
 0x73b   : > { %v3986_v46 = vpop.permute.xlu0 %3985  ;;  %4303 = vmatprep.subr.bf16.mxu0 %v7694_v18  ;;  %4344 = vmatprep.subr.bf16.mxu1 %v7696_v62  ;;  %v4055_v42 = vpop.permute.xlu1 %4054  ;;  %v4060_v61 = vsel %vm11421_vm7, %v9731_v54, %v4059_v34  ;;  %v4039_v16 = vsel %vm11422_vm11, %v4030_v14, %v4038_v2  ;;  %v3990_v49 = vsel %vm795_vm2, %v3987_v60, %v3988_v9  ;;  %vm11425_vm7 = vcmask 179200   ;;  %vm11426_vm11 = vmmov %vm11424_vm6  ;;  %v4163_v60 = vld [vmem:[%s11428_s23] sm:$0xf]  ;;  %s11467_s23 = smov 66  }
 0x73c   : > { %v3989_v43 = vrot.slane %v3986_v46, 4  ;;  %4345 = vmatpush1.bf16.msra.mxu1 %v7695_v40  ;;  %v4058_v37 = vrot.slane %v4055_v42, 4  ;;  %4304 = vmatpush1.bf16.msra.mxu0 %v7693_v31  ;;  %v7689_v41 = vcombine.low %v4037_v35, %v4060_v61  ;;  %v7690_v28 = vcombine.high %v4037_v35, %v4060_v61 }
 0x73d   : > { %4785 = vrot.lane.b32.xlu0 %v9583_v56, %s11292_s13  ;;  %4831 = vrot.lane.b32.xlu1 %v9583_v56, %s11289_s11 }
 0x73e   : > { %v4061_v8 = vsel %vm795_vm2, %v4057_v63, %v4058_v37  ;;  %4305 = vmatprep.subr.bf16.mxu0 %v7690_v28  ;;  %v3992_v54 = vsel %vm795_vm2, %v3988_v9, %v3989_v43  ;;  %v3991_v9 = vsel %vm11426_vm11, %v9706_v10, %v3990_v49  ;;  %v4722_v43 = vrot.slane %v9306_v44, 4 }
 0x73f   : > { %v4009_v45 = vpop.permute.xlu0 %4008  ;;  %v4007_v19 = vpop.permute.xlu1 %4006  ;;  %v4062_v13 = vsel %vm11423_vm14, %v4053_v36, %v4061_v8  ;;  %v3993_v36 = vsel %vm11424_vm6, %v9769_v24, %v3992_v54  ;;  %vm11427_vm14 = vmmov %vm11425_vm7  ;;  %vm11429_vm6 = vcmask 588800  }
 0x740   : > { %v4012_v52 = vrot.slane %v4009_v45, 4  ;;  %v4011_v40 = vrot.slane %v4007_v19, 4  ;;  %4306 = vmatpush1.bf16.msra.mxu0 %v7689_v41  ;;  %v7691_v57 = vcombine.low %v4039_v16, %v4062_v13  ;;  %v7692_v31 = vcombine.high %v4039_v16, %v4062_v13  ;;  %vm11433_vm11 = vmmov %vm11429_vm6 }
 0x741   : > { %4783 = vrot.lane.b32.xlu0 %v9579_v29, %s11292_s13  ;;  %4806 = vrot.lane.b32.xlu1 %v9579_v29, %s11287_s10  ;;  %v4745_v41 = vrot.slane %v9327_v5, 4  ;;  %v7974_v5 = vunpack.i.h.bf16 %v9340_v32 }
 0x742   : > { %v4015_v63 = vsel %vm795_vm2, %v4011_v40, %v4012_v52  ;;  %4346 = vmatprep.subr.bf16.mxu1 %v7692_v31  ;;  %v4013_v14 = vsel %vm795_vm2, %v4010_v4, %v4011_v40  ;;  %v9858_v52 = vld [vmem:[#allocation2 + $0x8] sm:$0xff] }
 0x743   : > { %v4717_v18 = vpop.permute.xlu0 %4716  ;;  %v4016_v62 = vsel %vm11425_vm7, %v4007_v19, %v4015_v63  ;;  %4347 = vmatpush1.bf16.msra.mxu1 %v7691_v57  ;;  %v4738_v34 = vpop.permute.xlu1 %4737  ;;  %v4014_v46 = vsel %vm11427_vm14, %v9741_v58, %v4013_v14  ;;  %vm11430_vm7 = vmmov %vm11429_vm6  ;;  %v9868_v57 = vld [vmem:[%s11432_s18] sm:$0xff]  ;;  %v4699_v31 = vrot.slane %v7974_v5, 4  ;;  %vm11434_vm14 = vcmask 1039360   ;;  %s11436_s18 = smov 63  }
 0x744   : > { %v4721_v2 = vrot.slane %v4717_v18, 4  ;;  %v7687_v42 = vcombine.low %v3993_v36, %v4016_v62  ;;  %v7685_v35 = vcombine.low %v3991_v9, %v4014_v46  ;;  %v7686_v24 = vcombine.high %v3991_v9, %v4014_v46 }
 0x745   : > { %6448 = vrot.lane.b32.xlu0 %v9620_v0, %s11321_s0  ;;  %4762 = vrot.lane.b32.xlu1 %v9583_v56, %s11291_s9  ;;  %v7688_v61 = vcombine.high %v3993_v36, %v4016_v62  ;;  %v4743_v4 = vrot.slane %v4738_v34, 4  ;;  %v7712_v62 = vcombine.high %v9868_v57, %v9868_v57 }
 0x746   : > { %4307 = vmatprep.subr.bf16.mxu0 %v7686_v24  ;;  %v4725_v58 = vsel %vm795_vm2, %v4721_v2, %v4722_v43 }
 0x747   : > { %v4740_v37 = vpop.permute.xlu0 %4739  ;;  %4348 = vmatprep.subr.bf16.mxu1 %v7688_v61  ;;  %v4692_v10 = vpop.permute.xlu1 %4691  ;;  %4308 = vmatpush1.bf16.msra.mxu0 %v7685_v35  ;;  %v4726_v8 = vsel %vm2388_vm4, %v4717_v18, %v4725_v58 }
 0x748   : > { %v4744_v28 = vrot.slane %v4740_v37, 4  ;;  %4349 = vmatpush1.bf16.msra.mxu1 %v7687_v42 }
 0x749   : > { %6471 = vrot.lane.b32.xlu0 %v9620_v0, %s11349_s26  ;;  %4760 = vrot.lane.b32.xlu1 %v9579_v29, %s11291_s9 }
 0x74a   : > { %v4748_v44 = vsel %vm795_vm2, %v4744_v28, %v4745_v41  ;;  %7706 = vmatmul.mubr.msk.bf16.vlgmr.msra.gmra.mxu0 %vm11430_vm7, %v4163_v60  ;;  %v4746_v49 = vsel %vm795_vm2, %v4743_v4, %v4744_v28 }
 0x74b   : > { %v4749_v54 = vsel %vm2460_vm3, %v4740_v37, %v4748_v44  ;;  %v4715_v45 = vpop.permute.xlu0 %4714  ;;  %7708 = vmatmul.mubr.msk.bf16.vlgmr.msra.gmra.mxu1 %vm11429_vm6, %v4163_v60  ;;  %v4646_v19 = vpop.permute.xlu1 %4645  ;;  %v4747_v14 = vsel %vm2460_vm3, %v4738_v34, %v4746_v49  ;;  %vm11435_vm6 = vmmov %vm11434_vm14  ;;  %7766 = vmatprep.mubr.msk.bf16.mxu0 %vm11430_vm7, %v7712_v62  ;;  %v9887_v44 = vld [vmem:[#allocation2] sm:$0xff] }
 0x74c   : > { %v7743_v16 = vcombine.low %v4726_v8, %v4749_v54  ;;  %v4720_v13 = vrot.slane %v4715_v45, 4  ;;  %v7744_v40 = vcombine.high %v4726_v8, %v4749_v54  ;;  %7768 = vmatprep.mubr.msk.bf16.mxu1 %vm11433_vm11, %v7712_v62  ;;  %vm11437_vm11 = vcmask 7168  }
 0x74d   : > { %5731 = vrot.lane.b32.xlu0 %v9858_v52, %s11431_s16  ;;  %6446 = vrot.lane.b32.xlu1 %v9609_v38, %s11321_s0  ;;  %s11439_s0 = smov 41  }
 0x74e   : > { %v4723_v32 = vsel %vm795_vm2, %v4720_v13, %v4721_v2  ;;  %5330 = vmatprep.subr.bf16.mxu1 %v7744_v40  ;;  %v4697_v2 = vrot.slane %v4692_v10, 4 }
 0x74f   : > { %v4724_v63 = vsel %vm2388_vm4, %v4715_v45, %v4723_v32  ;;  %v4694_v18 = vpop.permute.xlu0 %4693  ;;  %5331 = vmatpush1.bf16.msra.mxu1 %v7743_v16  ;;  %v4669_v36 = vpop.permute.xlu1 %4668 }
 0x750   : > { %v7741_v9 = vcombine.low %v4724_v63, %v4747_v14  ;;  %v4698_v46 = vrot.slane %v4694_v18, 4  ;;  %v7742_v42 = vcombine.high %v4724_v63, %v4747_v14 }
 0x751   : > { %5754 = vrot.lane.b32.xlu0 %v9858_v52, %s11295_s15  ;;  %6469 = vrot.lane.b32.xlu1 %v9609_v38, %s11349_s26  ;;  %s11466_s26 = smov 67  }
 0x752   : > { %v4702_v35 = vsel %vm795_vm2, %v4698_v46, %v4699_v31  ;;  %v4700_v34 = vsel %vm795_vm2, %v4697_v2, %v4698_v46  ;;  %5289 = vmatprep.subr.bf16.mxu0 %v7742_v42 }
 0x753   : > { %v4703_v24 = vsel %vm11434_vm14, %v4694_v18, %v4702_v35  ;;  %v4701_v61 = vsel %vm11435_vm6, %v4692_v10, %v4700_v34  ;;  %v4644_v43 = vpop.permute.xlu0 %4643  ;;  %5290 = vmatpush1.bf16.msra.mxu0 %v7741_v9  ;;  %v4665_v37 = vpop.permute.xlu1 %4664  ;;  %v4649_v10 = vrot.slane %v4646_v19, 4  ;;  %vm11438_vm14 = vmmov %vm11437_vm11  ;;  %vm11440_vm6 = vcmask 171008  }
 0x754   : > { %v7739_v41 = vcombine.low %v9583_v56, %v4703_v24  ;;  %v7737_v58 = vcombine.low %v9579_v29, %v4701_v61  ;;  %v4648_v28 = vrot.slane %v4644_v43, 4  ;;  %v7738_v60 = vcombine.high %v9579_v29, %v4701_v61  ;;  %vm11441_vm7 = vmmov %vm11440_vm6 }
 0x755   : > { %6402 = vrot.lane.b32.xlu0 %v9620_v0, %s11436_s18  ;;  %v7740_v4 = vcombine.high %v9583_v56, %v4703_v24  ;;  %5729 = vrot.lane.b32.xlu1 %v9887_v44, %s11431_s16  ;;  %v4672_v29 = vrot.slane %v4669_v36, 4  ;;  %v4670_v16 = vrot.slane %v4665_v37, 4 }
 0x756   : > { %5291 = vmatprep.subr.bf16.mxu0 %v7738_v60  ;;  %v4652_v54 = vsel %vm795_vm2, %v4648_v28, %v4649_v10 }
 0x757   : > { %5332 = vmatprep.subr.bf16.mxu1 %v7740_v4  ;;  %v4667_v5 = vpop.permute.xlu0 %4666  ;;  %5292 = vmatpush1.bf16.msra.mxu0 %v7737_v58  ;;  %v4600_v8 = vpop.permute.xlu1 %4599  ;;  %v4653_v13 = vsel %vm2314_vm13, %v4644_v43, %v4652_v54 }
 0x758   : > { %v4671_v45 = vrot.slane %v4667_v5, 4  ;;  %5333 = vmatpush1.bf16.msra.mxu1 %v7739_v41  ;;  %v4603_v34 = vrot.slane %v4600_v8, 4 }
 0x759   : > { %6425 = vrot.lane.b32.xlu0 %v9620_v0, %s11269_s24  ;;  %5752 = vrot.lane.b32.xlu1 %v9887_v44, %s11295_s15 }
 0x75a   : > { %v4675_v56 = vsel %vm795_vm2, %v4671_v45, %v4672_v29  ;;  %v4673_v31 = vsel %vm795_vm2, %v4670_v16, %v4671_v45 }
 0x75b   : > { %v4642_v19 = vpop.permute.xlu0 %4641  ;;  %v4676_v49 = vsel %vm11437_vm11, %v4667_v5, %v4675_v56  ;;  %v4623_v40 = vpop.permute.xlu1 %4622  ;;  %v4674_v62 = vsel %vm11438_vm14, %v4665_v37, %v4673_v31  ;;  %vm11442_vm11 = vcmask 187392   ;;  %vm11443_vm14 = vcmask 179200  }
 0x75c   : > { %v4647_v32 = vrot.slane %v4642_v19, 4  ;;  %v7735_v63 = vcombine.low %v4653_v13, %v4676_v49  ;;  %v7736_v14 = vcombine.high %v4653_v13, %v4676_v49  ;;  %v4626_v41 = vrot.slane %v4623_v40, 4 }
 0x75d   : > { %5685 = vrot.lane.b32.xlu0 %v9858_v52, %s11298_s27  ;;  %6400 = vrot.lane.b32.xlu1 %v9609_v38, %s11436_s18 }
 0x75e   : > { %v4650_v18 = vsel %vm795_vm2, %v4647_v32, %v4648_v28  ;;  %5334 = vmatprep.subr.bf16.mxu1 %v7736_v14 }
 0x75f   : > { %v4651_v36 = vsel %vm2314_vm13, %v4642_v19, %v4650_v18  ;;  %v4598_v9 = vpop.permute.xlu0 %4597  ;;  %5335 = vmatpush1.bf16.msra.mxu1 %v7735_v63  ;;  %v4619_v46 = vpop.permute.xlu1 %4618 }
 0x760   : > { %v7733_v2 = vcombine.low %v4651_v36, %v4674_v62  ;;  %v4602_v42 = vrot.slane %v4598_v9, 4  ;;  %v7734_v35 = vcombine.high %v4651_v36, %v4674_v62  ;;  %v4624_v28 = vrot.slane %v4619_v46, 4 }
 0x761   : > { %5708 = vrot.lane.b32.xlu0 %v9858_v52, %s11439_s0  ;;  %6423 = vrot.lane.b32.xlu1 %v9609_v38, %s11269_s24  ;;  %s11452_s24 = smov 47  }
 0x762   : > { %5293 = vmatprep.subr.bf16.mxu0 %v7734_v35  ;;  %v4606_v43 = vsel %vm795_vm2, %v4602_v42, %v4603_v34 }
 0x763   : > { %v4621_v24 = vpop.permute.xlu0 %4620  ;;  %5294 = vmatpush1.bf16.msra.mxu0 %v7733_v2  ;;  %v4554_v61 = vpop.permute.xlu1 %4553  ;;  %v4607_v4 = vsel %vm11440_vm6, %v4598_v9, %v4606_v43  ;;  %vm11444_vm6 = vmmov %vm11442_vm11 }
 0x764   : > { %v4625_v37 = vrot.slane %v4621_v24, 4  ;;  %v4557_v63 = vrot.slane %v4554_v61, 4 }
 0x765   : > { %6356 = vrot.lane.b32.xlu0 %v9620_v0, %s11270_s29  ;;  %5683 = vrot.lane.b32.xlu1 %v9887_v44, %s11298_s27 }
 0x766   : > { %v4629_v58 = vsel %vm795_vm2, %v4625_v37, %v4626_v41  ;;  %v4627_v54 = vsel %vm795_vm2, %v4624_v28, %v4625_v37 }
 0x767   : > { %v4596_v60 = vpop.permute.xlu0 %4595  ;;  %v4630_v10 = vsel %vm2242_vm15, %v4621_v24, %v4629_v58  ;;  %v4577_v5 = vpop.permute.xlu1 %4576  ;;  %v4628_v19 = vsel %vm2242_vm15, %v4619_v46, %v4627_v54 }
 0x768   : > { %v4601_v8 = vrot.slane %v4596_v60, 4  ;;  %v7731_v45 = vcombine.low %v4607_v4, %v4630_v10  ;;  %v7732_v29 = vcombine.high %v4607_v4, %v4630_v10  ;;  %v4580_v9 = vrot.slane %v4577_v5, 4 }
 0x769   : > { %6379 = vrot.lane.b32.xlu0 %v9620_v0, %s11271_s30  ;;  %5706 = vrot.lane.b32.xlu1 %v9887_v44, %s11439_s0 }
 0x76a   : > { %v4604_v56 = vsel %vm795_vm2, %v4601_v8, %v4602_v42  ;;  %5336 = vmatprep.subr.bf16.mxu1 %v7732_v29 }
 0x76b   : > { %v4605_v16 = vsel %vm11441_vm7, %v4596_v60, %v4604_v56  ;;  %v4552_v13 = vpop.permute.xlu0 %4551  ;;  %5337 = vmatpush1.bf16.msra.mxu1 %v7731_v45  ;;  %v4573_v49 = vpop.permute.xlu1 %4572  ;;  %vm11445_vm7 = vmmov %vm11443_vm14 }
 0x76c   : > { %v7729_v40 = vcombine.low %v4605_v16, %v4628_v19  ;;  %v4556_v32 = vrot.slane %v4552_v13, 4  ;;  %v7730_v31 = vcombine.high %v4605_v16, %v4628_v19  ;;  %v4578_v2 = vrot.slane %v4573_v49, 4 }
 0x76d   : > { %5639 = vrot.lane.b32.xlu0 %v9858_v52, %s11404_s12  ;;  %6354 = vrot.lane.b32.xlu1 %v9609_v38, %s11270_s29 }
 0x76e   : > { %5295 = vmatprep.subr.bf16.mxu0 %v7730_v31  ;;  %v4560_v36 = vsel %vm795_vm2, %v4556_v32, %v4557_v63 }
 0x76f   : > { %v4575_v14 = vpop.permute.xlu0 %4574  ;;  %5296 = vmatpush1.bf16.msra.mxu0 %v7729_v40  ;;  %v4508_v18 = vpop.permute.xlu1 %4507  ;;  %v4561_v35 = vsel %vm11442_vm11, %v4552_v13, %v4560_v36  ;;  %vm11446_vm11 = vcmask 195584  }
 0x770   : > { %v4579_v62 = vrot.slane %v4575_v14, 4  ;;  %v4511_v45 = vrot.slane %v4508_v18, 4 }
 0x771   : > { %5662 = vrot.lane.b32.xlu0 %v9858_v52, %s11405_s20  ;;  %6377 = vrot.lane.b32.xlu1 %v9609_v38, %s11271_s30 }
 0x772   : > { %v4583_v46 = vsel %vm795_vm2, %v4579_v62, %v4580_v9  ;;  %v4581_v43 = vsel %vm795_vm2, %v4578_v2, %v4579_v62 }
 0x773   : > { %v4550_v42 = vpop.permute.xlu0 %4549  ;;  %v4584_v34 = vsel %vm11443_vm14, %v4575_v14, %v4583_v46  ;;  %v4531_v24 = vpop.permute.xlu1 %4530  ;;  %v4582_v60 = vsel %vm11445_vm7, %v4573_v49, %v4581_v43  ;;  %vm11447_vm14 = vmmov %vm11446_vm11  ;;  %vm11449_vm7 = vcmask 351232  }
 0x774   : > { %v4555_v61 = vrot.slane %v4550_v42, 4  ;;  %v7727_v37 = vcombine.low %v4561_v35, %v4584_v34  ;;  %v7728_v41 = vcombine.high %v4561_v35, %v4584_v34  ;;  %v4534_v13 = vrot.slane %v4531_v24, 4 }
 0x775   : > { %6310 = vrot.lane.b32.xlu0 %v9620_v0, %s11272_s1  ;;  %5637 = vrot.lane.b32.xlu1 %v9887_v44, %s11404_s12 }
 0x776   : > { %v4558_v58 = vsel %vm795_vm2, %v4555_v61, %v4556_v32  ;;  %5338 = vmatprep.subr.bf16.mxu1 %v7728_v41 }
 0x777   : > { %v4559_v28 = vsel %vm11444_vm6, %v4550_v42, %v4558_v58  ;;  %v4506_v4 = vpop.permute.xlu0 %4505  ;;  %5339 = vmatpush1.bf16.msra.mxu1 %v7727_v37  ;;  %v4527_v10 = vpop.permute.xlu1 %4526  ;;  %vm11448_vm6 = vcmask 359424  }
 0x778   : > { %v7725_v5 = vcombine.low %v4559_v28, %v4582_v60  ;;  %v4510_v8 = vrot.slane %v4506_v4, 4  ;;  %v7726_v54 = vcombine.high %v4559_v28, %v4582_v60  ;;  %v4532_v40 = vrot.slane %v4527_v10, 4 }
 0x779   : > { %6333 = vrot.lane.b32.xlu0 %v9620_v0, %s11273_s3  ;;  %5660 = vrot.lane.b32.xlu1 %v9887_v44, %s11405_s20 }
 0x77a   : > { %5297 = vmatprep.subr.bf16.mxu0 %v7726_v54  ;;  %v4514_v16 = vsel %vm795_vm2, %v4510_v8, %v4511_v45 }
 0x77b   : > { %v4529_v29 = vpop.permute.xlu0 %4528  ;;  %5298 = vmatpush1.bf16.msra.mxu0 %v7725_v5  ;;  %v4462_v56 = vpop.permute.xlu1 %4461  ;;  %v4515_v31 = vsel %vm2077_vm12, %v4506_v4, %v4514_v16 }
 0x77c   : > { %v4533_v19 = vrot.slane %v4529_v29, 4  ;;  %v4465_v37 = vrot.slane %v4462_v56, 4 }
 0x77d   : > { %5593 = vrot.lane.b32.xlu0 %v9858_v52, %s11406_s7  ;;  %6308 = vrot.lane.b32.xlu1 %v9609_v38, %s11272_s1  ;;  %s11463_s1 = smov 87  }
 0x77e   : > { %v4537_v49 = vsel %vm795_vm2, %v4533_v19, %v4534_v13  ;;  %v4535_v36 = vsel %vm795_vm2, %v4532_v40, %v4533_v19 }
 0x77f   : > { %v4504_v32 = vpop.permute.xlu0 %4503  ;;  %v4538_v63 = vsel %vm11446_vm11, %v4529_v29, %v4537_v49  ;;  %v4485_v14 = vpop.permute.xlu1 %4484  ;;  %v4536_v42 = vsel %vm11447_vm14, %v4527_v10, %v4535_v36  ;;  %vm11450_vm11 = vmmov %vm11448_vm6 }
 0x780   : > { %v4509_v18 = vrot.slane %v4504_v32, 4  ;;  %v7723_v62 = vcombine.low %v4515_v31, %v4538_v63  ;;  %v7724_v9 = vcombine.high %v4515_v31, %v4538_v63  ;;  %v4488_v4 = vrot.slane %v4485_v14, 4  ;;  %vm11451_vm14 = vmmov %vm11449_vm7 }
 0x781   : > { %5616 = vrot.lane.b32.xlu0 %v9858_v52, %s11407_s19  ;;  %6331 = vrot.lane.b32.xlu1 %v9609_v38, %s11273_s3  ;;  %s11459_s3 = smov 103  }
 0x782   : > { %v4512_v46 = vsel %vm795_vm2, %v4509_v18, %v4510_v8  ;;  %5340 = vmatprep.subr.bf16.mxu1 %v7724_v9 }
 0x783   : > { %v4513_v2 = vsel %vm2077_vm12, %v4504_v32, %v4512_v46  ;;  %v4460_v35 = vpop.permute.xlu0 %4459  ;;  %5341 = vmatpush1.bf16.msra.mxu1 %v7723_v62  ;;  %v4481_v34 = vpop.permute.xlu1 %4480 }
 0x784   : > { %v7721_v24 = vcombine.low %v4513_v2, %v4536_v42  ;;  %v4464_v61 = vrot.slane %v4460_v35, 4  ;;  %v7722_v43 = vcombine.high %v4513_v2, %v4536_v42  ;;  %v4486_v5 = vrot.slane %v4481_v34, 4 }
 0x785   : > { %6264 = vrot.lane.b32.xlu0 %v9620_v0, %s11408_s14  ;;  %5591 = vrot.lane.b32.xlu1 %v9887_v44, %s11406_s7 }
 0x786   : > { %5299 = vmatprep.subr.bf16.mxu0 %v7722_v43  ;;  %v4468_v28 = vsel %vm795_vm2, %v4464_v61, %v4465_v37 }
 0x787   : > { %v4483_v41 = vpop.permute.xlu0 %4482  ;;  %5300 = vmatpush1.bf16.msra.mxu0 %v7721_v24  ;;  %v4416_v58 = vpop.permute.xlu1 %4415  ;;  %v4469_v54 = vsel %vm11448_vm6, %v4460_v35, %v4468_v28  ;;  %vm11453_vm6 = vcmask 367616  }
 0x788   : > { %v4487_v60 = vrot.slane %v4483_v41, 4  ;;  %v4419_v62 = vrot.slane %v4416_v58, 4 }
 0x789   : > { %6287 = vrot.lane.b32.xlu0 %v9620_v0, %s11410_s17  ;;  %5614 = vrot.lane.b32.xlu1 %v9887_v44, %s11407_s19 }
 0x78a   : > { %v4491_v10 = vsel %vm795_vm2, %v4487_v60, %v4488_v4  ;;  %v4489_v16 = vsel %vm795_vm2, %v4486_v5, %v4487_v60  ;;  %v4929_v5 = vrot.slane %v9376_v6, 4 }
 0x78b   : > { %v4458_v8 = vpop.permute.xlu0 %4457  ;;  %v4492_v45 = vsel %vm11449_vm7, %v4483_v41, %v4491_v10  ;;  %v4439_v29 = vpop.permute.xlu1 %4438  ;;  %v4490_v32 = vsel %vm11451_vm14, %v4481_v34, %v4489_v16  ;;  %vm11454_vm7 = vmmov %vm11453_vm6  ;;  %vm11456_vm14 = vcmask 678912  }
 0x78c   : > { %v4463_v56 = vrot.slane %v4458_v8, 4  ;;  %v7719_v19 = vcombine.low %v4469_v54, %v4492_v45  ;;  %v7720_v13 = vcombine.high %v4469_v54, %v4492_v45  ;;  %v4442_v35 = vrot.slane %v4439_v29, 4 }
 0x78d   : > { %5547 = vrot.lane.b32.xlu0 %v9858_v52, %s11436_s18  ;;  %6262 = vrot.lane.b32.xlu1 %v9609_v38, %s11408_s14  ;;  %v4952_v45 = vrot.slane %v9345_v1, 4  ;;  %v4906_v29 = vrot.slane %v9358_v51, 4 }
 0x78e   : > { %v4466_v49 = vsel %vm795_vm2, %v4463_v56, %v4464_v61  ;;  %5342 = vmatprep.subr.bf16.mxu1 %v7720_v13 }
 0x78f   : > { %v4467_v40 = vsel %vm11450_vm11, %v4458_v8, %v4466_v49  ;;  %v4414_v31 = vpop.permute.xlu0 %4413  ;;  %5343 = vmatpush1.bf16.msra.mxu1 %v7719_v19  ;;  %v4435_v63 = vpop.permute.xlu1 %4434  ;;  %vm11455_vm11 = vcmask 670720  }
 0x790   : > { %v7717_v14 = vcombine.low %v4467_v40, %v4490_v32  ;;  %v4418_v18 = vrot.slane %v4414_v31, 4  ;;  %v7718_v36 = vcombine.high %v4467_v40, %v4490_v32  ;;  %v4440_v34 = vrot.slane %v4435_v63, 4 }
 0x791   : > { %5570 = vrot.lane.b32.xlu0 %v9858_v52, %s11452_s24  ;;  %6285 = vrot.lane.b32.xlu1 %v9609_v38, %s11410_s17 }
 0x792   : > { %5301 = vmatprep.subr.bf16.mxu0 %v7718_v36  ;;  %v4422_v2 = vsel %vm795_vm2, %v4418_v18, %v4419_v62 }
 0x793   : > { %v4437_v9 = vpop.permute.xlu0 %4436  ;;  %5302 = vmatpush1.bf16.msra.mxu0 %v7717_v14  ;;  %v4901_v46 = vpop.permute.xlu1 %4900  ;;  %v4423_v37 = vsel %vm1981_vm5, %v4414_v31, %v4422_v2 }
 0x794   : > { %v4441_v42 = vrot.slane %v4437_v9, 4  ;;  %v4905_v54 = vrot.slane %v4901_v46, 4 }
 0x795   : > { %6218 = vrot.lane.b32.xlu0 %v9620_v0, %s11276_s28  ;;  %5545 = vrot.lane.b32.xlu1 %v9887_v44, %s11436_s18 }
 0x796   : > { %v4445_v24 = vsel %vm795_vm2, %v4441_v42, %v4442_v35  ;;  %v4443_v43 = vsel %vm795_vm2, %v4440_v34, %v4441_v42  ;;  %v4909_v51 = vsel %vm795_vm2, %v4905_v54, %v4906_v29  ;;  %v4860_v34 = vrot.slane %v9640_v47, 4 }
 0x797   : > { %v4412_v61 = vpop.permute.xlu0 %4411  ;;  %v4446_v41 = vsel %vm11453_vm6, %v4437_v9, %v4445_v24  ;;  %v4924_v58 = vpop.permute.xlu1 %4923  ;;  %v4444_v16 = vsel %vm11454_vm7, %v4435_v63, %v4443_v43  ;;  %vm11457_vm6 = vcmask 687104   ;;  %vm11458_vm7 = vmmov %vm11455_vm11  ;;  %v4883_v47 = vrot.slane %v9647_v50, 4 }
 0x798   : > { %v4417_v28 = vrot.slane %v4412_v61, 4  ;;  %v7715_v60 = vcombine.low %v4423_v37, %v4446_v41  ;;  %v7716_v4 = vcombine.high %v4423_v37, %v4446_v41  ;;  %v4928_v10 = vrot.slane %v4924_v58, 4 }
 0x799   : > { %6241 = vrot.lane.b32.xlu0 %v9620_v0, %s11278_s2  ;;  %5568 = vrot.lane.b32.xlu1 %v9887_v44, %s11452_s24  ;;  %v4910_v42 = vsel %vm11457_vm6, %v4901_v46, %v4909_v51 }
 0x79a   : > { %v4420_v8 = vsel %vm795_vm2, %v4417_v28, %v4418_v18  ;;  %5344 = vmatprep.subr.bf16.mxu1 %v7716_v4  ;;  %v4932_v6 = vsel %vm795_vm2, %v4928_v10, %v4929_v5 }
 0x79b   : > { %v4421_v56 = vsel %vm1981_vm5, %v4412_v61, %v4420_v8  ;;  %v4947_v19 = vpop.permute.xlu0 %4946  ;;  %5345 = vmatpush1.bf16.msra.mxu1 %v7715_v60  ;;  %v4899_v13 = vpop.permute.xlu1 %4898  ;;  %v4933_v14 = vsel %vm11456_vm14, %v4924_v58, %v4932_v6 }
 0x79c   : > { %v7713_v49 = vcombine.low %v4421_v56, %v4444_v16  ;;  %v4951_v40 = vrot.slane %v4947_v19, 4  ;;  %v7714_v32 = vcombine.high %v4421_v56, %v4444_v16  ;;  %v4904_v18 = vrot.slane %v4899_v13, 4 }
 0x79d   : > { %5501 = vrot.lane.b32.xlu0 %v9858_v52, %s11270_s29  ;;  %6216 = vrot.lane.b32.xlu1 %v9609_v38, %s11276_s28  ;;  %v7760_v43 = vcombine.high %v4910_v42, %v4933_v14  ;;  %v7759_v5 = vcombine.low %v4910_v42, %v4933_v14  ;;  %v10059_v42 = vld [vmem:[#allocation2 + $0x4] sm:$0xff] }
 0x79e   : > { %v4955_v1 = vsel %vm795_vm2, %v4951_v40, %v4952_v45  ;;  %5303 = vmatprep.subr.bf16.mxu0 %v7714_v32  ;;  %v4907_v46 = vsel %vm795_vm2, %v4904_v18, %v4905_v54 }
 0x79f   : > { %v4956_v31 = vsel %vm11455_vm11, %v4947_v19, %v4955_v1  ;;  %v4945_v63 = vpop.permute.xlu0 %4944  ;;  %5304 = vmatpush1.bf16.msra.mxu0 %v7713_v49  ;;  %v4855_v36 = vpop.permute.xlu1 %4854  ;;  %vm11460_vm11 = vmmov %vm11457_vm6  ;;  %vm11461_vm6 = vcmask 703488  }
 0x7a0   : > { %v7763_v62 = vcombine.low %v4956_v31, %v4956_v31  ;;  %v7764_v9 = vcombine.high %v4956_v31, %v4956_v31  ;;  %v4950_v2 = vrot.slane %v4945_v63, 4  ;;  %v4859_v35 = vrot.slane %v4855_v36, 4 }
 0x7a1   : > { %5524 = vrot.lane.b32.xlu0 %v9858_v52, %s11271_s30  ;;  %6239 = vrot.lane.b32.xlu1 %v9609_v38, %s11278_s2  ;;  %v4908_v54 = vsel %vm11460_vm11, %v4899_v13, %v4907_v46  ;;  %v10047_v13 = vld [vmem:[#allocation2 + $0xc] sm:$0xff]  ;;  %v7969_v46 = vunpack.i.h.bf16 %v9325_v3  ;;  %s11479_s2 = smov 59  }
 0x7a2   : > { %v4953_v24 = vsel %vm795_vm2, %v4950_v2, %v4951_v40  ;;  %7767 = vmatprep.subr.msk.bf16.mxu1 %vm795_vm2, %v7764_v9  ;;  %v5284_v61 = vsel %vm795_vm2, %v7763_v62, 0  ;;  %v4863_v38 = vsel %vm795_vm2, %v4859_v35, %v4860_v34 }
 0x7a3   : > { %v4954_v37 = vsel %vm11458_vm7, %v4945_v63, %v4953_v24  ;;  %v4922_v41 = vpop.permute.xlu0 %4921  ;;  %5353 = vmatpush2.bf16.msra.mxu1 %v5284_v61  ;;  %v4878_v58 = vpop.permute.xlu1 %4877  ;;  %v4864_v50 = vsel %vm11461_vm6, %v4855_v36, %v4863_v38  ;;  %vm11462_vm7 = vcmask 695296   ;;  %v4814_v24 = vrot.slane %v9654_v17, 4 }
 0x7a4   : > { %v7761_v28 = vcombine.low %v4954_v37, %v4954_v37  ;;  %v7762_v60 = vcombine.high %v4954_v37, %v4954_v37  ;;  %v4927_v4 = vrot.slane %v4922_v41, 4  ;;  %5354 = vmatprep.subr.bf16.mxu1 %v7760_v43  ;;  %v4882_v8 = vrot.slane %v4878_v58, 4  ;;  %vm11464_vm11 = vmmov %vm11462_vm7 }
 0x7a5   : > { %6172 = vrot.lane.b32.xlu0 %v9620_v0, %s11459_s3  ;;  %5499 = vrot.lane.b32.xlu1 %v9887_v44, %s11270_s29  ;;  %v4837_v43 = vrot.slane %v9665_v55, 4 }
 0x7a6   : > { %v4930_v45 = vsel %vm795_vm2, %v4927_v4, %v4928_v10  ;;  %7765 = vmatprep.subr.msk.bf16.mxu0 %vm795_vm2, %v7762_v60  ;;  %v5278_v29 = vsel %vm795_vm2, %v7761_v28, 0  ;;  %v4886_v0 = vsel %vm795_vm2, %v4882_v8, %v4883_v47 }
 0x7a7   : > { %v4931_v56 = vsel %vm11456_vm14, %v4922_v41, %v4930_v45  ;;  %v4876_v16 = vpop.permute.xlu0 %4875  ;;  %5355 = vmatpush2.bf16.msra.mxu1 %v7759_v5  ;;  %5312 = vmatpush2.bf16.msra.mxu0 %v5278_v29  ;;  %v4853_v19 = vpop.permute.xlu1 %4852  ;;  %v4887_v10 = vsel %vm11462_vm7, %v4878_v58, %v4886_v0  ;;  %vm11465_vm14 = vmmov %vm11461_vm6  ;;  %v7964_v58 = vunpack.i.h.bf16 %v11411_v33  ;;  %vm11468_vm6 = vcmask 859136  }
 0x7a8   : > { %v7757_v49 = vcombine.low %v4908_v54, %v4931_v56  ;;  %v4881_v40 = vrot.slane %v4876_v16, 4  ;;  %v7758_v32 = vcombine.high %v4908_v54, %v4931_v56  ;;  %v7755_v6 = vcombine.low %v4864_v50, %v4887_v10 }
 0x7a9   : > { %6195 = vrot.lane.b32.xlu0 %v10047_v13, %s11463_s1  ;;  %v4858_v1 = vrot.slane %v4853_v19, 4  ;;  %5522 = vrot.lane.b32.xlu1 %v9887_v44, %s11271_s30  ;;  %v7756_v51 = vcombine.high %v4864_v50, %v4887_v10  ;;  %vm11469_vm7 = vcmask 850944   ;;  %v4791_v54 = vrot.slane %v7969_v46, 4 }
 0x7aa   : > { %5313 = vmatprep.subr.bf16.mxu0 %v7758_v32  ;;  %v4884_v31 = vsel %vm795_vm2, %v4881_v40, %v4882_v8  ;;  %v4768_v33 = vrot.slane %v7964_v58, 4 }
 0x7ab   : > { %v4830_v63 = vpop.permute.xlu0 %4829  ;;  %5314 = vmatpush2.bf16.msra.mxu0 %v7757_v49  ;;  %v4885_v14 = vsel %vm11464_vm11, %v4876_v16, %v4884_v31  ;;  %v4861_v18 = vsel %vm795_vm2, %v4858_v1, %v4859_v35  ;;  %5356 = vmatprep.subr.bf16.mxu1 %v7756_v51  ;;  %v4809_v36 = vpop.permute.xlu1 %4808  ;;  %vm11470_vm11 = vmmov %vm11469_vm7  ;;  %v6454_v1 = vrot.slane %v9417_v26, 4  ;;  %v6477_v51 = vrot.slane %v9672_v59, 4 }
 0x7ac   : > { %v4862_v62 = vsel %vm11465_vm14, %v4853_v19, %v4861_v18  ;;  %5357 = vmatpush2.bf16.msra.mxu1 %v7755_v6  ;;  %v4813_v9 = vrot.slane %v4809_v36, 4  ;;  %v4835_v17 = vrot.slane %v4830_v63, 4  ;;  %vm11471_vm14 = vmmov %vm11468_vm6 }
 0x7ad   : > { %5455 = vrot.lane.b32.xlu0 %v9858_v52, %s11466_s26  ;;  %v7753_v2 = vcombine.low %v4862_v62, %v4885_v14  ;;  %6170 = vrot.lane.b32.xlu1 %v10059_v42, %s11459_s3  ;;  %v7754_v34 = vcombine.high %v4862_v62, %v4885_v14 }
 0x7ae   : > { %v4817_v37 = vsel %vm795_vm2, %v4813_v9, %v4814_v24 }
 0x7af   : > { %v4786_v61 = vpop.permute.xlu0 %4785  ;;  %5315 = vmatprep.subr.bf16.mxu0 %v7754_v34  ;;  %v4832_v35 = vpop.permute.xlu1 %4831  ;;  %v4818_v55 = vsel %vm11468_vm6, %v4809_v36, %v4817_v37  ;;  %vm11472_vm6 = vcmask 867328  }
 0x7b0   : > { %v4836_v41 = vrot.slane %v4832_v35, 4  ;;  %5316 = vmatpush2.bf16.msra.mxu0 %v7753_v2  ;;  %v4790_v60 = vrot.slane %v4786_v61, 4 }
 0x7b1   : > { %5478 = vrot.lane.b32.xlu0 %v9858_v52, %s11467_s23  ;;  %6193 = vrot.lane.b32.xlu1 %v10059_v42, %s11463_s1  ;;  %s11478_s1 = smov 68  }
 0x7b2   : > { %v4840_v28 = vsel %vm795_vm2, %v4836_v41, %v4837_v43  ;;  %v4838_v3 = vsel %vm795_vm2, %v4835_v17, %v4836_v41  ;;  %v4794_v56 = vsel %vm795_vm2, %v4790_v60, %v4791_v54 }
 0x7b3   : > { %v4784_v4 = vpop.permute.xlu0 %4783  ;;  %v4841_v38 = vsel %vm11469_vm7, %v4832_v35, %v4840_v28  ;;  %v4807_v47 = vpop.permute.xlu1 %4806  ;;  %v4839_v0 = vsel %vm11470_vm11, %v4830_v63, %v4838_v3  ;;  %v4795_v63 = vsel %vm11472_vm6, %v4786_v61, %v4794_v56  ;;  %vm11473_vm7 = vcmask 875520   ;;  %vm11475_vm11 = vmmov %vm11472_vm6  ;;  %v5426_v28 = vld [vmem:[#allocation2 + $0x10] sm:$0xf] }
 0x7b4   : > { %v7751_v5 = vcombine.low %v4818_v55, %v4841_v38  ;;  %v4812_v8 = vrot.slane %v4807_v47, 4  ;;  %v7752_v45 = vcombine.high %v4818_v55, %v4841_v38  ;;  %v4789_v16 = vrot.slane %v4784_v4, 4 }
 0x7b5   : > { %6126 = vrot.lane.b32.xlu0 %v10047_v13, %s11287_s10  ;;  %5453 = vrot.lane.b32.xlu1 %v9887_v44, %s11466_s26  ;;  %v7711_v35 = vcombine.low %v9868_v57, %v9868_v57  ;;  %vm11477_vm6 = vcmask 490496  }
 0x7b6   : > { %v4815_v29 = vsel %vm795_vm2, %v4812_v8, %v4813_v9  ;;  %5358 = vmatprep.subr.bf16.mxu1 %v7752_v45  ;;  %v4792_v14 = vsel %vm795_vm2, %v4789_v16, %v4790_v60 }
 0x7b7   : > { %v6449_v50 = vpop.permute.xlu0 %6448  ;;  %v4816_v19 = vsel %vm11471_vm14, %v4807_v47, %v4815_v29  ;;  %5359 = vmatpush2.bf16.msra.mxu1 %v7751_v5  ;;  %v4763_v49 = vpop.permute.xlu1 %4762  ;;  %v4793_v43 = vsel %vm11475_vm11, %v4784_v4, %v4792_v14  ;;  %vm11476_vm14 = vcmask 498688  }
 0x7b8   : > { %v6453_v40 = vrot.slane %v6449_v50, 4  ;;  %v7749_v32 = vcombine.low %v4816_v19, %v4839_v0  ;;  %v4767_v10 = vrot.slane %v4763_v49, 4  ;;  %v7750_v6 = vcombine.high %v4816_v19, %v4839_v0  ;;  %vm11480_vm11 = vmmov %vm11476_vm14 }
 0x7b9   : > { %6149 = vrot.lane.b32.xlu0 %v10047_v13, %s11289_s11  ;;  %5476 = vrot.lane.b32.xlu1 %v9887_v44, %s11467_s23  ;;  %v6408_v0 = vrot.slane %v9652_v11, 4 }
 0x7ba   : > { %v4771_v31 = vsel %vm795_vm2, %v4767_v10, %v4768_v33  ;;  %5317 = vmatprep.subr.bf16.mxu0 %v7750_v6  ;;  %v6457_v18 = vsel %vm795_vm2, %v6453_v40, %v6454_v1 }
 0x7bb   : > { %v6472_v36 = vpop.permute.xlu0 %6471  ;;  %v4772_v26 = vsel %vm11473_vm7, %v4763_v49, %v4771_v31  ;;  %v4761_v62 = vpop.permute.xlu1 %4760  ;;  %5318 = vmatpush2.bf16.msra.mxu0 %v7749_v32  ;;  %v10105_v37 = vsel %vm11476_vm14, %v6449_v50, %v6457_v18  ;;  %vm11481_vm14 = vmmov %vm11477_vm6  ;;  %v6431_v49 = vrot.slane %v9690_v27, 4 }
 0x7bc   : > { %v6476_v9 = vrot.slane %v6472_v36, 4  ;;  %v7747_v2 = vcombine.low %v4772_v26, %v4795_v63  ;;  %v4766_v34 = vrot.slane %v4761_v62, 4  ;;  %v7748_v24 = vcombine.high %v4772_v26, %v4795_v63 }
 0x7bd   : > { %5409 = vrot.lane.b32.xlu0 %v9858_v52, %s11474_s6  ;;  %6124 = vrot.lane.b32.xlu1 %v10059_v42, %s11287_s10 }
 0x7be   : > { %v6480_v59 = vsel %vm795_vm2, %v6476_v9, %v6477_v51  ;;  %v4769_v61 = vsel %vm795_vm2, %v4766_v34, %v4767_v10  ;;  %5360 = vmatprep.subr.bf16.mxu1 %v7748_v24  ;;  %v10140_v51 = vld [vmem:[#allocation2 + $0xc] sm:$0xff]  ;;  %v10165_v34 = vld [vmem:[#allocation2 + $0x4] sm:$0xff] }
 0x7bf   : > { %v10108_v41 = vsel %vm11477_vm6, %v6472_v36, %v6480_v59  ;;  %v10110_v46 = vpop.permute.xlu0 %5731  ;;  %v4770_v58 = vsel %vm11473_vm7, %v4761_v62, %v4769_v61  ;;  %5361 = vmatpush2.bf16.msra.mxu1 %v7747_v2  ;;  %v6447_v17 = vpop.permute.xlu1 %6446  ;;  %vm11482_vm6 = vcmask 515072   ;;  %vm11483_vm7 = vcmask 506880   ;;  %v5748_v62 = vld [vmem:[#allocation2 + $0x10] sm:$0xf] }
 0x7c0   : > { %v7745_v60 = vcombine.low %v4770_v58, %v4793_v43  ;;  %v6452_v55 = vrot.slane %v6447_v17, 4  ;;  %v7746_v57 = vcombine.high %v4770_v58, %v4793_v43  ;;  %v11206_v19 = vrot.slane %v10110_v46, 4 }
 0x7c1   : > { %5432 = vrot.lane.b32.xlu0 %v9858_v52, %s11478_s1  ;;  %6147 = vrot.lane.b32.xlu1 %v10059_v42, %s11289_s11 }
 0x7c2   : > { %5363 = vmatmul.mubr.bf16.vlgmr.msra.gmra.mxu1 %v7711_v35  ;;  %5319 = vmatprep.subr.bf16.mxu0 %v7746_v57  ;;  %v6455_v5 = vsel %vm795_vm2, %v6452_v55, %v6453_v40 }
 0x7c3   : > { %v10121_v38 = vpop.permute.xlu0 %5754  ;;  %v6470_v47 = vpop.permute.xlu1 %6469  ;;  %5320 = vmatpush2.bf16.msra.mxu0 %v7745_v60  ;;  %v6456_v45 = vsel %vm11480_vm11, %v6447_v17, %v6455_v5  ;;  %vm11484_vm11 = vcmask 203776  }
 0x7c4   : > { %v6475_v3 = vrot.slane %v6470_v47, 4  ;;  %v11208_v40 = vrot.slane %v10121_v38, 4 }
 0x7c5   : > { %6494 = vrot.lane.b32.xlu0 %v10047_v13, %s11479_s2  ;;  %5407 = vrot.lane.b32.xlu1 %v9887_v44, %s11474_s6 }
 0x7c6   : > { %v6478_v52 = vsel %vm795_vm2, %v6475_v3, %v6476_v9  ;;  %5322 = vmatmul.mubr.bf16.vlgmr.msra.gmra.mxu0 %v7711_v35 }
 0x7c7   : > { %v6403_v8 = vpop.permute.xlu0 %6402  ;;  %v6479_v54 = vsel %vm11481_vm14, %v6470_v47, %v6478_v52  ;;  %v5730_v33 = vpop.permute.xlu1 %5729  ;;  %vm11485_vm14 = vcmask 195584  }
 0x7c8   : > { %v6407_v29 = vrot.slane %v6403_v8, 4  ;;  %v7867_v56 = vcombine.low %v6456_v45, %v6479_v54  ;;  %v5735_v16 = vrot.slane %v5730_v33, 4  ;;  %v7868_v50 = vcombine.high %v6456_v45, %v6479_v54 }
 0x7c9   : > { %6080 = vrot.lane.b32.xlu0 %v10047_v13, %s11291_s9  ;;  %5430 = vrot.lane.b32.xlu1 %v9887_v44, %s11478_s1  ;;  %v6362_v54 = vrot.slane %v9670_v20, 4 }
 0x7ca   : > { %7174 = vmatprep.subr.bf16.mxu1 %v7868_v50  ;;  %v6411_v6 = vsel %vm795_vm2, %v6407_v29, %v6408_v0  ;;  %v5738_v44 = vsel %vm795_vm2, %v5735_v16, %v11206_v19 }
 0x7cb   : > { %v6426_v32 = vpop.permute.xlu0 %6425  ;;  %7175 = vmatpush1.bf16.msra.mxu1 %v7867_v56  ;;  %v5753_v10 = vpop.permute.xlu1 %5752  ;;  %v10154_v31 = vsel %vm11482_vm6, %v6403_v8, %v6411_v6  ;;  %v5739_v18 = vsel %vm11484_vm11, %v5730_v33, %v5738_v44  ;;  %v5725_v8 = vld [vmem:[#allocation2 + $0x10] sm:$0xf]  ;;  %vm11487_vm11 = vcmask 523264  }
 0x7cc   : > { %v6430_v1 = vrot.slane %v6426_v32, 4  ;;  %v5758_v11 = vrot.slane %v5753_v10, 4 }
 0x7cd   : > { %6103 = vrot.lane.b32.xlu0 %v10140_v51, %s11292_s13  ;;  %6492 = vrot.lane.b32.xlu1 %v10059_v42, %s11479_s2 }
 0x7ce   : > { %v6434_v27 = vsel %vm795_vm2, %v6430_v1, %v6431_v49  ;;  %v5761_v13 = vsel %vm795_vm2, %v5758_v11, %v11208_v40 }
 0x7cf   : > { %v10157_v63 = vsel %vm11483_vm7, %v6426_v32, %v6434_v27  ;;  %v10159_v14 = vpop.permute.xlu0 %5685  ;;  %v5762_v36 = vsel %vm11485_vm14, %v5753_v10, %v5761_v13  ;;  %v6401_v26 = vpop.permute.xlu1 %6400  ;;  %v5702_v32 = vld [vmem:[#allocation2 + $0x10] sm:$0xf]  ;;  %vm11488_vm14 = vcmask 334848  }
 0x7d0   : > { %v7803_v9 = vcombine.low %v5739_v18, %v5762_v36  ;;  %v6406_v2 = vrot.slane %v6401_v26, 4  ;;  %v7804_v24 = vcombine.high %v5739_v18, %v5762_v36  ;;  %v11202_v33 = vrot.slane %v10159_v14, 4 }
 0x7d1   : > { %5756 = vrot.lane.b32.xlu0 %v5748_v62, %s11295_s15  ;;  %6078 = vrot.lane.b32.xlu1 %v10165_v34, %s11291_s9  ;;  %s11486_s15 = sld [smem:[#allocation53_spill]] }
 0x7d2   : > { %7133 = vmatprep.subr.bf16.mxu0 %v7804_v24  ;;  %v6409_v43 = vsel %vm795_vm2, %v6406_v2, %v6407_v29  ;;  %v6385_v29 = vrot.slane %v9708_v12, 4  ;;  %s11634_s9 = sld [smem:[#allocation6_spill]] }
 0x7d3   : > { %v10172_v61 = vpop.permute.xlu0 %5708  ;;  %v6424_v35 = vpop.permute.xlu1 %6423  ;;  %7134 = vmatpush1.bf16.msra.mxu0 %v7803_v9  ;;  %v6410_v55 = vsel %vm11482_vm6, %v6401_v26, %v6409_v43  ;;  %vm11489_vm6 = vmmov %vm11487_vm11 }
 0x7d4   : > { %v6429_v58 = vrot.slane %v6424_v35, 4  ;;  %v11203_v56 = vrot.slane %v10172_v61, 4 }
 0x7d5   : > { %6034 = vrot.lane.b32.xlu0 %v10140_v51, %s11296_s25  ;;  %6101 = vrot.lane.b32.xlu1 %v10165_v34, %s11292_s13 }
 0x7d6   : > { %v6432_v17 = vsel %vm795_vm2, %v6429_v58, %v6430_v1 }
 0x7d7   : > { %v6357_v60 = vpop.permute.xlu0 %6356  ;;  %v6433_v57 = vsel %vm11483_vm7, %v6424_v35, %v6432_v17  ;;  %v5684_v47 = vpop.permute.xlu1 %5683  ;;  %v10196_v20 = vld [vmem:[%s11486_s15 + $0x8] sm:$0xff]  ;;  %vm11490_vm7 = vcmask 670720  }
 0x7d8   : > { %v6361_v5 = vrot.slane %v6357_v60, 4  ;;  %v7863_v3 = vcombine.low %v6410_v55, %v6433_v57  ;;  %v5689_v52 = vrot.slane %v5684_v47, 4  ;;  %v7864_v45 = vcombine.high %v6410_v55, %v6433_v57  ;;  %v5679_v55 = vld [vmem:[#allocation2 + $0x10] sm:$0xf]  ;;  %s7501_s13 = sshll.u32 %s11634_s9, 2 }
 0x7d9   : > { %6057 = vrot.lane.b32.xlu0 %v10140_v51, %s11297_s5  ;;  %5733 = vrot.lane.b32.xlu1 %v5725_v8, %s11431_s16  ;;  %v10203_v12 = vcombine.high %v10196_v20, %v10196_v20  ;;  %s11526_s16 = sld [smem:[#allocation54_spill]] }
 0x7da   : > { %7176 = vmatprep.subr.bf16.mxu1 %v7864_v45  ;;  %v6365_v0 = vsel %vm795_vm2, %v6361_v5, %v6362_v54  ;;  %v5692_v10 = vsel %vm795_vm2, %v5689_v52, %v11202_v33  ;;  %v5656_v54 = vld [vmem:[#allocation2 + $0x10] sm:$0xf] }
 0x7db   : > { %v6380_v16 = vpop.permute.xlu0 %6379  ;;  %7177 = vmatpush1.bf16.msra.mxu1 %v7863_v3  ;;  %v5707_v50 = vpop.permute.xlu1 %5706  ;;  %v10210_v11 = vsel %vm1885_vm9, %v6357_v60, %v6365_v0  ;;  %v5693_v18 = vsel %vm2077_vm12, %v5684_v47, %v5692_v10  ;;  %7876 = vmatprep.mubr.msk.bf16.mxu1 %vm1649_vm10, %v10203_v12  ;;  %v5863_v33 = vld [vmem:[#allocation2 + $0x10] sm:$0xf] }
 0x7dc   : > { %v6384_v49 = vrot.slane %v6380_v16, 4  ;;  %v5712_v6 = vrot.slane %v5707_v50, 4 }
 0x7dd   : > { %5710 = vrot.lane.b32.xlu0 %v5702_v32, %s11439_s0  ;;  %6032 = vrot.lane.b32.xlu1 %v10165_v34, %s11296_s25 }
 0x7de   : > { %v6388_v1 = vsel %vm795_vm2, %v6384_v49, %v6385_v29  ;;  %v5715_v44 = vsel %vm795_vm2, %v5712_v6, %v11203_v56 }
 0x7df   : > { %v10213_v27 = vsel %vm11487_vm11, %v6380_v16, %v6388_v1  ;;  %v10215_v13 = vpop.permute.xlu0 %5639  ;;  %v5716_v36 = vsel %vm11488_vm14, %v5707_v50, %v5715_v44  ;;  %v6355_v26 = vpop.permute.xlu1 %6354  ;;  %v6316_v50 = vrot.slane %v9688_v39, 4  ;;  %vm11491_vm11 = vcmask 662528  }
 0x7e0   : > { %v7799_v9 = vcombine.low %v5693_v18, %v5716_v36  ;;  %v6360_v2 = vrot.slane %v6355_v26, 4  ;;  %v7800_v24 = vcombine.high %v5693_v18, %v5716_v36  ;;  %v11199_v0 = vrot.slane %v10215_v13, 4 }
 0x7e1   : > { %5988 = vrot.lane.b32.xlu0 %v10140_v51, %s11300_s21  ;;  %6055 = vrot.lane.b32.xlu1 %v10165_v34, %s11297_s5  ;;  %vm11492_vm14 = vcmask 359424   ;;  %s11500_s5 = smov 21  }
 0x7e2   : > { %7135 = vmatprep.subr.bf16.mxu0 %v7800_v24  ;;  %v6363_v17 = vsel %vm795_vm2, %v6360_v2, %v6361_v5 }
 0x7e3   : > { %v10229_v43 = vpop.permute.xlu0 %5662  ;;  %v6378_v58 = vpop.permute.xlu1 %6377  ;;  %7136 = vmatpush1.bf16.msra.mxu0 %v7799_v9  ;;  %v6364_v3 = vsel %vm1885_vm9, %v6355_v26, %v6363_v17 }
 0x7e4   : > { %v6383_v60 = vrot.slane %v6378_v58, 4  ;;  %v11201_v32 = vrot.slane %v10229_v43, 4 }
 0x7e5   : > { %6011 = vrot.lane.b32.xlu0 %v10140_v51, %s11301_s22  ;;  %5687 = vrot.lane.b32.xlu1 %v5679_v55, %s11298_s27  ;;  %s11503_s27 = smov 20  }
 0x7e6   : > { %v6386_v57 = vsel %vm795_vm2, %v6383_v60, %v6384_v49  ;;  %v6339_v49 = vrot.slane %v9726_v21, 4  ;;  %v5610_v60 = vld [vmem:[#allocation2 + $0x10] sm:$0xf] }
 0x7e7   : > { %v6311_v47 = vpop.permute.xlu0 %6310  ;;  %v6387_v52 = vsel %vm11489_vm6, %v6378_v58, %v6386_v57  ;;  %v5638_v8 = vpop.permute.xlu1 %5637  ;;  %vm11493_vm6 = vcmask 351232  }
 0x7e8   : > { %v6315_v45 = vrot.slane %v6311_v47, 4  ;;  %v7859_v29 = vcombine.low %v6364_v3, %v6387_v52  ;;  %v5643_v5 = vrot.slane %v5638_v8, 4  ;;  %v7860_v16 = vcombine.high %v6364_v3, %v6387_v52  ;;  %v5633_v3 = vld [vmem:[#allocation2 + $0x10] sm:$0xf] }
 0x7e9   : > { %5664 = vrot.lane.b32.xlu0 %v5656_v54, %s11405_s20  ;;  %5986 = vrot.lane.b32.xlu1 %v10165_v34, %s11300_s21  ;;  %s11494_s21 = smov 1   ;;  %s11525_s20 = sld [smem:[#allocation55_spill]] }
 0x7ea   : > { %7178 = vmatprep.subr.bf16.mxu1 %v7860_v16  ;;  %v6319_v1 = vsel %vm795_vm2, %v6315_v45, %v6316_v50  ;;  %v5646_v18 = vsel %vm795_vm2, %v5643_v5, %v11199_v0 }
 0x7eb   : > { %v6334_v10 = vpop.permute.xlu0 %6333  ;;  %7179 = vmatpush1.bf16.msra.mxu1 %v7859_v29  ;;  %v5661_v6 = vpop.permute.xlu1 %5660  ;;  %v10258_v26 = vsel %vm11490_vm7, %v6311_v47, %v6319_v1  ;;  %v5647_v24 = vsel %vm11492_vm14, %v5638_v8, %v5646_v18  ;;  %v10275_v29 = vld [vmem:[#allocation2 + $0x8] sm:$0xff]  ;;  %vm11495_vm14 = vcmask 367616  }
 0x7ec   : > { %v6338_v44 = vrot.slane %v6334_v10, 4  ;;  %v5666_v36 = vrot.slane %v5661_v6, 4 }
 0x7ed   : > { %5965 = vrot.lane.b32.xlu0 %v10140_v51, %s11304_s8  ;;  %6009 = vrot.lane.b32.xlu1 %v10165_v34, %s11301_s22  ;;  %s11497_s22 = smov 3  }
 0x7ee   : > { %v6342_v39 = vsel %vm795_vm2, %v6338_v44, %v6339_v49  ;;  %v5669_v21 = vsel %vm795_vm2, %v5666_v36, %v11201_v32 }
 0x7ef   : > { %v10261_v9 = vsel %vm11491_vm11, %v6334_v10, %v6342_v39  ;;  %v10263_v2 = vpop.permute.xlu0 %5593  ;;  %v5670_v51 = vsel %vm11493_vm6, %v5661_v6, %v5669_v21  ;;  %v6309_v58 = vpop.permute.xlu1 %6308  ;;  %vm11498_vm6 = vcmask 687104  }
 0x7f0   : > { %v7795_v55 = vcombine.low %v5647_v24, %v5670_v51  ;;  %v6314_v57 = vrot.slane %v6309_v58, 4  ;;  %v7796_v47 = vcombine.high %v5647_v24, %v5670_v51  ;;  %v11196_v21 = vrot.slane %v10263_v2, 4 }
 0x7f1   : > { %5618 = vrot.lane.b32.xlu0 %v5610_v60, %s11407_s19  ;;  %5641 = vrot.lane.b32.xlu1 %v5633_v3, %s11404_s12 }
 0x7f2   : > { %7137 = vmatprep.subr.bf16.mxu0 %v7796_v47  ;;  %v6317_v5 = vsel %vm795_vm2, %v6314_v57, %v6315_v45  ;;  %v5587_v45 = vld [vmem:[#allocation2 + $0x10] sm:$0xf]  ;;  %v10297_v57 = vld [vmem:[#allocation2] sm:$0xff] }
 0x7f3   : > { %v10273_v54 = vpop.permute.xlu0 %5616  ;;  %v6332_v8 = vpop.permute.xlu1 %6331  ;;  %7138 = vmatpush1.bf16.msra.mxu0 %v7795_v55  ;;  %v6318_v10 = vsel %vm11490_vm7, %v6309_v58, %v6317_v5  ;;  %v5564_v58 = vld [vmem:[#allocation2 + $0x10] sm:$0xf]  ;;  %vm11499_vm7 = vcmask 678912  }
 0x7f4   : > { %v6337_v16 = vrot.slane %v6332_v8, 4  ;;  %v11197_v51 = vrot.slane %v10273_v54, 4 }
 0x7f5   : > { %5915 = vrot.lane.b32.xlu0 %v10275_v29, %s11318_s4  ;;  %5963 = vrot.lane.b32.xlu1 %v10165_v34, %s11304_s8  ;;  %s11496_s8 = smov 19  }
 0x7f6   : > { %v6340_v50 = vsel %vm795_vm2, %v6337_v16, %v6338_v44 }
 0x7f7   : > { %v10283_v49 = vpop.permute.xlu0 %6264  ;;  %v6341_v6 = vsel %vm11491_vm11, %v6332_v8, %v6340_v50  ;;  %v5592_v1 = vpop.permute.xlu1 %5591  ;;  %vm11501_vm11 = vcmask 515072  }
 0x7f8   : > { %v7855_v18 = vcombine.low %v6318_v10, %v6341_v6  ;;  %v5597_v36 = vrot.slane %v5592_v1, 4  ;;  %v7856_v39 = vcombine.high %v6318_v10, %v6341_v6 }
 0x7f9   : > { %5938 = vrot.lane.b32.xlu0 %v10275_v29, %s11494_s21  ;;  %5595 = vrot.lane.b32.xlu1 %v5587_v45, %s11406_s7 }
 0x7fa   : > { %7180 = vmatprep.subr.bf16.mxu1 %v7856_v39  ;;  %v5600_v60 = vsel %vm795_vm2, %v5597_v36, %v11196_v21 }
 0x7fb   : > { %v10291_v44 = vpop.permute.xlu0 %6287  ;;  %7181 = vmatpush1.bf16.msra.mxu1 %v7855_v18  ;;  %v5615_v24 = vpop.permute.xlu1 %5614  ;;  %v5601_v8 = vsel %vm1981_vm5, %v5592_v1, %v5600_v60  ;;  %v11186_v18 = vrot.slane %v10283_v49, 4 }
 0x7fc   : > { %v5620_v55 = vrot.slane %v5615_v24, 4  ;;  %v11187_v1 = vrot.slane %v10291_v44, 4 }
 0x7fd   : > { %5572 = vrot.lane.b32.xlu0 %v5564_v58, %s11452_s24  ;;  %5913 = vrot.lane.b32.xlu1 %v10297_v57, %s11318_s4  ;;  %v5541_v58 = vld [vmem:[#allocation2 + $0x10] sm:$0xf] }
 0x7fe   : > { %v5623_v3 = vsel %vm795_vm2, %v5620_v55, %v11197_v51 }
 0x7ff   : > { %v10305_v47 = vpop.permute.xlu0 %5547  ;;  %v5624_v5 = vsel %vm11495_vm14, %v5615_v24, %v5623_v3  ;;  %v6263_v16 = vpop.permute.xlu1 %6262  ;;  %vm11502_vm14 = vcmask 384000  }
 0x800   : > { %v7791_v50 = vcombine.low %v5601_v8, %v5624_v5  ;;  %v6268_v10 = vrot.slane %v6263_v16, 4  ;;  %v7792_v6 = vcombine.high %v5601_v8, %v5624_v5 }
 0x801   : > { %5869 = vrot.lane.b32.xlu0 %v10275_v29, %s11496_s8  ;;  %5936 = vrot.lane.b32.xlu1 %v10297_v57, %s11494_s21 }
 0x802   : > { %7139 = vmatprep.subr.bf16.mxu0 %v7792_v6  ;;  %v6271_v39 = vsel %vm795_vm2, %v6268_v10, %v11186_v18  ;;  %v5495_v18 = vld [vmem:[#allocation2 + $0x10] sm:$0xf] }
 0x803   : > { %v10314_v36 = vpop.permute.xlu0 %5570  ;;  %v6286_v45 = vpop.permute.xlu1 %6285  ;;  %7140 = vmatpush1.bf16.msra.mxu0 %v7791_v50  ;;  %v6272_v3 = vsel %vm11498_vm6, %v6263_v16, %v6271_v39  ;;  %v5518_v50 = vld [vmem:[#allocation2 + $0x10] sm:$0xf]  ;;  %vm11504_vm6 = vcmask 703488  }
 0x804   : > { %v6291_v24 = vrot.slane %v6286_v45, 4  ;;  %v11194_v16 = vrot.slane %v10314_v36, 4 }
 0x805   : > { %5892 = vrot.lane.b32.xlu0 %v10275_v29, %s11497_s22  ;;  %5549 = vrot.lane.b32.xlu1 %v5541_v58, %s11436_s18  ;;  %v11192_v58 = vrot.slane %v10305_v47, 4 }
 0x806   : > { %v6294_v60 = vsel %vm795_vm2, %v6291_v24, %v11187_v1 }
 0x807   : > { %v10326_v55 = vpop.permute.xlu0 %6218  ;;  %v6295_v8 = vsel %vm11499_vm7, %v6286_v45, %v6294_v60  ;;  %v5546_v5 = vpop.permute.xlu1 %5545  ;;  %vm11505_vm7 = vcmask 695296  }
 0x808   : > { %v7851_v10 = vcombine.low %v6272_v3, %v6295_v8  ;;  %v5551_v6 = vrot.slane %v5546_v5, 4  ;;  %v7852_v17 = vcombine.high %v6272_v3, %v6295_v8  ;;  %v11188_v35 = vrot.slane %v10326_v55, 4 }
 0x809   : > { %5526 = vrot.lane.b32.xlu0 %v5518_v50, %s11271_s30  ;;  %5867 = vrot.lane.b32.xlu1 %v10297_v57, %s11496_s8  ;;  %s11507_s30 = smov 22  }
 0x80a   : > { %7182 = vmatprep.subr.bf16.mxu1 %v7852_v17  ;;  %v5554_v45 = vsel %vm795_vm2, %v5551_v6, %v11192_v58 }
 0x80b   : > { %v10334_v24 = vpop.permute.xlu0 %6241  ;;  %7183 = vmatpush1.bf16.msra.mxu1 %v7851_v10  ;;  %v5569_v52 = vpop.permute.xlu1 %5568  ;;  %v5555_v3 = vsel %vm11501_vm11, %v5546_v5, %v5554_v45  ;;  %vm11508_vm11 = vcmask 523264  }
 0x80c   : > { %v5574_v39 = vrot.slane %v5569_v52, 4  ;;  %v11189_v5 = vrot.slane %v10334_v24, 4 }
 0x80d   : > { %5823 = vrot.lane.b32.xlu0 %v10275_v29, %s11500_s5  ;;  %5890 = vrot.lane.b32.xlu1 %v10297_v57, %s11497_s22 }
 0x80e   : > { %v5577_v17 = vsel %vm795_vm2, %v5574_v39, %v11194_v16  ;;  %v5403_v16 = vld [vmem:[#allocation2 + $0x10] sm:$0xf] }
 0x80f   : > { %v10347_v60 = vpop.permute.xlu0 %5501  ;;  %v5578_v8 = vsel %vm11502_vm14, %v5569_v52, %v5577_v17  ;;  %v6217_v50 = vpop.permute.xlu1 %6216  ;;  %v5472_v52 = vld [vmem:[#allocation2 + $0x10] sm:$0xf]  ;;  %vm11510_vm14 = vcmask 842752  }
 0x810   : > { %v7787_v10 = vcombine.low %v5555_v3, %v5578_v8  ;;  %v7788_v6 = vcombine.high %v5555_v3, %v5578_v8  ;;  %v6222_v62 = vrot.slane %v6217_v50, 4 }
 0x811   : > { %5846 = vrot.lane.b32.xlu0 %v10275_v29, %s11503_s27  ;;  %5503 = vrot.lane.b32.xlu1 %v5495_v18, %s11270_s29  ;;  %s11506_s29 = smov 23  }
 0x812   : > { %7141 = vmatprep.subr.bf16.mxu0 %v7788_v6  ;;  %v6225_v45 = vsel %vm795_vm2, %v6222_v62, %v11188_v35 }
 0x813   : > { %v10355_v39 = vpop.permute.xlu0 %5524  ;;  %v6240_v1 = vpop.permute.xlu1 %6239  ;;  %7142 = vmatpush1.bf16.msra.mxu0 %v7787_v10  ;;  %v6226_v8 = vsel %vm11504_vm6, %v6217_v50, %v6225_v45  ;;  %vm11511_vm6 = vcmask 711680  }
 0x814   : > { %v6245_v17 = vrot.slane %v6240_v1, 4  ;;  %v11191_v50 = vrot.slane %v10355_v39, 4 }
 0x815   : > { %5480 = vrot.lane.b32.xlu0 %v5472_v52, %s11467_s23  ;;  %5821 = vrot.lane.b32.xlu1 %v10297_v57, %s11500_s5  ;;  %v11190_v52 = vrot.slane %v10347_v60, 4 }
 0x816   : > { %v6248_v18 = vsel %vm795_vm2, %v6245_v17, %v11189_v5 }
 0x817   : > { %v10367_v3 = vpop.permute.xlu0 %6172  ;;  %v6249_v10 = vsel %vm11505_vm7, %v6240_v1, %v6248_v18  ;;  %v5500_v6 = vpop.permute.xlu1 %5499  ;;  %v5449_v18 = vld [vmem:[#allocation2 + $0x10] sm:$0xf]  ;;  %vm11512_vm7 = vcmask 547840  }
 0x818   : > { %v7847_v42 = vcombine.low %v6226_v8, %v6249_v10  ;;  %v7848_v59 = vcombine.high %v6226_v8, %v6249_v10  ;;  %v5505_v62 = vrot.slane %v5500_v6, 4 }
 0x819   : > { %5777 = vrot.lane.b32.xlu0 %v10275_v29, %s11506_s29  ;;  %5844 = vrot.lane.b32.xlu1 %v10297_v57, %s11503_s27 }
 0x81a   : > { %7184 = vmatprep.subr.bf16.mxu1 %v7848_v59  ;;  %v5508_v1 = vsel %vm795_vm2, %v5505_v62, %v11190_v52 }
 0x81b   : > { %v10376_v17 = vpop.permute.xlu0 %6195  ;;  %7185 = vmatpush1.bf16.msra.mxu1 %v7847_v42  ;;  %v5523_v35 = vpop.permute.xlu1 %5522  ;;  %v5509_v42 = vsel %vm1885_vm9, %v5500_v6, %v5508_v1 }
 0x81c   : > { %v5528_v45 = vrot.slane %v5523_v35, 4 }
 0x81d   : > { %5800 = vrot.lane.b32.xlu0 %v10275_v29, %s11507_s30  ;;  %5457 = vrot.lane.b32.xlu1 %v5449_v18, %s11466_s26  ;;  %v11193_v29 = vrot.slane %v10367_v3, 4  ;;  %v6258_v18 = vld [vmem:[#allocation2 + $0x14] sm:$0xf] }
 0x81e   : > { %v5531_v59 = vsel %vm795_vm2, %v5528_v45, %v11191_v50 }
 0x81f   : > { %v10388_v8 = vpop.permute.xlu0 %5455  ;;  %v5532_v10 = vsel %vm11508_vm11, %v5523_v35, %v5531_v59  ;;  %v6171_v5 = vpop.permute.xlu1 %6170  ;;  %v11195_v35 = vrot.slane %v10376_v17, 4  ;;  %vm11513_vm11 = vcmask 539648  }
 0x820   : > { %v7783_v62 = vcombine.low %v5509_v42, %v5532_v10  ;;  %v7784_v4 = vcombine.high %v5509_v42, %v5532_v10  ;;  %v6176_v52 = vrot.slane %v6171_v5, 4 }
 0x821   : > { %5434 = vrot.lane.b32.xlu0 %v5426_v28, %s11478_s1  ;;  %5775 = vrot.lane.b32.xlu1 %v10297_v57, %s11506_s29  ;;  %v6212_v28 = vld [vmem:[#allocation2 + $0x14] sm:$0xf]  ;;  %s11532_s1 = sld [smem:[#allocation50_spill]] }
 0x822   : > { %7143 = vmatprep.subr.bf16.mxu0 %v7784_v4  ;;  %v6179_v6 = vsel %vm795_vm2, %v6176_v52, %v11193_v29 }
 0x823   : > { %v10396_v45 = vpop.permute.xlu0 %5478  ;;  %v6194_v50 = vpop.permute.xlu1 %6193  ;;  %7144 = vmatpush1.bf16.msra.mxu0 %v7783_v62  ;;  %v6180_v42 = vsel %vm11510_vm14, %v6171_v5, %v6179_v6  ;;  %v10418_v5 = vld [vmem:[%s11486_s15] sm:$0xff]  ;;  %vm11516_vm14 = vcmask 859136  }
 0x824   : > { %v6199_v1 = vrot.slane %v6194_v50, 4 }
 0x825   : > { %6266 = vrot.lane.b32.xlu0 %v6258_v18, %s11408_s14  ;;  %5798 = vrot.lane.b32.xlu1 %v10297_v57, %s11507_s30  ;;  %v11198_v57 = vrot.slane %v10388_v8, 4  ;;  %v6166_v18 = vld [vmem:[#allocation2 + $0x14] sm:$0xf] }
 0x826   : > { %v6202_v4 = vsel %vm795_vm2, %v6199_v1, %v11195_v35  ;;  %v6281_v1 = vld [vmem:[#allocation2 + $0x14] sm:$0xf] }
 0x827   : > { %v10408_v59 = vpop.permute.xlu0 %6126  ;;  %v6203_v10 = vsel %vm11511_vm6, %v6194_v50, %v6202_v4  ;;  %v5454_v62 = vpop.permute.xlu1 %5453  ;;  %v10424_v4 = vcombine.high %v10418_v5, %v10418_v5  ;;  %vm11517_vm6 = vcmask 850944  }
 0x828   : > { %11509 = vst [vmem:[#allocation17_spill] sm:$0xff] %v10408_v59  ;;  %v7843_v58 = vcombine.low %v6180_v42, %v6203_v10  ;;  %v7844_v52 = vcombine.high %v6180_v42, %v6203_v10  ;;  %v5459_v29 = vrot.slane %v5454_v62, 4  ;;  %v6120_v10 = vld [vmem:[#allocation2 + $0x14] sm:$0xf] }
 0x829   : > { %6220 = vrot.lane.b32.xlu0 %v6212_v28, %s11276_s28  ;;  %5411 = vrot.lane.b32.xlu1 %v5403_v16, %s11474_s6  ;;  %v11200_v16 = vrot.slane %v10396_v45, 4  ;;  %s11618_s6 = sld [smem:[#allocation7_spill]] }
 0x82a   : > { %7186 = vmatprep.subr.bf16.mxu1 %v7844_v52  ;;  %v5462_v28 = vsel %vm795_vm2, %v5459_v29, %v11198_v57  ;;  %v6235_v52 = vld [vmem:[#allocation2 + $0x14] sm:$0xf]  ;;  %7165 = vmatprep.mubr.bf16.mxu0 %v10424_v4 }
 0x82b   : > { %v10420_v50 = vpop.permute.xlu0 %6149  ;;  %7187 = vmatpush1.bf16.msra.mxu1 %v7843_v58  ;;  %v5477_v6 = vpop.permute.xlu1 %5476  ;;  %v5463_v21 = vsel %vm11512_vm7, %v5454_v62, %v5462_v28  ;;  %v5909_v28 = vld [vmem:[#allocation2 + $0x10] sm:$0xf]  ;;  %vm11522_vm7 = vcmask 875520  }
 0x82c   : > { %v5482_v42 = vrot.slane %v5477_v6, 4  ;;  %v11205_v62 = vrot.slane %v10420_v50, 4 }
 0x82d   : > { %6174 = vrot.lane.b32.xlu0 %v6166_v18, %s11459_s3  ;;  %6289 = vrot.lane.b32.xlu1 %v6281_v1, %s11410_s17  ;;  %s11514_s17 = smov 85   ;;  %v11204_v1 = vrot.slane %v10408_v59, 4 }
 0x82e   : > { %v5485_v58 = vsel %vm795_vm2, %v5482_v42, %v11200_v16  ;;  %v6189_v42 = vld [vmem:[#allocation2 + $0x14] sm:$0xf] }
 0x82f   : > { %v10436_v35 = vpop.permute.xlu0 %5409  ;;  %v5486_v51 = vsel %vm11513_vm11, %v5477_v6, %v5485_v58  ;;  %v6125_v29 = vpop.permute.xlu1 %6124  ;;  %v6143_v6 = vld [vmem:[#allocation2 + $0x14] sm:$0xf]  ;;  %vm11523_vm11 = vcmask 867328  }
 0x830   : > { %v7779_v57 = vcombine.low %v5463_v21, %v5486_v51  ;;  %v7780_v0 = vcombine.high %v5463_v21, %v5486_v51  ;;  %v6130_v18 = vrot.slane %v6125_v29, 4 }
 0x831   : > { %6128 = vrot.lane.b32.xlu0 %v6120_v10, %s11287_s10  ;;  %6243 = vrot.lane.b32.xlu1 %v6235_v52, %s11514_s17  ;;  %s11515_s10 = smov 87  }
 0x832   : > { %7145 = vmatprep.subr.bf16.mxu0 %v7780_v0  ;;  %v6133_v21 = vsel %vm795_vm2, %v6130_v18, %v11204_v1 }
 0x833   : > { %v10443_v16 = vpop.permute.xlu0 %5432  ;;  %v6148_v32 = vpop.permute.xlu1 %6147  ;;  %7146 = vmatpush1.bf16.msra.mxu0 %v7779_v57  ;;  %v6134_v57 = vsel %vm11516_vm14, %v6125_v29, %v6133_v21  ;;  %vm11527_vm14 = vcmask 891904  }
 0x834   : > { %v6153_v51 = vrot.slane %v6148_v32, 4 }
 0x835   : > { %5917 = vrot.lane.b32.xlu0 %v5909_v28, %s11318_s4  ;;  %6197 = vrot.lane.b32.xlu1 %v6189_v42, %s11515_s10  ;;  %v11207_v42 = vrot.slane %v10436_v35, 4  ;;  %v6086_v28 = vrot.slane %v9436_v22, 4  ;;  %v6109_v22 = vrot.slane %v9683_v30, 4  ;;  %s11524_s4 = sld [smem:[#allocation52_spill]] }
 0x836   : > { %v6156_v0 = vsel %vm795_vm2, %v6153_v51, %v11205_v62  ;;  %v5817_v62 = vld [vmem:[#allocation2 + $0x10] sm:$0xf] }
 0x837   : > { %v10454_v10 = vpop.permute.xlu0 %6494  ;;  %v6157_v58 = vsel %vm11517_vm6, %v6148_v32, %v6156_v0  ;;  %v5408_v52 = vpop.permute.xlu1 %5407  ;;  %v11209_v32 = vrot.slane %v10443_v16, 4  ;;  %vm11528_vm6 = vmmov %vm11522_vm7 }
 0x838   : > { %v7839_v56 = vcombine.low %v6134_v57, %v6157_v58  ;;  %v7840_v18 = vcombine.high %v6134_v57, %v6157_v58  ;;  %v5413_v1 = vrot.slane %v5408_v52, 4  ;;  %v10469_v57 = vpop.f32.mrf.mxu0  ;;  %v10471_v58 = vpop.f32.mrf.mxu1 }
 0x839   : > { %5871 = vrot.lane.b32.xlu0 %v5863_v33, %s11496_s8  ;;  %6151 = vrot.lane.b32.xlu1 %v6143_v6, %s11289_s11  ;;  %v5932_v6 = vld [vmem:[#allocation2 + $0x10] sm:$0xf]  ;;  %11518 = vst [vmem:[#allocation24_spill] sm:$0xff] %v10469_v57  ;;  %11519 = vst [vmem:[#allocation30_spill] sm:$0xff] %v10471_v58 }
 0x83a   : > { %7188 = vmatprep.subr.bf16.mxu1 %v7840_v18  ;;  %v5416_v33 = vsel %vm795_vm2, %v5413_v1, %v11207_v42  ;;  %v10480_v19 = vpop.f32.mrf.mxu0  ;;  %v10482_v1 = vpop.f32.mrf.mxu1  ;;  %v11212_v42 = vrot.slane %v10454_v10, 4  ;;  %v5771_v57 = vld [vmem:[#allocation2 + $0x10] sm:$0xf] }
 0x83b   : > { %v10462_v51 = vpop.permute.xlu0 %6080  ;;  %7189 = vmatpush1.bf16.msra.mxu1 %v7839_v56  ;;  %v5431_v29 = vpop.permute.xlu1 %5430  ;;  %11520 = vst [vmem:[#allocation31_spill] sm:$0xff] %v10480_v19  ;;  %11521 = vst [vmem:[#allocation32_spill] sm:$0xff] %v10482_v1  ;;  %v5886_v19 = vld [vmem:[#allocation2 + $0x10] sm:$0xf] }
 0x83c   : > { %v6085_v21 = vrot.slane %v10462_v51, 4  ;;  %v5436_v0 = vrot.slane %v5431_v29, 4  ;;  %v4331_v59 = vpop.f32.mrf.mxu0  ;;  %v4372_v1 = vpop.f32.mrf.mxu1 }
 0x83d   : > { %5825 = vrot.lane.b32.xlu0 %v5817_v62, %s11500_s5  ;;  %5940 = vrot.lane.b32.xlu1 %v5932_v6, %s11494_s21  ;;  %v5417_v6 = vsel %vm1789_vm8, %v5408_v52, %v5416_v33 }
 0x83e   : > { %v6089_v56 = vsel %vm795_vm2, %v6085_v21, %v6086_v28  ;;  %v5439_v18 = vsel %vm795_vm2, %v5436_v0, %v11209_v32  ;;  %v4373_v33 = vpop.f32.mrf.mxu1 }
 0x83f   : > { %v10487_v40 = vsel %vm11522_vm7, %v10462_v51, %v6089_v56  ;;  %v6104_v62 = vpop.permute.xlu0 %6103  ;;  %v5440_v30 = vsel %vm1813_vm1, %v5431_v29, %v5439_v18  ;;  %v6493_v28 = vpop.permute.xlu1 %6492  ;;  %v6488_v56 = vld [vmem:[#allocation2 + $0x14] sm:$0xf]  ;;  %vm11529_vm7 = vmmov %vm11523_vm11 }
 0x840   : > { %v6108_v58 = vrot.slane %v6104_v62, 4  ;;  %v7775_v15 = vcombine.low %v5417_v6, %v5440_v30  ;;  %v7776_v0 = vcombine.high %v5417_v6, %v5440_v30  ;;  %v6498_v32 = vrot.slane %v6493_v28, 4  ;;  %v4332_v29 = vpop.f32.mrf.mxu0  ;;  %v5840_v30 = vld [vmem:[#allocation2 + $0x10] sm:$0xf] }
 0x841   : > { %5779 = vrot.lane.b32.xlu0 %v5771_v57, %s11506_s29  ;;  %5894 = vrot.lane.b32.xlu1 %v5886_v19, %s11497_s22  ;;  %v11530_v57 = vrot.slane %v10121_v38, 4  ;;  %s11635_s22 = sld [smem:[#allocation56_spill]] }
 0x842   : > { %v6112_v51 = vsel %vm795_vm2, %v6108_v58, %v6109_v22  ;;  %v6501_v52 = vsel %vm795_vm2, %v6498_v32, %v11212_v42  ;;  %7147 = vmatprep.subr.bf16.mxu0 %v7776_v0 }
 0x843   : > { %v10498_v18 = vsel %vm11523_vm11, %v6104_v62, %v6112_v51  ;;  %v5757_v6 = vpop.permute.xlu0 %5756  ;;  %v6502_v59 = vsel %vm2910_vm0, %v6493_v28, %v6501_v52  ;;  %v6079_v1 = vpop.permute.xlu1 %6078  ;;  %7148 = vmatpush1.bf16.msra.mxu0 %v7775_v15  ;;  %v5012_v62 = vld [vmem:[%s11524_s4] sm:$0xff]  ;;  %v10514_v52 = vcombine.low %v10196_v20, %v10196_v20  ;;  %vm11533_vm11 = vcmask 203776  }
 0x844   : > { %v7871_v22 = vcombine.low %v6502_v59, %v6502_v59  ;;  %v7872_v32 = vcombine.high %v6502_v59, %v6502_v59  ;;  %v6084_v0 = vrot.slane %v6079_v1, 4  ;;  %v5760_v42 = vrot.slane %v5757_v6, 4 }
 0x845   : > { %6496 = vrot.lane.b32.xlu0 %v6488_v56, %s11479_s2  ;;  %5848 = vrot.lane.b32.xlu1 %v5840_v30, %s11503_s27  ;;  %v6040_v56 = vrot.slane %v9663_v48, 4  ;;  %v5794_v30 = vld [vmem:[#allocation2 + $0x10] sm:$0xf]  ;;  %v6609_v48 = vld [vmem:[%s11526_s16] sm:$0xff] }
 0x846   : > { %v7122_v15 = vsel %vm795_vm2, %v7871_v22, 0  ;;  %7875 = vmatprep.subr.msk.bf16.mxu1 %vm795_vm2, %v7872_v32  ;;  %v6087_v33 = vsel %vm795_vm2, %v6084_v0, %v6085_v21  ;;  %v7309_v32 = vld [vmem:[%s11525_s20] sm:$0xff]  ;;  %v6063_v21 = vrot.slane %v9701_v25, 4  ;;  %v5763_v25 = vsel %vm795_vm2, %v11530_v57, %v5760_v42 }
 0x847   : > { %v6035_v28 = vpop.permute.xlu0 %6034  ;;  %v6102_v51 = vpop.permute.xlu1 %6101  ;;  %7205 = vmatpush2.bf16.msra.mxu1 %v7122_v15  ;;  %s710_s5 = scalar_lea.vmem %s11635_s22, %s7501_s13 }
 0x848   : > { %v6039_v29 = vrot.slane %v6035_v28, 4  ;;  %v6107_v59 = vrot.slane %v6102_v51, 4 }
 0x849   : > { %5015 = vperm.xlu0 %7953, %v5012_v62   ;;  %5802 = vrot.lane.b32.xlu1 %v5794_v30, %s11507_s30  ;;  %v6088_v62 = vsel %vm11528_vm6, %v6079_v1, %v6087_v33  ;;  %v7311_v1 = vld [vmem:[%s11525_s20 + $0x10] sm:$0xff]  ;;  %vm11535_vm6 = vcmask 891904  }
 0x84a   : > { %v6043_v22 = vsel %vm795_vm2, %v6039_v29, %v6040_v56  ;;  %v6110_v20 = vsel %vm795_vm2, %v6107_v59, %v6108_v58  ;;  %7207 = vmatmul.mubr.bf16.vlgmr.msra.gmra.mxu1 %v10514_v52 }
 0x84b   : > { %v10529_v0 = vsel %vm11527_vm14, %v6035_v28, %v6043_v22  ;;  %v6058_v6 = vpop.permute.xlu0 %6057  ;;  %v6111_v15 = vsel %vm11529_vm7, %v6102_v51, %v6110_v20  ;;  %v5734_v56 = vpop.permute.xlu1 %5733  ;;  %7247 = vmatprep.mubr.bf16.mxu1 %v10424_v4  ;;  %v11531_v51 = vrot.slane %v10110_v46, 4  ;;  %v4182_v4 = vld [vmem:[%s11532_s1] sm:$0xff]  ;;  %vm11534_vm14 = vcmask 195584  }
 0x84c   : > { %v6062_v30 = vrot.slane %v6058_v6, 4  ;;  %v7835_v19 = vcombine.low %v6088_v62, %v6111_v15  ;;  %v7836_v58 = vcombine.high %v6088_v62, %v6111_v15  ;;  %v5737_v59 = vrot.slane %v5734_v56, 4 }
 0x84d   : > { %7318 = vperm.xlu0 %7953, %v7309_v32   ;;  %6612 = vperm.xlu1 %7954, %v6609_v48   ;;  %v5764_v62 = vsel %vm11534_vm14, %v10121_v38, %v5763_v25  ;;  %vm11538_vm7 = vcmask 1022976   ;;  %vm11545_vm14 = vcmask 351232  }
 0x84e   : > { %v6066_v28 = vsel %vm795_vm2, %v6062_v30, %v6063_v21  ;;  %v5740_v33 = vsel %vm795_vm2, %v11531_v51, %v5737_v59  ;;  %7149 = vmatprep.subr.bf16.mxu0 %v7836_v58  ;;  %v5994_v58 = vrot.slane %v9679_v23, 4 }
 0x84f   : > { %v10549_v22 = vsel %vm2460_vm3, %v6058_v6, %v6066_v28  ;;  %v5711_v42 = vpop.permute.xlu0 %5710  ;;  %v6033_v57 = vpop.permute.xlu1 %6032  ;;  %7150 = vmatpush2.bf16.msra.mxu0 %v7835_v19  ;;  %v5741_v32 = vsel %vm11533_vm11, %v10110_v46, %v5740_v33  ;;  %v7310_v19 = vld [vmem:[%s11525_s20 + $0x8] sm:$0xff]  ;;  %vm11541_vm11 = vmmov %vm11538_vm7 }
 0x850   : > { %v7833_v20 = vcombine.low %v10529_v0, %v10549_v22  ;;  %v7834_v48 = vcombine.high %v10529_v0, %v10549_v22  ;;  %v6038_v21 = vrot.slane %v6033_v57, 4  ;;  %v7805_v6 = vcombine.low %v5741_v32, %v5764_v62 }
 0x851   : > { %7348 = vperm.xlu0 %7953, %v7311_v1   ;;  %4185 = vperm.xlu1 %7954, %v4182_v4   ;;  %v7806_v15 = vcombine.high %v5741_v32, %v5764_v62  ;;  %v5714_v33 = vrot.slane %v5711_v42, 4  ;;  %v6017_v1 = vrot.slane %v9719_v7, 4  ;;  %v11537_v7 = vrot.slane %v10159_v14, 4 }
 0x852   : > { %v6041_v28 = vsel %vm795_vm2, %v6038_v21, %v6039_v29  ;;  %v11581_v0 = vcombine.high %v10258_v26, %v10261_v9 }
 0x853   : > { %v5989_v56 = vpop.permute.xlu0 %5988  ;;  %7215 = vmatprep.subr.bf16.mxu1 %v7806_v15  ;;  %v6056_v46 = vpop.permute.xlu1 %6055  ;;  %v6042_v62 = vsel %vm11535_vm6, %v6033_v57, %v6041_v28 }
 0x854   : > { %v5993_v59 = vrot.slane %v5989_v56, 4  ;;  %7216 = vmatpush1.bf16.msra.mxu1 %v7805_v6  ;;  %v6061_v51 = vrot.slane %v6056_v46, 4 }
 0x855   : > { %7331 = vperm.xlu1 %7954, %v7310_v19   ;;  %v11536_v19 = vrot.slane %v10172_v61, 4 }
 0x856   : > { %v5997_v38 = vsel %vm795_vm2, %v5993_v59, %v5994_v58  ;;  %v6064_v25 = vsel %vm795_vm2, %v6061_v51, %v6062_v30 }
 0x857   : > { %v10568_v4 = vsel %vm2388_vm4, %v5989_v56, %v5997_v38  ;;  %v6012_v32 = vpop.permute.xlu0 %6011  ;;  %v6065_v23 = vsel %vm2460_vm3, %v6056_v46, %v6064_v25  ;;  %v5688_v15 = vpop.permute.xlu1 %5687  ;;  %v5717_v58 = vsel %vm795_vm2, %v11536_v19, %v5714_v33  ;;  %vm11539_vm3 = vcmask 334848  }
 0x858   : > { %v6016_v29 = vrot.slane %v6012_v32, 4  ;;  %v7831_v21 = vcombine.low %v6042_v62, %v6065_v23  ;;  %v7832_v6 = vcombine.high %v6042_v62, %v6065_v23  ;;  %v5691_v42 = vrot.slane %v5688_v15, 4 }
 0x85a   : > { %v6020_v30 = vsel %vm795_vm2, %v6016_v29, %v6017_v1  ;;  %v5694_v56 = vsel %vm795_vm2, %v11537_v7, %v5691_v42  ;;  %7151 = vmatprep.subr.bf16.mxu0 %v7832_v6  ;;  %v5718_v1 = vsel %vm11539_vm3, %v10172_v61, %v5717_v58  ;;  %vm11553_vm3 = vcmask 515072  }
 0x85b   : > { %v10580_v57 = vsel %vm11538_vm7, %v6012_v32, %v6020_v30  ;;  %v5665_v46 = vpop.permute.xlu0 %5664  ;;  %v5987_v28 = vpop.permute.xlu1 %5986  ;;  %7152 = vmatpush2.bf16.msra.mxu0 %v7831_v21  ;;  %v5695_v51 = vsel %vm2077_vm12, %v10159_v14, %v5694_v56  ;;  %v5971_v21 = vrot.slane %v9697_v53, 4  ;;  %vm11540_vm12 = vcmask 1039360  }
 0x85c   : > { %v7830_v33 = vcombine.high %v10568_v4, %v10580_v57  ;;  %v5992_v25 = vrot.slane %v5987_v28, 4  ;;  %v7801_v62 = vcombine.low %v5695_v51, %v5718_v1  ;;  %v7802_v23 = vcombine.high %v5695_v51, %v5718_v1  ;;  %vm11546_vm6 = vmmov %vm11540_vm12 }
 0x85d   : > { %v5668_v19 = vrot.slane %v5665_v46, 4  ;;  %vm11549_vm7 = vcmask 367616  }
 0x85e   : > { %7217 = vmatprep.subr.bf16.mxu1 %v7802_v23  ;;  %v5995_v14 = vsel %vm795_vm2, %v5992_v25, %v5993_v59  ;;  %v11542_v23 = vrot.slane %v10229_v43, 4 }
 0x85f   : > { %v5966_v32 = vpop.permute.xlu0 %5965  ;;  %v6010_v15 = vpop.permute.xlu1 %6009  ;;  %7218 = vmatpush1.bf16.msra.mxu1 %v7801_v62  ;;  %v5996_v58 = vsel %vm2388_vm4, %v5987_v28, %v5995_v14  ;;  %vm11544_vm4 = vcmask 359424  }
 0x860   : > { %v5970_v6 = vrot.slane %v5966_v32, 4  ;;  %v6015_v42 = vrot.slane %v6010_v15, 4  ;;  %v5671_v59 = vsel %vm795_vm2, %v11542_v23, %v5668_v19 }
 0x861   : > { %v5672_v14 = vsel %vm11545_vm14, %v10229_v43, %v5671_v59  ;;  %v11548_v59 = vrot.slane %v10263_v2, 4  ;;  %vm11559_vm14 = vcmask 523264  }
 0x862   : > { %v5974_v30 = vsel %vm795_vm2, %v5970_v6, %v5971_v21  ;;  %v6018_v7 = vsel %vm795_vm2, %v6015_v42, %v6016_v29  ;;  %v11543_v29 = vrot.slane %v10215_v13, 4 }
 0x863   : > { %v10595_v56 = vsel %vm11540_vm12, %v5966_v32, %v5974_v30  ;;  %v5619_v61 = vpop.permute.xlu0 %5618  ;;  %v6019_v51 = vsel %vm11541_vm11, %v6010_v15, %v6018_v7  ;;  %v5642_v1 = vpop.permute.xlu1 %5641  ;;  %vm11554_vm12 = vcmask 384000   ;;  %vm11555_vm11 = vcmask 154624  }
 0x864   : > { %v7827_v53 = vcombine.low %v5996_v58, %v6019_v51  ;;  %v7828_v25 = vcombine.high %v5996_v58, %v6019_v51  ;;  %v5645_v46 = vrot.slane %v5642_v1, 4  ;;  %v5622_v42 = vrot.slane %v5619_v61, 4 }
 0x865   : > { %v11547_v61 = vrot.slane %v10273_v54, 4 }
 0x866   : > { %v5648_v32 = vsel %vm795_vm2, %v11543_v29, %v5645_v46  ;;  %7153 = vmatprep.subr.bf16.mxu0 %v7828_v25 }
 0x867   : > { %v10602_v62 = vpop.permute.xlu0 %5915  ;;  %v5964_v21 = vpop.permute.xlu1 %5963  ;;  %7154 = vmatpush2.bf16.msra.mxu0 %v7827_v53  ;;  %v5649_v15 = vsel %vm11544_vm4, %v10215_v13, %v5648_v32  ;;  %v5625_v53 = vsel %vm795_vm2, %v11547_v61, %v5622_v42  ;;  %vm11556_vm4 = vcmask 23552  }
 0x868   : > { %v5969_v28 = vrot.slane %v5964_v21, 4  ;;  %v7797_v19 = vcombine.low %v5649_v15, %v5672_v14  ;;  %v7798_v30 = vcombine.high %v5649_v15, %v5672_v14  ;;  %v5626_v32 = vsel %vm11549_vm7, %v10273_v54, %v5625_v53 }
 0x869   : > { %vm11564_vm7 = vcmask 539648  }
 0x86a   : > { %v5972_v7 = vsel %vm795_vm2, %v5969_v28, %v5970_v6  ;;  %7219 = vmatprep.subr.bf16.mxu1 %v7798_v30 }
 0x86b   : > { %v10612_v58 = vpop.permute.xlu0 %5938  ;;  %v5973_v51 = vsel %vm11546_vm6, %v5964_v21, %v5972_v7  ;;  %v5596_v1 = vpop.permute.xlu1 %5595  ;;  %7220 = vmatpush1.bf16.msra.mxu1 %v7797_v19  ;;  %vm11563_vm6 = vcmask 547840  }
 0x86c   : > { %v7823_v23 = vcombine.low %v10165_v34, %v5973_v51  ;;  %v7824_v13 = vcombine.high %v10165_v34, %v5973_v51  ;;  %v5599_v43 = vrot.slane %v5596_v1, 4  ;;  %v5920_v34 = vrot.slane %v10602_v62, 4 }
 0x86d   : > { %v11215_v19 = vrot.slane %v10612_v58, 4 }
 0x86e   : > { %v5602_v6 = vsel %vm795_vm2, %v11548_v59, %v5599_v43  ;;  %7155 = vmatprep.subr.bf16.mxu0 %v7824_v13 }
 0x86f   : > { %v5573_v25 = vpop.permute.xlu0 %5572  ;;  %v5914_v46 = vpop.permute.xlu1 %5913  ;;  %7156 = vmatpush2.bf16.msra.mxu0 %v7823_v23  ;;  %v5603_v29 = vsel %vm1981_vm5, %v10263_v2, %v5602_v6  ;;  %vm11550_vm5 = vcmask 7168   ;;  %v11551_v23 = vrot.slane %v10314_v36, 4 }
 0x870   : > { %v5919_v21 = vrot.slane %v5914_v46, 4  ;;  %v7793_v42 = vcombine.low %v5603_v29, %v5626_v32  ;;  %v7794_v28 = vcombine.high %v5603_v29, %v5626_v32  ;;  %v5576_v30 = vrot.slane %v5573_v25, 4 }
 0x871   : > { %v11552_v25 = vrot.slane %v10305_v47, 4 }
 0x872   : > { %7221 = vmatprep.subr.bf16.mxu1 %v7794_v28  ;;  %v5922_v2 = vsel %vm795_vm2, %v5919_v21, %v5920_v34  ;;  %v5579_v13 = vsel %vm795_vm2, %v11551_v23, %v5576_v30 }
 0x873   : > { %v10628_v15 = vpop.permute.xlu0 %5869  ;;  %7222 = vmatpush1.bf16.msra.mxu1 %v7793_v42  ;;  %v5937_v14 = vpop.permute.xlu1 %5936  ;;  %v5923_v1 = vsel %vm2314_vm13, %v5914_v46, %v5922_v2  ;;  %v5580_v42 = vsel %vm11554_vm12, %v10314_v36, %v5579_v13  ;;  %vm11589_vm12 = vcmask 703488  }
 0x874   : > { %v5942_v7 = vrot.slane %v5937_v14, 4  ;;  %v11214_v2 = vrot.slane %v10628_v15, 4 }
 0x876   : > { %v5945_v54 = vsel %vm795_vm2, %v5942_v7, %v11215_v19 }
 0x877   : > { %v10637_v51 = vpop.permute.xlu0 %5892  ;;  %v5946_v61 = vsel %vm11550_vm5, %v5937_v14, %v5945_v54  ;;  %v5550_v53 = vpop.permute.xlu1 %5549  ;;  %vm11565_vm5 = vcmask 187392  }
 0x878   : > { %v7819_v43 = vcombine.low %v5923_v1, %v5946_v61  ;;  %v7820_v59 = vcombine.high %v5923_v1, %v5946_v61  ;;  %v5553_v6 = vrot.slane %v5550_v53, 4  ;;  %v11213_v1 = vrot.slane %v10637_v51, 4 }
 0x87a   : > { %v5556_v29 = vsel %vm795_vm2, %v11552_v25, %v5553_v6  ;;  %7157 = vmatprep.subr.bf16.mxu0 %v7820_v59  ;;  %v11557_v25 = vrot.slane %v10355_v39, 4 }
 0x87b   : > { %v5527_v32 = vpop.permute.xlu0 %5526  ;;  %v5868_v21 = vpop.permute.xlu1 %5867  ;;  %7158 = vmatpush2.bf16.msra.mxu0 %v7819_v43  ;;  %v5557_v46 = vsel %vm11553_vm3, %v10305_v47, %v5556_v29  ;;  %vm11566_vm3 = vcmask 179200  }
 0x87c   : > { %v5873_v28 = vrot.slane %v5868_v21, 4  ;;  %v7789_v14 = vcombine.low %v5557_v46, %v5580_v42  ;;  %v7790_v30 = vcombine.high %v5557_v46, %v5580_v42  ;;  %v5530_v61 = vrot.slane %v5527_v32, 4 }
 0x87e   : > { %7223 = vmatprep.subr.bf16.mxu1 %v7790_v30  ;;  %v5876_v47 = vsel %vm795_vm2, %v5873_v28, %v11214_v2  ;;  %v5533_v29 = vsel %vm795_vm2, %v11557_v25, %v5530_v61 }
 0x87f   : > { %v10652_v7 = vpop.permute.xlu0 %5823  ;;  %7224 = vmatpush1.bf16.msra.mxu1 %v7789_v14  ;;  %v5891_v54 = vpop.permute.xlu1 %5890  ;;  %v5877_v43 = vsel %vm11555_vm11, %v5868_v21, %v5876_v47  ;;  %v11558_v14 = vrot.slane %v10347_v60, 4  ;;  %v5534_v61 = vsel %vm11559_vm14, %v10355_v39, %v5533_v29  ;;  %vm11592_vm11 = vcmask 7168  }
 0x880   : > { %v5896_v53 = vrot.slane %v5891_v54, 4  ;;  %v11216_v25 = vrot.slane %v10652_v7, 4  ;;  %vm11599_vm14 = vcmask 154624  }
 0x882   : > { %v5899_v36 = vsel %vm795_vm2, %v5896_v53, %v11213_v1  ;;  %v10661_v23 = vpop.f32.mrf.mxu1 }
 0x883   : > { %v10663_v13 = vpop.permute.xlu0 %5846  ;;  %v5900_v59 = vsel %vm11556_vm4, %v5891_v54, %v5899_v36  ;;  %v5504_v6 = vpop.permute.xlu1 %5503  ;;  %vm11593_vm4 = vcmask 711680  }
 0x884   : > { %v7815_v32 = vcombine.low %v5877_v43, %v5900_v59  ;;  %v7816_v46 = vcombine.high %v5877_v43, %v5900_v59  ;;  %v5507_v42 = vrot.slane %v5504_v6, 4  ;;  %v10670_v28 = vpop.f32.mrf.mxu1 }
 0x886   : > { %v5510_v30 = vsel %vm795_vm2, %v11558_v14, %v5507_v42  ;;  %7159 = vmatprep.subr.bf16.mxu0 %v7816_v46  ;;  %v5368_v53 = vpop.f32.mrf.mxu1  ;;  %v10679_v59 = vpop.f32.mrf.mxu0 }
 0x887   : > { %v5481_v1 = vpop.permute.xlu0 %5480  ;;  %v5822_v21 = vpop.permute.xlu1 %5821  ;;  %7160 = vmatpush2.bf16.msra.mxu0 %v7815_v32  ;;  %v5511_v54 = vsel %vm1885_vm9, %v10347_v60, %v5510_v30  ;;  %v5851_v60 = vrot.slane %v10663_v13, 4  ;;  %vm11560_vm9 = vcmask 171008  }
 0x888   : > { %v5827_v47 = vrot.slane %v5822_v21, 4  ;;  %v7785_v36 = vcombine.low %v5511_v54, %v5534_v61  ;;  %v7786_v43 = vcombine.high %v5511_v54, %v5534_v61  ;;  %v5369_v6 = vpop.f32.mrf.mxu1  ;;  %v10682_v46 = vpop.f32.mrf.mxu0  ;;  %v5484_v14 = vrot.slane %v5481_v1, 4 }
 0x889   : > { %v11561_v1 = vrot.slane %v10396_v45, 4 }
 0x88a   : > { %7225 = vmatprep.subr.bf16.mxu1 %v7786_v43  ;;  %v5830_v39 = vsel %vm795_vm2, %v5827_v47, %v11216_v25  ;;  %v5327_v30 = vpop.f32.mrf.mxu0 }
 0x88b   : > { %v10684_v42 = vpop.permute.xlu0 %5777  ;;  %7226 = vmatpush1.bf16.msra.mxu1 %v7785_v36  ;;  %v5845_v32 = vpop.permute.xlu1 %5844  ;;  %v5831_v43 = vsel %vm11560_vm9, %v5822_v21, %v5830_v39  ;;  %v5487_v2 = vsel %vm795_vm2, %v11561_v1, %v5484_v14  ;;  %v11562_v30 = vrot.slane %v10388_v8, 4  ;;  %vm11601_vm9 = vcmask 23552  }
 0x88c   : > { %v5850_v29 = vrot.slane %v5845_v32, 4  ;;  %v5328_v54 = vpop.f32.mrf.mxu0 }
 0x88e   : > { %v5853_v53 = vsel %vm795_vm2, %v5850_v29, %v5851_v60 }
 0x88f   : > { %v10693_v61 = vpop.permute.xlu0 %5800  ;;  %v5854_v36 = vsel %vm2242_vm15, %v5845_v32, %v5853_v53  ;;  %v5458_v6 = vpop.permute.xlu1 %5457  ;;  %v5488_v32 = vsel %vm11564_vm7, %v10396_v45, %v5487_v2  ;;  %vm11603_vm7 = vcmask 859136  }
 0x890   : > { %v7811_v19 = vcombine.low %v5831_v43, %v5854_v36  ;;  %v7812_v47 = vcombine.high %v5831_v43, %v5854_v36  ;;  %v5461_v25 = vrot.slane %v5458_v6, 4  ;;  %v11217_v43 = vrot.slane %v10684_v42, 4 }
 0x892   : > { %v5464_v38 = vsel %vm795_vm2, %v11562_v30, %v5461_v25  ;;  %7161 = vmatprep.subr.bf16.mxu0 %v7812_v47  ;;  %v5805_v25 = vrot.slane %v10693_v61, 4 }
 0x893   : > { %v5435_v29 = vpop.permute.xlu0 %5434  ;;  %v5776_v54 = vpop.permute.xlu1 %5775  ;;  %7162 = vmatpush2.bf16.msra.mxu0 %v7811_v19  ;;  %v5465_v21 = vsel %vm11563_vm6, %v10388_v8, %v5464_v38  ;;  %vm11602_vm6 = vcmask 850944  }
 0x894   : > { %v5781_v39 = vrot.slane %v5776_v54, 4  ;;  %v7781_v53 = vcombine.low %v5465_v21, %v5488_v32  ;;  %v7782_v14 = vcombine.high %v5465_v21, %v5488_v32  ;;  %v5438_v1 = vrot.slane %v5435_v29, 4 }
 0x895   : > { %v11567_v21 = vrot.slane %v10443_v16, 4 }
 0x896   : > { %7227 = vmatprep.subr.bf16.mxu1 %v7782_v14  ;;  %v5784_v19 = vsel %vm795_vm2, %v5781_v39, %v11217_v43  ;;  %v11568_v39 = vrot.slane %v10436_v35, 4 }
 0x897   : > { %v6267_v36 = vpop.permute.xlu0 %6266  ;;  %7228 = vmatpush1.bf16.msra.mxu1 %v7781_v53  ;;  %v5799_v6 = vpop.permute.xlu1 %5798  ;;  %v5785_v2 = vsel %vm11565_vm5, %v5776_v54, %v5784_v19  ;;  %v5441_v32 = vsel %vm795_vm2, %v11567_v21, %v5438_v1  ;;  %v11570_v21 = vcombine.low %v10105_v37, %v10108_v41  ;;  %vm11605_vm5 = vcmask 171008  }
 0x898   : > { %v5804_v8 = vrot.slane %v5799_v6, 4  ;;  %v5442_v1 = vsel %vm1813_vm1, %v10443_v16, %v5441_v32  ;;  %v11571_v16 = vcombine.high %v10487_v40, %v10498_v18  ;;  %v6270_v32 = vrot.slane %v6267_v36, 4 }
 0x899   : > { %vm11579_vm1 = vcmask 678912  }
 0x89a   : > { %v5807_v45 = vsel %vm795_vm2, %v5804_v8, %v5805_v25  ;;  %v10725_v8 = vcombine.low %v10418_v5, %v10418_v5 }
 0x89b   : > { %v6221_v38 = vpop.permute.xlu0 %6220  ;;  %v5808_v47 = vsel %vm11566_vm3, %v5799_v6, %v5807_v45  ;;  %v5412_v30 = vpop.permute.xlu1 %5411  ;;  %v11569_v45 = vcombine.high %v10105_v37, %v10108_v41  ;;  %v11574_v41 = vcombine.low %v10154_v31, %v10157_v63 }
 0x89c   : > { %v7807_v29 = vcombine.low %v5785_v2, %v5808_v47  ;;  %v7808_v53 = vcombine.high %v5785_v2, %v5808_v47  ;;  %v5415_v14 = vrot.slane %v5412_v30, 4  ;;  %v6224_v36 = vrot.slane %v6221_v38, 4 }
 0x89e   : > { %v5418_v43 = vsel %vm795_vm2, %v11568_v39, %v5415_v14  ;;  %7163 = vmatprep.subr.bf16.mxu0 %v7808_v53  ;;  %v11573_v53 = vcombine.low %v10487_v40, %v10498_v18  ;;  %v11575_v14 = vrot.slane %v10291_v44, 4  ;;  %v11577_v40 = vrot.slane %v10283_v49, 4 }
 0x89f   : > { %v6175_v54 = vpop.permute.xlu0 %6174  ;;  %v6290_v19 = vpop.permute.xlu1 %6289  ;;  %7164 = vmatpush2.bf16.msra.mxu0 %v7807_v29  ;;  %v5419_v6 = vsel %vm1789_vm8, %v10436_v35, %v5418_v43  ;;  %v11572_v43 = vcombine.high %v10154_v31, %v10157_v63  ;;  %vm11582_vm8 = vcmask 687104  }
 0x8a0   : > { %7256 = vmatprep.subr.bf16.mxu0 %v11569_v45  ;;  %v7777_v2 = vcombine.low %v5419_v6, %v5442_v1  ;;  %v7778_v47 = vcombine.high %v5419_v6, %v5442_v1  ;;  %v6293_v35 = vrot.slane %v6290_v19, 4  ;;  %v6273_v18 = vsel %vm795_vm2, %v11577_v40, %v6270_v32 }
 0x8a1   : > { %v11578_v1 = vcombine.low %v10210_v11, %v10213_v27  ;;  %v11580_v45 = vrot.slane %v10334_v24, 4  ;;  %v6178_v22 = vrot.slane %v6175_v54, 4  ;;  %v11584_v54 = vcombine.low %v10568_v4, %v10580_v57 }
 0x8a2   : > { %7166 = vmatmul.mubr.bf16.vlgmr.msra.gmra.mxu0 %v10725_v8  ;;  %7229 = vmatprep.subr.bf16.mxu1 %v7778_v47  ;;  %v6296_v39 = vsel %vm795_vm2, %v11575_v14, %v6293_v35  ;;  %v11587_v32 = vrot.slane %v10376_v17, 4  ;;  %v11588_v4 = vrot.slane %v10367_v3, 4 }
 0x8a3   : > { %v10735_v5 = vpop.permute.xlu0 %6128  ;;  %7230 = vmatpush1.bf16.msra.mxu1 %v7777_v2  ;;  %v6244_v30 = vpop.permute.xlu1 %6243  ;;  %7257 = vmatpush1.bf16.msra.mxu0 %v11570_v21 }
 0x8a4   : > { %7231 = vmatprep.subr.bf16.mxu1 %v11571_v16  ;;  %7258 = vmatprep.subr.bf16.mxu0 %v11572_v43  ;;  %v6247_v19 = vrot.slane %v6244_v30, 4  ;;  %v6181_v57 = vsel %vm795_vm2, %v11588_v4, %v6178_v22  ;;  %v11606_v4 = vrot.slane %v10684_v42, 4 }
 0x8a5   : > { %7878 = vmatprep.mubr.msk.bf16.mxu0 %vm1649_vm10, %v10203_v12  ;;  %v11576_v12 = vcombine.high %v10210_v11, %v10213_v27  ;;  %v6274_v11 = vsel %vm11582_vm8, %v10283_v49, %v6273_v18  ;;  %v8016_v27 = vld [vmem:[#allocation2 + $0xc] sm:$0xff]  ;;  %v11585_v49 = vcombine.low %v10258_v26, %v10261_v9  ;;  %vm11586_vm10 = vcmask 695296  }
 0x8a6   : > { %v6250_v2 = vsel %vm795_vm2, %v11580_v45, %v6247_v19  ;;  %v6132_v9 = vrot.slane %v10735_v5, 4 }
 0x8a7   : > { %v5918_v29 = vpop.permute.xlu0 %5917  ;;  %7232 = vmatpush2.bf16.msra.mxu1 %v11573_v53  ;;  %v6198_v37 = vpop.permute.xlu1 %6197  ;;  %7259 = vmatpush1.bf16.msra.mxu0 %v11574_v41  ;;  %v6251_v43 = vsel %vm11586_vm10, %v10334_v24, %v6250_v2  ;;  %v11590_v24 = vrot.slane %v10612_v58, 4  ;;  %v11596_v2 = vld [vmem:[#allocation17_spill] sm:$0xff] }
 0x8a8   : > { %7233 = vmatprep.subr.bf16.mxu1 %v7834_v48  ;;  %7260 = vmatprep.subr.bf16.mxu0 %v11576_v12  ;;  %v5921_v31 = vrot.slane %v5918_v29, 4  ;;  %v6297_v48 = vsel %vm11579_vm1, %v10291_v44, %v6296_v39  ;;  %v6201_v47 = vrot.slane %v6198_v37, 4  ;;  %v7826_v44 = vcombine.high %v8016_v27, %v10595_v56 }
 0x8a9   : > { %v7854_v30 = vcombine.high %v6274_v11, %v6297_v48  ;;  %v7825_v37 = vcombine.low %v8016_v27, %v10595_v56  ;;  %v7853_v41 = vcombine.low %v6274_v11, %v6297_v48  ;;  %v11591_v56 = vrot.slane %v10628_v15, 4 }
 0x8aa   : > { %v6204_v29 = vsel %vm795_vm2, %v11587_v32, %v6201_v47  ;;  %v11597_v47 = vrot.slane %v11596_v2, 4  ;;  %v11600_v27 = vrot.slane %v10652_v7, 4 }
 0x8ab   : > { %v5872_v63 = vpop.permute.xlu0 %5871  ;;  %7234 = vmatpush2.bf16.msra.mxu1 %v7833_v20  ;;  %v6152_v6 = vpop.permute.xlu1 %6151  ;;  %7261 = vmatpush1.bf16.msra.mxu0 %v11578_v1  ;;  %v11583_v20 = vrot.slane %v10326_v55, 4  ;;  %v6205_v5 = vsel %vm11593_vm4, %v10376_v17, %v6204_v29 }
 0x8ac   : > { %7235 = vmatprep.subr.bf16.mxu1 %v7830_v33  ;;  %7262 = vmatprep.subr.bf16.mxu0 %v11581_v0  ;;  %v5924_v33 = vsel %vm795_vm2, %v5920_v34, %v5921_v31  ;;  %v5875_v21 = vrot.slane %v5872_v63, 4  ;;  %v6155_v53 = vrot.slane %v6152_v6, 4  ;;  %v11594_v31 = vrot.slane %v10420_v50, 4 }
 0x8ad   : > { %v6227_v38 = vsel %vm795_vm2, %v11583_v20, %v6224_v36  ;;  %v5925_v19 = vsel %vm2314_vm13, %v10602_v62, %v5924_v33  ;;  %vm11595_vm13 = vcmask 842752   ;;  %v6135_v0 = vsel %vm795_vm2, %v11597_v47, %v6132_v9 }
 0x8ae   : > { %v6228_v26 = vsel %vm11589_vm12, %v10326_v55, %v6227_v38  ;;  %v5878_v12 = vsel %vm795_vm2, %v11591_v56, %v5875_v21  ;;  %v6158_v63 = vsel %vm795_vm2, %v11594_v31, %v6155_v53  ;;  %v6182_v45 = vsel %vm11595_vm13, %v10367_v3, %v6181_v57  ;;  %v11612_v31 = vld [vmem:[#allocation25_spill] sm:$0xff] }
 0x8af   : > { %v5826_v35 = vpop.permute.xlu0 %5825  ;;  %7236 = vmatpush2.bf16.msra.mxu1 %v11584_v54  ;;  %v5941_v16 = vpop.permute.xlu1 %5940  ;;  %7263 = vmatpush1.bf16.msra.mxu0 %v11585_v49  ;;  %v7850_v39 = vcombine.high %v6228_v26, %v6251_v43  ;;  %v7849_v48 = vcombine.low %v6228_v26, %v6251_v43  ;;  %v7846_v22 = vcombine.high %v6182_v45, %v6205_v5  ;;  %v11604_v43 = vrot.slane %v10454_v10, 4 }
 0x8b0   : > { %v5944_v34 = vrot.slane %v5941_v16, 4  ;;  %7237 = vmatprep.subr.bf16.mxu1 %v7826_v44  ;;  %7264 = vmatprep.subr.bf16.mxu0 %v7854_v30  ;;  %v5829_v40 = vrot.slane %v5826_v35, 4  ;;  %v5879_v11 = vsel %vm11599_vm14, %v10628_v15, %v5878_v12  ;;  %v6159_v33 = vsel %vm11602_vm6, %v10420_v50, %v6158_v63 }
 0x8b1   : > { %v7845_v16 = vcombine.low %v6182_v45, %v6205_v5  ;;  %v6136_v49 = vsel %vm11603_vm7, %v11596_v2, %v6135_v0 }
 0x8b2   : > { %v5947_v14 = vsel %vm795_vm2, %v11590_v24, %v5944_v34  ;;  %v5832_v44 = vsel %vm795_vm2, %v11600_v27, %v5829_v40  ;;  %v7842_v29 = vcombine.high %v6136_v49, %v6159_v33  ;;  %v7841_v9 = vcombine.low %v6136_v49, %v6159_v33  ;;  %v11609_v40 = vld [vmem:[#allocation23_spill] sm:$0xff]  ;;  %v11619_v49 = vld [vmem:[#allocation22_spill] sm:$0xff] }
 0x8b3   : > { %v5780_v18 = vpop.permute.xlu0 %5779  ;;  %7238 = vmatpush2.bf16.msra.mxu1 %v7825_v37  ;;  %v5895_v36 = vpop.permute.xlu1 %5894  ;;  %7265 = vmatpush1.bf16.msra.mxu0 %v7853_v41  ;;  %v5948_v55 = vsel %vm11592_vm11, %v10612_v58, %v5947_v14  ;;  %v11598_v58 = vrot.slane %v10637_v51, 4  ;;  %v5833_v34 = vsel %vm11605_vm5, %v10652_v7, %v5832_v44  ;;  %v3947_v63 = vadd.f32 %v11612_v31, %v11609_v40  ;;  %v11615_v44 = vld [vmem:[#allocation20_spill] sm:$0xff] }
 0x8b4   : > { %v5898_v62 = vrot.slane %v5895_v36, 4  ;;  %7266 = vmatprep.subr.bf16.mxu0 %v7850_v39  ;;  %v7821_v6 = vcombine.low %v5925_v19, %v5948_v55  ;;  %v7822_v1 = vcombine.high %v5925_v19, %v5948_v55  ;;  %v5783_v20 = vrot.slane %v5780_v18, 4  ;;  %v11610_v18 = vld [vmem:[#allocation19_spill] sm:$0xff]  ;;  %v11611_v55 = vld [vmem:[#allocation21_spill] sm:$0xff] }
 0x8b5   : > { %v3894_v36 = vadd.f32 %v11610_v18, %v11609_v40  ;;  %v3896_v5 = vadd.f32 %v11611_v55, %v11609_v40 }
 0x8b6   : > { %v5901_v17 = vsel %vm795_vm2, %v11598_v58, %v5898_v62  ;;  %7239 = vmatprep.subr.bf16.mxu1 %v7822_v1  ;;  %v5786_v57 = vsel %vm795_vm2, %v11606_v4, %v5783_v20  ;;  %v11616_v20 = vld [vmem:[#allocation14_spill] sm:$0xff]  ;;  %v11622_v4 = vld [vmem:[#allocation28_spill] sm:$0xff] }
 0x8b7   : > { %v6497_v38 = vpop.permute.xlu0 %6496  ;;  %7240 = vmatpush2.bf16.msra.mxu1 %v7821_v6  ;;  %v5849_v3 = vpop.permute.xlu1 %5848  ;;  %7267 = vmatpush1.bf16.msra.mxu0 %v7849_v48  ;;  %v5902_v30 = vsel %vm11601_vm9, %v10637_v51, %v5901_v17  ;;  %v11614_v17 = vld [vmem:[#allocation31_spill] sm:$0xff] }
 0x8b8   : > { %v6500_v21 = vrot.slane %v6497_v38, 4  ;;  %v5852_v35 = vrot.slane %v5849_v3, 4  ;;  %7268 = vmatprep.subr.bf16.mxu0 %v7846_v22  ;;  %v7817_v54 = vcombine.low %v5879_v11, %v5902_v30  ;;  %v7818_v15 = vcombine.high %v5879_v11, %v5902_v30 }
 0x8b9   : > { %v3890_v38 = vadd.f32 %v11616_v20, %v11615_v44 }
 0x8ba   : > { %v6503_v32 = vsel %vm795_vm2, %v11604_v43, %v6500_v21  ;;  %v5855_v51 = vsel %vm795_vm2, %v5851_v60, %v5852_v35  ;;  %7241 = vmatprep.subr.bf16.mxu1 %v7818_v15  ;;  %v11617_v21 = vld [vmem:[#allocation16_spill] sm:$0xff]  ;;  %v11620_v43 = vld [vmem:[#allocation26_spill] sm:$0xff] }
 0x8bb   : > { %v6504_v50 = vsel %vm2910_vm0, %v10454_v10, %v6503_v32  ;;  %7242 = vmatpush2.bf16.msra.mxu1 %v7817_v54  ;;  %v5803_v53 = vpop.permute.xlu1 %5802  ;;  %7269 = vmatpush1.bf16.msra.mxu0 %v7845_v16  ;;  %v5856_v37 = vsel %vm2242_vm15, %v10663_v13, %v5855_v51  ;;  %vm11607_vm0 = vcmask 187392   ;;  %vm11608_vm15 = vmmov %vm11566_vm3  ;;  %v3892_v35 = vadd.f32 %v11617_v21, %v11615_v44 }
 0x8bc   : > { %v5806_v41 = vrot.slane %v5803_v53, 4  ;;  %7270 = vmatprep.subr.bf16.mxu0 %v7842_v29  ;;  %v7813_v60 = vcombine.low %v5833_v34, %v5856_v37  ;;  %v7814_v26 = vcombine.high %v5833_v34, %v5856_v37  ;;  %v7874_v24 = vcombine.high %v6504_v50, %v6504_v50  ;;  %v11621_v29 = vld [vmem:[#allocation9_spill] sm:$0xff] }
 0x8bd   : > { %v7873_v14 = vcombine.low %v6504_v50, %v6504_v50  ;;  %v5787_v7 = vsel %vm11607_vm0, %v10684_v42, %v5786_v57  ;;  %v3900_v32 = vadd.f32 %v11620_v43, %v11619_v49  ;;  %v3902_v57 = vadd.f32 %v11622_v4, %v11619_v49 }
 0x8be   : > { %v5809_v10 = vsel %vm795_vm2, %v5805_v25, %v5806_v41  ;;  %7243 = vmatprep.subr.bf16.mxu1 %v7814_v26 }
 0x8bf   : > { %7244 = vmatpush2.bf16.msra.mxu1 %v7813_v60  ;;  %7271 = vmatpush1.bf16.msra.mxu0 %v7841_v9  ;;  %v5810_v13 = vsel %vm11608_vm15, %v10693_v61, %v5809_v10  ;;  %v7128_v56 = vsel %vm795_vm2, %v7873_v14, 0  ;;  %v11623_v60 = vld [vmem:[#allocation10_spill] sm:$0xff] }
 0x8c0   : > { %7877 = vmatprep.subr.msk.bf16.mxu0 %vm795_vm2, %v7874_v24  ;;  %v7809_v39 = vcombine.low %v5787_v7, %v5810_v13  ;;  %v7810_v19 = vcombine.high %v5787_v7, %v5810_v13  ;;  %v8017_v7 = vld [vmem:[%s11618_s6] sm:$0xff] }
 0x8c2   : > { %7245 = vmatprep.subr.bf16.mxu1 %v7810_v19 }
 0x8c3   : > { %7246 = vmatpush2.bf16.msra.mxu1 %v7809_v39  ;;  %7287 = vmatpush2.bf16.msra.mxu0 %v7128_v56 }
 0x8c4   : > { %v10868_v25 = vpop.permute.xlu0 %5015 }
 0x8c5   : > { %v5324_v12 = vadd.f32 %v10679_v59, %v10868_v25  ;;  %v5326_v42 = vadd.f32 %v10682_v46, %v10868_v25  ;;  %v5367_v61 = vadd.f32 %v10670_v28, %v10868_v25 }
 0x8c6   : > { %7248 = vmatmul.mubr.bf16.vlgmr.msra.gmra.mxu1 %v10725_v8  ;;  %7289 = vmatmul.mubr.bf16.vlgmr.msra.gmra.mxu0 %v10514_v52  ;;  %v11613_v52 = vld [vmem:[#allocation24_spill] sm:$0xff] }
 0x8c7   : > { %v5371_v59 = vmax.f32 %v5324_v12, 0.0  ;;  %v5372_v62 = vmax.f32 %v5326_v42, 0.0  ;;  %v5374_v6 = vmax.f32 %v5367_v61, 0.0  ;;  %v8018_v12 = vld [vmem:[%s11618_s6 + $0x8] sm:$0xff] }
 0x8c8   : > { %v10886_v0 = vpop.permute.xlu1 %6612  ;;  %v10907_v14 = vpop.permute.xlu0 %7318 }
 0x8c9   : > { %v5375_v46 = vadd.f32 %v5371_v59, %v3894_v36  ;;  %v5376_v1 = vadd.f32 %v5372_v62, %v3896_v5  ;;  %v10884_v48 = vadd.f32 %v5374_v6, %v3947_v63 }
 0x8cb   : > { %v5379_v50 = vmul.f32 %v5375_v46, %v11621_v29  ;;  %v5380_v26 = vmul.f32 %v5376_v1, %v11623_v60 }
 0x8cc   : > { %v10888_v58 = vpop.permute.xlu1 %4185  ;;  %v10918_v62 = vpop.permute.xlu0 %7348 }
 0x8cd   : > { %v4328_v8 = vadd.f32 %v11613_v52, %v10888_v58  ;;  %v4330_v22 = vadd.f32 %v11614_v17, %v10888_v58  ;;  %v7312_v13 = vadd.f32 %v8017_v7, %v5379_v50  ;;  %v7313_v42 = vadd.f32 %v8018_v12, %v5380_v26 }
 0x8cf   : > { %v4375_v11 = vmax.f32 %v4328_v8, 0.0  ;;  %v4376_v3 = vmax.f32 %v4330_v22, 0.0  ;;  %v7321_v5 = vmul.f32 %v10907_v14, %v7312_v13  ;;  %v7322_v6 = vmul.f32 %v10907_v14, %v7313_v42  ;;  %v11630_v42 = vld [vmem:[#allocation27_spill] sm:$0xff] }
 0x8d0   : > { %v10914_v55 = vpop.permute.xlu1 %7331 }
 0x8d1   : > { %v4379_v54 = vadd.f32 %v4375_v11, %v3890_v38  ;;  %v4380_v53 = vadd.f32 %v4376_v3, %v3892_v35 }
 0x8d3   : > { %v4383_v9 = vmul.f32 %v4379_v54, %v11621_v29  ;;  %v4384_v39 = vmul.f32 %v4380_v53, %v11623_v60  ;;  %v11624_v54 = vld [vmem:[#allocation30_spill] sm:$0xff] }
 0x8d4   : > { %v11626_v53 = vld [vmem:[#allocation18_spill] sm:$0xff] }
 0x8d5   : > { %v7342_v61 = vadd.f32 %v8017_v7, %v4383_v9  ;;  %v7343_v31 = vadd.f32 %v8018_v12, %v4384_v39  ;;  %v11629_v39 = vld [vmem:[#allocation11_spill] sm:$0xff] }
 0x8d7   : > { %v7351_v46 = vmul.f32 %v10918_v62, %v7342_v61  ;;  %v3951_v61 = vadd.f32 %v11630_v42, %v11619_v49 }
 0x90a   : > { %v7208_v28 = vpop.f32.mrf.mxu1 }
 0x90c   : > { %v7210_v45 = vpop.f32.mrf.mxu1 }
 0x90e   : > { %v7212_v2 = vpop.f32.mrf.mxu1 }
 0x910   : > { %v7213_v47 = vpop.f32.mrf.mxu1 }
 0x962   : > { %v7167_v27 = vpop.f32.mrf.mxu0 }
 0x963   : > { %v7168_v30 = vadd.f32 %v7167_v27, %v10886_v0 }
 0x964   : > { %v7169_v33 = vpop.f32.mrf.mxu0 }
 0x965   : > { %v7209_v15 = vadd.f32 %v7208_v28, %v7168_v30  ;;  %v7170_v16 = vadd.f32 %v7169_v33, %v10886_v0  ;;  %v5365_v33 = vadd.f32 %v10661_v23, %v10868_v25 }
 0x966   : > { %v7171_v51 = vpop.f32.mrf.mxu0 }
 0x967   : > { %v7297_v34 = vmax.f32 %v7209_v15, 0.0  ;;  %v7211_v37 = vadd.f32 %v7210_v45, %v7170_v16  ;;  %v7352_v45 = vmul.f32 %v10918_v62, %v7343_v31  ;;  %v4369_v15 = vadd.f32 %v11624_v54, %v10888_v58  ;;  %v11625_v51 = vld [vmem:[#allocation32_spill] sm:$0xff] }
 0x968   : > { %v7172_v41 = vpop.f32.mrf.mxu0  ;;  %v11631_v31 = vld [vmem:[#allocation12_spill] sm:$0xff] }
 0x969   : > { %v7301_v10 = vadd.f32 %v7297_v34, %v3900_v32  ;;  %v7298_v24 = vmax.f32 %v7211_v37, 0.0  ;;  %v5373_v32 = vmax.f32 %v5365_v33, 0.0  ;;  %v3945_v34 = vadd.f32 %v11626_v53, %v11609_v40 }
 0x96a   : > { %v4377_v37 = vmax.f32 %v4369_v15, 0.0 }
 0x96b   : > { %v7305_v19 = vmul.f32 %v7301_v10, %v11621_v29  ;;  %v7302_v56 = vadd.f32 %v7298_v24, %v3902_v57  ;;  %v4371_v29 = vadd.f32 %v11625_v51, %v10888_v58  ;;  %v5377_v4 = vadd.f32 %v5373_v32, %v3945_v34  ;;  %v11627_v57 = vld [vmem:[#allocation13_spill] sm:$0xff]  ;;  %v11628_v58 = vld [vmem:[#allocation15_spill] sm:$0xff] }
 0x96c   : > { %v3941_v41 = vadd.f32 %v11627_v57, %v11615_v44  ;;  %v3943_v24 = vadd.f32 %v11628_v58, %v11615_v44 }
 0x96d   : > { %v7325_v18 = vadd.f32 %v8017_v7, %v7305_v19  ;;  %v7306_v36 = vmul.f32 %v7302_v56, %v11623_v60  ;;  %v4378_v60 = vmax.f32 %v4371_v29, 0.0  ;;  %v5381_v19 = vmul.f32 %v5377_v4, %v11629_v39 }
 0x96e   : > { %v4381_v7 = vadd.f32 %v4377_v37, %v3941_v41 }
 0x96f   : > { %v7334_v63 = vmul.f32 %v10914_v55, %v7325_v18  ;;  %v7326_v59 = vadd.f32 %v8018_v12, %v7306_v36  ;;  %v4382_v18 = vadd.f32 %v4378_v60, %v3943_v24 }
 0x971   : > { %v7338_v1 = vadd.f32 %v7334_v63, %v7321_v5  ;;  %v7335_v28 = vmul.f32 %v10914_v55, %v7326_v59  ;;  %v5382_v63 = vmul.f32 %v10884_v48, %v11631_v31 }
 0x973   : > { %v7355_v2 = vadd.f32 %v7351_v46, %v7338_v1  ;;  %v7339_v47 = vadd.f32 %v7335_v28, %v7322_v6  ;;  %v11632_v6 = vld [vmem:[#allocation29_spill] sm:$0xff] }
 0x974   : > { %v3953_v46 = vadd.f32 %v11632_v6, %v11619_v49 }
 0x975   : > { %v7359_v52 = vrot.slane %v7355_v2, 4  ;;  %v7356_v8 = vadd.f32 %v7352_v45, %v7339_v47  ;;  %v8019_v45 = vld [vmem:[%s11618_s6 + $0x10] sm:$0xff]  ;;  %v4386_v47 = vmul.f32 %v4382_v18, %v11631_v31 }
 0x977   : > { %v7360_v17 = vadd.f32 %v7359_v52, %v7355_v2  ;;  %v7365_v22 = vrot.slane %v7356_v8, 4  ;;  %v7314_v2 = vadd.f32 %v8019_v45, %v5381_v19 }
 0x979   : > { %v7361_v11 = vrot.slane %v7360_v17, 2  ;;  %v7366_v27 = vadd.f32 %v7365_v22, %v7356_v8  ;;  %v8020_v22 = vld [vmem:[%s11618_s6 + $0x18] sm:$0xff] }
 0x97b   : > { %v7362_v20 = vadd.f32 %v7361_v11, %v7360_v17  ;;  %v7367_v38 = vrot.slane %v7366_v27, 2  ;;  %v7315_v11 = vadd.f32 %v8020_v22, %v5382_v63 }
 0x97d   : > { %v7363_v3 = vrot.slane %v7362_v20, 1  ;;  %v7368_v30 = vadd.f32 %v7367_v38, %v7366_v27  ;;  %v7324_v54 = vmul.f32 %v10907_v14, %v7315_v11 }
 0x97f   : > { %v7364_v21 = vadd.f32 %v7363_v3, %v7362_v20  ;;  %v7369_v35 = vrot.slane %v7368_v30, 1  ;;  %v7323_v3 = vmul.f32 %v10907_v14, %v7314_v2 }
 0x981   : > { %v7879_v16 = vmul.f32 -1.442695, %v7364_v21  ;;  %v7370_v43 = vadd.f32 %v7369_v35, %v7368_v30  ;;  %v7345_v30 = vadd.f32 %v8020_v22, %v4386_v47 }
 0x983   : > { %7997 = vpow2.f32 %v7879_v16  ;;  %v7880_v50 = vmul.f32 -1.442695, %v7370_v43  ;;  %v7354_v32 = vmul.f32 %v10918_v62, %v7345_v30 }
 0x985   : > { %7999 = vpow2.f32 %v7880_v50  ;;  %v8075_v50 = vmov 1966171168  }
 0x986   : > { %v7249_v23 = vpop.f32.mrf.mxu1  ;;  %v7290_v25 = vpop.f32.mrf.mxu0  ;;  %v7414_v53 = vunpack.c.l.s4 %v8075_v50 }
 0x987   : > { %v7250_v26 = vadd.f32 %v7249_v23, %v10886_v0 }
 0x988   : > { %v7251_v9 = vpop.f32.mrf.mxu1  ;;  %v7292_v10 = vpop.f32.mrf.mxu0 }
 0x989   : > { %v7291_v13 = vadd.f32 %v7290_v25, %v7250_v26  ;;  %v7252_v40 = vadd.f32 %v7251_v9, %v10886_v0  ;;  %v4385_v0 = vmul.f32 %v4381_v7, %v11629_v39  ;;  %v7415_v25 = vunpack.c.0.s8 %v7414_v53  ;;  %v11633_v9 = vld [vmem:[#allocation8_spill] sm:$0xff] }
 0x98a   : > { %v7253_v56 = vpop.f32.mrf.mxu1  ;;  %v7294_v12 = vpop.f32.mrf.mxu0 }
 0x98b   : > { %v7299_v36 = vmax.f32 %v7291_v13, 0.0  ;;  %v7293_v5 = vadd.f32 %v7292_v10, %v7252_v40  ;;  %v7344_v48 = vadd.f32 %v8019_v45, %v4385_v0  ;;  %v7418_v10 = vsub.s32 %v7415_v25, %v11633_v9 }
 0x98c   : > { %v7254_v44 = vpop.f32.mrf.mxu1  ;;  %v7295_v59 = vpop.f32.mrf.mxu0 }
 0x98d   : > { %v7303_v1 = vadd.f32 %v7299_v36, %v3951_v61  ;;  %v7300_v28 = vmax.f32 %v7293_v5, 0.0  ;;  %v7353_v15 = vmul.f32 %v10918_v62, %v7344_v48  ;;  %v11636_v59 = vlaneseq }
 0x98f   : > { %v7307_v52 = vmul.f32 %v7303_v1, %v11629_v39  ;;  %v7304_v8 = vadd.f32 %v7300_v28, %v3953_v46  ;;  %vm7438_vm2 = vcmp.lt.s32.totalorder %v11636_v59, 512 }
 0x990   : > { %v7998_v17 = vpop.eup %7997 }
 0x991   : > { %v7395_v27 = vadd.f32 1.0, %v7998_v17  ;;  %v7327_v20 = vadd.f32 %v8019_v45, %v7307_v52  ;;  %v7308_v38 = vmul.f32 %v7304_v8, %v11631_v31 }
 0x992   : > { %v8000_v49 = vpop.eup %7999 }
 0x993   : > { %v7396_v33 = vadd.f32 1.0, %v8000_v49  ;;  %v7336_v21 = vmul.f32 %v10914_v55, %v7327_v20  ;;  %v7328_v35 = vadd.f32 %v8020_v22, %v7308_v38  ;;  %8001 = vrcp.f32 %v7395_v27 }
 0x995   : > { %8003 = vrcp.f32 %v7396_v33  ;;  %v7340_v16 = vadd.f32 %v7336_v21, %v7323_v3  ;;  %v7337_v43 = vmul.f32 %v10914_v55, %v7328_v35 }
 0x997   : > { %v7357_v51 = vadd.f32 %v7353_v15, %v7340_v16  ;;  %v7341_v29 = vadd.f32 %v7337_v43, %v7324_v54 }
 0x999   : > { %v7371_v34 = vrot.slane %v7357_v51, 4  ;;  %v7358_v37 = vadd.f32 %v7354_v32, %v7341_v29 }
 0x99b   : > { %v7372_v4 = vadd.f32 %v7371_v34, %v7357_v51  ;;  %v7377_v23 = vrot.slane %v7358_v37, 4 }
 0x99d   : > { %v7373_v57 = vrot.slane %v7372_v4, 2  ;;  %v7378_v14 = vadd.f32 %v7377_v23, %v7358_v37 }
 0x99f   : > { %v7374_v41 = vadd.f32 %v7373_v57, %v7372_v4  ;;  %v7379_v60 = vrot.slane %v7378_v14, 2 }
 0x9a0   : > { %v8002_v26 = vpop.eup %8001 }
 0x9a1   : > { %v7375_v58 = vrot.slane %v7374_v41, 1  ;;  %v7380_v55 = vadd.f32 %v7379_v60, %v7378_v14 }
 0x9a2   : > { %v8004_v24 = vpop.eup %8003 }
 0x9a3   : > { %v7411_v62 = vcombine.low %v8002_v26, %v8004_v24  ;;  %v7376_v7 = vadd.f32 %v7375_v58, %v7374_v41  ;;  %v7381_v13 = vrot.slane %v7380_v55, 1 }
 0x9a5   : > { %v7419_v40 = vrot.slane %v7411_v62, %v7418_v10  ;;  %v7881_v39 = vmul.f32 -1.442695, %v7376_v7  ;;  %v7382_v19 = vadd.f32 %v7381_v13, %v7380_v55 }
 0x9a7   : > { %8005 = vpow2.f32 %v7881_v39  ;;  %v7882_v56 = vmul.f32 -1.442695, %v7382_v19 }
 0x9a9   : > { %8007 = vpow2.f32 %v7882_v56 }
 0x9b4   : > { %v8006_v12 = vpop.eup %8005 }
 0x9b5   : > { %v7397_v42 = vadd.f32 1.0, %v8006_v12 }
 0x9b6   : > { %v8008_v61 = vpop.eup %8007 }
 0x9b7   : > { %v7398_v18 = vadd.f32 1.0, %v8008_v61  ;;  %8009 = vrcp.f32 %v7397_v42 }
 0x9b9   : > { %8011 = vrcp.f32 %v7398_v18 }
 0x9c4   : > { %v8010_v36 = vpop.eup %8009 }
 0x9c6   : > { %v8012_v5 = vpop.eup %8011 }
 0x9c7   : > { %v7412_v31 = vcombine.low %v8010_v36, %v8012_v5 }
 0x9c9   : > { %v7426_v63 = vrot.slane %v7412_v31, %v7418_v10 }
 0x9cb   : > { %v7427_v44 = vcombine.low %v7419_v40, %v7426_v63 }
 0x9cd   : > { %v7434_v6 = vrot.slane %v7427_v44, %v7418_v10 }
 0x9cf   : > { %7440 = vst.msk [vmem:[%s710_s5] sm:$0xf] %vm7438_vm2, %v7434_v6 }
 0x9d0 PF: > { %s11637_s27 = sld [smem:[#allocation5_spill]] }
 0x9d6   : > { %s35_s25 = sadd.s32 1, %s11637_s27  }
 0x9d7   : > { %p32_p4 = scmp.ge.s32.totalorder %s35_s25, 4  }
 0x9d9   :  { %34 = sbr.rel (!%p32_p4) target bundleno = 33 (0x21), region = 142 }

</bundles_post_ra>
